<compile_context>
chip_gen: v7x
topology: tpu7x:2x2x1
jax: 0.10.0
libtpu: 0.0.40
codegen_flags: <defaults>
</compile_context>

<pallas_src>
import functools

import jax
import jax.numpy as jnp
from jax.experimental import pallas as pl
from jax.experimental.pallas import tpu as pltpu

NEG_SLOPE = 0.01           # PyTorch nn.LeakyReLU default negative_slope
MM_DT = jnp.bfloat16       # MXU operand dtype; accumulation stays f32
LANE = 128                 # packed-buffer lane width

# concat order of the three branch sequences == torch.cat order feeding `enc`
_BRANCH_ORDER = ("enc_base_rep", "enc_base_entropy_params", "enc_enh_entropy_params")


def _leaky(x):
    return jnp.where(x >= 0, x, x * NEG_SLOPE)


def _round_up(x, m):
    return (x + m - 1) // m * m


# ---------------------------------------------------------------------------
# Wrapper-side parameter preparation
# ---------------------------------------------------------------------------
def _build_fused_layers(params):
    """Merge the three independent branch sequences depth-wise into
    block-diagonal residual blocks, then append the `enc` blocks.

    Returns a list of dicts with keys w1 (3,3,ci,co), b1 (co,), w2, b2,
    ws (ci,co) or None, bs (co,) or None (None => identity skip)."""
    seqs = [params[n] for n in _BRANCH_ORDER]
    depth = len(seqs[0])
    assert all(len(s) == depth for s in seqs), "branch depths must match"
    layers = []
    for d in range(depth):
        blks = [s[d] for s in seqs]
        cins = [int(b["w1"].shape[2]) for b in blks]
        couts = [int(b["w1"].shape[3]) for b in blks]
        ci_t, co_t = sum(cins), sum(couts)
        w1 = jnp.zeros((3, 3, ci_t, co_t), jnp.float32)
        w2 = jnp.zeros((3, 3, co_t, co_t), jnp.float32)
        b1 = jnp.zeros((co_t,), jnp.float32)
        b2 = jnp.zeros((co_t,), jnp.float32)
        need_skip = any("ws" in b for b in blks) or cins != couts
        ws = jnp.zeros((ci_t, co_t), jnp.float32) if need_skip else None
        bs = jnp.zeros((co_t,), jnp.float32) if need_skip else None
        io = oo = 0
        for b, ci, co in zip(blks, cins, couts):
            w1 = w1.at[:, :, io:io + ci, oo:oo + co].set(b["w1"])
            b1 = b1.at[oo:oo + co].set(b["b1"][0])
            w2 = w2.at[:, :, oo:oo + co, oo:oo + co].set(b["w2"])
            b2 = b2.at[oo:oo + co].set(b["b2"][0])
            if need_skip:
                if "ws" in b:
                    ws = ws.at[io:io + ci, oo:oo + co].set(b["ws"])
                    bs = bs.at[oo:oo + co].set(b["bs"][0])
                else:
                    assert ci == co, "identity skip requires cin == cout"
                    ws = ws.at[io:io + ci, oo:oo + co].set(
                        jnp.eye(ci, dtype=jnp.float32))
            io += ci
            oo += co
        layers.append(dict(w1=w1, b1=b1, w2=w2, b2=b2, ws=ws, bs=bs))
    for p in params["enc"]:
        layers.append(dict(w1=p["w1"], b1=p["b1"][0], w2=p["w2"], b2=p["b2"][0],
                           ws=p.get("ws", None),
                           bs=(p["bs"][0] if "bs" in p else None)))
    return layers


def _pack_layers(layers):
    """Pack every conv / 1x1-skip weight (matmul-shaped, bf16) into ONE
    (rows, 128) buffer and every bias into ONE (rows, 128) f32 buffer.

    Conv weights are stored as (9*cin, cout) with rows ordered (dy, dx, cin)
    -- exactly the order of the in-kernel im2col patch, so the dx taps fold
    into the contraction dim (K = 3*cin per dy).

    Returns (wbuf, bbuf, program) where program is a tuple of blocks
    (c1, c2, skip_or_None), each conv spec = (row_off, cin, cout, bias_row)."""
    w_chunks, b_rows, program = [], [], []
    wrow = [0]

    def add_w(mat):
        r, c = int(mat.shape[0]), int(mat.shape[1])
        rp = _round_up(r, 8)
        pad = jnp.zeros((rp, LANE), MM_DT).at[:r, :c].set(mat.astype(MM_DT))
        w_chunks.append(pad)
        off = wrow[0]
        wrow[0] += rp
        return off

    def add_b(vec):
        n = int(vec.shape[0])
        b_rows.append(jnp.zeros((LANE,), jnp.float32).at[:n].set(vec))
        return len(b_rows) - 1

    for L in layers:
        ci, co = int(L["w1"].shape[2]), int(L["w1"].shape[3])
        c1 = (add_w(L["w1"].reshape(9 * ci, co)), ci, co, add_b(L["b1"]))
        c2 = (add_w(L["w2"].reshape(9 * co, co)), co, co, add_b(L["b2"]))
        if L["ws"] is not None:
            sk = (add_w(L["ws"]), ci, co, add_b(L["bs"]))
        else:
            sk = None
        program.append((c1, c2, sk))

    wbuf = jnp.concatenate(w_chunks, axis=0)
    nb = _round_up(len(b_rows), 8)
    b_rows = b_rows + [jnp.zeros((LANE,), jnp.float32)] * (nb - len(b_rows))
    bbuf = jnp.stack(b_rows, axis=0)
    return wbuf, bbuf, tuple(program)


# ---------------------------------------------------------------------------
# Fused whole-network Pallas kernel
# ---------------------------------------------------------------------------
def _fused_kernel(acat_ref, att_ref, wbuf_ref, bbuf_ref, out_ref, pad_ref,
                  *, program, H, W, id_off, id_ch):
    HW = H * W
    cp = pad_ref.shape[-1]

    # Zero ONLY the 1-px SAME-padding border of the shared padded scratch
    # (the interior is fully overwritten by every conv).  Done every grid
    # step so it is safe under megacore "parallel".
    zrow = jnp.zeros((1, W + 2, cp), MM_DT)
    pad_ref[0:1, :, :] = zrow
    pad_ref[H + 1:H + 2, :, :] = zrow
    zcol = jnp.zeros((H + 2, 1, cp), MM_DT)
    pad_ref[:, 0:1, :] = zcol
    pad_ref[:, W + 1:W + 2, :] = zcol

    def bias(brow, cout):
        return bbuf_ref[brow:brow + 1, :cout]          # (1, cout) f32, broadcasts

    def conv3x3(a, spec):
        roff, cin, cout, brow = spec
        # one interior store per conv; zero border gives SAME padding for free
        pad_ref[1:H + 1, 1:W + 1, :cin] = a.astype(MM_DT).reshape(H, W, cin)
        # im2col patch built once per conv: lanes ordered (dx, cin)
        flat = [pad_ref[:, dx:dx + W, :cin].reshape((H + 2) * W, cin)
                for dx in range(3)]
        patch = jnp.concatenate(flat, axis=-1)         # ((H+2)*W, 3*cin) bf16
        # 3 MXU dots with K = 3*cin (dx folded into K); dy taps are row slices
        acc = None
        for dy in range(3):
            lhs = patch[dy * W:dy * W + HW, :]
            rhs = wbuf_ref[roff + dy * 3 * cin:roff + (dy + 1) * 3 * cin, :cout]
            d = jnp.dot(lhs, rhs, preferred_element_type=jnp.float32)
            acc = d if acc is None else acc + d
        return acc + bias(brow, cout)

    def conv1x1(a, spec):
        roff, cin, cout, brow = spec
        d = jnp.dot(a.astype(MM_DT), wbuf_ref[roff:roff + cin, :cout],
                    preferred_element_type=jnp.float32)
        return d + bias(brow, cout)

    def resblock(a, blk):
        c1, c2, sk = blk
        h = _leaky(conv3x3(a, c1))
        h = _leaky(conv3x3(h, c2))
        s = a if sk is None else conv1x1(a, sk)
        return h + s

    # activations live in-kernel as (HW, C) f32 values (channels on lanes)
    a0 = acat_ref[...].reshape(HW, acat_ref.shape[-1]).astype(jnp.float32)
    am = att_ref[...].reshape(HW, att_ref.shape[-1]).astype(jnp.float32)

    a = a0
    for blk in program:
        a = resblock(a, blk)

    # fused epilogue: ret * att_mask + identity (identity == ent_prog slice)
    ret = a * am + a0[:, id_off:id_off + id_ch]
    out_ref[...] = ret.reshape(1, H, W, ret.shape[-1]).astype(out_ref.dtype)


# ---------------------------------------------------------------------------
# Wrapper
# ---------------------------------------------------------------------------
def latent_rate_reduction_fwd(params, x_base, ent_base, ent_prog, att_mask):
    """All activations NHWC.  Whole LatentRateReduction forward in one pallas_call."""
    B, H, W, _ = ent_prog.shape

    layers = _build_fused_layers(params)
    wbuf, bbuf, program = _pack_layers(layers)

    # Branch inputs concatenated once (order == branch batching order == the
    # torch.cat order feeding `enc`); identity is a channel slice of it.
    acat = jnp.concatenate([x_base, ent_base, ent_prog], axis=-1)
    cin_tot = int(acat.shape[-1])
    id_ch = int(ent_prog.shape[-1])
    id_off = cin_tot - id_ch
    c_out = int(layers[-1]["w2"].shape[3])
    c_att = int(att_mask.shape[-1])
    assert c_out == id_ch == c_att, "output / att_mask / identity channels must match"

    c_max_in = max(max(int(L["w1"].shape[2]), int(L["w2"].shape[2])) for L in layers)

    # explicit VMEM budget (packed weights/biases + blocks, double-buffered,
    # + padded scratch + headroom for spilled intermediates)
    pad_bytes = (H + 2) * (W + 2) * c_max_in * jnp.dtype(MM_DT).itemsize
    blk_bytes = (H * W * (cin_tot + c_att + c_out)) * 4
    need = 2 * (wbuf.size * wbuf.dtype.itemsize + bbuf.size * 4 + blk_bytes) + pad_bytes
    vmem_limit = int(min(max(3 * need + (16 << 20), 32 << 20), 64 << 20))

    kern = functools.partial(_fused_kernel, program=program, H=H, W=W,
                             id_off=id_off, id_ch=id_ch)

    return pl.pallas_call(
        kern,
        out_shape=jax.ShapeDtypeStruct((B, H, W, c_out), ent_prog.dtype),
        grid=(B,),
        in_specs=[
            pl.BlockSpec((1, H, W, cin_tot), lambda b: (b, 0, 0, 0)),
            pl.BlockSpec((1, H, W, c_att), lambda b: (b, 0, 0, 0)),
            # constant index maps -> packed weights/biases are DMA'd once
            pl.BlockSpec(wbuf.shape, lambda b: (0, 0)),
            pl.BlockSpec(bbuf.shape, lambda b: (0, 0)),
        ],
        out_specs=pl.BlockSpec((1, H, W, c_out), lambda b: (b, 0, 0, 0)),
        scratch_shapes=[
            pltpu.VMEM((H + 2, W + 2, c_max_in), MM_DT),   # SAME-pad scratch
        ],
        compiler_params=pltpu.CompilerParams(
            dimension_semantics=("parallel",),   # v7x: one batch element per TC
            vmem_limit_bytes=vmem_limit),
    )(acat, att_mask, wbuf, bbuf)


# ---------------------------------------------------------------------------
# Parameter init (HWIO conv weights, (1,Cout) biases, (Cin,Cout) 1x1 skip)
# ---------------------------------------------------------------------------
def init_res_params(key, cin, cout, scale=0.05):
    ks = jax.random.split(key, 6)
    p = {
        "w1": scale * jax.random.normal(ks[0], (3, 3, cin, cout), jnp.float32),
        "b1": scale * jax.random.normal(ks[1], (1, cout), jnp.float32),
        "w2": scale * jax.random.normal(ks[2], (3, 3, cout, cout), jnp.float32),
        "b2": scale * jax.random.normal(ks[3], (1, cout), jnp.float32),
    }
    if cin != cout:
        p["ws"] = scale * jax.random.normal(ks[4], (cin, cout), jnp.float32)
        p["bs"] = scale * jax.random.normal(ks[5], (1, cout), jnp.float32)
    return p


def init_latent_rate_reduction(key, dim_chunk=32, mu_std=False, dimension="middle"):
    N = dim_chunk
    ks = iter(jax.random.split(key, 16))
    if dimension != "big":
        enc_base_ent = [(2 * N, N), (N, N)]
        enc_enh_ent = [(2 * N if mu_std else N, N), (N, N)]
        enc_base_rep = [(N, N), (N, N)]
        enc = [(3 * N, 2 * N), (2 * N, 2 * N), (2 * N, 2 * N if mu_std else N)]
    else:
        enc_base_ent = [(2 * N, N), (N, N), (N, N)]
        enc_enh_ent = [(2 * N if mu_std else N, N), (N, N), (N, N)]
        enc_base_rep = [(N, N), (N, N), (N, N)]
        enc = [(3 * N, 2 * N), (2 * N, 2 * N), (2 * N, 2 * N),
               (2 * N, 2 * N if mu_std else N)]
    mk = lambda dims: [init_res_params(next(ks), ci, co) for ci, co in dims]
    return {
        "enc_base_entropy_params": mk(enc_base_ent),
        "enc_enh_entropy_params": mk(enc_enh_ent),
        "enc_base_rep": mk(enc_base_rep),
        "enc": mk(enc),
    }


# ---------------------------------------------------------------------------
# Pure-JAX reference (lax.conv) used only to sanity-check the Pallas result
# ---------------------------------------------------------------------------
def _ref_conv3x3(x, w, b):
    y = jax.lax.conv_general_dilated(
        x, w, window_strides=(1, 1), padding="SAME",
        dimension_numbers=("NHWC", "HWIO", "NHWC"))
    return _leaky(y + b[0])


def _ref_resblock(x, p):
    skip = x if "ws" not in p else (jnp.einsum("bhwc,cd->bhwd", x, p["ws"]) + p["bs"][0])
    h = _ref_conv3x3(x, p["w1"], p["b1"])
    h = _ref_conv3x3(h, p["w2"], p["b2"])
    return h + skip


def _ref_forward(params, x_base, ent_base, ent_prog, att_mask):
    def seq(x, ps):
        for p in ps:
            x = _ref_resblock(x, p)
        return x
    f_ent_prog = seq(ent_prog, params["enc_enh_entropy_params"])
    f_latent = seq(x_base, params["enc_base_rep"])
    f_ent_base = seq(ent_base, params["enc_base_entropy_params"])
    ret = seq(jnp.concatenate([f_latent, f_ent_base, f_ent_prog], -1), params["enc"])
    return ret * att_mask + ent_prog


# ---------------------------------------------------------------------------
if __name__ == "__main__":
    key = jax.random.PRNGKey(0)
    N = 32            # dim_chunk
    B, H, W = 2, 8, 8

    kp, k1, k2, k3, k4 = jax.random.split(key, 5)
    params = init_latent_rate_reduction(kp, dim_chunk=N, mu_std=False, dimension="middle")

    # PyTorch-style NCHW inputs
    x_base_nchw = jax.random.normal(k1, (B, N, H, W), jnp.float32)
    ent_base_nchw = jax.random.normal(k2, (B, 2 * N, H, W), jnp.float32)
    ent_prog_nchw = jax.random.normal(k3, (B, N, H, W), jnp.float32)
    att_mask_nchw = jax.nn.sigmoid(jax.random.normal(k4, (B, N, H, W), jnp.float32))

    to_nhwc = lambda t: jnp.transpose(t, (0, 2, 3, 1))
    x_base = to_nhwc(x_base_nchw)
    ent_base = to_nhwc(ent_base_nchw)
    ent_prog = to_nhwc(ent_prog_nchw)
    att_mask = to_nhwc(att_mask_nchw)

    fwd = jax.jit(latent_rate_reduction_fwd)
    out_nhwc = jax.block_until_ready(fwd(params, x_base, ent_base, ent_prog, att_mask))
    out_nchw = jnp.transpose(out_nhwc, (0, 3, 1, 2))  # back to PyTorch NCHW

    # sanity check against the pure-JAX f32 reference (kernel matmuls are bf16)
    ref = _ref_forward(params, x_base, ent_base, ent_prog, att_mask)
    assert out_nchw.shape == (B, N, H, W)
    max_err = float(jnp.max(jnp.abs(out_nhwc - ref)))
    rel_err = float(jnp.linalg.norm(out_nhwc - ref) / jnp.linalg.norm(ref))
    assert max_err < 2.5e-1 and rel_err < 5e-2, \
        f"mismatch vs reference: max_abs={max_err:.4f} rel_fro={rel_err:.4f}"

    print("KERNEL_OK")
</pallas_src>

<mosaic_0001>
module attributes {stable_mosaic.version = 11 : i64} {
  func.func @_fused_kernel(%arg0: i32, %arg1: memref<1x8x8x128xf32, #tpu.memory_space<vmem>>, %arg2: memref<1x8x8x32xf32, #tpu.memory_space<vmem>>, %arg3: memref<7488x128xbf16, #tpu.memory_space<vmem>>, %arg4: memref<16x128xf32, #tpu.memory_space<vmem>>, %arg5: memref<1x8x8x32xf32, #tpu.memory_space<vmem>>, %arg6: memref<10x10x128xbf16, #tpu.memory_space<vmem>>) attributes {dimension_semantics = [#tpu.dimension_semantics<parallel>], iteration_bounds = array<i64: 2>, scalar_prefetch = 0 : i64, scratch_operands = 1 : i64, tpu.core_type = #tpu.core_type<tc>, window_params = [{transform_indices = @transform_0, window_bounds = array<i64: 1, 8, 8, 128>}, {transform_indices = @transform_1, window_bounds = array<i64: 1, 8, 8, 32>}, {pipeline_mode = #tpu.pipeline_mode<synchronous>, transform_indices = @transform_2, window_bounds = array<i64: 7488, 128>}, {pipeline_mode = #tpu.pipeline_mode<synchronous>, transform_indices = @transform_3, window_bounds = array<i64: 16, 128>}, {transform_indices = @transform_4, window_bounds = array<i64: 1, 8, 8, 32>}]} {
    %cst = arith.constant 0.000000e+00 : bf16
    %0 = vector.broadcast %cst : bf16 to vector<1x10x128xbf16>
    %c0 = arith.constant 0 : index
    %c0_0 = arith.constant 0 : index
    %c0_1 = arith.constant 0 : index
    %1 = vector.load %arg6[%c0, %c0_0, %c0_1] : memref<10x10x128xbf16, #tpu.memory_space<vmem>>, vector<1x10x128xbf16>
    tpu.vector_store %arg6[%c0, %c0_0, %c0_1], %0 {strides = array<i32>} : memref<10x10x128xbf16, #tpu.memory_space<vmem>>, vector<1x10x128xbf16>,
    %c9 = arith.constant 9 : index
    %c0_2 = arith.constant 0 : index
    %c0_3 = arith.constant 0 : index
    %2 = vector.load %arg6[%c9, %c0_2, %c0_3] : memref<10x10x128xbf16, #tpu.memory_space<vmem>>, vector<1x10x128xbf16>
    tpu.vector_store %arg6[%c9, %c0_2, %c0_3], %0 {strides = array<i32>} : memref<10x10x128xbf16, #tpu.memory_space<vmem>>, vector<1x10x128xbf16>,
    %cst_4 = arith.constant 0.000000e+00 : bf16
    %3 = vector.broadcast %cst_4 : bf16 to vector<10x1x128xbf16>
    %c0_5 = arith.constant 0 : index
    %c0_6 = arith.constant 0 : index
    %c0_7 = arith.constant 0 : index
    %4 = vector.load %arg6[%c0_5, %c0_6, %c0_7] : memref<10x10x128xbf16, #tpu.memory_space<vmem>>, vector<10x1x128xbf16>
    tpu.vector_store %arg6[%c0_5, %c0_6, %c0_7], %3 {strides = array<i32>} : memref<10x10x128xbf16, #tpu.memory_space<vmem>>, vector<10x1x128xbf16>,
    %c0_8 = arith.constant 0 : index
    %c9_9 = arith.constant 9 : index
    %c0_10 = arith.constant 0 : index
    %5 = vector.load %arg6[%c0_8, %c9_9, %c0_10] : memref<10x10x128xbf16, #tpu.memory_space<vmem>>, vector<10x1x128xbf16>
    tpu.vector_store %arg6[%c0_8, %c9_9, %c0_10], %3 {strides = array<i32>} : memref<10x10x128xbf16, #tpu.memory_space<vmem>>, vector<10x1x128xbf16>,
    %c0_11 = arith.constant 0 : index
    %c0_12 = arith.constant 0 : index
    %c0_13 = arith.constant 0 : index
    %c0_14 = arith.constant 0 : index
    %6 = vector.load %arg1[%c0_11, %c0_12, %c0_13, %c0_14] : memref<1x8x8x128xf32, #tpu.memory_space<vmem>>, vector<1x8x8x128xf32>
    %7 = vector.shape_cast %6 : vector<1x8x8x128xf32> to vector<64x128xf32>
    %c0_15 = arith.constant 0 : index
    %c0_16 = arith.constant 0 : index
    %c0_17 = arith.constant 0 : index
    %c0_18 = arith.constant 0 : index
    %8 = vector.load %arg2[%c0_15, %c0_16, %c0_17, %c0_18] : memref<1x8x8x32xf32, #tpu.memory_space<vmem>>, vector<1x8x8x32xf32>
    %9 = vector.shape_cast %8 : vector<1x8x8x32xf32> to vector<64x32xf32>
    %10 = arith.truncf %7 : vector<64x128xf32> to vector<64x128xbf16>
    %11 = vector.shape_cast %10 : vector<64x128xbf16> to vector<8x8x128xbf16>
    %c1 = arith.constant 1 : index
    %c1_19 = arith.constant 1 : index
    %c0_20 = arith.constant 0 : index
    %12 = vector.load %arg6[%c1, %c1_19, %c0_20] : memref<10x10x128xbf16, #tpu.memory_space<vmem>>, vector<8x8x128xbf16>
    tpu.vector_store %arg6[%c1, %c1_19, %c0_20], %11 {strides = array<i32>} : memref<10x10x128xbf16, #tpu.memory_space<vmem>>, vector<8x8x128xbf16>,
    %c0_21 = arith.constant 0 : index
    %c0_22 = arith.constant 0 : index
    %c0_23 = arith.constant 0 : index
    %13 = vector.load %arg6[%c0_21, %c0_22, %c0_23] : memref<10x10x128xbf16, #tpu.memory_space<vmem>>, vector<10x8x128xbf16>
    %14 = vector.shape_cast %13 : vector<10x8x128xbf16> to vector<80x128xbf16>
    %c0_24 = arith.constant 0 : index
    %c1_25 = arith.constant 1 : index
    %c0_26 = arith.constant 0 : index
    %15 = vector.load %arg6[%c0_24, %c1_25, %c0_26] : memref<10x10x128xbf16, #tpu.memory_space<vmem>>, vector<10x8x128xbf16>
    %16 = vector.shape_cast %15 : vector<10x8x128xbf16> to vector<80x128xbf16>
    %c0_27 = arith.constant 0 : index
    %c2 = arith.constant 2 : index
    %c0_28 = arith.constant 0 : index
    %17 = vector.load %arg6[%c0_27, %c2, %c0_28] : memref<10x10x128xbf16, #tpu.memory_space<vmem>>, vector<10x8x128xbf16>
    %18 = vector.shape_cast %17 : vector<10x8x128xbf16> to vector<80x128xbf16>
    %19 = tpu.concatenate %14, %16, %18 in 1 : vector<80x128xbf16>, vector<80x128xbf16>, vector<80x128xbf16> -> vector<80x384xbf16>
    %20 = vector.extract_strided_slice %19 {offsets = [0, 0], sizes = [64, 384], strides = [1, 1]} : vector<80x384xbf16> to vector<64x384xbf16>
    %c0_29 = arith.constant 0 : index
    %c0_30 = arith.constant 0 : index
    %21 = vector.load %arg3[%c0_29, %c0_30] : memref<7488x128xbf16, #tpu.memory_space<vmem>>, vector<384x96xbf16>
    %cst_31 = arith.constant dense<0.000000e+00> : vector<64x96xf32>
    %22 = tpu.matmul %20, %21, %cst_31 {dimension_numbers = #tpu.dot_dimension_numbers<[1], [0], [0], [1], [0, 0, 1, 1], [], []>} : vector<64x384xbf16>, vector<384x96xbf16>, vector<64x96xf32> -> vector<64x96xf32>
    %23 = vector.extract_strided_slice %19 {offsets = [8, 0], sizes = [64, 384], strides = [1, 1]} : vector<80x384xbf16> to vector<64x384xbf16>
    %c384 = arith.constant 384 : index
    %c0_32 = arith.constant 0 : index
    %24 = vector.load %arg3[%c384, %c0_32] : memref<7488x128xbf16, #tpu.memory_space<vmem>>, vector<384x96xbf16>
    %cst_33 = arith.constant dense<0.000000e+00> : vector<64x96xf32>
    %25 = tpu.matmul %23, %24, %cst_33 {dimension_numbers = #tpu.dot_dimension_numbers<[1], [0], [0], [1], [0, 0, 1, 1], [], []>} : vector<64x384xbf16>, vector<384x96xbf16>, vector<64x96xf32> -> vector<64x96xf32>
    %26 = arith.addf %22, %25 : vector<64x96xf32>
    %27 = vector.extract_strided_slice %19 {offsets = [16, 0], sizes = [64, 384], strides = [1, 1]} : vector<80x384xbf16> to vector<64x384xbf16>
    %c768 = arith.constant 768 : index
    %c0_34 = arith.constant 0 : index
    %28 = vector.load %arg3[%c768, %c0_34] : memref<7488x128xbf16, #tpu.memory_space<vmem>>, vector<384x96xbf16>
    %cst_35 = arith.constant dense<0.000000e+00> : vector<64x96xf32>
    %29 = tpu.matmul %27, %28, %cst_35 {dimension_numbers = #tpu.dot_dimension_numbers<[1], [0], [0], [1], [0, 0, 1, 1], [], []>} : vector<64x384xbf16>, vector<384x96xbf16>, vector<64x96xf32> -> vector<64x96xf32>
    %30 = arith.addf %26, %29 : vector<64x96xf32>
    %c0_36 = arith.constant 0 : index
    %c0_37 = arith.constant 0 : index
    %31 = vector.load %arg4[%c0_36, %c0_37] : memref<16x128xf32, #tpu.memory_space<vmem>>, vector<1x96xf32>
    %32 = vector.broadcast %31 : vector<1x96xf32> to vector<64x96xf32>
    %33 = arith.addf %30, %32 : vector<64x96xf32>
    %cst_38 = arith.constant 0.000000e+00 : f32
    %34 = vector.broadcast %cst_38 : f32 to vector<64x96xf32>
    %35 = arith.cmpf oge, %33, %34 : vector<64x96xf32>
    %cst_39 = arith.constant 0.00999999977 : f32
    %36 = vector.broadcast %cst_39 : f32 to vector<64x96xf32>
    %37 = arith.mulf %33, %36 : vector<64x96xf32>
    %38 = arith.select %35, %33, %37 : vector<64x96xi1>, vector<64x96xf32>
    %39 = arith.truncf %38 : vector<64x96xf32> to vector<64x96xbf16>
    %40 = vector.shape_cast %39 : vector<64x96xbf16> to vector<8x8x96xbf16>
    %c1_40 = arith.constant 1 : index
    %c1_41 = arith.constant 1 : index
    %c0_42 = arith.constant 0 : index
    %41 = vector.load %arg6[%c1_40, %c1_41, %c0_42] : memref<10x10x128xbf16, #tpu.memory_space<vmem>>, vector<8x8x96xbf16>
    tpu.vector_store %arg6[%c1_40, %c1_41, %c0_42], %40 {strides = array<i32>} : memref<10x10x128xbf16, #tpu.memory_space<vmem>>, vector<8x8x96xbf16>,
    %c0_43 = arith.constant 0 : index
    %c0_44 = arith.constant 0 : index
    %c0_45 = arith.constant 0 : index
    %42 = vector.load %arg6[%c0_43, %c0_44, %c0_45] : memref<10x10x128xbf16, #tpu.memory_space<vmem>>, vector<10x8x96xbf16>
    %43 = vector.shape_cast %42 : vector<10x8x96xbf16> to vector<80x96xbf16>
    %c0_46 = arith.constant 0 : index
    %c1_47 = arith.constant 1 : index
    %c0_48 = arith.constant 0 : index
    %44 = vector.load %arg6[%c0_46, %c1_47, %c0_48] : memref<10x10x128xbf16, #tpu.memory_space<vmem>>, vector<10x8x96xbf16>
    %45 = vector.shape_cast %44 : vector<10x8x96xbf16> to vector<80x96xbf16>
    %c0_49 = arith.constant 0 : index
    %c2_50 = arith.constant 2 : index
    %c0_51 = arith.constant 0 : index
    %46 = vector.load %arg6[%c0_49, %c2_50, %c0_51] : memref<10x10x128xbf16, #tpu.memory_space<vmem>>, vector<10x8x96xbf16>
    %47 = vector.shape_cast %46 : vector<10x8x96xbf16> to vector<80x96xbf16>
    %48 = tpu.concatenate %43, %45, %47 in 1 : vector<80x96xbf16>, vector<80x96xbf16>, vector<80x96xbf16> -> vector<80x288xbf16>
    %49 = vector.extract_strided_slice %48 {offsets = [0, 0], sizes = [64, 288], strides = [1, 1]} : vector<80x288xbf16> to vector<64x288xbf16>
    %c1152 = arith.constant 1152 : index
    %c0_52 = arith.constant 0 : index
    %50 = vector.load %arg3[%c1152, %c0_52] : memref<7488x128xbf16, #tpu.memory_space<vmem>>, vector<288x96xbf16>
    %cst_53 = arith.constant dense<0.000000e+00> : vector<64x96xf32>
    %51 = tpu.matmul %49, %50, %cst_53 {dimension_numbers = #tpu.dot_dimension_numbers<[1], [0], [0], [1], [0, 0, 1, 1], [], []>} : vector<64x288xbf16>, vector<288x96xbf16>, vector<64x96xf32> -> vector<64x96xf32>
    %52 = vector.extract_strided_slice %48 {offsets = [8, 0], sizes = [64, 288], strides = [1, 1]} : vector<80x288xbf16> to vector<64x288xbf16>
    %c1440 = arith.constant 1440 : index
    %c0_54 = arith.constant 0 : index
    %53 = vector.load %arg3[%c1440, %c0_54] : memref<7488x128xbf16, #tpu.memory_space<vmem>>, vector<288x96xbf16>
    %cst_55 = arith.constant dense<0.000000e+00> : vector<64x96xf32>
    %54 = tpu.matmul %52, %53, %cst_55 {dimension_numbers = #tpu.dot_dimension_numbers<[1], [0], [0], [1], [0, 0, 1, 1], [], []>} : vector<64x288xbf16>, vector<288x96xbf16>, vector<64x96xf32> -> vector<64x96xf32>
    %55 = arith.addf %51, %54 : vector<64x96xf32>
    %56 = vector.extract_strided_slice %48 {offsets = [16, 0], sizes = [64, 288], strides = [1, 1]} : vector<80x288xbf16> to vector<64x288xbf16>
    %c1728 = arith.constant 1728 : index
    %c0_56 = arith.constant 0 : index
    %57 = vector.load %arg3[%c1728, %c0_56] : memref<7488x128xbf16, #tpu.memory_space<vmem>>, vector<288x96xbf16>
    %cst_57 = arith.constant dense<0.000000e+00> : vector<64x96xf32>
    %58 = tpu.matmul %56, %57, %cst_57 {dimension_numbers = #tpu.dot_dimension_numbers<[1], [0], [0], [1], [0, 0, 1, 1], [], []>} : vector<64x288xbf16>, vector<288x96xbf16>, vector<64x96xf32> -> vector<64x96xf32>
    %59 = arith.addf %55, %58 : vector<64x96xf32>
    %c1_58 = arith.constant 1 : index
    %c0_59 = arith.constant 0 : index
    %60 = vector.load %arg4[%c1_58, %c0_59] : memref<16x128xf32, #tpu.memory_space<vmem>>, vector<1x96xf32>
    %61 = vector.broadcast %60 : vector<1x96xf32> to vector<64x96xf32>
    %62 = arith.addf %59, %61 : vector<64x96xf32>
    %cst_60 = arith.constant 0.000000e+00 : f32
    %63 = vector.broadcast %cst_60 : f32 to vector<64x96xf32>
    %64 = arith.cmpf oge, %62, %63 : vector<64x96xf32>
    %cst_61 = arith.constant 0.00999999977 : f32
    %65 = vector.broadcast %cst_61 : f32 to vector<64x96xf32>
    %66 = arith.mulf %62, %65 : vector<64x96xf32>
    %67 = arith.select %64, %62, %66 : vector<64x96xi1>, vector<64x96xf32>
    %68 = arith.truncf %7 : vector<64x128xf32> to vector<64x128xbf16>
    %c2016 = arith.constant 2016 : index
    %c0_62 = arith.constant 0 : index
    %69 = vector.load %arg3[%c2016, %c0_62] : memref<7488x128xbf16, #tpu.memory_space<vmem>>, vector<128x96xbf16>
    %cst_63 = arith.constant dense<0.000000e+00> : vector<64x96xf32>
    %70 = tpu.matmul %68, %69, %cst_63 {dimension_numbers = #tpu.dot_dimension_numbers<[1], [0], [0], [1], [0, 0, 1, 1], [], []>} : vector<64x128xbf16>, vector<128x96xbf16>, vector<64x96xf32> -> vector<64x96xf32>
    %c2_64 = arith.constant 2 : index
    %c0_65 = arith.constant 0 : index
    %71 = vector.load %arg4[%c2_64, %c0_65] : memref<16x128xf32, #tpu.memory_space<vmem>>, vector<1x96xf32>
    %72 = vector.broadcast %71 : vector<1x96xf32> to vector<64x96xf32>
    %73 = arith.addf %70, %72 : vector<64x96xf32>
    %74 = arith.addf %67, %73 : vector<64x96xf32>
    %75 = arith.truncf %74 : vector<64x96xf32> to vector<64x96xbf16>
    %76 = vector.shape_cast %75 : vector<64x96xbf16> to vector<8x8x96xbf16>
    %c1_66 = arith.constant 1 : index
    %c1_67 = arith.constant 1 : index
    %c0_68 = arith.constant 0 : index
    %77 = vector.load %arg6[%c1_66, %c1_67, %c0_68] : memref<10x10x128xbf16, #tpu.memory_space<vmem>>, vector<8x8x96xbf16>
    tpu.vector_store %arg6[%c1_66, %c1_67, %c0_68], %76 {strides = array<i32>} : memref<10x10x128xbf16, #tpu.memory_space<vmem>>, vector<8x8x96xbf16>,
    %c0_69 = arith.constant 0 : index
    %c0_70 = arith.constant 0 : index
    %c0_71 = arith.constant 0 : index
    %78 = vector.load %arg6[%c0_69, %c0_70, %c0_71] : memref<10x10x128xbf16, #tpu.memory_space<vmem>>, vector<10x8x96xbf16>
    %79 = vector.shape_cast %78 : vector<10x8x96xbf16> to vector<80x96xbf16>
    %c0_72 = arith.constant 0 : index
    %c1_73 = arith.constant 1 : index
    %c0_74 = arith.constant 0 : index
    %80 = vector.load %arg6[%c0_72, %c1_73, %c0_74] : memref<10x10x128xbf16, #tpu.memory_space<vmem>>, vector<10x8x96xbf16>
    %81 = vector.shape_cast %80 : vector<10x8x96xbf16> to vector<80x96xbf16>
    %c0_75 = arith.constant 0 : index
    %c2_76 = arith.constant 2 : index
    %c0_77 = arith.constant 0 : index
    %82 = vector.load %arg6[%c0_75, %c2_76, %c0_77] : memref<10x10x128xbf16, #tpu.memory_space<vmem>>, vector<10x8x96xbf16>
    %83 = vector.shape_cast %82 : vector<10x8x96xbf16> to vector<80x96xbf16>
    %84 = tpu.concatenate %79, %81, %83 in 1 : vector<80x96xbf16>, vector<80x96xbf16>, vector<80x96xbf16> -> vector<80x288xbf16>
    %85 = vector.extract_strided_slice %84 {offsets = [0, 0], sizes = [64, 288], strides = [1, 1]} : vector<80x288xbf16> to vector<64x288xbf16>
    %c2144 = arith.constant 2144 : index
    %c0_78 = arith.constant 0 : index
    %86 = vector.load %arg3[%c2144, %c0_78] : memref<7488x128xbf16, #tpu.memory_space<vmem>>, vector<288x96xbf16>
    %cst_79 = arith.constant dense<0.000000e+00> : vector<64x96xf32>
    %87 = tpu.matmul %85, %86, %cst_79 {dimension_numbers = #tpu.dot_dimension_numbers<[1], [0], [0], [1], [0, 0, 1, 1], [], []>} : vector<64x288xbf16>, vector<288x96xbf16>, vector<64x96xf32> -> vector<64x96xf32>
    %88 = vector.extract_strided_slice %84 {offsets = [8, 0], sizes = [64, 288], strides = [1, 1]} : vector<80x288xbf16> to vector<64x288xbf16>
    %c2432 = arith.constant 2432 : index
    %c0_80 = arith.constant 0 : index
    %89 = vector.load %arg3[%c2432, %c0_80] : memref<7488x128xbf16, #tpu.memory_space<vmem>>, vector<288x96xbf16>
    %cst_81 = arith.constant dense<0.000000e+00> : vector<64x96xf32>
    %90 = tpu.matmul %88, %89, %cst_81 {dimension_numbers = #tpu.dot_dimension_numbers<[1], [0], [0], [1], [0, 0, 1, 1], [], []>} : vector<64x288xbf16>, vector<288x96xbf16>, vector<64x96xf32> -> vector<64x96xf32>
    %91 = arith.addf %87, %90 : vector<64x96xf32>
    %92 = vector.extract_strided_slice %84 {offsets = [16, 0], sizes = [64, 288], strides = [1, 1]} : vector<80x288xbf16> to vector<64x288xbf16>
    %c2720 = arith.constant 2720 : index
    %c0_82 = arith.constant 0 : index
    %93 = vector.load %arg3[%c2720, %c0_82] : memref<7488x128xbf16, #tpu.memory_space<vmem>>, vector<288x96xbf16>
    %cst_83 = arith.constant dense<0.000000e+00> : vector<64x96xf32>
    %94 = tpu.matmul %92, %93, %cst_83 {dimension_numbers = #tpu.dot_dimension_numbers<[1], [0], [0], [1], [0, 0, 1, 1], [], []>} : vector<64x288xbf16>, vector<288x96xbf16>, vector<64x96xf32> -> vector<64x96xf32>
    %95 = arith.addf %91, %94 : vector<64x96xf32>
    %c3 = arith.constant 3 : index
    %c0_84 = arith.constant 0 : index
    %96 = vector.load %arg4[%c3, %c0_84] : memref<16x128xf32, #tpu.memory_space<vmem>>, vector<1x96xf32>
    %97 = vector.broadcast %96 : vector<1x96xf32> to vector<64x96xf32>
    %98 = arith.addf %95, %97 : vector<64x96xf32>
    %cst_85 = arith.constant 0.000000e+00 : f32
    %99 = vector.broadcast %cst_85 : f32 to vector<64x96xf32>
    %100 = arith.cmpf oge, %98, %99 : vector<64x96xf32>
    %cst_86 = arith.constant 0.00999999977 : f32
    %101 = vector.broadcast %cst_86 : f32 to vector<64x96xf32>
    %102 = arith.mulf %98, %101 : vector<64x96xf32>
    %103 = arith.select %100, %98, %102 : vector<64x96xi1>, vector<64x96xf32>
    %104 = arith.truncf %103 : vector<64x96xf32> to vector<64x96xbf16>
    %105 = vector.shape_cast %104 : vector<64x96xbf16> to vector<8x8x96xbf16>
    %c1_87 = arith.constant 1 : index
    %c1_88 = arith.constant 1 : index
    %c0_89 = arith.constant 0 : index
    %106 = vector.load %arg6[%c1_87, %c1_88, %c0_89] : memref<10x10x128xbf16, #tpu.memory_space<vmem>>, vector<8x8x96xbf16>
    tpu.vector_store %arg6[%c1_87, %c1_88, %c0_89], %105 {strides = array<i32>} : memref<10x10x128xbf16, #tpu.memory_space<vmem>>, vector<8x8x96xbf16>,
    %c0_90 = arith.constant 0 : index
    %c0_91 = arith.constant 0 : index
    %c0_92 = arith.constant 0 : index
    %107 = vector.load %arg6[%c0_90, %c0_91, %c0_92] : memref<10x10x128xbf16, #tpu.memory_space<vmem>>, vector<10x8x96xbf16>
    %108 = vector.shape_cast %107 : vector<10x8x96xbf16> to vector<80x96xbf16>
    %c0_93 = arith.constant 0 : index
    %c1_94 = arith.constant 1 : index
    %c0_95 = arith.constant 0 : index
    %109 = vector.load %arg6[%c0_93, %c1_94, %c0_95] : memref<10x10x128xbf16, #tpu.memory_space<vmem>>, vector<10x8x96xbf16>
    %110 = vector.shape_cast %109 : vector<10x8x96xbf16> to vector<80x96xbf16>
    %c0_96 = arith.constant 0 : index
    %c2_97 = arith.constant 2 : index
    %c0_98 = arith.constant 0 : index
    %111 = vector.load %arg6[%c0_96, %c2_97, %c0_98] : memref<10x10x128xbf16, #tpu.memory_space<vmem>>, vector<10x8x96xbf16>
    %112 = vector.shape_cast %111 : vector<10x8x96xbf16> to vector<80x96xbf16>
    %113 = tpu.concatenate %108, %110, %112 in 1 : vector<80x96xbf16>, vector<80x96xbf16>, vector<80x96xbf16> -> vector<80x288xbf16>
    %114 = vector.extract_strided_slice %113 {offsets = [0, 0], sizes = [64, 288], strides = [1, 1]} : vector<80x288xbf16> to vector<64x288xbf16>
    %c3008 = arith.constant 3008 : index
    %c0_99 = arith.constant 0 : index
    %115 = vector.load %arg3[%c3008, %c0_99] : memref<7488x128xbf16, #tpu.memory_space<vmem>>, vector<288x96xbf16>
    %cst_100 = arith.constant dense<0.000000e+00> : vector<64x96xf32>
    %116 = tpu.matmul %114, %115, %cst_100 {dimension_numbers = #tpu.dot_dimension_numbers<[1], [0], [0], [1], [0, 0, 1, 1], [], []>} : vector<64x288xbf16>, vector<288x96xbf16>, vector<64x96xf32> -> vector<64x96xf32>
    %117 = vector.extract_strided_slice %113 {offsets = [8, 0], sizes = [64, 288], strides = [1, 1]} : vector<80x288xbf16> to vector<64x288xbf16>
    %c3296 = arith.constant 3296 : index
    %c0_101 = arith.constant 0 : index
    %118 = vector.load %arg3[%c3296, %c0_101] : memref<7488x128xbf16, #tpu.memory_space<vmem>>, vector<288x96xbf16>
    %cst_102 = arith.constant dense<0.000000e+00> : vector<64x96xf32>
    %119 = tpu.matmul %117, %118, %cst_102 {dimension_numbers = #tpu.dot_dimension_numbers<[1], [0], [0], [1], [0, 0, 1, 1], [], []>} : vector<64x288xbf16>, vector<288x96xbf16>, vector<64x96xf32> -> vector<64x96xf32>
    %120 = arith.addf %116, %119 : vector<64x96xf32>
    %121 = vector.extract_strided_slice %113 {offsets = [16, 0], sizes = [64, 288], strides = [1, 1]} : vector<80x288xbf16> to vector<64x288xbf16>
    %c3584 = arith.constant 3584 : index
    %c0_103 = arith.constant 0 : index
    %122 = vector.load %arg3[%c3584, %c0_103] : memref<7488x128xbf16, #tpu.memory_space<vmem>>, vector<288x96xbf16>
    %cst_104 = arith.constant dense<0.000000e+00> : vector<64x96xf32>
    %123 = tpu.matmul %121, %122, %cst_104 {dimension_numbers = #tpu.dot_dimension_numbers<[1], [0], [0], [1], [0, 0, 1, 1], [], []>} : vector<64x288xbf16>, vector<288x96xbf16>, vector<64x96xf32> -> vector<64x96xf32>
    %124 = arith.addf %120, %123 : vector<64x96xf32>
    %c4 = arith.constant 4 : index
    %c0_105 = arith.constant 0 : index
    %125 = vector.load %arg4[%c4, %c0_105] : memref<16x128xf32, #tpu.memory_space<vmem>>, vector<1x96xf32>
    %126 = vector.broadcast %125 : vector<1x96xf32> to vector<64x96xf32>
    %127 = arith.addf %124, %126 : vector<64x96xf32>
    %cst_106 = arith.constant 0.000000e+00 : f32
    %128 = vector.broadcast %cst_106 : f32 to vector<64x96xf32>
    %129 = arith.cmpf oge, %127, %128 : vector<64x96xf32>
    %cst_107 = arith.constant 0.00999999977 : f32
    %130 = vector.broadcast %cst_107 : f32 to vector<64x96xf32>
    %131 = arith.mulf %127, %130 : vector<64x96xf32>
    %132 = arith.select %129, %127, %131 : vector<64x96xi1>, vector<64x96xf32>
    %133 = arith.addf %132, %74 : vector<64x96xf32>
    %134 = arith.truncf %133 : vector<64x96xf32> to vector<64x96xbf16>
    %135 = vector.shape_cast %134 : vector<64x96xbf16> to vector<8x8x96xbf16>
    %c1_108 = arith.constant 1 : index
    %c1_109 = arith.constant 1 : index
    %c0_110 = arith.constant 0 : index
    %136 = vector.load %arg6[%c1_108, %c1_109, %c0_110] : memref<10x10x128xbf16, #tpu.memory_space<vmem>>, vector<8x8x96xbf16>
    tpu.vector_store %arg6[%c1_108, %c1_109, %c0_110], %135 {strides = array<i32>} : memref<10x10x128xbf16, #tpu.memory_space<vmem>>, vector<8x8x96xbf16>,
    %c0_111 = arith.constant 0 : index
    %c0_112 = arith.constant 0 : index
    %c0_113 = arith.constant 0 : index
    %137 = vector.load %arg6[%c0_111, %c0_112, %c0_113] : memref<10x10x128xbf16, #tpu.memory_space<vmem>>, vector<10x8x96xbf16>
    %138 = vector.shape_cast %137 : vector<10x8x96xbf16> to vector<80x96xbf16>
    %c0_114 = arith.constant 0 : index
    %c1_115 = arith.constant 1 : index
    %c0_116 = arith.constant 0 : index
    %139 = vector.load %arg6[%c0_114, %c1_115, %c0_116] : memref<10x10x128xbf16, #tpu.memory_space<vmem>>, vector<10x8x96xbf16>
    %140 = vector.shape_cast %139 : vector<10x8x96xbf16> to vector<80x96xbf16>
    %c0_117 = arith.constant 0 : index
    %c2_118 = arith.constant 2 : index
    %c0_119 = arith.constant 0 : index
    %141 = vector.load %arg6[%c0_117, %c2_118, %c0_119] : memref<10x10x128xbf16, #tpu.memory_space<vmem>>, vector<10x8x96xbf16>
    %142 = vector.shape_cast %141 : vector<10x8x96xbf16> to vector<80x96xbf16>
    %143 = tpu.concatenate %138, %140, %142 in 1 : vector<80x96xbf16>, vector<80x96xbf16>, vector<80x96xbf16> -> vector<80x288xbf16>
    %144 = vector.extract_strided_slice %143 {offsets = [0, 0], sizes = [64, 288], strides = [1, 1]} : vector<80x288xbf16> to vector<64x288xbf16>
    %c3872 = arith.constant 3872 : index
    %c0_120 = arith.constant 0 : index
    %145 = vector.load %arg3[%c3872, %c0_120] : memref<7488x128xbf16, #tpu.memory_space<vmem>>, vector<288x64xbf16>
    %cst_121 = arith.constant dense<0.000000e+00> : vector<64x64xf32>
    %146 = tpu.matmul %144, %145, %cst_121 {dimension_numbers = #tpu.dot_dimension_numbers<[1], [0], [0], [1], [0, 0, 1, 1], [], []>} : vector<64x288xbf16>, vector<288x64xbf16>, vector<64x64xf32> -> vector<64x64xf32>
    %147 = vector.extract_strided_slice %143 {offsets = [8, 0], sizes = [64, 288], strides = [1, 1]} : vector<80x288xbf16> to vector<64x288xbf16>
    %c4160 = arith.constant 4160 : index
    %c0_122 = arith.constant 0 : index
    %148 = vector.load %arg3[%c4160, %c0_122] : memref<7488x128xbf16, #tpu.memory_space<vmem>>, vector<288x64xbf16>
    %cst_123 = arith.constant dense<0.000000e+00> : vector<64x64xf32>
    %149 = tpu.matmul %147, %148, %cst_123 {dimension_numbers = #tpu.dot_dimension_numbers<[1], [0], [0], [1], [0, 0, 1, 1], [], []>} : vector<64x288xbf16>, vector<288x64xbf16>, vector<64x64xf32> -> vector<64x64xf32>
    %150 = arith.addf %146, %149 : vector<64x64xf32>
    %151 = vector.extract_strided_slice %143 {offsets = [16, 0], sizes = [64, 288], strides = [1, 1]} : vector<80x288xbf16> to vector<64x288xbf16>
    %c4448 = arith.constant 4448 : index
    %c0_124 = arith.constant 0 : index
    %152 = vector.load %arg3[%c4448, %c0_124] : memref<7488x128xbf16, #tpu.memory_space<vmem>>, vector<288x64xbf16>
    %cst_125 = arith.constant dense<0.000000e+00> : vector<64x64xf32>
    %153 = tpu.matmul %151, %152, %cst_125 {dimension_numbers = #tpu.dot_dimension_numbers<[1], [0], [0], [1], [0, 0, 1, 1], [], []>} : vector<64x288xbf16>, vector<288x64xbf16>, vector<64x64xf32> -> vector<64x64xf32>
    %154 = arith.addf %150, %153 : vector<64x64xf32>
    %c5 = arith.constant 5 : index
    %c0_126 = arith.constant 0 : index
    %155 = vector.load %arg4[%c5, %c0_126] : memref<16x128xf32, #tpu.memory_space<vmem>>, vector<1x64xf32>
    %156 = vector.broadcast %155 : vector<1x64xf32> to vector<64x64xf32>
    %157 = arith.addf %154, %156 : vector<64x64xf32>
    %cst_127 = arith.constant 0.000000e+00 : f32
    %158 = vector.broadcast %cst_127 : f32 to vector<64x64xf32>
    %159 = arith.cmpf oge, %157, %158 : vector<64x64xf32>
    %cst_128 = arith.constant 0.00999999977 : f32
    %160 = vector.broadcast %cst_128 : f32 to vector<64x64xf32>
    %161 = arith.mulf %157, %160 : vector<64x64xf32>
    %162 = arith.select %159, %157, %161 : vector<64x64xi1>, vector<64x64xf32>
    %163 = arith.truncf %162 : vector<64x64xf32> to vector<64x64xbf16>
    %164 = vector.shape_cast %163 : vector<64x64xbf16> to vector<8x8x64xbf16>
    %c1_129 = arith.constant 1 : index
    %c1_130 = arith.constant 1 : index
    %c0_131 = arith.constant 0 : index
    %165 = vector.load %arg6[%c1_129, %c1_130, %c0_131] : memref<10x10x128xbf16, #tpu.memory_space<vmem>>, vector<8x8x64xbf16>
    tpu.vector_store %arg6[%c1_129, %c1_130, %c0_131], %164 {strides = array<i32>} : memref<10x10x128xbf16, #tpu.memory_space<vmem>>, vector<8x8x64xbf16>,
    %c0_132 = arith.constant 0 : index
    %c0_133 = arith.constant 0 : index
    %c0_134 = arith.constant 0 : index
    %166 = vector.load %arg6[%c0_132, %c0_133, %c0_134] : memref<10x10x128xbf16, #tpu.memory_space<vmem>>, vector<10x8x64xbf16>
    %167 = vector.shape_cast %166 : vector<10x8x64xbf16> to vector<80x64xbf16>
    %c0_135 = arith.constant 0 : index
    %c1_136 = arith.constant 1 : index
    %c0_137 = arith.constant 0 : index
    %168 = vector.load %arg6[%c0_135, %c1_136, %c0_137] : memref<10x10x128xbf16, #tpu.memory_space<vmem>>, vector<10x8x64xbf16>
    %169 = vector.shape_cast %168 : vector<10x8x64xbf16> to vector<80x64xbf16>
    %c0_138 = arith.constant 0 : index
    %c2_139 = arith.constant 2 : index
    %c0_140 = arith.constant 0 : index
    %170 = vector.load %arg6[%c0_138, %c2_139, %c0_140] : memref<10x10x128xbf16, #tpu.memory_space<vmem>>, vector<10x8x64xbf16>
    %171 = vector.shape_cast %170 : vector<10x8x64xbf16> to vector<80x64xbf16>
    %172 = tpu.concatenate %167, %169, %171 in 1 : vector<80x64xbf16>, vector<80x64xbf16>, vector<80x64xbf16> -> vector<80x192xbf16>
    %173 = vector.extract_strided_slice %172 {offsets = [0, 0], sizes = [64, 192], strides = [1, 1]} : vector<80x192xbf16> to vector<64x192xbf16>
    %c4736 = arith.constant 4736 : index
    %c0_141 = arith.constant 0 : index
    %174 = vector.load %arg3[%c4736, %c0_141] : memref<7488x128xbf16, #tpu.memory_space<vmem>>, vector<192x64xbf16>
    %cst_142 = arith.constant dense<0.000000e+00> : vector<64x64xf32>
    %175 = tpu.matmul %173, %174, %cst_142 {dimension_numbers = #tpu.dot_dimension_numbers<[1], [0], [0], [1], [0, 0, 1, 1], [], []>} : vector<64x192xbf16>, vector<192x64xbf16>, vector<64x64xf32> -> vector<64x64xf32>
    %176 = vector.extract_strided_slice %172 {offsets = [8, 0], sizes = [64, 192], strides = [1, 1]} : vector<80x192xbf16> to vector<64x192xbf16>
    %c4928 = arith.constant 4928 : index
    %c0_143 = arith.constant 0 : index
    %177 = vector.load %arg3[%c4928, %c0_143] : memref<7488x128xbf16, #tpu.memory_space<vmem>>, vector<192x64xbf16>
    %cst_144 = arith.constant dense<0.000000e+00> : vector<64x64xf32>
    %178 = tpu.matmul %176, %177, %cst_144 {dimension_numbers = #tpu.dot_dimension_numbers<[1], [0], [0], [1], [0, 0, 1, 1], [], []>} : vector<64x192xbf16>, vector<192x64xbf16>, vector<64x64xf32> -> vector<64x64xf32>
    %179 = arith.addf %175, %178 : vector<64x64xf32>
    %180 = vector.extract_strided_slice %172 {offsets = [16, 0], sizes = [64, 192], strides = [1, 1]} : vector<80x192xbf16> to vector<64x192xbf16>
    %c5120 = arith.constant 5120 : index
    %c0_145 = arith.constant 0 : index
    %181 = vector.load %arg3[%c5120, %c0_145] : memref<7488x128xbf16, #tpu.memory_space<vmem>>, vector<192x64xbf16>
    %cst_146 = arith.constant dense<0.000000e+00> : vector<64x64xf32>
    %182 = tpu.matmul %180, %181, %cst_146 {dimension_numbers = #tpu.dot_dimension_numbers<[1], [0], [0], [1], [0, 0, 1, 1], [], []>} : vector<64x192xbf16>, vector<192x64xbf16>, vector<64x64xf32> -> vector<64x64xf32>
    %183 = arith.addf %179, %182 : vector<64x64xf32>
    %c6 = arith.constant 6 : index
    %c0_147 = arith.constant 0 : index
    %184 = vector.load %arg4[%c6, %c0_147] : memref<16x128xf32, #tpu.memory_space<vmem>>, vector<1x64xf32>
    %185 = vector.broadcast %184 : vector<1x64xf32> to vector<64x64xf32>
    %186 = arith.addf %183, %185 : vector<64x64xf32>
    %cst_148 = arith.constant 0.000000e+00 : f32
    %187 = vector.broadcast %cst_148 : f32 to vector<64x64xf32>
    %188 = arith.cmpf oge, %186, %187 : vector<64x64xf32>
    %cst_149 = arith.constant 0.00999999977 : f32
    %189 = vector.broadcast %cst_149 : f32 to vector<64x64xf32>
    %190 = arith.mulf %186, %189 : vector<64x64xf32>
    %191 = arith.select %188, %186, %190 : vector<64x64xi1>, vector<64x64xf32>
    %192 = arith.truncf %133 : vector<64x96xf32> to vector<64x96xbf16>
    %c5312 = arith.constant 5312 : index
    %c0_150 = arith.constant 0 : index
    %193 = vector.load %arg3[%c5312, %c0_150] : memref<7488x128xbf16, #tpu.memory_space<vmem>>, vector<96x64xbf16>
    %cst_151 = arith.constant dense<0.000000e+00> : vector<64x64xf32>
    %194 = tpu.matmul %192, %193, %cst_151 {dimension_numbers = #tpu.dot_dimension_numbers<[1], [0], [0], [1], [0, 0, 1, 1], [], []>} : vector<64x96xbf16>, vector<96x64xbf16>, vector<64x64xf32> -> vector<64x64xf32>
    %c7 = arith.constant 7 : index
    %c0_152 = arith.constant 0 : index
    %195 = vector.load %arg4[%c7, %c0_152] : memref<16x128xf32, #tpu.memory_space<vmem>>, vector<1x64xf32>
    %196 = vector.broadcast %195 : vector<1x64xf32> to vector<64x64xf32>
    %197 = arith.addf %194, %196 : vector<64x64xf32>
    %198 = arith.addf %191, %197 : vector<64x64xf32>
    %199 = arith.truncf %198 : vector<64x64xf32> to vector<64x64xbf16>
    %200 = vector.shape_cast %199 : vector<64x64xbf16> to vector<8x8x64xbf16>
    %c1_153 = arith.constant 1 : index
    %c1_154 = arith.constant 1 : index
    %c0_155 = arith.constant 0 : index
    %201 = vector.load %arg6[%c1_153, %c1_154, %c0_155] : memref<10x10x128xbf16, #tpu.memory_space<vmem>>, vector<8x8x64xbf16>
    tpu.vector_store %arg6[%c1_153, %c1_154, %c0_155], %200 {strides = array<i32>} : memref<10x10x128xbf16, #tpu.memory_space<vmem>>, vector<8x8x64xbf16>,
    %c0_156 = arith.constant 0 : index
    %c0_157 = arith.constant 0 : index
    %c0_158 = arith.constant 0 : index
    %202 = vector.load %arg6[%c0_156, %c0_157, %c0_158] : memref<10x10x128xbf16, #tpu.memory_space<vmem>>, vector<10x8x64xbf16>
    %203 = vector.shape_cast %202 : vector<10x8x64xbf16> to vector<80x64xbf16>
    %c0_159 = arith.constant 0 : index
    %c1_160 = arith.constant 1 : index
    %c0_161 = arith.constant 0 : index
    %204 = vector.load %arg6[%c0_159, %c1_160, %c0_161] : memref<10x10x128xbf16, #tpu.memory_space<vmem>>, vector<10x8x64xbf16>
    %205 = vector.shape_cast %204 : vector<10x8x64xbf16> to vector<80x64xbf16>
    %c0_162 = arith.constant 0 : index
    %c2_163 = arith.constant 2 : index
    %c0_164 = arith.constant 0 : index
    %206 = vector.load %arg6[%c0_162, %c2_163, %c0_164] : memref<10x10x128xbf16, #tpu.memory_space<vmem>>, vector<10x8x64xbf16>
    %207 = vector.shape_cast %206 : vector<10x8x64xbf16> to vector<80x64xbf16>
    %208 = tpu.concatenate %203, %205, %207 in 1 : vector<80x64xbf16>, vector<80x64xbf16>, vector<80x64xbf16> -> vector<80x192xbf16>
    %209 = vector.extract_strided_slice %208 {offsets = [0, 0], sizes = [64, 192], strides = [1, 1]} : vector<80x192xbf16> to vector<64x192xbf16>
    %c5408 = arith.constant 5408 : index
    %c0_165 = arith.constant 0 : index
    %210 = vector.load %arg3[%c5408, %c0_165] : memref<7488x128xbf16, #tpu.memory_space<vmem>>, vector<192x64xbf16>
    %cst_166 = arith.constant dense<0.000000e+00> : vector<64x64xf32>
    %211 = tpu.matmul %209, %210, %cst_166 {dimension_numbers = #tpu.dot_dimension_numbers<[1], [0], [0], [1], [0, 0, 1, 1], [], []>} : vector<64x192xbf16>, vector<192x64xbf16>, vector<64x64xf32> -> vector<64x64xf32>
    %212 = vector.extract_strided_slice %208 {offsets = [8, 0], sizes = [64, 192], strides = [1, 1]} : vector<80x192xbf16> to vector<64x192xbf16>
    %c5600 = arith.constant 5600 : index
    %c0_167 = arith.constant 0 : index
    %213 = vector.load %arg3[%c5600, %c0_167] : memref<7488x128xbf16, #tpu.memory_space<vmem>>, vector<192x64xbf16>
    %cst_168 = arith.constant dense<0.000000e+00> : vector<64x64xf32>
    %214 = tpu.matmul %212, %213, %cst_168 {dimension_numbers = #tpu.dot_dimension_numbers<[1], [0], [0], [1], [0, 0, 1, 1], [], []>} : vector<64x192xbf16>, vector<192x64xbf16>, vector<64x64xf32> -> vector<64x64xf32>
    %215 = arith.addf %211, %214 : vector<64x64xf32>
    %216 = vector.extract_strided_slice %208 {offsets = [16, 0], sizes = [64, 192], strides = [1, 1]} : vector<80x192xbf16> to vector<64x192xbf16>
    %c5792 = arith.constant 5792 : index
    %c0_169 = arith.constant 0 : index
    %217 = vector.load %arg3[%c5792, %c0_169] : memref<7488x128xbf16, #tpu.memory_space<vmem>>, vector<192x64xbf16>
    %cst_170 = arith.constant dense<0.000000e+00> : vector<64x64xf32>
    %218 = tpu.matmul %216, %217, %cst_170 {dimension_numbers = #tpu.dot_dimension_numbers<[1], [0], [0], [1], [0, 0, 1, 1], [], []>} : vector<64x192xbf16>, vector<192x64xbf16>, vector<64x64xf32> -> vector<64x64xf32>
    %219 = arith.addf %215, %218 : vector<64x64xf32>
    %c8 = arith.constant 8 : index
    %c0_171 = arith.constant 0 : index
    %220 = vector.load %arg4[%c8, %c0_171] : memref<16x128xf32, #tpu.memory_space<vmem>>, vector<1x64xf32>
    %221 = vector.broadcast %220 : vector<1x64xf32> to vector<64x64xf32>
    %222 = arith.addf %219, %221 : vector<64x64xf32>
    %cst_172 = arith.constant 0.000000e+00 : f32
    %223 = vector.broadcast %cst_172 : f32 to vector<64x64xf32>
    %224 = arith.cmpf oge, %222, %223 : vector<64x64xf32>
    %cst_173 = arith.constant 0.00999999977 : f32
    %225 = vector.broadcast %cst_173 : f32 to vector<64x64xf32>
    %226 = arith.mulf %222, %225 : vector<64x64xf32>
    %227 = arith.select %224, %222, %226 : vector<64x64xi1>, vector<64x64xf32>
    %228 = arith.truncf %227 : vector<64x64xf32> to vector<64x64xbf16>
    %229 = vector.shape_cast %228 : vector<64x64xbf16> to vector<8x8x64xbf16>
    %c1_174 = arith.constant 1 : index
    %c1_175 = arith.constant 1 : index
    %c0_176 = arith.constant 0 : index
    %230 = vector.load %arg6[%c1_174, %c1_175, %c0_176] : memref<10x10x128xbf16, #tpu.memory_space<vmem>>, vector<8x8x64xbf16>
    tpu.vector_store %arg6[%c1_174, %c1_175, %c0_176], %229 {strides = array<i32>} : memref<10x10x128xbf16, #tpu.memory_space<vmem>>, vector<8x8x64xbf16>,
    %c0_177 = arith.constant 0 : index
    %c0_178 = arith.constant 0 : index
    %c0_179 = arith.constant 0 : index
    %231 = vector.load %arg6[%c0_177, %c0_178, %c0_179] : memref<10x10x128xbf16, #tpu.memory_space<vmem>>, vector<10x8x64xbf16>
    %232 = vector.shape_cast %231 : vector<10x8x64xbf16> to vector<80x64xbf16>
    %c0_180 = arith.constant 0 : index
    %c1_181 = arith.constant 1 : index
    %c0_182 = arith.constant 0 : index
    %233 = vector.load %arg6[%c0_180, %c1_181, %c0_182] : memref<10x10x128xbf16, #tpu.memory_space<vmem>>, vector<10x8x64xbf16>
    %234 = vector.shape_cast %233 : vector<10x8x64xbf16> to vector<80x64xbf16>
    %c0_183 = arith.constant 0 : index
    %c2_184 = arith.constant 2 : index
    %c0_185 = arith.constant 0 : index
    %235 = vector.load %arg6[%c0_183, %c2_184, %c0_185] : memref<10x10x128xbf16, #tpu.memory_space<vmem>>, vector<10x8x64xbf16>
    %236 = vector.shape_cast %235 : vector<10x8x64xbf16> to vector<80x64xbf16>
    %237 = tpu.concatenate %232, %234, %236 in 1 : vector<80x64xbf16>, vector<80x64xbf16>, vector<80x64xbf16> -> vector<80x192xbf16>
    %238 = vector.extract_strided_slice %237 {offsets = [0, 0], sizes = [64, 192], strides = [1, 1]} : vector<80x192xbf16> to vector<64x192xbf16>
    %c5984 = arith.constant 5984 : index
    %c0_186 = arith.constant 0 : index
    %239 = vector.load %arg3[%c5984, %c0_186] : memref<7488x128xbf16, #tpu.memory_space<vmem>>, vector<192x64xbf16>
    %cst_187 = arith.constant dense<0.000000e+00> : vector<64x64xf32>
    %240 = tpu.matmul %238, %239, %cst_187 {dimension_numbers = #tpu.dot_dimension_numbers<[1], [0], [0], [1], [0, 0, 1, 1], [], []>} : vector<64x192xbf16>, vector<192x64xbf16>, vector<64x64xf32> -> vector<64x64xf32>
    %241 = vector.extract_strided_slice %237 {offsets = [8, 0], sizes = [64, 192], strides = [1, 1]} : vector<80x192xbf16> to vector<64x192xbf16>
    %c6176 = arith.constant 6176 : index
    %c0_188 = arith.constant 0 : index
    %242 = vector.load %arg3[%c6176, %c0_188] : memref<7488x128xbf16, #tpu.memory_space<vmem>>, vector<192x64xbf16>
    %cst_189 = arith.constant dense<0.000000e+00> : vector<64x64xf32>
    %243 = tpu.matmul %241, %242, %cst_189 {dimension_numbers = #tpu.dot_dimension_numbers<[1], [0], [0], [1], [0, 0, 1, 1], [], []>} : vector<64x192xbf16>, vector<192x64xbf16>, vector<64x64xf32> -> vector<64x64xf32>
    %244 = arith.addf %240, %243 : vector<64x64xf32>
    %245 = vector.extract_strided_slice %237 {offsets = [16, 0], sizes = [64, 192], strides = [1, 1]} : vector<80x192xbf16> to vector<64x192xbf16>
    %c6368 = arith.constant 6368 : index
    %c0_190 = arith.constant 0 : index
    %246 = vector.load %arg3[%c6368, %c0_190] : memref<7488x128xbf16, #tpu.memory_space<vmem>>, vector<192x64xbf16>
    %cst_191 = arith.constant dense<0.000000e+00> : vector<64x64xf32>
    %247 = tpu.matmul %245, %246, %cst_191 {dimension_numbers = #tpu.dot_dimension_numbers<[1], [0], [0], [1], [0, 0, 1, 1], [], []>} : vector<64x192xbf16>, vector<192x64xbf16>, vector<64x64xf32> -> vector<64x64xf32>
    %248 = arith.addf %244, %247 : vector<64x64xf32>
    %c9_192 = arith.constant 9 : index
    %c0_193 = arith.constant 0 : index
    %249 = vector.load %arg4[%c9_192, %c0_193] : memref<16x128xf32, #tpu.memory_space<vmem>>, vector<1x64xf32>
    %250 = vector.broadcast %249 : vector<1x64xf32> to vector<64x64xf32>
    %251 = arith.addf %248, %250 : vector<64x64xf32>
    %cst_194 = arith.constant 0.000000e+00 : f32
    %252 = vector.broadcast %cst_194 : f32 to vector<64x64xf32>
    %253 = arith.cmpf oge, %251, %252 : vector<64x64xf32>
    %cst_195 = arith.constant 0.00999999977 : f32
    %254 = vector.broadcast %cst_195 : f32 to vector<64x64xf32>
    %255 = arith.mulf %251, %254 : vector<64x64xf32>
    %256 = arith.select %253, %251, %255 : vector<64x64xi1>, vector<64x64xf32>
    %257 = arith.addf %256, %198 : vector<64x64xf32>
    %258 = arith.truncf %257 : vector<64x64xf32> to vector<64x64xbf16>
    %259 = vector.shape_cast %258 : vector<64x64xbf16> to vector<8x8x64xbf16>
    %c1_196 = arith.constant 1 : index
    %c1_197 = arith.constant 1 : index
    %c0_198 = arith.constant 0 : index
    %260 = vector.load %arg6[%c1_196, %c1_197, %c0_198] : memref<10x10x128xbf16, #tpu.memory_space<vmem>>, vector<8x8x64xbf16>
    tpu.vector_store %arg6[%c1_196, %c1_197, %c0_198], %259 {strides = array<i32>} : memref<10x10x128xbf16, #tpu.memory_space<vmem>>, vector<8x8x64xbf16>,
    %c0_199 = arith.constant 0 : index
    %c0_200 = arith.constant 0 : index
    %c0_201 = arith.constant 0 : index
    %261 = vector.load %arg6[%c0_199, %c0_200, %c0_201] : memref<10x10x128xbf16, #tpu.memory_space<vmem>>, vector<10x8x64xbf16>
    %262 = vector.shape_cast %261 : vector<10x8x64xbf16> to vector<80x64xbf16>
    %c0_202 = arith.constant 0 : index
    %c1_203 = arith.constant 1 : index
    %c0_204 = arith.constant 0 : index
    %263 = vector.load %arg6[%c0_202, %c1_203, %c0_204] : memref<10x10x128xbf16, #tpu.memory_space<vmem>>, vector<10x8x64xbf16>
    %264 = vector.shape_cast %263 : vector<10x8x64xbf16> to vector<80x64xbf16>
    %c0_205 = arith.constant 0 : index
    %c2_206 = arith.constant 2 : index
    %c0_207 = arith.constant 0 : index
    %265 = vector.load %arg6[%c0_205, %c2_206, %c0_207] : memref<10x10x128xbf16, #tpu.memory_space<vmem>>, vector<10x8x64xbf16>
    %266 = vector.shape_cast %265 : vector<10x8x64xbf16> to vector<80x64xbf16>
    %267 = tpu.concatenate %262, %264, %266 in 1 : vector<80x64xbf16>, vector<80x64xbf16>, vector<80x64xbf16> -> vector<80x192xbf16>
    %268 = vector.extract_strided_slice %267 {offsets = [0, 0], sizes = [64, 192], strides = [1, 1]} : vector<80x192xbf16> to vector<64x192xbf16>
    %c6560 = arith.constant 6560 : index
    %c0_208 = arith.constant 0 : index
    %269 = vector.load %arg3[%c6560, %c0_208] : memref<7488x128xbf16, #tpu.memory_space<vmem>>, vector<192x32xbf16>
    %cst_209 = arith.constant dense<0.000000e+00> : vector<64x32xf32>
    %270 = tpu.matmul %268, %269, %cst_209 {dimension_numbers = #tpu.dot_dimension_numbers<[1], [0], [0], [1], [0, 0, 1, 1], [], []>} : vector<64x192xbf16>, vector<192x32xbf16>, vector<64x32xf32> -> vector<64x32xf32>
    %271 = vector.extract_strided_slice %267 {offsets = [8, 0], sizes = [64, 192], strides = [1, 1]} : vector<80x192xbf16> to vector<64x192xbf16>
    %c6752 = arith.constant 6752 : index
    %c0_210 = arith.constant 0 : index
    %272 = vector.load %arg3[%c6752, %c0_210] : memref<7488x128xbf16, #tpu.memory_space<vmem>>, vector<192x32xbf16>
    %cst_211 = arith.constant dense<0.000000e+00> : vector<64x32xf32>
    %273 = tpu.matmul %271, %272, %cst_211 {dimension_numbers = #tpu.dot_dimension_numbers<[1], [0], [0], [1], [0, 0, 1, 1], [], []>} : vector<64x192xbf16>, vector<192x32xbf16>, vector<64x32xf32> -> vector<64x32xf32>
    %274 = arith.addf %270, %273 : vector<64x32xf32>
    %275 = vector.extract_strided_slice %267 {offsets = [16, 0], sizes = [64, 192], strides = [1, 1]} : vector<80x192xbf16> to vector<64x192xbf16>
    %c6944 = arith.constant 6944 : index
    %c0_212 = arith.constant 0 : index
    %276 = vector.load %arg3[%c6944, %c0_212] : memref<7488x128xbf16, #tpu.memory_space<vmem>>, vector<192x32xbf16>
    %cst_213 = arith.constant dense<0.000000e+00> : vector<64x32xf32>
    %277 = tpu.matmul %275, %276, %cst_213 {dimension_numbers = #tpu.dot_dimension_numbers<[1], [0], [0], [1], [0, 0, 1, 1], [], []>} : vector<64x192xbf16>, vector<192x32xbf16>, vector<64x32xf32> -> vector<64x32xf32>
    %278 = arith.addf %274, %277 : vector<64x32xf32>
    %c10 = arith.constant 10 : index
    %c0_214 = arith.constant 0 : index
    %279 = vector.load %arg4[%c10, %c0_214] : memref<16x128xf32, #tpu.memory_space<vmem>>, vector<1x32xf32>
    %280 = vector.broadcast %279 : vector<1x32xf32> to vector<64x32xf32>
    %281 = arith.addf %278, %280 : vector<64x32xf32>
    %cst_215 = arith.constant 0.000000e+00 : f32
    %282 = vector.broadcast %cst_215 : f32 to vector<64x32xf32>
    %283 = arith.cmpf oge, %281, %282 : vector<64x32xf32>
    %cst_216 = arith.constant 0.00999999977 : f32
    %284 = vector.broadcast %cst_216 : f32 to vector<64x32xf32>
    %285 = arith.mulf %281, %284 : vector<64x32xf32>
    %286 = arith.select %283, %281, %285 : vector<64x32xi1>, vector<64x32xf32>
    %287 = arith.truncf %286 : vector<64x32xf32> to vector<64x32xbf16>
    %288 = vector.shape_cast %287 : vector<64x32xbf16> to vector<8x8x32xbf16>
    %c1_217 = arith.constant 1 : index
    %c1_218 = arith.constant 1 : index
    %c0_219 = arith.constant 0 : index
    %289 = vector.load %arg6[%c1_217, %c1_218, %c0_219] : memref<10x10x128xbf16, #tpu.memory_space<vmem>>, vector<8x8x32xbf16>
    tpu.vector_store %arg6[%c1_217, %c1_218, %c0_219], %288 {strides = array<i32>} : memref<10x10x128xbf16, #tpu.memory_space<vmem>>, vector<8x8x32xbf16>,
    %c0_220 = arith.constant 0 : index
    %c0_221 = arith.constant 0 : index
    %c0_222 = arith.constant 0 : index
    %290 = vector.load %arg6[%c0_220, %c0_221, %c0_222] : memref<10x10x128xbf16, #tpu.memory_space<vmem>>, vector<10x8x32xbf16>
    %291 = vector.shape_cast %290 : vector<10x8x32xbf16> to vector<80x32xbf16>
    %c0_223 = arith.constant 0 : index
    %c1_224 = arith.constant 1 : index
    %c0_225 = arith.constant 0 : index
    %292 = vector.load %arg6[%c0_223, %c1_224, %c0_225] : memref<10x10x128xbf16, #tpu.memory_space<vmem>>, vector<10x8x32xbf16>
    %293 = vector.shape_cast %292 : vector<10x8x32xbf16> to vector<80x32xbf16>
    %c0_226 = arith.constant 0 : index
    %c2_227 = arith.constant 2 : index
    %c0_228 = arith.constant 0 : index
    %294 = vector.load %arg6[%c0_226, %c2_227, %c0_228] : memref<10x10x128xbf16, #tpu.memory_space<vmem>>, vector<10x8x32xbf16>
    %295 = vector.shape_cast %294 : vector<10x8x32xbf16> to vector<80x32xbf16>
    %296 = tpu.concatenate %291, %293, %295 in 1 : vector<80x32xbf16>, vector<80x32xbf16>, vector<80x32xbf16> -> vector<80x96xbf16>
    %297 = vector.extract_strided_slice %296 {offsets = [0, 0], sizes = [64, 96], strides = [1, 1]} : vector<80x96xbf16> to vector<64x96xbf16>
    %c7136 = arith.constant 7136 : index
    %c0_229 = arith.constant 0 : index
    %298 = vector.load %arg3[%c7136, %c0_229] : memref<7488x128xbf16, #tpu.memory_space<vmem>>, vector<96x32xbf16>
    %cst_230 = arith.constant dense<0.000000e+00> : vector<64x32xf32>
    %299 = tpu.matmul %297, %298, %cst_230 {dimension_numbers = #tpu.dot_dimension_numbers<[1], [0], [0], [1], [0, 0, 1, 1], [], []>} : vector<64x96xbf16>, vector<96x32xbf16>, vector<64x32xf32> -> vector<64x32xf32>
    %300 = vector.extract_strided_slice %296 {offsets = [8, 0], sizes = [64, 96], strides = [1, 1]} : vector<80x96xbf16> to vector<64x96xbf16>
    %c7232 = arith.constant 7232 : index
    %c0_231 = arith.constant 0 : index
    %301 = vector.load %arg3[%c7232, %c0_231] : memref<7488x128xbf16, #tpu.memory_space<vmem>>, vector<96x32xbf16>
    %cst_232 = arith.constant dense<0.000000e+00> : vector<64x32xf32>
    %302 = tpu.matmul %300, %301, %cst_232 {dimension_numbers = #tpu.dot_dimension_numbers<[1], [0], [0], [1], [0, 0, 1, 1], [], []>} : vector<64x96xbf16>, vector<96x32xbf16>, vector<64x32xf32> -> vector<64x32xf32>
    %303 = arith.addf %299, %302 : vector<64x32xf32>
    %304 = vector.extract_strided_slice %296 {offsets = [16, 0], sizes = [64, 96], strides = [1, 1]} : vector<80x96xbf16> to vector<64x96xbf16>
    %c7328 = arith.constant 7328 : index
    %c0_233 = arith.constant 0 : index
    %305 = vector.load %arg3[%c7328, %c0_233] : memref<7488x128xbf16, #tpu.memory_space<vmem>>, vector<96x32xbf16>
    %cst_234 = arith.constant dense<0.000000e+00> : vector<64x32xf32>
    %306 = tpu.matmul %304, %305, %cst_234 {dimension_numbers = #tpu.dot_dimension_numbers<[1], [0], [0], [1], [0, 0, 1, 1], [], []>} : vector<64x96xbf16>, vector<96x32xbf16>, vector<64x32xf32> -> vector<64x32xf32>
    %307 = arith.addf %303, %306 : vector<64x32xf32>
    %c11 = arith.constant 11 : index
    %c0_235 = arith.constant 0 : index
    %308 = vector.load %arg4[%c11, %c0_235] : memref<16x128xf32, #tpu.memory_space<vmem>>, vector<1x32xf32>
    %309 = vector.broadcast %308 : vector<1x32xf32> to vector<64x32xf32>
    %310 = arith.addf %307, %309 : vector<64x32xf32>
    %cst_236 = arith.constant 0.000000e+00 : f32
    %311 = vector.broadcast %cst_236 : f32 to vector<64x32xf32>
    %312 = arith.cmpf oge, %310, %311 : vector<64x32xf32>
    %cst_237 = arith.constant 0.00999999977 : f32
    %313 = vector.broadcast %cst_237 : f32 to vector<64x32xf32>
    %314 = arith.mulf %310, %313 : vector<64x32xf32>
    %315 = arith.select %312, %310, %314 : vector<64x32xi1>, vector<64x32xf32>
    %316 = arith.truncf %257 : vector<64x64xf32> to vector<64x64xbf16>
    %c7424 = arith.constant 7424 : index
    %c0_238 = arith.constant 0 : index
    %317 = vector.load %arg3[%c7424, %c0_238] : memref<7488x128xbf16, #tpu.memory_space<vmem>>, vector<64x32xbf16>
    %cst_239 = arith.constant dense<0.000000e+00> : vector<64x32xf32>
    %318 = tpu.matmul %316, %317, %cst_239 {dimension_numbers = #tpu.dot_dimension_numbers<[1], [0], [0], [1], [0, 0, 1, 1], [], []>} : vector<64x64xbf16>, vector<64x32xbf16>, vector<64x32xf32> -> vector<64x32xf32>
    %c12 = arith.constant 12 : index
    %c0_240 = arith.constant 0 : index
    %319 = vector.load %arg4[%c12, %c0_240] : memref<16x128xf32, #tpu.memory_space<vmem>>, vector<1x32xf32>
    %320 = vector.broadcast %319 : vector<1x32xf32> to vector<64x32xf32>
    %321 = arith.addf %318, %320 : vector<64x32xf32>
    %322 = arith.addf %315, %321 : vector<64x32xf32>
    %323 = arith.mulf %322, %9 : vector<64x32xf32>
    %324 = vector.extract_strided_slice %7 {offsets = [0, 96], sizes = [64, 32], strides = [1, 1]} : vector<64x128xf32> to vector<64x32xf32>
    %325 = arith.addf %323, %324 : vector<64x32xf32>
    %326 = vector.shape_cast %325 : vector<64x32xf32> to vector<1x8x8x32xf32>
    %c0_241 = arith.constant 0 : index
    %c0_242 = arith.constant 0 : index
    %c0_243 = arith.constant 0 : index
    %c0_244 = arith.constant 0 : index
    %327 = vector.load %arg5[%c0_241, %c0_242, %c0_243, %c0_244] : memref<1x8x8x32xf32, #tpu.memory_space<vmem>>, vector<1x8x8x32xf32>
    tpu.vector_store %arg5[%c0_241, %c0_242, %c0_243, %c0_244], %326 {strides = array<i32>} : memref<1x8x8x32xf32, #tpu.memory_space<vmem>>, vector<1x8x8x32xf32>,
    return
  }
  func.func @transform_0(%arg0: i32) -> (i32, i32, i32, i32) {
    %c0_i32 = arith.constant 0 : i32
    %c0_i32_0 = arith.constant 0 : i32
    %c0_i32_1 = arith.constant 0 : i32
    %c0_i32_2 = arith.constant 0 : i32
    return %arg0, %c0_i32, %c0_i32_0, %c0_i32_1 : i32, i32, i32, i32
  }
  func.func @transform_1(%arg0: i32) -> (i32, i32, i32, i32) {
    %c0_i32 = arith.constant 0 : i32
    %c0_i32_0 = arith.constant 0 : i32
    %c0_i32_1 = arith.constant 0 : i32
    %c0_i32_2 = arith.constant 0 : i32
    return %arg0, %c0_i32, %c0_i32_0, %c0_i32_1 : i32, i32, i32, i32
  }
  func.func @transform_2(%arg0: i32) -> (i32, i32) {
    %c0_i32 = arith.constant 0 : i32
    %c0_i32_0 = arith.constant 0 : i32
    %c0_i32_1 = arith.constant 0 : i32
    return %c0_i32, %c0_i32_0 : i32, i32
  }
  func.func @transform_3(%arg0: i32) -> (i32, i32) {
    %c0_i32 = arith.constant 0 : i32
    %c0_i32_0 = arith.constant 0 : i32
    %c0_i32_1 = arith.constant 0 : i32
    return %c0_i32, %c0_i32_0 : i32, i32
  }
  func.func @transform_4(%arg0: i32) -> (i32, i32, i32, i32) {
    %c0_i32 = arith.constant 0 : i32
    %c0_i32_0 = arith.constant 0 : i32
    %c0_i32_1 = arith.constant 0 : i32
    %c0_i32_2 = arith.constant 0 : i32
    return %arg0, %c0_i32, %c0_i32_0, %c0_i32_1 : i32, i32, i32, i32
  }
}

</mosaic_0001>

<bundles_post_ra>
// kernel: latent_rate_reduction_fwd.1
= control target key start
LH: loop header
LB: loop body
LE: loop exit
PB: predicated region body
PF: predicated region fallthrough
CT: control target
= control target key end

     0   :  { %9 = vsyncpa [#allocation4], 0  ;;  %s21343_s0 = inlined_call_operand.vmem [shape: f32[2,8,8,128], index: 0, kind: input, shape index: {}]   ;;  %s21344_s1 = inlined_call_operand.vmem [shape: f32[2,8,8,32], index: 1, kind: input, shape index: {}]   ;;  %s21345_s2 = inlined_call_operand.vmem [shape: bf16[7488,128], index: 2, kind: input, shape index: {}]   ;;  %s21346_s3 = inlined_call_operand.vmem [shape: f32[16,128], index: 3, kind: input, shape index: {}]   ;;  %s21347_s4 = inlined_call_operand.hbm [shape: f32[2,8,8,32], index: 4, kind: output, shape index: {}]  }
   0x1   :  { %11 = vsyncpa [#allocation4 + $0x1], 0  ;;  %s16214_s15 = smov 0   ;;  %s16216_s16 = smov 0  }
   0x2   :  { %s16218_s17 = smov 0   ;;  %s16220_s18 = smov 0  }
   0x3 LB: > { %s16235_s19 = sadd.s32 4294967295, %s16180_s18   ;;  %s13193_s20 = sadd.s32 4294967294, %s16180_s18   ;;  %s16180_s18 = sphi %s16220_s18, %s21375_s18   ;;  %s16176_s17 = sphi %s16218_s17, %s21374_s17   ;;  %s16172_s16 = sphi %s16216_s16, %s21373_s16   ;;  %s16168_s15 = sphi %s16214_s15, %s21372_s15  }
   0x4   : > { %s16239_s21 = sadd.s32 1, %s16180_s18   ;;  %s118_s22 = sadd.s32 1, %s16176_s17 }
   0x5   : > { %s115_s23 = ssub.s32 %s16180_s18, %s16239_s21  ;;  %p128_p0 = scmp.ne.s32.totalorder %s16176_s17, %s16172_s16 }
   0x6   : > { %p116_p1 = scmp.eq.s32.totalorder %s115_s23, 0  ;;  %p129_p2 = scmp.eq.s32.totalorder %s16235_s19, 1 }
   0x7   : > { %p134_p3 = scmp.ne.s32.totalorder %s16172_s16, %s16168_s15  ;;  %p135_p4 = scmp.eq.s32.totalorder %s13193_s20, 1 }
   0x8   : > { %s16250_s24 = scalar_select %p116_p1, %s16176_s17, %s118_s22  }
   0x9   : > { %p16252_p5 = por %p129_p2, %p128_p0  ;;  %p16256_p6 = por %p135_p4, %p134_p3 }
   0xa   : > { %p13196_p7 = scmp.ge.s32.totalorder %s16180_s18, 1  ;;  %p175_p8 = scmp.lt.s32.totalorder %s16180_s18, 3 }
   0xc   : > { %p176_p9 = pnand %p13196_p7, %p175_p8 }
   0xd   : > { %v15582_v0 = vld [vmem:[%s21345_s2 + $0x140] sm:$0xff] (!%p176_p9)   ;;  %v15584_v2 = vld [vmem:[%s21345_s2 + $0x148] sm:$0xff] (!%p176_p9)   ;;  %v16182_v3 = vmov (!%p176_p9), 0   ;;  %v15587_v6 = vld [vmem:[%s21345_s2 + $0x150] sm:$0xff] (!%p176_p9)   ;;  %p206_p10 = scmp.lt.s32.totalorder (!%p176_p9), %s16235_s19, 1  ;;  %vm222_vm0 = vcmask (!%p176_p9), 1040384  }
   0xe   : > { %179 = sbr.rel (%p176_p9) target bundleno = 4435 (0x1153), region = 36  ;;  %v15583_v1 = vld [vmem:[%s21345_s2 + $0x100] sm:$0xff] (!%p176_p9)   ;;  %14985 = vmatprep.subr.bf16.mxu1 (!%p176_p9), %v15582_v0  ;;  %217 = vst [vmem:[#allocation2] sm:$0xf] (!%p176_p9), %v16182_v3  ;;  %218 = vst [vmem:[#allocation2 + $0x4] sm:$0x1] (!%p176_p9), %v16182_v3 }
   0xf   : > { %220 = vst [vmem:[#allocation2 + $0x48] sm:$0xf] (!%p176_p9), %v16182_v3  ;;  %221 = vst [vmem:[#allocation2 + $0x4c] sm:$0x1] (!%p176_p9), %v16182_v3  ;;  %14986 = vmatpush3.bf16.msra.mxu1 (!%p176_p9), %v15582_v0  ;;  %14217 = vmatprep.subr.bf16.mxu0 (!%p176_p9), %v15583_v1  ;;  %v15585_v4 = vld [vmem:[%s21345_s2 + $0xc0] sm:$0xff] (!%p176_p9)   ;;  %v15586_v5 = vld [vmem:[%s21345_s2 + $0x108] sm:$0xff] (!%p176_p9)  }
  0x10   : > { %14987 = vmatprep.subr.bf16.mxu1 (!%p176_p9), %v15584_v2  ;;  %14218 = vmatpush3.bf16.msra.mxu0 (!%p176_p9), %v15585_v4  ;;  %v15588_v7 = vld [vmem:[%s21345_s2 + $0xc8] sm:$0xff] (!%p176_p9)   ;;  %v15589_v8 = vld [vmem:[%s21345_s2 + $0x110] sm:$0xff] (!%p176_p9)   ;;  %v15590_v9 = vld [vmem:[%s21345_s2 + $0x158] sm:$0xff] (!%p176_p9)   ;;  %vm223_vm1 = vsmask.f32 (!%p176_p9), 256  ;;  %vm408_vm5 = vcmask (!%p176_p9), 1043456  }
  0x11   : > { %14219 = vmatprep.subr.bf16.mxu0 (!%p176_p9), %v15586_v5  ;;  %v15591_v10 = vld [vmem:[%s21345_s2 + $0xd0] sm:$0xff] (!%p176_p9)   ;;  %v15592_v11 = vld [vmem:[%s21345_s2 + $0x118] sm:$0xff] (!%p176_p9)   ;;  %v15593_v12 = vld [vmem:[%s21345_s2 + $0x160] sm:$0xff] (!%p176_p9)   ;;  %vm255_vm3 = vsmask.f32 (!%p176_p9), 7938  ;;  %vm651_vm6 = vcmask (!%p176_p9), 1042432  }
  0x12   : > { %v15594_v13 = vld [vmem:[%s21345_s2 + $0xd8] sm:$0xff] (!%p176_p9)   ;;  %v15595_v14 = vld [vmem:[%s21345_s2 + $0x120] sm:$0xff] (!%p176_p9)   ;;  %v15596_v15 = vld [vmem:[%s21345_s2 + $0x168] sm:$0xff] (!%p176_p9)   ;;  %vm652_vm8 = vcmask (!%p176_p9), 1046532   ;;  %vm478_vm10 = vsmask.f32 (!%p176_p9), 3328 }
  0x13   : > { %14988 = vmatpush3.bf16.msra.mxu1 (!%p176_p9), %v15584_v2  ;;  %v15597_v16 = vld [vmem:[%s21345_s2 + $0xe0] sm:$0xff] (!%p176_p9)   ;;  %v15598_v17 = vld [vmem:[%s21345_s2 + $0x128] sm:$0xff] (!%p176_p9)   ;;  %v15599_v18 = vld [vmem:[%s21345_s2 + $0x170] sm:$0xff] (!%p176_p9)   ;;  %vm479_vm11 = vsmask.f32 (!%p176_p9), 7440  ;;  %vm1918_vm13 = vcmask (!%p176_p9), 781312  }
  0x14   : > { %14989 = vmatprep.subr.bf16.mxu1 (!%p176_p9), %v15587_v6  ;;  %14220 = vmatpush3.bf16.msra.mxu0 (!%p176_p9), %v15588_v7  ;;  %v15600_v19 = vld [vmem:[%s21345_s2 + $0xe8] sm:$0xff] (!%p176_p9)   ;;  %v15601_v20 = vld [vmem:[%s21345_s2 + $0x130] sm:$0xff] (!%p176_p9)   ;;  %v15602_v21 = vld [vmem:[%s21345_s2 + $0x178] sm:$0xff] (!%p176_p9)   ;;  %vm1923_vm14 = vcmask (!%p176_p9), 778240   ;;  %s16183_s28 = smov (!%p176_p9), 64   ;;  %s16184_s5 = smov (!%p176_p9), 96  }
  0x15   : > { %14221 = vmatprep.subr.bf16.mxu0 %v15589_v8  ;;  %s16310_s12 = scalar_select %p206_p10, %s16235_s19, 1  ;;  %v15603_v22 = vld [vmem:[%s21345_s2 + $0xf0] sm:$0xff]   ;;  %v228_v23 = vld [vmem:[#allocation2 + $0x8] sm:$0x1]  ;;  %v15604_v25 = vld [vmem:[%s21345_s2 + $0x138] sm:$0xff]  }
  0x16   : > { %v231_v24 = vld [vmem:[#allocation2 + $0x10] sm:$0x1]  ;;  %vm16349_vm2 = vmand %vm222_vm0, %vm223_vm1  ;;  %v234_v27 = vld [vmem:[#allocation2 + $0x18] sm:$0x1]  ;;  %s16185_s11 = smov 32   ;;  %s203_s29 = sand.u32 1, %s16172_s16  }
  0x17   : > { %14990 = vmatpush3.bf16.msra.mxu1 %v15587_v6  ;;  %s14134_s30 = sshll.u32 %s16310_s12, 6  ;;  %v257_v28 = vld [vmem:[#allocation2 + $0x4] sm:$0x1]  ;;  %v229_v29 = vsel %vm16349_vm2, 0, %v228_v23  ;;  %v232_v30 = vsel %vm16349_vm2, 0, %v231_v24  ;;  %v235_v31 = vsel %vm16349_vm2, 0, %v234_v27  ;;  %vm16361_vm4 = vmand %vm222_vm0, %vm255_vm3 }
  0x18   : > { %14991 = vmatprep.subr.bf16.mxu1 %v15590_v9  ;;  %14222 = vmatpush3.bf16.msra.mxu0 %v15591_v10  ;;  %s16339_s14 = scalar_lea.vmem %s21343_s0, %s14134_s30  ;;  %v260_v33 = vld [vmem:[#allocation2 + $0xc] sm:$0x1]  ;;  %230 = vst [vmem:[#allocation2 + $0x8] sm:$0x1] %v229_v29  ;;  %233 = vst [vmem:[#allocation2 + $0x10] sm:$0x1] %v232_v30  ;;  %s21244_s27 = scalar_lea.vmem %s21344_s1, %s14134_s30 }
  0x19   : > { %14223 = vmatprep.subr.bf16.mxu0 %v15592_v11  ;;  %v287_v34 = vld [vmem:[%s16339_s14] sm:$0xff]  ;;  %236 = vst [vmem:[#allocation2 + $0x18] sm:$0x1] %v235_v31  ;;  %v258_v35 = vsel %vm16361_vm4, 0, %v257_v28  ;;  %v261_v36 = vsel %vm16361_vm4, 0, %v260_v33  ;;  %v288_v42 = vld [vmem:[%s16339_s14 + $0x8] sm:$0xff]  ;;  %vm16386_vm7 = vmand %vm408_vm5, %vm255_vm3 }
  0x1a   : > { %v263_v37 = vld [vmem:[#allocation2 + $0x14] sm:$0x1]  ;;  %v266_v38 = vld [vmem:[#allocation2 + $0x1c] sm:$0x1]  ;;  %v14136_v39 = vpack.c.bf16 %v287_v34, %v287_v34  ;;  %259 = vst [vmem:[#allocation2 + $0x4] sm:$0x1] %v258_v35  ;;  %v14137_v44 = vpack.c.bf16 %v288_v42, %v288_v42  ;;  %vm16420_vm9 = vmor %vm651_vm6, %vm652_vm8 }
  0x1b   : > { %14992 = vmatpush3.bf16.msra.mxu1 %v15590_v9  ;;  %262 = vst [vmem:[#allocation2 + $0xc] sm:$0x1] %v261_v36  ;;  %v264_v40 = vsel %vm16361_vm4, 0, %v263_v37  ;;  %v267_v41 = vsel %vm16361_vm4, 0, %v266_v38  ;;  %v289_v43 = vld [vmem:[%s16339_s14 + $0x10] sm:$0xff]  ;;  %v16379_v48 = vld [vmem:[%s21345_s2 + $0x80] sm:$0xff]   ;;  %vm16454_vm12 = vmor %vm478_vm10, %vm479_vm11 }
  0x1c   : > { %14993 = vmatprep.subr.bf16.mxu1 %v15593_v12  ;;  %14224 = vmatpush3.bf16.msra.mxu0 %v15594_v13  ;;  %265 = vst [vmem:[#allocation2 + $0x14] sm:$0x1] %v264_v40  ;;  %268 = vst [vmem:[#allocation2 + $0x1c] sm:$0x1] %v267_v41  ;;  %v14138_v45 = vpack.c.bf16 %v289_v43, %v289_v43  ;;  %v328_v46 = vshrl.u32 %v14136_v39, 16  ;;  %v331_v47 = vshll.u32 %v14136_v39, 16 }
  0x1d   : > { %14225 = vmatprep.subr.bf16.mxu0 %v15595_v14  ;;  %v336_v50 = vshrl.u32 %v14137_v44, 16  ;;  %v339_v51 = vshll.u32 %v14137_v44, 16  ;;  %v15606_v54 = vld [vmem:[%s21345_s2 + $0xf8] sm:$0xff]   ;;  %v237_v60 = vld [vmem:[#allocation2 + $0x20] sm:$0x1]  ;;  %v15624_v32 = vld [vmem:[%s21345_s2 + $0xa8] sm:$0xff]  }
  0x1e   : > { %v330_v49 = vrot.slane %v328_v46, 7  ;;  %v344_v52 = vshrl.u32 %v14138_v45, 16  ;;  %v347_v53 = vshll.u32 %v14138_v45, 16  ;;  %v290_v61 = vld [vmem:[%s16339_s14 + $0x18] sm:$0xff]  ;;  %v621_v8 = vld [vmem:[#allocation2] sm:$0xe] }
  0x1f   : > { %14994 = vmatpush3.bf16.msra.mxu1 %v15593_v12  ;;  %v338_v57 = vrot.slane %v336_v50, 7  ;;  %v410_v62 = vld [vmem:[#allocation2 + $0x8] sm:$0xf]  ;;  %v416_v63 = vld [vmem:[#allocation2 + $0x10] sm:$0xf]  ;;  %v14139_v1 = vpack.c.bf16 %v290_v61, %v290_v61  ;;  %v15609_v28 = vld [vmem:[%s21345_s2 + $0x40] sm:$0xff]  }
  0x20   : > { %14995 = vmatprep.subr.bf16.mxu1 %v15596_v15  ;;  %14226 = vmatpush3.bf16.msra.mxu0 %v15597_v16  ;;  %v333_v55 = vor.u32 %v331_v47, %v330_v49  ;;  %v334_v56 = vrot.slane %v330_v49, 4  ;;  %v346_v58 = vrot.slane %v344_v52, 7  ;;  %v422_v0 = vld [vmem:[#allocation2 + $0x18] sm:$0xf]  ;;  %v240_v9 = vld [vmem:[#allocation2 + $0x28] sm:$0x1] }
  0x21   : > { %14227 = vmatprep.subr.bf16.mxu0 %v15598_v17  ;;  %v341_v2 = vor.u32 %v339_v51, %v338_v57  ;;  %v342_v4 = vrot.slane %v338_v57, 4  ;;  %v468_v14 = vld [vmem:[#allocation2 + $0x4] sm:$0x1]  ;;  %v241_v23 = vsel %vm16349_vm2, 0, %v240_v9  ;;  %v225_v27 = vld [vmem:[#allocation2] sm:$0x1] }
  0x22   : > { %v349_v5 = vor.u32 %v347_v53, %v346_v58  ;;  %v350_v6 = vrot.slane %v346_v58, 4  ;;  %v413_v7 = vld [vmem:[#allocation2 + $0xc] sm:$0x1]  ;;  %v411_v10 = vsel %vm16386_vm7, %v333_v55, %v410_v62  ;;  %242 = vst [vmem:[#allocation2 + $0x28] sm:$0x1] %v241_v23  ;;  %v352_v30 = vshrl.u32 %v14139_v1, 16 }
  0x23   : > { %14996 = vmatpush3.bf16.msra.mxu1 %v15596_v15  ;;  %v414_v11 = vsel %vm16349_vm2, %v334_v56, %v413_v7  ;;  %v419_v12 = vld [vmem:[#allocation2 + $0x14] sm:$0x1]  ;;  %v425_v13 = vld [vmem:[#allocation2 + $0x1c] sm:$0x1]  ;;  %v238_v15 = vsel %vm16349_vm2, 0, %v237_v60  ;;  %v417_v16 = vsel %vm16386_vm7, %v341_v2, %v416_v63  ;;  %v355_v31 = vshll.u32 %v14139_v1, 16 }
  0x24   : > { %14997 = vmatprep.subr.bf16.mxu1 %v15599_v18  ;;  %14228 = vmatpush3.bf16.msra.mxu0 %v15600_v19  ;;  %412 = vst [vmem:[#allocation2 + $0x8] sm:$0xf] %v411_v10  ;;  %415 = vst [vmem:[#allocation2 + $0xc] sm:$0x1] %v414_v11  ;;  %v420_v17 = vsel %vm16349_vm2, %v342_v4, %v419_v12  ;;  %v426_v19 = vsel %vm16349_vm2, %v350_v6, %v425_v13  ;;  %v226_v33 = vsel %vm16349_vm2, 0, %v225_v27  ;;  %v16113_v40 = vld [vmem:[%s16339_s14 + $0x18] sm:$0xff] }
  0x25   : > { %14229 = vmatprep.subr.bf16.mxu0 %v15601_v20  ;;  %239 = vst [vmem:[#allocation2 + $0x20] sm:$0x1] %v238_v15  ;;  %v269_v20 = vld [vmem:[#allocation2 + $0x24] sm:$0x1]  ;;  %418 = vst [vmem:[#allocation2 + $0x10] sm:$0xf] %v417_v16 }
  0x26   : > { %421 = vst [vmem:[#allocation2 + $0x14] sm:$0x1] %v420_v17  ;;  %427 = vst [vmem:[#allocation2 + $0x1c] sm:$0x1] %v426_v19  ;;  %v270_v24 = vsel %vm16361_vm4, 0, %v269_v20  ;;  %v13210_v34 = vrot.slane %v621_v8, 9 }
  0x27   : > { %14998 = vmatpush3.bf16.msra.mxu1 %v15599_v18  ;;  %v423_v18 = vsel %vm16386_vm7, %v349_v5, %v422_v0  ;;  %271 = vst [vmem:[#allocation2 + $0x24] sm:$0x1] %v270_v24  ;;  %227 = vst [vmem:[#allocation2] sm:$0x1] %v226_v33  ;;  %v491_v35 = vshll.u32 %v468_v14, 16  ;;  %v656_v36 = vrot.slane %v468_v14, 5 }
  0x28   : > { %14999 = vmatprep.subr.bf16.mxu1 %v15602_v21  ;;  %14230 = vmatpush3.bf16.msra.mxu0 %v15603_v22  ;;  %v291_v22 = vld [vmem:[%s16339_s14 + $0x20] sm:$0xff]  ;;  %424 = vst [vmem:[#allocation2 + $0x18] sm:$0xf] %v423_v18  ;;  %v354_v37 = vrot.slane %v352_v30, 7  ;;  %s13197_s12 = sshll.u32 %s203_s29, 6  ;;  %s16186_s9 = smov [#allocation3]  }
  0x29   : > { %14231 = vmatprep.subr.bf16.mxu0 %v15604_v25  ;;  %v14140_v29 = vpack.c.bf16 %v291_v22, %v291_v22  ;;  %v16424_v41 = vrot.slane %v491_v35, 5  ;;  %v657_v52 = vsel %vm16420_vm9, %v13210_v34, %v656_v36  ;;  %v434_v6 = vld [vmem:[#allocation2 + $0x28] sm:$0xf]  ;;  %s21263_s30 = scalar_lea.vmem [#allocation3], %s13197_s12  ;;  %s16122_s10 = sshll.u32 %s16186_s9, 4  ;;  %s16123_s10 = int_to_ptr.vmem [resolvable:$false] %s16122_s10 }
  0x2a   : > { %v357_v42 = vor.u32 %v355_v31, %v354_v37  ;;  %v358_v43 = vrot.slane %v354_v37, 4 }
  0x2b   : > { %15000 = vmatpush3.bf16.msra.mxu1 %v15602_v21  ;;  %v272_v21 = vld [vmem:[#allocation2 + $0x2c] sm:$0x1]  ;;  %v360_v38 = vshrl.u32 %v14140_v29, 16  ;;  %v363_v39 = vshll.u32 %v14140_v29, 16  ;;  %v622_v46 = vld [vmem:[#allocation2 + $0x8] sm:$0xe] }
  0x2c   : > { %15009 = vmatprep.subr.bf16.mxu1 %v16379_v48  ;;  %14232 = vmatpush3.bf16.msra.mxu0 %v15606_v54  ;;  %v273_v25 = vsel %vm16361_vm4, 0, %v272_v21  ;;  %v469_v45 = vld [vmem:[#allocation2 + $0xc] sm:$0x1]  ;;  %v428_v47 = vld [vmem:[#allocation2 + $0x20] sm:$0xf]  ;;  %v13211_v56 = vrot.slane %v622_v46, 9 }
  0x2d   : > { %274 = vst [vmem:[#allocation2 + $0x2c] sm:$0x1] %v273_v25  ;;  %14269 = vmatprep.subr.bf16.mxu0 %v15609_v28  ;;  %v362_v44 = vrot.slane %v360_v38, 7  ;;  %v470_v49 = vld [vmem:[#allocation2 + $0x14] sm:$0x1]  ;;  %v429_v54 = vsel %vm16386_vm7, %v357_v42, %v428_v47  ;;  %v660_v57 = vrot.slane %v469_v45, 5 }
  0x2e   : > { %v16426_v50 = vld [vmem:[#allocation2 + $0x1c] sm:$0x1]  ;;  %v623_v51 = vld [vmem:[#allocation2 + $0x10] sm:$0xe]  ;;  %v664_v60 = vrot.slane %v470_v49, 5  ;;  %v505_v1 = vshll.u32 %v469_v45, 16 }
  0x2f   : > { %v365_v53 = vor.u32 %v363_v39, %v362_v44  ;;  %v624_v55 = vld [vmem:[#allocation2 + $0x18] sm:$0xe]  ;;  %v13212_v58 = vrot.slane %v623_v51, 9  ;;  %430 = vst [vmem:[#allocation2 + $0x20] sm:$0xf] %v429_v54  ;;  %v668_v62 = vrot.slane %v16426_v50, 5  ;;  %v661_v2 = vsel %vm16420_vm9, %v13211_v56, %v660_v57 }
  0x30   : > { %v13213_v61 = vrot.slane %v624_v55, 9  ;;  %v366_v63 = vrot.slane %v362_v44, 4  ;;  %v431_v0 = vld [vmem:[#allocation2 + $0x24] sm:$0x1]  ;;  %v458_v8 = vld [vmem:[#allocation2] sm:$0xf]  ;;  %v16441_v10 = vcombine.low %v657_v52, %v661_v2 }
  0x31   : > { %v665_v4 = vsel %vm16420_vm9, %v13212_v58, %v664_v60  ;;  %v432_v5 = vsel %vm16349_vm2, %v358_v43, %v431_v0  ;;  %v435_v11 = vsel %vm16386_vm7, %v365_v53, %v434_v6  ;;  %v459_v13 = vld [vmem:[#allocation2 + $0x8] sm:$0xf]  ;;  %v460_v14 = vld [vmem:[#allocation2 + $0x10] sm:$0xf]  ;;  %v461_v15 = vld [vmem:[#allocation2 + $0x18] sm:$0xf] }
  0x32   : > { %v669_v9 = vsel %vm16420_vm9, %v13213_v61, %v668_v62  ;;  %433 = vst [vmem:[#allocation2 + $0x24] sm:$0x1] %v432_v5  ;;  %436 = vst [vmem:[#allocation2 + $0x28] sm:$0xf] %v435_v11  ;;  %v482_v17 = vshrl.u32 %v458_v8, 16  ;;  %v485_v18 = vshll.u32 %v458_v8, 16  ;;  %v16459_v52 = vcombine.low %v458_v8, %v459_v13 }
  0x33   : > { %v16447_v16 = vcombine.low %v665_v4, %v669_v9  ;;  %v496_v19 = vshrl.u32 %v459_v13, 16  ;;  %v866_v20 = vrot.slane %v16441_v10, 4  ;;  %v499_v21 = vshll.u32 %v459_v13, 16 }
  0x34   : > { %v437_v7 = vld [vmem:[#allocation2 + $0x2c] sm:$0x1]  ;;  %v507_v22 = vrot.slane %v505_v1, 5  ;;  %v510_v23 = vshrl.u32 %v460_v14, 16  ;;  %v484_v25 = vrot.slane %v482_v17, 4  ;;  %v487_v27 = vrot.slane %v485_v18, 5 }
  0x35   : > { %v438_v12 = vsel %vm16349_vm2, %v366_v63, %v437_v7  ;;  %v867_v24 = vrot.slane %v16447_v16, 4  ;;  %v498_v28 = vrot.slane %v496_v19, 4  ;;  %v501_v30 = vrot.slane %v499_v21, 5 }
  0x36   : > { %439 = vst [vmem:[#allocation2 + $0x2c] sm:$0x1] %v438_v12  ;;  %v625_v29 = vld [vmem:[#allocation2 + $0x20] sm:$0xe]  ;;  %v512_v31 = vrot.slane %v510_v23, 4  ;;  %v513_v33 = vshll.u32 %v460_v14, 16  ;;  %v488_v37 = vor.u32 %v487_v27, %v484_v25  ;;  %v16461_v60 = vcombine.low %v460_v14, %v461_v15 }
  0x37   : > { %v519_v34 = vshll.u32 %v470_v49, 16  ;;  %v868_v35 = vsel %vm408_vm5, %v866_v20, %v867_v24  ;;  %v13214_v36 = vrot.slane %v625_v29, 9  ;;  %v524_v38 = vshrl.u32 %v461_v15, 16  ;;  %v462_v53 = vld [vmem:[#allocation2 + $0x20] sm:$0xf]  ;;  %v15610_v23 = vld [vmem:[%s21345_s2 + $0x88] sm:$0xff]  }
  0x38   : > { %15001 = vmatprep.mubr.bf16.mxu1 %v868_v35  ;;  %v502_v42 = vor.u32 %v501_v30, %v498_v28  ;;  %v515_v43 = vrot.slane %v513_v33, 5  ;;  %v527_v45 = vshll.u32 %v461_v15, 16  ;;  %v489_v47 = vrot.slane %v488_v37, 4  ;;  %v15611_v35 = vld [vmem:[%s21345_s2] sm:$0xff]  }
  0x39   : > { %v521_v44 = vrot.slane %v519_v34, 5  ;;  %v472_v46 = vld [vmem:[#allocation2 + $0x24] sm:$0x1]  ;;  %v526_v51 = vrot.slane %v524_v38, 4  ;;  %v533_v49 = vshll.u32 %v16426_v50, 16  ;;  %v860_v11 = vrot.slane %v16459_v52, 4 }
  0x3a   : > { %v626_v55 = vld [vmem:[#allocation2 + $0x28] sm:$0xe]  ;;  %v672_v56 = vrot.slane %v472_v46, 5  ;;  %v503_v57 = vrot.slane %v502_v42, 4  ;;  %v516_v58 = vor.u32 %v515_v43, %v512_v31  ;;  %v494_v63 = vsel %vm16454_vm12, %v489_v47, %v16424_v41  ;;  %v243_v38 = vld [vmem:[#allocation2 + $0x30] sm:$0x1] }
  0x3b   : > { %v13215_v61 = vrot.slane %v626_v55, 9  ;;  %v529_v0 = vrot.slane %v527_v45, 5  ;;  %v463_v1 = vld [vmem:[#allocation2 + $0x28] sm:$0xf]  ;;  %v535_v7 = vrot.slane %v533_v49, 5  ;;  %v538_v12 = vshrl.u32 %v462_v53, 16 }
  0x3c   : > { %v673_v50 = vsel %vm16420_vm9, %v13214_v36, %v672_v56  ;;  %v508_v2 = vsel %vm16454_vm12, %v503_v57, %v507_v22  ;;  %v517_v4 = vrot.slane %v516_v58, 4  ;;  %v861_v14 = vrot.slane %v16461_v60, 4  ;;  %v246_v42 = vld [vmem:[#allocation2 + $0x38] sm:$0x1]  ;;  %v292_v43 = vld [vmem:[%s16339_s14 + $0x28] sm:$0xff]  ;;  %v293_v57 = vld [vmem:[%s16339_s14 + $0x30] sm:$0xff] }
  0x3d   : > { %v473_v54 = vld [vmem:[#allocation2 + $0x2c] sm:$0x1]  ;;  %v530_v6 = vor.u32 %v529_v0, %v526_v51  ;;  %v16472_v8 = vcombine.low %v494_v63, %v508_v2  ;;  %v541_v15 = vshll.u32 %v462_v53, 16  ;;  %v547_v17 = vshll.u32 %v472_v46, 16  ;;  %v275_v51 = vld [vmem:[#allocation2 + $0x34] sm:$0x1] }
  0x3e   : > { %v676_v62 = vrot.slane %v473_v54, 5  ;;  %v522_v41 = vsel %vm16454_vm12, %v517_v4, %v521_v44  ;;  %v540_v20 = vrot.slane %v538_v12, 4  ;;  %v552_v21 = vshrl.u32 %v463_v1, 16  ;;  %v15613_v44 = vld [vmem:[%s21345_s2 + $0x90] sm:$0xff]   ;;  %v278_v56 = vld [vmem:[#allocation2 + $0x3c] sm:$0x1] }
  0x3f   : > { %v531_v13 = vrot.slane %v530_v6, 4  ;;  %v863_v19 = vrot.slane %v16472_v8, 4  ;;  %v543_v25 = vrot.slane %v541_v15, 5  ;;  %v549_v27 = vrot.slane %v547_v17, 5  ;;  %v15612_v58 = vld [vmem:[%s21345_s2 + $0x48] sm:$0xff]  }
  0x40   : > { %v677_v5 = vsel %vm16420_vm9, %v13215_v61, %v676_v62  ;;  %v555_v28 = vshll.u32 %v463_v1, 16  ;;  %v554_v31 = vrot.slane %v552_v21, 4  ;;  %v561_v33 = vshll.u32 %v473_v54, 16  ;;  %v15614_v0 = vld [vmem:[%s21345_s2 + $0x8] sm:$0xff]   ;;  %v249_v21 = vld [vmem:[#allocation2 + $0x40] sm:$0x1] }
  0x41   : > { %v16474_v9 = vcombine.low %v673_v50, %v677_v5  ;;  %v536_v22 = vsel %vm16454_vm12, %v531_v13, %v535_v7  ;;  %v862_v34 = vsel %vm408_vm5, %v860_v11, %v861_v14  ;;  %v544_v36 = vor.u32 %v543_v25, %v540_v20  ;;  %v15617_v11 = vld [vmem:[%s21345_s2 + $0x98] sm:$0xff]   ;;  %v15616_v13 = vld [vmem:[%s21345_s2 + $0x50] sm:$0xff]   ;;  %v15620_v20 = vld [vmem:[%s21345_s2 + $0xa0] sm:$0xff]  }
  0x42   : > { %v16490_v30 = vcombine.low %v522_v41, %v536_v22  ;;  %v557_v37 = vrot.slane %v555_v28, 5  ;;  %v16504_v45 = vcombine.low %v462_v53, %v463_v1  ;;  %v244_v46 = vsel %vm16349_vm2, 0, %v243_v38 }
  0x43   : > { %v873_v18 = vrot.slane %v16474_v9, 4  ;;  %v247_v47 = vsel %vm16349_vm2, 0, %v246_v42  ;;  %v545_v49 = vrot.slane %v544_v36, 4  ;;  %v563_v55 = vrot.slane %v561_v33, 5  ;;  %245 = vst [vmem:[#allocation2 + $0x30] sm:$0x1] %v244_v46 }
  0x44   : > { %v558_v54 = vor.u32 %v557_v37, %v554_v31  ;;  %248 = vst [vmem:[#allocation2 + $0x38] sm:$0x1] %v247_v47  ;;  %v279_v61 = vsel %vm16361_vm4, 0, %v278_v56  ;;  %v14141_v62 = vpack.c.bf16 %v292_v43, %v292_v43  ;;  %v14142_v63 = vpack.c.bf16 %v293_v57, %v293_v57  ;;  %v281_v37 = vld [vmem:[#allocation2 + $0x44] sm:$0x1]  ;;  %v294_v47 = vld [vmem:[%s16339_s14 + $0x38] sm:$0xff] }
  0x45   : > { %v874_v29 = vsel %vm408_vm5, %v867_v24, %v873_v18  ;;  %v864_v24 = vrot.slane %v16490_v30, 4  ;;  %v550_v1 = vsel %vm16454_vm12, %v545_v49, %v549_v27  ;;  %280 = vst [vmem:[#allocation2 + $0x3c] sm:$0x1] %v279_v61  ;;  %v869_v41 = vrot.slane %v16504_v45, 4  ;;  %v284_v46 = vld [vmem:[#allocation2 + $0x4c] sm:$0x1] }
  0x46   : > { %15002 = vmatmul.mubr.bf16.vlgmr.msra.gmra.mrb[0].mxu1 %v874_v29  ;;  %v559_v50 = vrot.slane %v558_v54, 4  ;;  %v368_v2 = vshrl.u32 %v14141_v62, 16  ;;  %v371_v4 = vshll.u32 %v14141_v62, 16  ;;  %v376_v5 = vshrl.u32 %v14142_v63, 16  ;;  %v16574_v56 = vld [vmem:[#allocation2 + $0x48] sm:$0xe] }
  0x47   : > { %15010 = vmatpush3.bf16.msra.mxu1 %v16379_v48  ;;  %v276_v48 = vsel %vm16361_vm4, 0, %v275_v51  ;;  %v865_v53 = vsel %vm408_vm5, %v863_v19, %v864_v24  ;;  %v379_v6 = vshll.u32 %v14142_v63, 16  ;;  %v15618_v19 = vld [vmem:[%s21345_s2 + $0x10] sm:$0xff]   ;;  %v870_v33 = vsel %vm408_vm5, %v861_v14, %v869_v41  ;;  %v15621_v51 = vld [vmem:[%s21345_s2 + $0x18] sm:$0xff]   ;;  %v252_v57 = vld [vmem:[#allocation2 + $0x48] sm:$0x1] }
  0x48   : > { %15011 = vmatprep.subr.bf16.mxu1 %v15610_v23  ;;  %277 = vst [vmem:[#allocation2 + $0x34] sm:$0x1] %v276_v48  ;;  %1075 = vmatprep.mubr.bf16.mxu0 %v865_v53  ;;  %v564_v7 = vsel %vm16454_vm12, %v559_v50, %v563_v55  ;;  %v370_v15 = vrot.slane %v368_v2, 7  ;;  %v378_v17 = vrot.slane %v376_v5, 7  ;;  %v250_v36 = vsel %vm16349_vm2, 0, %v249_v21  ;;  %v15623_v48 = vld [vmem:[%s21345_s2 + $0x60] sm:$0xff]  }
  0x49   : > { %1076 = vmatmul.mubr.bf16.vlgmr.msra.gmra.mrb[0].mxu0 %v862_v34  ;;  %v16530_v12 = vcombine.low %v550_v1, %v564_v7  ;;  %251 = vst [vmem:[#allocation2 + $0x40] sm:$0x1] %v250_v36  ;;  %v282_v49 = vsel %vm16361_vm4, 0, %v281_v37  ;;  %v285_v54 = vsel %vm16361_vm4, 0, %v284_v46  ;;  %v14143_v55 = vpack.c.bf16 %v294_v47, %v294_v47  ;;  %v15625_v62 = vld [vmem:[%s21345_s2 + $0x20] sm:$0xff]   ;;  %v15627_v1 = vld [vmem:[%s21345_s2 + $0xb0] sm:$0xff]   ;;  %vm16839_vm4 = vmand %vm1923_vm14, %vm223_vm1 }
  0x4a   : > { %14270 = vmatpush3.bf16.msra.mxu0 %v15611_v35  ;;  %v373_v25 = vor.u32 %v371_v4, %v370_v15  ;;  %v374_v27 = vrot.slane %v370_v15, 4  ;;  %v381_v28 = vor.u32 %v379_v6, %v378_v17  ;;  %v440_v29 = vld [vmem:[#allocation2 + $0x30] sm:$0xf]  ;;  %v382_v34 = vrot.slane %v378_v17, 4  ;;  %283 = vst [vmem:[#allocation2 + $0x44] sm:$0x1] %v282_v49 }
  0x4b   : > { %15012 = vmatpush3.bf16.msra.mxu1 %v15610_v23  ;;  %14271 = vmatprep.subr.bf16.mxu0 %v15612_v58  ;;  %v871_v22 = vrot.slane %v16530_v12, 4  ;;  %v15619_v23 = vld [vmem:[%s21345_s2 + $0x58] sm:$0xff]   ;;  %286 = vst [vmem:[#allocation2 + $0x4c] sm:$0x1] %v285_v54  ;;  %v384_v53 = vshrl.u32 %v14143_v55, 16  ;;  %v387_v58 = vshll.u32 %v14143_v55, 16 }
  0x4c   : > { %15013 = vmatprep.subr.bf16.mxu1 %v15613_v44  ;;  %v446_v31 = vld [vmem:[#allocation2 + $0x38] sm:$0xf]  ;;  %v441_v42 = vsel %vm16386_vm7, %v373_v25, %v440_v29  ;;  %v253_v61 = vsel %vm16349_vm2, 0, %v252_v57  ;;  %v13219_v5 = vrot.slane %v16574_v56, 9  ;;  %v15628_v21 = vld [vmem:[%s21345_s2 + $0x28] sm:$0xff]   ;;  %v15632_v54 = vld [vmem:[%s21345_s2 + $0x30] sm:$0xff]  }
  0x4d   : > { %v872_v38 = vsel %vm408_vm5, %v864_v24, %v871_v22  ;;  %v447_v14 = vsel %vm16386_vm7, %v381_v28, %v446_v31  ;;  %442 = vst [vmem:[#allocation2 + $0x30] sm:$0xf] %v441_v42  ;;  %254 = vst [vmem:[#allocation2 + $0x48] sm:$0x1] %v253_v61  ;;  %v386_v63 = vrot.slane %v384_v53, 7  ;;  %vm2537_vm14 = vcmask 261120  }
  0x4e   : > { %14272 = vmatpush3.bf16.msra.mxu0 %v15614_v0  ;;  %1083 = vmatprep.mubr.bf16.mxu0 %v872_v38  ;;  %448 = vst [vmem:[#allocation2 + $0x38] sm:$0xf] %v447_v14  ;;  %v15626_v0 = vld [vmem:[%s21345_s2 + $0x68] sm:$0xff]   ;;  %v15631_v38 = vld [vmem:[%s21345_s2 + $0xb8] sm:$0xff]  }
  0x4f   : > { %15014 = vmatpush3.bf16.msra.mxu1 %v15613_v44  ;;  %v443_v35 = vld [vmem:[#allocation2 + $0x34] sm:$0x1]  ;;  %14273 = vmatprep.subr.bf16.mxu0 %v15616_v13  ;;  %v449_v44 = vld [vmem:[#allocation2 + $0x3c] sm:$0x1]  ;;  %v389_v50 = vor.u32 %v387_v58, %v386_v63  ;;  %v390_v2 = vrot.slane %v386_v63, 4 }
  0x50   : > { %15015 = vmatprep.subr.bf16.mxu1 %v15617_v11  ;;  %v444_v43 = vsel %vm16349_vm2, %v374_v27, %v443_v35  ;;  %v450_v24 = vsel %vm16349_vm2, %v382_v34, %v449_v44  ;;  %v452_v4 = vld [vmem:[#allocation2 + $0x40] sm:$0xf] }
  0x51   : > { %445 = vst [vmem:[#allocation2 + $0x34] sm:$0x1] %v444_v43  ;;  %1084 = vmatmul.mubr.bf16.gmra.mrb[4].mxu0 %v870_v33  ;;  %451 = vst [vmem:[#allocation2 + $0x3c] sm:$0x1] %v450_v24  ;;  %v453_v31 = vsel %vm16386_vm7, %v389_v50, %v452_v4  ;;  %v15630_v33 = vld [vmem:[%s21345_s2 + $0x70] sm:$0xff]   ;;  %v15633_v50 = vld [vmem:[%s21345_s2 + $0x78] sm:$0xff]  }
  0x52   : > { %14274 = vmatpush3.bf16.msra.mxu0 %v15618_v19  ;;  %454 = vst [vmem:[#allocation2 + $0x40] sm:$0xf] %v453_v31  ;;  %v455_v37 = vld [vmem:[#allocation2 + $0x44] sm:$0x1]  ;;  %v477_v44 = vld [vmem:[#allocation2 + $0x4c] sm:$0x1] }
  0x53   : > { %15016 = vmatpush3.bf16.msra.mxu1 %v15617_v11  ;;  %14275 = vmatprep.subr.bf16.mxu0 %v15619_v23  ;;  %v456_v57 = vsel %vm16349_vm2, %v390_v2, %v455_v37  ;;  %v15636_v31 = vld [vmem:[%s21345_s2 + $0x1c0] sm:$0xff]   ;;  %vm16833_vm2 = vmand %vm1918_vm13, %vm255_vm3 }
  0x54   : > { %15017 = vmatprep.subr.bf16.mxu1 %v15620_v20  ;;  %v464_v6 = vld [vmem:[#allocation2 + $0x30] sm:$0xf]  ;;  %v467_v49 = vld [vmem:[#allocation2 + $0x48] sm:$0xf]  ;;  %457 = vst [vmem:[#allocation2 + $0x44] sm:$0x1] %v456_v57 }
  0x55   : > { %v465_v7 = vld [vmem:[#allocation2 + $0x38] sm:$0xf]  ;;  %v566_v15 = vshrl.u32 %v464_v6, 16  ;;  %v569_v17 = vshll.u32 %v464_v6, 16  ;;  %v627_v28 = vld [vmem:[#allocation2 + $0x30] sm:$0xe] }
  0x56   : > { %14276 = vmatpush3.bf16.msra.mxu0 %v15621_v51  ;;  %v583_v23 = vshll.u32 %v465_v7, 16  ;;  %v16594_v27 = vcombine.low %v464_v6, %v465_v7  ;;  %v628_v29 = vld [vmem:[#allocation2 + $0x38] sm:$0xe]  ;;  %v13216_v59 = vrot.slane %v627_v28, 9  ;;  %v617_v6 = vshll.u32 %v477_v44, 16 }
  0x57   : > { %15018 = vmatpush3.bf16.msra.mxu1 %v15620_v20  ;;  %14277 = vmatprep.subr.bf16.mxu0 %v15623_v48  ;;  %v580_v20 = vshrl.u32 %v465_v7, 16  ;;  %v568_v34 = vrot.slane %v566_v15, 4  ;;  %v571_v35 = vrot.slane %v569_v17, 5  ;;  %v13217_v51 = vrot.slane %v628_v29, 9 }
  0x58   : > { %15019 = vmatprep.subr.bf16.mxu1 %v15624_v32  ;;  %v474_v11 = vld [vmem:[#allocation2 + $0x34] sm:$0x1]  ;;  %v475_v13 = vld [vmem:[#allocation2 + $0x3c] sm:$0x1]  ;;  %v585_v43 = vrot.slane %v583_v23, 5  ;;  %v875_v48 = vrot.slane %v16594_v27, 4 }
  0x59   : > { %v575_v19 = vshll.u32 %v474_v11, 16  ;;  %v589_v25 = vshll.u32 %v475_v13, 16  ;;  %v582_v36 = vrot.slane %v580_v20, 4  ;;  %v572_v46 = vor.u32 %v571_v35, %v568_v34  ;;  %v466_v15 = vld [vmem:[#allocation2 + $0x40] sm:$0xf]  ;;  %v15635_v23 = vld [vmem:[%s21345_s2 + $0x38] sm:$0xff]  }
  0x5a   : > { %14278 = vmatpush3.bf16.msra.mxu0 %v15625_v62  ;;  %v680_v47 = vrot.slane %v474_v11, 5  ;;  %v684_v24 = vrot.slane %v475_v13, 5  ;;  %v608_v62 = vshrl.u32 %v467_v49, 16  ;;  %v629_v13 = vld [vmem:[#allocation2 + $0x40] sm:$0xe]  ;;  %v594_v20 = vshrl.u32 %v466_v15, 16 }
  0x5b   : > { %15020 = vmatpush3.bf16.msra.mxu1 %v15624_v32  ;;  %v577_v42 = vrot.slane %v575_v19, 5  ;;  %v591_v14 = vrot.slane %v589_v25, 5  ;;  %14279 = vmatprep.subr.bf16.mxu0 %v15626_v0  ;;  %v586_v55 = vor.u32 %v585_v43, %v582_v36  ;;  %v16613_v32 = vld [vmem:[%s21345_s2 + $0x200] sm:$0xff]   ;;  %v573_v53 = vrot.slane %v572_v46, 4 }
  0x5c   : > { %15021 = vmatprep.subr.bf16.mxu1 %v15627_v1  ;;  %v681_v58 = vsel %vm16420_vm9, %v13216_v59, %v680_v47  ;;  %v685_v61 = vsel %vm16420_vm9, %v13217_v51, %v684_v24  ;;  %v692_v0 = vrot.slane %v477_v44, 5  ;;  %v610_v4 = vrot.slane %v608_v62, 4  ;;  %v15638_v62 = vld [vmem:[%s21345_s2 + $0x180] sm:$0xff]  }
  0x5d   : > { %v587_v63 = vrot.slane %v586_v55, 4  ;;  %v16619_v26 = vcombine.low %v681_v58, %v685_v61  ;;  %v578_v2 = vsel %vm16454_vm12, %v573_v53, %v577_v42  ;;  %v13218_v28 = vrot.slane %v629_v13, 9  ;;  %v15637_v61 = vld [vmem:[%s21345_s2 + $0x208] sm:$0xff]   ;;  %v15654_v13 = vld [vmem:[%s21345_s2 + $0x1f0] sm:$0xff]  }
  0x5e   : > { %14280 = vmatpush3.bf16.msra.mxu0 %v15628_v21  ;;  %v597_v21 = vshll.u32 %v466_v15, 16  ;;  %v596_v34 = vrot.slane %v594_v20, 4  ;;  %v619_v36 = vrot.slane %v617_v6, 5  ;;  %v876_v37 = vsel %vm408_vm5, %v869_v41, %v875_v48  ;;  %v15651_v6 = vld [vmem:[%s21345_s2 + $0x1e8] sm:$0xff]   ;;  %v15657_v20 = vld [vmem:[%s21345_s2 + $0x1f8] sm:$0xff]  }
  0x5f   : > { %15022 = vmatpush3.bf16.msra.mxu1 %v15627_v1  ;;  %v611_v1 = vshll.u32 %v467_v49, 16  ;;  %14281 = vmatprep.subr.bf16.mxu0 %v15630_v33  ;;  %v592_v7 = vsel %vm16454_vm12, %v587_v63, %v591_v14  ;;  %v879_v11 = vrot.slane %v16619_v26, 4  ;;  %v16651_v43 = vcombine.low %v466_v15, %v467_v49  ;;  %v15642_v63 = vld [vmem:[%s21345_s2 + $0x1d0] sm:$0xff]   ;;  %v15655_v15 = vld [vmem:[%s21345_s2 + $0x238] sm:$0xff]  }
  0x60   : > { %15023 = vmatprep.subr.bf16.mxu1 %v15631_v38  ;;  %v16629_v19 = vcombine.low %v578_v2, %v592_v7  ;;  %v599_v35 = vrot.slane %v597_v21, 5  ;;  %v15648_v2 = vld [vmem:[%s21345_s2 + $0x1e0] sm:$0xff]   ;;  %v15652_v7 = vld [vmem:[%s21345_s2 + $0x230] sm:$0xff]   ;;  %v15658_v21 = vld [vmem:[%s21345_s2 + $0x1b8] sm:$0xff]  }
  0x61   : > { %v613_v17 = vrot.slane %v611_v1, 5  ;;  %v880_v25 = vsel %vm408_vm5, %v873_v18, %v879_v11  ;;  %v476_v18 = vld [vmem:[#allocation2 + $0x44] sm:$0x1]  ;;  %v881_v24 = vrot.slane %v16651_v43, 4 }
  0x62   : > { %14282 = vmatpush3.bf16.msra.mxu0 %v15632_v54  ;;  %v877_v33 = vrot.slane %v16629_v19, 4  ;;  %15005 = vmatprep.mubr.bf16.mxu1 %v880_v25  ;;  %v688_v59 = vrot.slane %v476_v18, 5  ;;  %v600_v44 = vor.u32 %v599_v35, %v596_v34  ;;  %v603_v46 = vshll.u32 %v476_v18, 16  ;;  %v15646_v1 = vld [vmem:[%s21345_s2 + $0x220] sm:$0xff]   ;;  %v15661_v34 = vld [vmem:[%s21345_s2 + $0x318] sm:$0xff]  }
  0x63   : > { %15024 = vmatpush3.bf16.msra.mxu1 %v15631_v38  ;;  %v614_v29 = vor.u32 %v613_v17, %v610_v4  ;;  %14283 = vmatprep.subr.bf16.mxu0 %v15633_v50  ;;  %v693_v38 = vsel %vm16420_vm9, %v13219_v5, %v692_v0  ;;  %v882_v53 = vsel %vm408_vm5, %v875_v48, %v881_v24  ;;  %v15639_v48 = vld [vmem:[%s21345_s2 + $0x1c8] sm:$0xff]   ;;  %v15644_v0 = vld [vmem:[%s21345_s2 + $0x190] sm:$0xff]   ;;  %v15647_v50 = vld [vmem:[%s21345_s2 + $0x198] sm:$0xff]  }
  0x64   : > { %15033 = vmatprep.subr.bf16.mxu1 %v16613_v32  ;;  %v878_v14 = vsel %vm408_vm5, %v871_v22, %v877_v33  ;;  %v689_v41 = vsel %vm16420_vm9, %v13218_v28, %v688_v59  ;;  %v601_v56 = vrot.slane %v600_v44, 4  ;;  %v605_v47 = vrot.slane %v603_v46, 5  ;;  %v15649_v4 = vld [vmem:[%s21345_s2 + $0x228] sm:$0xff]   ;;  %v15656_v17 = vld [vmem:[%s21345_s2 + $0x1b0] sm:$0xff]   ;;  %v15662_v35 = vld [vmem:[%s21345_s2 + $0x2d8] sm:$0xff]  }
  0x65   : > { %v615_v42 = vrot.slane %v614_v29, 4  ;;  %1091 = vmatprep.mubr.bf16.mxu0 %v878_v14  ;;  %v16660_v51 = vcombine.low %v689_v41, %v693_v38 }
  0x66   : > { %14284 = vmatpush3.bf16.msra.mxu0 %v15635_v23  ;;  %v606_v22 = vsel %vm16454_vm12, %v601_v56, %v605_v47 }
  0x67   : > { %14321 = vmatprep.subr.bf16.mxu0 %v15636_v31  ;;  %1092 = vmatmul.mubr.bf16.gmra.mrb[8].mxu0 %v876_v37  ;;  %v620_v5 = vsel %vm16454_vm12, %v615_v42, %v619_v36  ;;  %v885_v49 = vrot.slane %v16660_v51, 4 }
  0x68   : > { %v16666_v54 = vcombine.low %v606_v22, %v620_v5 }
  0x69   : > { %v886_v55 = vsel %vm408_vm5, %v879_v11, %v885_v49  ;;  %v15653_v11 = vld [vmem:[%s21345_s2 + $0x1a8] sm:$0xff]  }
  0x6a   : > { %v883_v57 = vrot.slane %v16666_v54, 4  ;;  %15006 = vmatmul.mubr.bf16.gmra.mrb[4].mxu1 %v886_v55 }
  0x6b   : > { %15025 = vmatprep.mubr.bf16.mxu1 %v16441_v10  ;;  %v15640_v10 = vld [vmem:[%s21345_s2 + $0x210] sm:$0xff]  }
  0x6c   : > { %v884_v58 = vsel %vm408_vm5, %v877_v33, %v883_v57 }
  0x6d   : > { %1099 = vmatprep.mubr.bf16.mxu0 %v884_v58 }
  0x6f   : > { %1100 = vmatmul.mubr.bf16.gmra.mrb[12].mxu0 %v882_v53 }
  0x70   : > { %1349 = vmatprep.mubr.bf16.mxu0 %v16472_v8  ;;  %v15641_v8 = vld [vmem:[%s21345_s2 + $0x188] sm:$0xff]  }
  0x72   : > { %15026 = vmatmul.mubr.bf16.vlgmr.msra.gmra.mrb[0].mxu1 %v16447_v16 }
  0x73   : > { %15034 = vmatpush3.bf16.msra.mxu1 %v16613_v32  ;;  %15029 = vmatprep.mubr.bf16.mxu1 %v16474_v9  ;;  %v15643_v32 = vld [vmem:[%s21345_s2 + $0x218] sm:$0xff]  }
  0x74   : > { %15035 = vmatprep.subr.bf16.mxu1 %v15637_v61 }
  0x77   : > { %1350 = vmatmul.mubr.bf16.vlgmr.msra.gmra.mrb[16].mxu0 %v16459_v52  ;;  %15036 = vmatpush3.bf16.msra.mxu1 %v15637_v61  ;;  %v15645_v52 = vld [vmem:[%s21345_s2 + $0x1d8] sm:$0xff]  }
  0x78   : > { %14322 = vmatpush3.bf16.msra.mxu0 %v15638_v62  ;;  %1357 = vmatprep.mubr.bf16.mxu0 %v16490_v30 }
  0x79   : > { %14323 = vmatprep.subr.bf16.mxu0 %v15639_v48  ;;  %15037 = vmatprep.subr.bf16.mxu1 %v15640_v10 }
  0x7a   : > { %15030 = vmatmul.mubr.bf16.gmra.mrb[4].mxu1 %v16619_v26 }
  0x7b   : > { %15038 = vmatpush3.bf16.msra.mxu1 %v15640_v10  ;;  %15049 = vmatprep.mubr.bf16.mxu1 %v16447_v16  ;;  %v15650_v16 = vld [vmem:[%s21345_s2 + $0x1a0] sm:$0xff]  }
  0x7c   : > { %14324 = vmatpush3.bf16.msra.mxu0 %v15641_v8  ;;  %15039 = vmatprep.subr.bf16.mxu1 %v15643_v32  ;;  %v1970_v8 = vld [vmem:[#allocation2] sm:$0xf] }
  0x7d   : > { %14325 = vmatprep.subr.bf16.mxu0 %v15642_v63 }
  0x7f   : > { %1358 = vmatmul.mubr.bf16.gmra.mrb[20].mxu0 %v16461_v60  ;;  %15040 = vmatpush3.bf16.msra.mxu1 %v15643_v32 }
  0x80   : > { %14326 = vmatpush3.bf16.msra.mxu0 %v15644_v0  ;;  %1365 = vmatprep.mubr.bf16.mxu0 %v16530_v12 }
  0x81   : > { %14327 = vmatprep.subr.bf16.mxu0 %v15645_v52  ;;  %15041 = vmatprep.subr.bf16.mxu1 %v15646_v1 }
  0x83   : > { %15042 = vmatpush3.bf16.msra.mxu1 %v15646_v1 }
  0x84   : > { %14328 = vmatpush3.bf16.msra.mxu0 %v15647_v50  ;;  %15043 = vmatprep.subr.bf16.mxu1 %v15649_v4  ;;  %v1991_v50 = vshrl.u32 %v1970_v8, 16 }
  0x85   : > { %14329 = vmatprep.subr.bf16.mxu0 %v15648_v2 }
  0x87   : > { %1366 = vmatmul.mubr.bf16.gmra.mrb[24].mxu0 %v16504_v45  ;;  %15044 = vmatpush3.bf16.msra.mxu1 %v15649_v4  ;;  %v1994_v4 = vshll.u32 %v1970_v8, 16 }
  0x88   : > { %14330 = vmatpush3.bf16.msra.mxu0 %v15650_v16  ;;  %1373 = vmatprep.mubr.bf16.mxu0 %v16629_v19 }
  0x89   : > { %14331 = vmatprep.subr.bf16.mxu0 %v15651_v6  ;;  %15045 = vmatprep.subr.bf16.mxu1 %v15652_v7 }
  0x8b   : > { %15046 = vmatpush3.bf16.msra.mxu1 %v15652_v7 }
  0x8c   : > { %14332 = vmatpush3.bf16.msra.mxu0 %v15653_v11  ;;  %15047 = vmatprep.subr.bf16.mxu1 %v15655_v15 }
  0x8d   : > { %14333 = vmatprep.subr.bf16.mxu0 %v15654_v13 }
  0x8f   : > { %1374 = vmatmul.mubr.bf16.gmra.mrb[28].mxu0 %v16594_v27  ;;  %15048 = vmatpush3.bf16.msra.mxu1 %v15655_v15  ;;  %v16785_v15 = vld [vmem:[#allocation2] sm:$0xe] }
  0x90   : > { %14334 = vmatpush3.bf16.msra.mxu0 %v15656_v17  ;;  %1671 = vmatprep.mubr.bf16.mxu0 %v16490_v30  ;;  %v1993_v17 = vrot.slane %v1991_v50, 4 }
  0x91   : > { %14335 = vmatprep.subr.bf16.mxu0 %v15657_v20 }
  0x92   : > { %15050 = vmatmul.mubr.bf16.vlgmr.msra.gmra.mrb[0].mxu1 %v16474_v9 }
  0x93   : > { %15053 = vmatprep.mubr.bf16.mxu1 %v16619_v26 }
  0x94   : > { %14336 = vmatpush3.bf16.msra.mxu0 %v15658_v21 }
  0x97   : > { %1672 = vmatmul.mubr.bf16.vlgmr.msra.gmra.mrb[32].mxu0 %v16461_v60 }
  0x98   : > { %1679 = vmatprep.mubr.bf16.mxu0 %v16530_v12 }
  0x9a   : > { %15054 = vmatmul.mubr.bf16.gmra.mrb[4].mxu1 %v16660_v51 }
  0x9f   : > { %1680 = vmatmul.mubr.bf16.gmra.mrb[36].mxu0 %v16504_v45 }
  0xa0   : > { %1687 = vmatprep.mubr.bf16.mxu0 %v16629_v19  ;;  %v15660_v19 = vld [vmem:[%s21345_s2 + $0x2d0] sm:$0xff]  }
  0xa7   : > { %1688 = vmatmul.mubr.bf16.gmra.mrb[40].mxu0 %v16594_v27  ;;  %v15659_v27 = vld [vmem:[%s21345_s2 + $0x310] sm:$0xff]  }
  0xa8   : > { %1695 = vmatprep.mubr.bf16.mxu0 %v16666_v54  ;;  %14373 = vmatprep.subr.bf16.mxu0 %v15659_v27 }
  0xa9   : > { %14374 = vmatpush3.bf16.msra.mxu0 %v15660_v19 }
  0xaa   : > { %14375 = vmatprep.subr.bf16.mxu0 %v15661_v34  ;;  %v16795_v34 = vld [vmem:[#allocation2 + $0x48] sm:$0xe] }
  0xad   : > { %14376 = vmatpush3.bf16.msra.mxu0 %v15662_v35 }
  0xaf   : > { %1696 = vmatmul.mubr.bf16.gmra.mrb[44].mxu0 %v16651_v43 }
 0x11c   : > { %v14233_v9 = vpop.f32.mrb[0].mxu0 }
 0x11d   : > { %v14234_v30 = vpop.f32.mrb[1].mxu0 }
 0x11e   : > { %v14235_v23 = vadd.f32 %v14234_v30, %v14233_v9  ;;  %v14236_v26 = vpop.f32.mrb[2].mxu0  ;;  %v1996_v9 = vrot.slane %v1994_v4, 5 }
 0x11f   : > { %v14237_v25 = vpop.f32.mrb[3].mxu0 }
 0x120   : > { %v14238_v60 = vadd.f32 %v14237_v25, %v14236_v26  ;;  %v16789_v25 = vld [vmem:[#allocation2 + $0x4] sm:$0x1] }
 0x124   : > { %v14239_v28 = vpop.f32.mrb[4].mxu0 }
 0x125   : > { %v14240_v12 = vpop.f32.mrb[5].mxu0 }
 0x126   : > { %v14241_v29 = vadd.f32 %v14240_v12, %v14239_v28  ;;  %v14242_v31 = vpop.f32.mrb[6].mxu0 }
 0x127   : > { %v14243_v33 = vpop.f32.mrb[7].mxu0 }
 0x128   : > { %v14244_v45 = vadd.f32 %v14243_v33, %v14242_v31  ;;  %v1997_v31 = vor.u32 %v1996_v9, %v1993_v17 }
 0x13a   : > { %v14245_v36 = vpop.f32.mrb[8].mxu0 }
 0x13b   : > { %v14246_v37 = vpop.f32.mrb[9].mxu0 }
 0x13c   : > { %v14247_v18 = vadd.f32 %v14246_v37, %v14245_v36  ;;  %v14248_v38 = vpop.f32.mrb[10].mxu0  ;;  %v2162_v36 = vrot.slane %v16789_v25, 5  ;;  %v16798_v37 = vld [vmem:[#allocation2 + $0x4c] sm:$0x1] }
 0x13d   : > { %v14249_v42 = vpop.f32.mrb[11].mxu0 }
 0x13e   : > { %v14250_v43 = vadd.f32 %v14249_v42, %v14248_v38  ;;  %v16800_v42 = vrot.slane %v1997_v31, 4  ;;  %v1925_v31 = vld [vmem:[#allocation2 + $0xc] sm:$0x1] }
 0x142   : > { %v14251_v14 = vpop.f32.mrb[12].mxu0 }
 0x143   : > { %v14252_v59 = vpop.f32.mrb[13].mxu0 }
 0x144   : > { %v14253_v44 = vadd.f32 %v14252_v59, %v14251_v14  ;;  %v14254_v46 = vpop.f32.mrb[14].mxu0 }
 0x145   : > { %v14255_v41 = vpop.f32.mrb[15].mxu0 }
 0x146   : > { %v14256_v56 = vadd.f32 %v14255_v41, %v14254_v46  ;;  %v16809_v41 = vld [vmem:[#allocation2 + $0x48] sm:$0xf] }
 0x14a   : > { %v14285_v47 = vpop.f32.mrb[16].mxu0 }
 0x14b   : > { %v14286_v5 = vpop.f32.mrb[17].mxu0 }
 0x14c   : > { %v14287_v51 = vadd.f32 %v14286_v5, %v14285_v47  ;;  %v14288_v22 = vpop.f32.mrb[18].mxu0  ;;  %v13325_v47 = vrot.slane %v16795_v34, 9 }
 0x14d   : > { %v14289_v24 = vpop.f32.mrb[19].mxu0 }
 0x14e   : > { %v15324_v49 = vadd.f32 %v14287_v51, %v14235_v23  ;;  %v14290_v54 = vadd.f32 %v14289_v24, %v14288_v22  ;;  %v2198_v24 = vrot.slane %v16798_v37, 5 }
 0x150   : > { %v15330_v55 = vadd.f32 %v14290_v54, %v14238_v60 }
 0x152   : > { %v14291_v57 = vpop.f32.mrb[20].mxu0 }
 0x153   : > { %v14292_v53 = vpop.f32.mrb[21].mxu0 }
 0x154   : > { %v14293_v58 = vadd.f32 %v14292_v53, %v14291_v57  ;;  %v14294_v61 = vpop.f32.mrb[22].mxu0  ;;  %v2126_v57 = vshll.u32 %v16798_v37, 16 }
 0x155   : > { %v14295_v62 = vpop.f32.mrb[23].mxu0 }
 0x156   : > { %v16777_v48 = vadd.f32 %v14293_v58, %v14241_v29  ;;  %v14296_v10 = vadd.f32 %v14295_v62, %v14294_v61  ;;  %v13316_v29 = vrot.slane %v16785_v15, 9 }
 0x158   : > { %v16779_v63 = vadd.f32 %v14296_v10, %v14244_v45  ;;  %v2000_v45 = vshll.u32 %v16789_v25, 16  ;;  %v2117_v10 = vshrl.u32 %v16809_v41, 16 }
 0x15a   : > { %v14297_v32 = vpop.f32.mrb[24].mxu0  ;;  %v16807_v59 = vrot.slane %v2000_v45, 5 }
 0x15b   : > { %v14298_v0 = vpop.f32.mrb[25].mxu0 }
 0x15c   : > { %v14299_v52 = vadd.f32 %v14298_v0, %v14297_v32  ;;  %v14300_v1 = vpop.f32.mrb[26].mxu0 }
 0x15d   : > { %v14301_v2 = vpop.f32.mrb[27].mxu0 }
 0x15e   : > { %v14302_v16 = vadd.f32 %v14301_v2, %v14300_v1  ;;  %v16781_v6 = vadd.f32 %v14299_v52, %v14247_v18  ;;  %v2120_v1 = vshll.u32 %v16809_v41, 16  ;;  %v15679_v41 = vld [vmem:[%s21345_s2 + $0x348] sm:$0xff]  }
 0x160   : > { %v16783_v7 = vadd.f32 %v14302_v16, %v14250_v43  ;;  %v16805_v43 = vld [vmem:[%s21346_s3] ss:$0 sm:$0xff] }
 0x162   : > { %v14303_v11 = vpop.f32.mrb[28].mxu0 }
 0x163   : > { %v14304_v13 = vpop.f32.mrb[29].mxu0 }
 0x164   : > { %v14305_v20 = vadd.f32 %v14304_v13, %v14303_v11  ;;  %v14306_v21 = vpop.f32.mrb[30].mxu0 }
 0x165   : > { %v14307_v30 = vpop.f32.mrb[31].mxu0  ;;  %v15051_v60 = vpop.f32.mrb[0].mxu1 }
 0x166   : > { %v14308_v23 = vadd.f32 %v14307_v30, %v14306_v21  ;;  %v16787_v26 = vadd.f32 %v14305_v20, %v14253_v44  ;;  %v1738_v28 = vpop.f32.mrb[1].mxu1  ;;  %v16828_v30 = vrot.slane %v2126_v57, 5 }
 0x167   : > { %v15052_v33 = vpop.f32.mrb[2].mxu1 }
 0x168   : > { %v16791_v12 = vadd.f32 %v14308_v23, %v14256_v56  ;;  %v1741_v27 = vpop.f32.mrb[3].mxu1 }
 0x16a   : > { %v14337_v19 = vpop.f32.mrb[32].mxu0 }
 0x16b   : > { %v14338_v35 = vpop.f32.mrb[33].mxu0 }
 0x16c   : > { %v14339_v18 = vadd.f32 %v14338_v35, %v14337_v19  ;;  %v14340_v38 = vpop.f32.mrb[34].mxu0 }
 0x16d   : > { %v14341_v14 = vpop.f32.mrb[35].mxu0  ;;  %v16811_v56 = vpop.f32.mrb[4].mxu1 }
 0x16e   : > { %v15325_v44 = vadd.f32 %v15324_v49, %v14339_v18  ;;  %v14342_v46 = vadd.f32 %v14341_v14, %v14340_v38  ;;  %v16814_v22 = vpop.f32.mrb[5].mxu1  ;;  %v1928_v14 = vld [vmem:[#allocation2 + $0x10] sm:$0xf] }
 0x16f   : > { %v16817_v54 = vpop.f32.mrb[6].mxu1 }
 0x170   : > { %v15326_v5 = vadd.f32 %v15325_v44, %v1738_v28  ;;  %v15331_v51 = vadd.f32 %v15330_v55, %v14342_v46  ;;  %v16821_v58 = vpop.f32.mrb[7].mxu1  ;;  %v1920_v28 = vld [vmem:[#allocation2 + $0x8] sm:$0xf]  ;;  %v1931_v44 = vld [vmem:[#allocation2 + $0x14] sm:$0x1] }
 0x172   : > { %v1782_v49 = vadd.f32 %v15326_v5, %v16805_v43  ;;  %v15332_v53 = vadd.f32 %v15331_v51, %v1741_v27  ;;  %v14343_v61 = vpop.f32.mrb[36].mxu0 }
 0x173   : > { %v14344_v62 = vpop.f32.mrb[37].mxu0 }
 0x174   : > { %vm1790_vm15 = vcmp.ge.f32.partialorder %v1782_v49, 0.0  ;;  %v1798_v55 = vmul.f32 0.01, %v1782_v49  ;;  %v1783_v8 = vadd.f32 %v15332_v53, %v16805_v43  ;;  %v14345_v32 = vadd.f32 %v14344_v62, %v14343_v61  ;;  %v14346_v0 = vpop.f32.mrb[38].mxu0 }
 0x175   : > { %v14347_v52 = vpop.f32.mrb[39].mxu0 }
 0x176   : > { %v1806_v50 = vsel %vm1790_vm15, %v1782_v49, %v1798_v55  ;;  %vm1791_vm0 = vcmp.ge.f32.partialorder %v1783_v8, 0.0  ;;  %v1799_v2 = vmul.f32 0.01, %v1783_v8  ;;  %v15322_v4 = vadd.f32 %v16777_v48, %v14345_v32 }
 0x177   : > { %v14144_v16 = vpack.c.bf16 %v1806_v50, %v1806_v50  ;;  %v14348_v11 = vadd.f32 %v14347_v52, %v14346_v0  ;;  %vm2275_vm15 = vcmask 785408  }
 0x178   : > { %v1807_v13 = vsel %vm1791_vm0, %v1783_v8, %v1799_v2  ;;  %v15323_v17 = vadd.f32 %v15322_v4, %v15051_v60  ;;  %vm2296_vm0 = vcmask 523264  }
 0x179   : > { %v1839_v20 = vshrl.u32 %v14144_v16, 16  ;;  %v14145_v21 = vpack.c.bf16 %v1807_v13, %v1807_v13  ;;  %v15328_v9 = vadd.f32 %v16779_v63, %v14348_v11  ;;  %v1842_v23 = vshll.u32 %v14144_v16, 16 }
 0x17a   : > { %v1784_v45 = vadd.f32 %v15323_v17, %v16805_v43  ;;  %v14349_v27 = vpop.f32.mrb[40].mxu0 }
 0x17b   : > { %v1841_v19 = vrot.slane %v1839_v20, 7  ;;  %v1847_v60 = vshrl.u32 %v14145_v21, 16  ;;  %v1850_v35 = vshll.u32 %v14145_v21, 16  ;;  %v15329_v18 = vadd.f32 %v15328_v9, %v15052_v33  ;;  %v14350_v38 = vpop.f32.mrb[41].mxu0 }
 0x17c   : > { %vm1792_vm6 = vcmp.ge.f32.partialorder %v1784_v45, 0.0  ;;  %v1800_v46 = vmul.f32 0.01, %v1784_v45  ;;  %v14351_v5 = vadd.f32 %v14350_v38, %v14349_v27  ;;  %v14352_v51 = vpop.f32.mrb[42].mxu0 }
 0x17d   : > { %v1844_v57 = vor.u32 %v1842_v23, %v1841_v19  ;;  %v1845_v49 = vrot.slane %v1841_v19, 4  ;;  %v1849_v53 = vrot.slane %v1847_v60, 7  ;;  %v1785_v61 = vadd.f32 %v15329_v18, %v16805_v43  ;;  %v14353_v62 = vpop.f32.mrb[43].mxu0 }
 0x17e   : > { %v1808_v33 = vsel %vm1792_vm6, %v1784_v45, %v1800_v46  ;;  %v15337_v55 = vadd.f32 %v16781_v6, %v14351_v5  ;;  %v14354_v8 = vadd.f32 %v14353_v62, %v14352_v51  ;;  %v16858_v23 = vrot.slane %v2117_v10, 4  ;;  %v15664_v5 = vld [vmem:[%s21345_s2 + $0x2e0] sm:$0xff]   ;;  %v15665_v51 = vld [vmem:[%s21345_s2 + $0x350] sm:$0xff]  }
 0x17f   : > { %v1921_v32 = vsel %vm16833_vm2, %v1844_v57, %v1920_v28  ;;  %v1926_v0 = vsel %vm16839_vm4, %v1845_v49, %v1925_v31  ;;  %v1852_v52 = vor.u32 %v1850_v35, %v1849_v53  ;;  %v1853_v50 = vrot.slane %v1849_v53, 4  ;;  %v1934_v28 = vld [vmem:[#allocation2 + $0x18] sm:$0xf]  ;;  %v1937_v31 = vld [vmem:[#allocation2 + $0x1c] sm:$0x1]  ;;  %15057 = vmatprep.subr.bf16.mxu1 %v15665_v51 }
 0x180   : > { %1922 = vst [vmem:[#allocation2 + $0x8] sm:$0xf] %v1921_v32  ;;  %1927 = vst [vmem:[#allocation2 + $0xc] sm:$0x1] %v1926_v0  ;;  %v14146_v2 = vpack.c.bf16 %v1808_v33, %v1808_v33  ;;  %vm1793_vm7 = vcmp.ge.f32.partialorder %v1785_v61, 0.0  ;;  %v15338_v16 = vadd.f32 %v15337_v55, %v16814_v22  ;;  %v15343_v13 = vadd.f32 %v16783_v7, %v14354_v8 }
 0x181   : > { %v1801_v4 = vmul.f32 0.01, %v1785_v61  ;;  %v1929_v11 = vsel %vm16833_vm2, %v1852_v52, %v1928_v14  ;;  %v1932_v6 = vsel %vm16839_vm4, %v1853_v50, %v1931_v44  ;;  %v16868_v10 = vsel %vm16420_vm9, %v13316_v29, %v2162_v36  ;;  %v15666_v29 = vld [vmem:[%s21345_s2 + $0x328] sm:$0xff]   ;;  %v1940_v53 = vld [vmem:[#allocation2 + $0x20] sm:$0xf]  ;;  %15058 = vmatpush3.bf16.msra.mxu1 %v15665_v51 }
 0x182   : > { %1930 = vst [vmem:[#allocation2 + $0x10] sm:$0xf] %v1929_v11  ;;  %1933 = vst [vmem:[#allocation2 + $0x14] sm:$0x1] %v1932_v6  ;;  %v1855_v17 = vshrl.u32 %v14146_v2, 16  ;;  %v1786_v21 = vadd.f32 %v15338_v16, %v16805_v43  ;;  %v14355_v9 = vpop.f32.mrb[44].mxu0  ;;  %v15344_v27 = vadd.f32 %v15343_v13, %v16821_v58 }
 0x183   : > { %v1809_v20 = vsel %vm1793_vm7, %v1785_v61, %v1801_v4  ;;  %v1858_v22 = vshll.u32 %v14146_v2, 16  ;;  %v14356_v19 = vpop.f32.mrb[45].mxu0  ;;  %v15663_v58 = vld [vmem:[%s21345_s2 + $0x320] sm:$0xff]   ;;  %v15667_v52 = vld [vmem:[%s21345_s2 + $0x2e8] sm:$0xff]  }
 0x184   : > { %v14147_v45 = vpack.c.bf16 %v1809_v20, %v1809_v20  ;;  %v1857_v60 = vrot.slane %v1855_v17, 7  ;;  %vm1794_vm8 = vcmp.ge.f32.partialorder %v1786_v21, 0.0  ;;  %v1802_v7 = vmul.f32 0.01, %v1786_v21  ;;  %v14358_v18 = vpop.f32.mrb[46].mxu0  ;;  %14377 = vmatprep.subr.bf16.mxu0 %v15663_v58 }
 0x185   : > { %v14357_v35 = vadd.f32 %v14356_v19, %v14355_v9  ;;  %v1787_v44 = vadd.f32 %v15344_v27, %v16805_v43  ;;  %v14359_v46 = vpop.f32.mrb[47].mxu0  ;;  %v1943_v8 = vld [vmem:[#allocation2 + $0x24] sm:$0x1]  ;;  %14378 = vmatpush3.bf16.msra.mxu0 %v15664_v5  ;;  %v1946_v6 = vld [vmem:[#allocation2 + $0x28] sm:$0xf]  ;;  %v15668_v27 = vld [vmem:[%s21345_s2 + $0x330] sm:$0xff]  }
 0x186   : > { %v1863_v38 = vshrl.u32 %v14147_v45, 16  ;;  %v1866_v14 = vshll.u32 %v14147_v45, 16  ;;  %v1860_v57 = vor.u32 %v1858_v22, %v1857_v60  ;;  %v1861_v25 = vrot.slane %v1857_v60, 4  ;;  %14379 = vmatprep.subr.bf16.mxu0 %v15666_v29  ;;  %v1949_v13 = vld [vmem:[#allocation2 + $0x2c] sm:$0x1]  ;;  %v15670_v19 = vld [vmem:[%s21345_s2 + $0x358] sm:$0xff]  }
 0x187   : > { %v1810_v49 = vsel %vm1794_vm8, %v1786_v21, %v1802_v7  ;;  %v15334_v15 = vadd.f32 %v16787_v26, %v14357_v35  ;;  %vm1795_vm10 = vcmp.ge.f32.partialorder %v1787_v44, 0.0  ;;  %v1803_v62 = vmul.f32 0.01, %v1787_v44  ;;  %v2131_v0 = vld [vmem:[#allocation2 + $0x8] sm:$0xe]  ;;  %v15669_v35 = vld [vmem:[%s21345_s2 + $0x2f0] sm:$0xff]   ;;  %15059 = vmatprep.subr.bf16.mxu1 %v15670_v19 }
 0x188   : > { %v1865_v36 = vrot.slane %v1863_v38, 7  ;;  %v14148_v61 = vpack.c.bf16 %v1810_v49, %v1810_v49  ;;  %v1935_v33 = vsel %vm16833_vm2, %v1860_v57, %v1934_v28  ;;  %v1938_v55 = vsel %vm16839_vm4, %v1861_v25, %v1937_v31  ;;  %v16891_v11 = vld [vmem:[#allocation2 + $0xc] sm:$0x1]  ;;  %v1952_v58 = vld [vmem:[#allocation2 + $0x30] sm:$0xf]  ;;  %15060 = vmatpush3.bf16.msra.mxu1 %v15670_v19  ;;  %v15671_v49 = vld [vmem:[%s21345_s2 + $0x338] sm:$0xff]  }
 0x189   : > { %v15335_v26 = vadd.f32 %v15334_v15, %v16811_v56  ;;  %v14360_v32 = vadd.f32 %v14359_v46, %v14358_v18  ;;  %1936 = vst [vmem:[#allocation2 + $0x18] sm:$0xf] %v1935_v33  ;;  %1939 = vst [vmem:[#allocation2 + $0x1c] sm:$0x1] %v1938_v55  ;;  %v1811_v56 = vsel %vm1795_vm10, %v1787_v44, %v1803_v62  ;;  %v13317_v21 = vrot.slane %v2131_v0, 9 }
 0x18a   : > { %v1868_v50 = vor.u32 %v1866_v14, %v1865_v36  ;;  %v1869_v2 = vrot.slane %v1865_v36, 4  ;;  %v1871_v4 = vshrl.u32 %v14148_v61, 16  ;;  %v1874_v16 = vshll.u32 %v14148_v61, 16  ;;  %v2132_v45 = vld [vmem:[#allocation2 + $0x10] sm:$0xe]  ;;  %14380 = vmatpush3.bf16.msra.mxu0 %v15667_v52 }
 0x18b   : > { %v1788_v17 = vadd.f32 %v15335_v26, %v16805_v43  ;;  %v15340_v20 = vadd.f32 %v16791_v12, %v14360_v32  ;;  %v14149_v31 = vpack.c.bf16 %v1811_v56, %v1811_v56  ;;  %v2166_v7 = vrot.slane %v16891_v11, 5  ;;  %v16911_v46 = vld [vmem:[#allocation2 + $0x14] sm:$0x1]  ;;  %14381 = vmatprep.subr.bf16.mxu0 %v15668_v27  ;;  %v16927_v0 = vld [vmem:[#allocation2 + $0x10] sm:$0xf] }
 0x18c   : > { %v1941_v9 = vsel %vm16833_vm2, %v1868_v50, %v1940_v53  ;;  %v1944_v22 = vsel %vm16839_vm4, %v1869_v2, %v1943_v8  ;;  %v1873_v28 = vrot.slane %v1871_v4, 7  ;;  %v1955_v5 = vld [vmem:[#allocation2 + $0x34] sm:$0x1]  ;;  %v13318_v25 = vrot.slane %v2132_v45, 9 }
 0x18d   : > { %1942 = vst [vmem:[#allocation2 + $0x20] sm:$0xf] %v1941_v9  ;;  %1945 = vst [vmem:[#allocation2 + $0x24] sm:$0x1] %v1944_v22  ;;  %vm1796_vm11 = vcmp.ge.f32.partialorder %v1788_v17, 0.0  ;;  %v15341_v60 = vadd.f32 %v15340_v20, %v16817_v54  ;;  %v1879_v14 = vshrl.u32 %v14149_v31, 16  ;;  %v2167_v57 = vsel %vm16420_vm9, %v13317_v21, %v2166_v7 }
 0x18e   : > { %v1804_v12 = vmul.f32 0.01, %v1788_v17  ;;  %v1876_v18 = vor.u32 %v1874_v16, %v1873_v28  ;;  %v1877_v38 = vrot.slane %v1873_v28, 4  ;;  %v1882_v44 = vshll.u32 %v14149_v31, 16  ;;  %14382 = vmatpush3.bf16.msra.mxu0 %v15669_v35  ;;  %v1964_v7 = vld [vmem:[#allocation2 + $0x40] sm:$0xf] }
 0x18f   : > { %v1789_v54 = vadd.f32 %v15341_v60, %v16805_v43  ;;  %v1881_v36 = vrot.slane %v1879_v14, 7  ;;  %v13336_v61 = vcombine.low %v16868_v10, %v2167_v57  ;;  %v2170_v33 = vrot.slane %v16911_v46, 5  ;;  %14383 = vmatprep.subr.bf16.mxu0 %v15671_v49  ;;  %v1967_v35 = vld [vmem:[#allocation2 + $0x44] sm:$0x1] }
 0x190   : > { %v1812_v51 = vsel %vm1796_vm11, %v1788_v17, %v1804_v12  ;;  %v1947_v15 = vsel %vm16833_vm2, %v1876_v18, %v1946_v6  ;;  %v1950_v29 = vsel %vm16839_vm4, %v1877_v38, %v1949_v13  ;;  %v16924_v62 = vld [vmem:[#allocation2 + $0x1c] sm:$0x1]  ;;  %v2133_v32 = vld [vmem:[#allocation2 + $0x18] sm:$0xe]  ;;  %v2019_v22 = vshrl.u32 %v16927_v0, 16 }
 0x191   : > { %v14150_v53 = vpack.c.bf16 %v1812_v51, %v1812_v51  ;;  %1948 = vst [vmem:[#allocation2 + $0x28] sm:$0xf] %v1947_v15  ;;  %1951 = vst [vmem:[#allocation2 + $0x2c] sm:$0x1] %v1950_v29  ;;  %vm1797_vm13 = vcmp.ge.f32.partialorder %v1789_v54, 0.0  ;;  %v1884_v55 = vor.u32 %v1882_v44, %v1881_v36  ;;  %v1885_v8 = vrot.slane %v1881_v36, 4  ;;  %2265 = vrot.lane.b32.xlu0 %v13336_v61, %s16183_s28 }
 0x192   : > { %v1805_v43 = vmul.f32 0.01, %v1789_v54  ;;  %v13319_v2 = vrot.slane %v2133_v32, 9  ;;  %v2174_v10 = vrot.slane %v16924_v62, 5  ;;  %v1958_v13 = vld [vmem:[#allocation2 + $0x38] sm:$0xf]  ;;  %v2171_v20 = vsel %vm16420_vm9, %v13318_v25, %v2170_v33 }
 0x193   : > { %v1887_v26 = vshrl.u32 %v14150_v53, 16  ;;  %v1890_v52 = vshll.u32 %v14150_v53, 16  ;;  %v1953_v4 = vsel %vm16833_vm2, %v1884_v55, %v1952_v58  ;;  %v1956_v16 = vsel %vm16839_vm4, %v1885_v8, %v1955_v5  ;;  %v1961_v17 = vld [vmem:[#allocation2 + $0x3c] sm:$0x1]  ;;  %v16939_v9 = vld [vmem:[#allocation2 + $0x18] sm:$0xf] }
 0x194   : > { %v1813_v50 = vsel %vm1797_vm13, %v1789_v54, %v1805_v43  ;;  %1954 = vst [vmem:[#allocation2 + $0x30] sm:$0xf] %v1953_v4  ;;  %1957 = vst [vmem:[#allocation2 + $0x34] sm:$0x1] %v1956_v16  ;;  %v2175_v21 = vsel %vm16420_vm9, %v13319_v2, %v2174_v10  ;;  %v2022_v28 = vshll.u32 %v16927_v0, 16  ;;  %v2028_v19 = vshll.u32 %v16911_v46, 16 }
 0x195   : > { %v1889_v6 = vrot.slane %v1887_v26, 7  ;;  %v14151_v56 = vpack.c.bf16 %v1813_v50, %v1813_v50  ;;  %v2134_v12 = vld [vmem:[#allocation2 + $0x20] sm:$0xe]  ;;  %v13337_v18 = vcombine.low %v2171_v20, %v2175_v21  ;;  %v2021_v38 = vrot.slane %v2019_v22, 4  ;;  %v16944_v44 = vld [vmem:[#allocation2 + $0x24] sm:$0x1] }
 0x196   : > { %v2024_v14 = vrot.slane %v2022_v28, 5  ;;  %v2033_v54 = vshrl.u32 %v16939_v9, 16  ;;  %v16951_v46 = vld [vmem:[#allocation2 + $0x8] sm:$0xf]  ;;  %v2036_v49 = vshll.u32 %v16939_v9, 16  ;;  %v2042_v15 = vshll.u32 %v16924_v62, 16 }
 0x197   : > { %v1892_v31 = vor.u32 %v1890_v52, %v1889_v6  ;;  %v1893_v45 = vrot.slane %v1889_v6, 4  ;;  %v1895_v27 = vshrl.u32 %v14151_v56, 16  ;;  %v1898_v60 = vshll.u32 %v14151_v56, 16  ;;  %2267 = vrot.lane.b32.xlu0 %v13337_v18, %s16183_s28  ;;  %v15673_v53 = vld [vmem:[%s21345_s2 + $0x2f8] sm:$0xff]   ;;  %v15674_v8 = vld [vmem:[%s21345_s2 + $0x340] sm:$0xff]   ;;  %v15680_v18 = vld [vmem:[%s21345_s2 + $0x308] sm:$0xff]  }
 0x198   : > { %v2135_v57 = vld [vmem:[#allocation2 + $0x28] sm:$0xe]  ;;  %v2025_v25 = vor.u32 %v2024_v14, %v2021_v38  ;;  %v16956_v29 = vld [vmem:[#allocation2 + $0x2c] sm:$0x1]  ;;  %v13320_v36 = vrot.slane %v2134_v12, 9  ;;  %v2035_v33 = vrot.slane %v2033_v54, 4  ;;  %14384 = vmatpush3.bf16.msra.mxu0 %v15673_v53 }
 0x199   : > { %v1959_v58 = vsel %vm16833_vm2, %v1892_v31, %v1958_v13  ;;  %v1962_v5 = vsel %vm16839_vm4, %v1893_v45, %v1961_v17  ;;  %v1897_v51 = vrot.slane %v1895_v27, 7  ;;  %v2178_v55 = vrot.slane %v16944_v44, 5  ;;  %v15676_v62 = vld [vmem:[%s21345_s2 + $0x280] sm:$0xff]   ;;  %14385 = vmatprep.subr.bf16.mxu0 %v15674_v8  ;;  %v16995_v27 = vld [vmem:[#allocation2 + $0x28] sm:$0xf] }
 0x19a   : > { %1960 = vst [vmem:[#allocation2 + $0x38] sm:$0xf] %v1959_v58  ;;  %1963 = vst [vmem:[#allocation2 + $0x3c] sm:$0x1] %v1962_v5  ;;  %v2030_v26 = vrot.slane %v2028_v19, 5  ;;  %v2038_v32 = vrot.slane %v2036_v49, 5  ;;  %14419 = vmatprep.subr.bf16.mxu1 %v15676_v62  ;;  %v2199_v5 = vsel %vm16420_vm9, %v13325_v47, %v2198_v24 }
 0x19b   : > { %v1900_v43 = vor.u32 %v1898_v60, %v1897_v51  ;;  %v1901_v61 = vrot.slane %v1897_v51, 4  ;;  %v13321_v52 = vrot.slane %v2135_v57, 9  ;;  %v16970_v50 = vrot.slane %v2120_v1, 5  ;;  %v15675_v2 = vld [vmem:[%s21345_s2 + $0x300] sm:$0xff]   ;;  %v16980_v13 = vld [vmem:[#allocation2 + $0x30] sm:$0xe] }
 0x19c   : > { %v2026_v16 = vrot.slane %v2025_v25, 4  ;;  %v2182_v6 = vrot.slane %v16956_v29, 5  ;;  %v2039_v1 = vor.u32 %v2038_v32, %v2035_v33  ;;  %v2044_v56 = vrot.slane %v2042_v15, 5  ;;  %v16987_v21 = vld [vmem:[#allocation2 + $0x20] sm:$0xf]  ;;  %14386 = vmatpush3.bf16.msra.mxu0 %v15675_v2 }
 0x19d   : > { %v1965_v10 = vsel %vm16833_vm2, %v1900_v43, %v1964_v7  ;;  %v1968_v4 = vsel %vm16839_vm4, %v1901_v61, %v1967_v35  ;;  %v2005_v17 = vshrl.u32 %v16951_v46, 16  ;;  %v2008_v20 = vshll.u32 %v16951_v46, 16  ;;  %v16997_v35 = vld [vmem:[#allocation2 + $0x34] sm:$0x1]  ;;  %14387 = vmatprep.subr.bf16.mxu0 %v15679_v41  ;;  %v15683_v54 = vld [vmem:[%s21345_s2 + $0x3a0] sm:$0xff]  }
 0x19e   : > { %1966 = vst [vmem:[#allocation2 + $0x40] sm:$0xf] %v1965_v10  ;;  %1969 = vst [vmem:[#allocation2 + $0x44] sm:$0x1] %v1968_v4  ;;  %v2179_v22 = vsel %vm16420_vm9, %v13320_v36, %v2178_v55  ;;  %v2183_v28 = vsel %vm16420_vm9, %v13321_v52, %v2182_v6  ;;  %v2014_v31 = vshll.u32 %v16891_v11, 16  ;;  %v13322_v45 = vrot.slane %v16980_v13, 9 }
 0x19f   : > { %v2040_v19 = vrot.slane %v2039_v1, 4  ;;  %v13338_v12 = vcombine.low %v2179_v22, %v2183_v28  ;;  %v2007_v60 = vrot.slane %v2005_v17, 4  ;;  %v2010_v7 = vrot.slane %v2008_v20, 5  ;;  %v17028_v43 = vld [vmem:[#allocation2 + $0x30] sm:$0xf] }
 0x1a0   : > { %v2031_v38 = vsel %vm16454_vm12, %v2026_v16, %v2030_v26  ;;  %v2003_v11 = vsel %vm16454_vm12, %v16800_v42, %v16807_v59  ;;  %v2047_v51 = vshrl.u32 %v16987_v21, 16  ;;  %v2186_v25 = vrot.slane %v16997_v35, 5  ;;  %14388 = vmatpush3.bf16.msra.mxu0 %v15680_v18 }
 0x1a1   : > { %v17008_v14 = vld [vmem:[#allocation2 + $0x3c] sm:$0x1]  ;;  %v2137_v58 = vld [vmem:[#allocation2 + $0x38] sm:$0xe]  ;;  %v2045_v42 = vsel %vm16454_vm12, %v2040_v19, %v2044_v56  ;;  %2269 = vrot.lane.b32.xlu1 %v13338_v12, %s16183_s28  ;;  %v2011_v59 = vor.u32 %v2010_v7, %v2007_v60  ;;  %v2050_v24 = vshll.u32 %v16987_v21, 16  ;;  %v2016_v15 = vrot.slane %v2014_v31, 5  ;;  %14465 = vmatprep.subr.bf16.mxu0 %v15683_v54 }
 0x1a2   : > { %v13323_v57 = vrot.slane %v2137_v58, 9  ;;  %v2190_v37 = vrot.slane %v17008_v14, 5  ;;  %v13332_v34 = vcombine.low %v2031_v38, %v2045_v42  ;;  %v2049_v47 = vrot.slane %v2047_v51, 4  ;;  %v17039_v41 = vld [vmem:[#allocation2 + $0x38] sm:$0xf] }
 0x1a3   : > { %v2012_v49 = vrot.slane %v2011_v59, 4  ;;  %v2061_v36 = vshrl.u32 %v16995_v27, 16  ;;  %v2064_v53 = vshll.u32 %v16995_v27, 16  ;;  %v2052_v8 = vrot.slane %v2050_v24, 5 }
 0x1a4   : > { %2242 = vrot.lane.b32.xlu0 %v13332_v34, %s16184_s5  ;;  %v2191_v61 = vsel %vm16420_vm9, %v13323_v57, %v2190_v37  ;;  %v2056_v62 = vshll.u32 %v16944_v44, 16  ;;  %v2123_v26 = vor.u32 %v16970_v50, %v16858_v23  ;;  %v2070_v13 = vshll.u32 %v16956_v29, 16 }
 0x1a5   : > { %v1988_v33 = vld [vmem:[#allocation2 + $0x44] sm:$0x1]  ;;  %v2138_v55 = vld [vmem:[#allocation2 + $0x40] sm:$0xe]  ;;  %v2017_v32 = vsel %vm16454_vm12, %v2012_v49, %v2016_v15  ;;  %v2063_v10 = vrot.slane %v2061_v36, 4  ;;  %v2053_v16 = vor.u32 %v2052_v8, %v2049_v47  ;;  %v2066_v6 = vrot.slane %v2064_v53, 5 }
 0x1a6   : > { %v13324_v52 = vrot.slane %v2138_v55, 9  ;;  %v2194_v2 = vrot.slane %v1988_v33, 5  ;;  %v13331_v4 = vcombine.low %v2003_v11, %v2017_v32  ;;  %v2187_v44 = vsel %vm16420_vm9, %v13322_v45, %v2186_v25  ;;  %v17048_v28 = vld [vmem:[#allocation2 + $0x40] sm:$0xf] }
 0x1a7   : > { %v2075_v50 = vshrl.u32 %v17028_v43, 16  ;;  %v2078_v1 = vshll.u32 %v17028_v43, 16  ;;  %v13339_v56 = vcombine.low %v2187_v44, %v2191_v61  ;;  %v2058_v20 = vrot.slane %v2056_v62, 5  ;;  %v15681_v44 = vld [vmem:[%s21345_s2 + $0x288] sm:$0xff]  }
 0x1a8   : > { %v2195_v23 = vsel %vm16420_vm9, %v13324_v52, %v2194_v2  ;;  %2240 = vrot.lane.b32.xlu1 %v13331_v4, %s16184_s5  ;;  %v2067_v22 = vor.u32 %v2066_v6, %v2063_v10  ;;  %v2054_v29 = vrot.slane %v2053_v16, 4  ;;  %v2089_v45 = vshrl.u32 %v17039_v41, 16 }
 0x1a9   : > { %v13340_v17 = vcombine.low %v2195_v23, %v2199_v5  ;;  %v2077_v31 = vrot.slane %v2075_v50, 4  ;;  %v2080_v19 = vrot.slane %v2078_v1, 5  ;;  %v2072_v60 = vrot.slane %v2070_v13, 5  ;;  %v15677_v13 = vld [vmem:[%s21345_s2 + $0x240] sm:$0xff]  }
 0x1aa   : > { %v2068_v12 = vrot.slane %v2067_v22, 4  ;;  %v2084_v7 = vshll.u32 %v16997_v35, 16  ;;  %v2092_v18 = vshll.u32 %v17039_v41, 16  ;;  %v2091_v11 = vrot.slane %v2089_v45, 4  ;;  %v16100_v22 = vld [vmem:[#allocation2] sm:$0xf] }
 0x1ab   : > { %2273 = vrot.lane.b32.xlu0 %v13340_v17, %s16183_s28  ;;  %v2081_v38 = vor.u32 %v2080_v19, %v2077_v31  ;;  %v2103_v58 = vshrl.u32 %v17048_v28, 16  ;;  %v2106_v5 = vshll.u32 %v17048_v28, 16  ;;  %v2098_v42 = vshll.u32 %v17008_v14, 16 }
 0x1ac   : > { %2271 = vrot.lane.b32.xlu1 %v13339_v56, %s16183_s28  ;;  %v2073_v51 = vsel %vm16454_vm12, %v2068_v12, %v2072_v60  ;;  %v2094_v54 = vrot.slane %v2092_v18, 5  ;;  %v2124_v59 = vrot.slane %v2123_v26, 4  ;;  %v2059_v35 = vsel %vm16454_vm12, %v2054_v29, %v2058_v20  ;;  %v15682_v56 = vld [vmem:[%s21345_s2 + $0x248] sm:$0xff]   ;;  %v15686_v18 = vld [vmem:[%s21345_s2 + $0x250] sm:$0xff]  }
 0x1ad   : > { %v2105_v57 = vrot.slane %v2103_v58, 4  ;;  %v2108_v37 = vrot.slane %v2106_v5, 5  ;;  %v2112_v34 = vshll.u32 %v1988_v33, 16  ;;  %v13333_v25 = vcombine.low %v2059_v35, %v2073_v51  ;;  %v15690_v58 = vld [vmem:[%s21345_s2 + $0x298] sm:$0xff]  }
 0x1ae   : > { %v2082_v47 = vrot.slane %v2081_v38, 4  ;;  %v2095_v24 = vor.u32 %v2094_v54, %v2091_v11  ;;  %v2086_v49 = vrot.slane %v2084_v7, 5  ;;  %v2100_v53 = vrot.slane %v2098_v42, 5  ;;  %v15685_v11 = vld [vmem:[%s21345_s2 + $0x360] sm:$0xff]   ;;  %v15689_v42 = vld [vmem:[%s21345_s2 + $0x3a8] sm:$0xff]   ;;  %v15692_v35 = vld [vmem:[%s21345_s2 + $0x258] sm:$0xff]  }
 0x1af   : > { %v2109_v15 = vor.u32 %v2108_v37, %v2105_v57  ;;  %v2114_v55 = vrot.slane %v2112_v34, 5  ;;  %v2129_v14 = vsel %vm16454_vm12, %v2124_v59, %v16828_v30  ;;  %v13327_v1 = vcombine.low %v16927_v0, %v16939_v9  ;;  %v15684_v0 = vld [vmem:[%s21345_s2 + $0x290] sm:$0xff]  }
 0x1b0   : > { %2244 = vrot.lane.b32.xlu1 %v13333_v25, %s16184_s5  ;;  %v2096_v36 = vrot.slane %v2095_v24, 4  ;;  %v2087_v8 = vsel %vm16454_vm12, %v2082_v47, %v2086_v49  ;;  %v13326_v29 = vcombine.low %v16100_v22, %v16951_v46  ;;  %v13328_v37 = vcombine.low %v16987_v21, %v16995_v27  ;;  %v15691_v25 = vld [vmem:[%s21345_s2 + $0x368] sm:$0xff]   ;;  %v15695_v47 = vld [vmem:[%s21345_s2 + $0x2a0] sm:$0xff]   ;;  %v15694_v49 = vld [vmem:[%s21345_s2 + $0x3b0] sm:$0xff]  }
 0x1b1   : > { %v2110_v61 = vrot.slane %v2109_v15, 4  ;;  %v15704_v22 = vld [vmem:[%s21345_s2 + $0x380] sm:$0xff]  }
 0x1b2   : > { %v2101_v33 = vsel %vm16454_vm12, %v2096_v36, %v2100_v53  ;;  %v15697_v53 = vld [vmem:[%s21345_s2 + $0x260] sm:$0xff]  }
 0x1b3   : > { %v13334_v62 = vcombine.low %v2087_v8, %v2101_v33  ;;  %v2115_v26 = vsel %vm16454_vm12, %v2110_v61, %v2114_v55  ;;  %v15696_v61 = vld [vmem:[%s21345_s2 + $0x370] sm:$0xff]   ;;  %v15699_v55 = vld [vmem:[%s21345_s2 + $0x2a8] sm:$0xff]  }
 0x1b4   : > { %v13335_v32 = vcombine.low %v2115_v26, %v2129_v14  ;;  %v13329_v14 = vcombine.low %v17028_v43, %v17039_v41  ;;  %v15701_v43 = vld [vmem:[%s21345_s2 + $0x268] sm:$0xff]  }
 0x1b5   : > { %2246 = vrot.lane.b32.xlu0 %v13334_v62, %s16184_s5  ;;  %v15698_v62 = vld [vmem:[%s21345_s2 + $0x3b8] sm:$0xff]  }
 0x1b6   : > { %2248 = vrot.lane.b32.xlu1 %v13335_v32, %s16184_s5 }
 0x203   : > { %v17074_v52 = vpop.permute.xlu0 %2265 }
 0x204   : > { %v2400_v30 = vrot.slane %v17074_v52, 4 }
 0x209   : > { %v17076_v2 = vpop.permute.xlu0 %2267 }
 0x20a   : > { %v2401_v10 = vrot.slane %v17076_v2, 4 }
 0x20c   : > { %v2402_v4 = vsel %vm408_vm5, %v2400_v30, %v2401_v10 }
 0x20d   : > { %15061 = vmatprep.mubr.msk.bf16.mxu1 %vm2537_vm14, %v2402_v4 }
 0x213   : > { %v17082_v16 = vpop.permute.xlu1 %2269 }
 0x214   : > { %v2407_v6 = vrot.slane %v17082_v16, 4 }
 0x216   : > { %v2243_v23 = vpop.permute.xlu0 %2242  ;;  %v2408_v50 = vsel %vm408_vm5, %v2401_v10, %v2407_v6 }
 0x217   : > { %15062 = vmatmul.mubr.msk.bf16.vlgmr.msra.gmra.mrb[8].mxu1 %vm2537_vm14, %v2408_v50  ;;  %v17099_v17 = vsel %vm2275_vm15, %v13327_v1, %v2243_v23  ;;  %v17103_v20 = vsel %vm2296_vm0, %v2243_v23, %v17076_v2 }
 0x218   : > { %14420 = vmatpush3.bf16.msra.mxu1 %v15677_v13  ;;  %v2395_v45 = vrot.slane %v17099_v17, 4  ;;  %v2398_v12 = vrot.slane %v17103_v20, 4  ;;  %v15703_v13 = vld [vmem:[%s21345_s2 + $0x2b0] sm:$0xff]  }
 0x219   : > { %14421 = vmatprep.subr.bf16.mxu1 %v15681_v44  ;;  %v15702_v44 = vld [vmem:[%s21345_s2 + $0x3c0] sm:$0xff]  }
 0x21a   : > { %v2241_v9 = vpop.permute.xlu1 %2240 }
 0x21b   : > { %v17110_v31 = vsel %vm2275_vm15, %v13326_v29, %v2241_v9  ;;  %v2298_v19 = vsel %vm2296_vm0, %v2241_v9, %v17074_v52  ;;  %v16101_v29 = vld [vmem:[#allocation2 + $0x48] sm:$0xf] }
 0x21c   : > { %v2394_v60 = vrot.slane %v17110_v31, 4  ;;  %v2397_v7 = vrot.slane %v2298_v19, 4  ;;  %14422 = vmatpush3.bf16.msra.mxu1 %v15682_v56  ;;  %v15705_v56 = vld [vmem:[%s21345_s2 + $0x270] sm:$0xff]   ;;  %v15706_v9 = vld [vmem:[%s21345_s2 + $0x3c8] sm:$0xff]  }
 0x21d   : > { %v17117_v46 = vpop.permute.xlu0 %2273  ;;  %14423 = vmatprep.subr.bf16.mxu1 %v15684_v0  ;;  %v13330_v0 = vcombine.low %v17048_v28, %v16101_v29  ;;  %v15709_v28 = vld [vmem:[%s21345_s2 + $0x278] sm:$0xff]   ;;  %v15732_v29 = vld [vmem:[%s21345_s2 + $0x4d0] sm:$0xff]  }
 0x21e   : > { %v2419_v38 = vrot.slane %v17117_v46, 4  ;;  %v17129_v5 = vpop.permute.xlu1 %2271  ;;  %v2399_v51 = vsel %vm408_vm5, %v2397_v7, %v2398_v12  ;;  %v2396_v54 = vsel %vm408_vm5, %v2394_v60, %v2395_v45  ;;  %v15708_v7 = vld [vmem:[%s21345_s2 + $0x388] sm:$0xff]  }
 0x21f   : > { %v2413_v59 = vrot.slane %v17129_v5, 4  ;;  %2582 = vmatprep.mubr.bf16.mxu0 %v2399_v51  ;;  %v15713_v51 = vld [vmem:[%s21345_s2 + $0x3d8] sm:$0xff]  }
 0x220   : > { %2583 = vmatmul.mubr.bf16.vlgmr.msra.gmra.mrb[48].mxu0 %v2396_v54  ;;  %14424 = vmatpush3.bf16.msra.mxu1 %v15686_v18  ;;  %v15711_v18 = vld [vmem:[%s21345_s2 + $0x2c0] sm:$0xff]  }
 0x221   : > { %14466 = vmatpush3.bf16.msra.mxu0 %v15685_v11  ;;  %v2414_v57 = vsel %vm408_vm5, %v2407_v6, %v2413_v59  ;;  %v2420_v34 = vsel %vm408_vm5, %v2413_v59, %v2419_v38  ;;  %14425 = vmatprep.subr.bf16.mxu1 %v15690_v58  ;;  %v15700_v6 = vld [vmem:[%s21345_s2 + $0x378] sm:$0xff]   ;;  %v15710_v38 = vld [vmem:[%s21345_s2 + $0x3d0] sm:$0xff]  }
 0x222   : > { %15065 = vmatprep.mubr.msk.bf16.mxu1 %vm2537_vm14, %v2414_v57  ;;  %v2245_v24 = vpop.permute.xlu1 %2244  ;;  %14467 = vmatprep.subr.bf16.mxu0 %v15689_v42  ;;  %v15712_v58 = vld [vmem:[%s21345_s2 + $0x390] sm:$0xff]   ;;  %v15715_v42 = vld [vmem:[%s21345_s2 + $0x2c8] sm:$0xff]   ;;  %v15714_v59 = vld [vmem:[%s21345_s2 + $0x398] sm:$0xff]  }
 0x223   : > { %v17155_v21 = vsel %vm2275_vm15, %v13328_v37, %v2245_v24  ;;  %v17159_v27 = vsel %vm2296_vm0, %v2245_v24, %v17082_v16  ;;  %15066 = vmatmul.mubr.msk.bf16.gmra.mrb[12].mxu1 %vm2537_vm14, %v2420_v34  ;;  %v15718_v57 = vld [vmem:[%s21345_s2 + $0x400] sm:$0xff]   ;;  %v15719_v37 = vld [vmem:[%s21345_s2 + $0x408] sm:$0xff]   ;;  %v15722_v34 = vld [vmem:[%s21345_s2 + $0x418] sm:$0xff]  }
 0x224   : > { %v2403_v15 = vrot.slane %v17155_v21, 4  ;;  %v2405_v36 = vrot.slane %v17159_v27, 4  ;;  %2828 = vmatprep.mubr.bf16.mxu1 %v2298_v19  ;;  %14426 = vmatpush3.bf16.msra.mxu1 %v15692_v35  ;;  %v15707_v19 = vld [vmem:[%s21345_s2 + $0x2b8] sm:$0xff]   ;;  %v15720_v35 = vld [vmem:[%s21345_s2 + $0x3e0] sm:$0xff]  }
 0x225   : > { %14468 = vmatpush3.bf16.msra.mxu0 %v15691_v25  ;;  %14427 = vmatprep.subr.bf16.mxu1 %v15695_v47  ;;  %v15724_v25 = vld [vmem:[%s21345_s2 + $0x420] sm:$0xff]   ;;  %v15723_v47 = vld [vmem:[%s21345_s2 + $0x3e8] sm:$0xff]  }
 0x226   : > { %v2406_v8 = vsel %vm408_vm5, %v2398_v12, %v2405_v36  ;;  %v2404_v33 = vsel %vm408_vm5, %v2395_v45, %v2403_v15  ;;  %14469 = vmatprep.subr.bf16.mxu0 %v15694_v49  ;;  %v16102_v24 = vld [vmem:[%s16339_s14] sm:$0xff]  ;;  %v16103_v49 = vld [vmem:[%s16339_s14 + $0x8] sm:$0xff] }
 0x227   : > { %v2247_v26 = vpop.permute.xlu0 %2246  ;;  %2590 = vmatprep.mubr.bf16.mxu0 %v2406_v8  ;;  %v16109_v8 = vld [vmem:[%s16339_s14 + $0x38] sm:$0xff] }
 0x228   : > { %v17181_v32 = vsel %vm2275_vm15, %v13329_v14, %v2247_v26  ;;  %v17185_v30 = vsel %vm2296_vm0, %v2247_v26, %v17129_v5  ;;  %v2249_v10 = vpop.permute.xlu1 %2248  ;;  %2591 = vmatmul.mubr.bf16.gmra.mrb[52].mxu0 %v2404_v33  ;;  %14428 = vmatpush3.bf16.msra.mxu1 %v15697_v53  ;;  %v16106_v53 = vld [vmem:[%s16339_s14 + $0x20] sm:$0xff]  ;;  %v16108_v14 = vld [vmem:[%s16339_s14 + $0x30] sm:$0xff] }
 0x229   : > { %v2411_v41 = vrot.slane %v17185_v30, 4  ;;  %v17193_v4 = vsel %vm2296_vm0, %v2249_v10, %v17117_v46  ;;  %14470 = vmatpush3.bf16.msra.mxu0 %v15696_v61  ;;  %14429 = vmatprep.subr.bf16.mxu1 %v15699_v55  ;;  %v2409_v23 = vrot.slane %v17181_v32, 4  ;;  %v17222_v12 = vsel %vm2275_vm15, %v13330_v0, %v2249_v10  ;;  %v16107_v61 = vld [vmem:[%s16339_s14 + $0x28] sm:$0xff] }
 0x22a   : > { %14471 = vmatprep.subr.bf16.mxu0 %v15698_v62  ;;  %v2417_v1 = vrot.slane %v17193_v4, 4  ;;  %v2415_v11 = vrot.slane %v17222_v12, 4  ;;  %v305_v55 = vpack.c.bf16 %v16107_v61, %v16106_v53  ;;  %v306_v33 = vpack.c.bf16 %v16109_v8, %v16108_v14 }
 0x22b   : > { %v2412_v50 = vsel %vm408_vm5, %v2405_v36, %v2411_v41  ;;  %v2410_v45 = vsel %vm408_vm5, %v2403_v15, %v2409_v23  ;;  %v16105_v15 = vld [vmem:[%s16339_s14 + $0x18] sm:$0xff] }
 0x22c   : > { %2598 = vmatprep.mubr.bf16.mxu0 %v2412_v50  ;;  %14430 = vmatpush3.bf16.msra.mxu1 %v15701_v43  ;;  %v2418_v60 = vsel %vm408_vm5, %v2411_v41, %v2417_v1  ;;  %v2416_v54 = vsel %vm408_vm5, %v2409_v23, %v2415_v11  ;;  %v15729_v50 = vld [vmem:[%s21345_s2 + $0x4c8] sm:$0xff]   ;;  %v15731_v1 = vld [vmem:[%s21345_s2 + $0x510] sm:$0xff]  }
 0x22d   : > { %14472 = vmatpush3.bf16.msra.mxu0 %v15700_v6  ;;  %14431 = vmatprep.subr.bf16.mxu1 %v15703_v13 }
 0x22e   : > { %14473 = vmatprep.subr.bf16.mxu0 %v15702_v44  ;;  %v15730_v44 = vld [vmem:[%s21345_s2 + $0x540] sm:$0xff]  }
 0x230   : > { %2599 = vmatmul.mubr.bf16.gmra.mrb[56].mxu0 %v2410_v45  ;;  %14432 = vmatpush3.bf16.msra.mxu1 %v15705_v56 }
 0x231   : > { %2606 = vmatprep.mubr.bf16.mxu0 %v2418_v60  ;;  %14474 = vmatpush3.bf16.msra.mxu0 %v15704_v22 }
 0x232   : > { %14475 = vmatprep.subr.bf16.mxu0 %v15706_v9  ;;  %14433 = vmatprep.subr.bf16.mxu1 %v15707_v19 }
 0x234   : > { %14434 = vmatpush3.bf16.msra.mxu1 %v15709_v28 }
 0x235   : > { %14476 = vmatpush3.bf16.msra.mxu0 %v15708_v7  ;;  %15069 = vmatprep.subr.bf16.mxu1 %v15711_v18 }
 0x236   : > { %14477 = vmatprep.subr.bf16.mxu0 %v15710_v38 }
 0x237   : > { %2829 = vmatmul.mubr.bf16.vlgmr.msra.gmra.mrb[16].mxu1 %v17110_v31  ;;  %v15716_v31 = vld [vmem:[%s21345_s2 + $0x3f0] sm:$0xff]  }
 0x238   : > { %2607 = vmatmul.mubr.bf16.gmra.mrb[60].mxu0 %v2416_v54  ;;  %2836 = vmatprep.mubr.bf16.mxu1 %v17103_v20 }
 0x239   : > { %14478 = vmatpush3.bf16.msra.mxu0 %v15712_v58  ;;  %3104 = vmatprep.mubr.bf16.mxu0 %v17103_v20  ;;  %v15717_v20 = vld [vmem:[%s21345_s2 + $0x3f8] sm:$0xff]  }
 0x23a   : > { %15070 = vmatpush3.bf16.msra.mxu1 %v15711_v18  ;;  %14479 = vmatprep.subr.bf16.mxu0 %v15713_v51 }
 0x23b   : > { %15071 = vmatprep.subr.bf16.mxu1 %v15715_v42 }
 0x23d   : > { %14480 = vmatpush3.bf16.msra.mxu0 %v15714_v59 }
 0x23e   : > { %15072 = vmatpush3.bf16.msra.mxu1 %v15715_v42  ;;  %15093 = vmatprep.subr.bf16.mxu0 %v15716_v31 }
 0x23f   : > { %2837 = vmatmul.mubr.bf16.gmra.mrb[20].mxu1 %v17099_v17  ;;  %15081 = vmatprep.subr.bf16.mxu1 %v15720_v35 }
 0x240   : > { %3105 = vmatmul.mubr.bf16.vlgmr.msra.gmra.mrb[64].mxu0 %v17099_v17  ;;  %2844 = vmatprep.mubr.bf16.mxu1 %v17159_v27  ;;  %v15721_v17 = vld [vmem:[%s21345_s2 + $0x410] sm:$0xff]  }
 0x241   : > { %3112 = vmatprep.mubr.bf16.mxu0 %v17159_v27  ;;  %15094 = vmatpush3.bf16.msra.mxu0 %v15716_v31  ;;  %v16104_v27 = vld [vmem:[%s16339_s14 + $0x10] sm:$0xff] }
 0x242   : > { %15095 = vmatprep.subr.bf16.mxu0 %v15717_v20  ;;  %v304_v36 = vpack.c.bf16 %v16105_v15, %v16104_v27 }
 0x245   : > { %15096 = vmatpush3.bf16.msra.mxu0 %v15717_v20 }
 0x246   : > { %15097 = vmatprep.subr.bf16.mxu0 %v15718_v57 }
 0x247   : > { %2845 = vmatmul.mubr.bf16.gmra.mrb[24].mxu1 %v17155_v21 }
 0x248   : > { %3113 = vmatmul.mubr.bf16.gmra.mrb[68].mxu0 %v17155_v21  ;;  %2852 = vmatprep.mubr.bf16.mxu1 %v17185_v30  ;;  %v303_v21 = vpack.c.bf16 %v16103_v49, %v16102_v24 }
 0x249   : > { %3120 = vmatprep.mubr.bf16.mxu0 %v17185_v30  ;;  %15098 = vmatpush3.bf16.msra.mxu0 %v15718_v57 }
 0x24a   : > { %15099 = vmatprep.subr.bf16.mxu0 %v15719_v37 }
 0x24d   : > { %15100 = vmatpush3.bf16.msra.mxu0 %v15719_v37 }
 0x24e   : > { %15101 = vmatprep.subr.bf16.mxu0 %v15721_v17 }
 0x24f   : > { %2853 = vmatmul.mubr.bf16.gmra.mrb[28].mxu1 %v17181_v32 }
 0x250   : > { %3121 = vmatmul.mubr.bf16.gmra.mrb[72].mxu0 %v17181_v32  ;;  %15073 = vmatprep.mubr.msk.bf16.mxu1 %vm2537_vm14, %v17074_v52  ;;  %v15725_v52 = vld [vmem:[%s21345_s2 + $0x428] sm:$0xff]  }
 0x251   : > { %3128 = vmatprep.mubr.bf16.mxu0 %v17193_v4  ;;  %15102 = vmatpush3.bf16.msra.mxu0 %v15721_v17 }
 0x252   : > { %15103 = vmatprep.subr.bf16.mxu0 %v15722_v34 }
 0x255   : > { %15104 = vmatpush3.bf16.msra.mxu0 %v15722_v34 }
 0x256   : > { %15105 = vmatprep.subr.bf16.mxu0 %v15724_v25 }
 0x257   : > { %15074 = vmatmul.mubr.msk.bf16.vlgmr.msra.gmra.mrb[8].mxu1 %vm2537_vm14, %v17076_v2 }
 0x258   : > { %3129 = vmatmul.mubr.bf16.gmra.mrb[76].mxu0 %v17222_v12  ;;  %15077 = vmatprep.mubr.msk.bf16.mxu1 %vm2537_vm14, %v17082_v16 }
 0x259   : > { %15082 = vmatpush3.bf16.msra.mxu1 %v15720_v35  ;;  %15106 = vmatpush3.bf16.msra.mxu0 %v15724_v25 }
 0x25a   : > { %15083 = vmatprep.subr.bf16.mxu1 %v15723_v47  ;;  %15107 = vmatprep.subr.bf16.mxu0 %v15725_v52 }
 0x25b   : > { %15109 = vmatprep.mubr.bf16.mxu0 %v303_v21 }
 0x25d   : > { %15084 = vmatpush3.bf16.msra.mxu1 %v15723_v47  ;;  %15108 = vmatpush3.bf16.msra.mxu0 %v15725_v52 }
 0x25e   : > { %15117 = vmatprep.subr.bf16.mxu1 %v15730_v44 }
 0x25f   : > { %15078 = vmatmul.mubr.msk.bf16.gmra.mrb[12].mxu1 %vm2537_vm14, %v17129_v5 }
 0x260   : > { %15085 = vmatprep.mubr.msk.bf16.mxu1 %vm2537_vm14, %v17076_v2  ;;  %15110 = vmatmul.mubr.bf16.vlgmr.msra.gmra.mrb[80].mxu0 %v304_v36 }
 0x261   : > { %15113 = vmatprep.mubr.bf16.mxu0 %v305_v55 }
 0x267   : > { %15086 = vmatmul.mubr.msk.bf16.vlgmr.msra.gmra.mrb[8].mxu1 %vm2537_vm14, %v17082_v16  ;;  %v15726_v16 = vld [vmem:[%s21345_s2 + $0x500] sm:$0xff]  }
 0x268   : > { %15089 = vmatprep.mubr.msk.bf16.mxu1 %vm2537_vm14, %v17129_v5  ;;  %15114 = vmatmul.mubr.bf16.gmra.mrb[84].mxu0 %v306_v33  ;;  %v15727_v5 = vld [vmem:[%s21345_s2 + $0x4c0] sm:$0xff]  }
 0x269   : > { %14523 = vmatprep.subr.bf16.mxu0 %v15726_v16  ;;  %15118 = vmatpush3.bf16.msra.mxu1 %v15730_v44 }
 0x26a   : > { %14524 = vmatpush3.bf16.msra.mxu0 %v15727_v5 }
 0x26f   : > { %15090 = vmatmul.mubr.msk.bf16.gmra.mrb[12].mxu1 %vm2537_vm14, %v17117_v46  ;;  %v15728_v46 = vld [vmem:[%s21345_s2 + $0x508] sm:$0xff]  }
 0x270   : > { %14525 = vmatprep.subr.bf16.mxu0 %v15728_v46 }
 0x271   : > { %14526 = vmatpush3.bf16.msra.mxu0 %v15729_v50 }
 0x272   : > { %14527 = vmatprep.subr.bf16.mxu0 %v15731_v1 }
 0x275   : > { %14528 = vmatpush3.bf16.msra.mxu0 %v15732_v29 }
 0x2f3   : > { %v14389_v62 = vpop.f32.mrb[48].mxu0 }
 0x2f4   : > { %v14390_v26 = vpop.f32.mrb[49].mxu0 }
 0x2f5   : > { %v14391_v32 = vadd.f32 %v14390_v26, %v14389_v62  ;;  %v14392_v30 = vpop.f32.mrb[50].mxu0 }
 0x2f6   : > { %v14393_v2 = vpop.f32.mrb[51].mxu0 }
 0x2f7   : > { %v14394_v10 = vadd.f32 %v14393_v2, %v14392_v30 }
 0x2fb   : > { %v14395_v43 = vpop.f32.mrb[52].mxu0 }
 0x2fc   : > { %v14396_v41 = vpop.f32.mrb[53].mxu0 }
 0x2fd   : > { %v14397_v4 = vadd.f32 %v14396_v41, %v14395_v43  ;;  %v14398_v6 = vpop.f32.mrb[54].mxu0 }
 0x2fe   : > { %v14399_v13 = vpop.f32.mrb[55].mxu0 }
 0x2ff   : > { %v14400_v23 = vadd.f32 %v14399_v13, %v14398_v6 }
 0x303   : > { %v14401_v56 = vpop.f32.mrb[56].mxu0 }
 0x304   : > { %v14402_v22 = vpop.f32.mrb[57].mxu0 }
 0x305   : > { %v14403_v0 = vadd.f32 %v14402_v22, %v14401_v56  ;;  %v14404_v9 = vpop.f32.mrb[58].mxu0 }
 0x306   : > { %v14405_v19 = vpop.f32.mrb[59].mxu0 }
 0x307   : > { %v14406_v45 = vadd.f32 %v14405_v19, %v14404_v9 }
 0x30a   : > { %v14435_v12 = vpop.f32.mrb[16].mxu1 }
 0x30b   : > { %v14407_v60 = vpop.f32.mrb[60].mxu0  ;;  %v14436_v28 = vpop.f32.mrb[17].mxu1 }
 0x30c   : > { %v14408_v7 = vpop.f32.mrb[61].mxu0  ;;  %v14437_v18 = vadd.f32 %v14436_v28, %v14435_v12  ;;  %v14438_v38 = vpop.f32.mrb[18].mxu1 }
 0x30d   : > { %v14409_v11 = vadd.f32 %v14408_v7, %v14407_v60  ;;  %v14410_v58 = vpop.f32.mrb[62].mxu0  ;;  %v14439_v51 = vpop.f32.mrb[19].mxu1 }
 0x30e   : > { %v15348_v54 = vadd.f32 %v14437_v18, %v14391_v32  ;;  %v14411_v42 = vpop.f32.mrb[63].mxu0  ;;  %v14440_v59 = vadd.f32 %v14439_v51, %v14438_v38 }
 0x30f   : > { %v14412_v31 = vadd.f32 %v14411_v42, %v14410_v58 }
 0x310   : > { %v15354_v35 = vadd.f32 %v14440_v59, %v14394_v10 }
 0x312   : > { %v14441_v20 = vpop.f32.mrb[20].mxu1 }
 0x313   : > { %v14481_v57 = vpop.f32.mrb[64].mxu0  ;;  %v14442_v37 = vpop.f32.mrb[21].mxu1 }
 0x314   : > { %v14482_v17 = vpop.f32.mrb[65].mxu0  ;;  %v14443_v34 = vadd.f32 %v14442_v37, %v14441_v20  ;;  %v14444_v25 = vpop.f32.mrb[22].mxu1  ;;  %v17353_v20 = vld [vmem:[#allocation2 + $0x4] sm:$0x1]  ;;  %v3701_v37 = vld [vmem:[#allocation2] sm:$0xe] }
 0x315   : > { %v14483_v47 = vadd.f32 %v14482_v17, %v14481_v57  ;;  %v14484_v52 = vpop.f32.mrb[66].mxu0  ;;  %v14445_v24 = vpop.f32.mrb[23].mxu1 }
 0x316   : > { %v15345_v49 = vadd.f32 %v14443_v34, %v14397_v4  ;;  %v14485_v21 = vpop.f32.mrb[67].mxu0  ;;  %v14446_v27 = vadd.f32 %v14445_v24, %v14444_v25 }
 0x317   : > { %v14486_v15 = vadd.f32 %v14485_v21, %v14484_v52  ;;  %v17341_v36 = vadd.f32 %v15348_v54, %v14483_v47  ;;  %v13425_v47 = vrot.slane %v3701_v37, 9  ;;  %v3733_v52 = vrot.slane %v17353_v20, 5  ;;  %v17362_v21 = vld [vmem:[#allocation2 + $0x48] sm:$0xe] }
 0x318   : > { %v15351_v53 = vadd.f32 %v14446_v27, %v14400_v23 }
 0x319   : > { %v17343_v61 = vadd.f32 %v15354_v35, %v14486_v15  ;;  %v17351_v35 = vld [vmem:[#allocation2] sm:$0xf] }
 0x31a   : > { %v14447_v55 = vpop.f32.mrb[24].mxu1  ;;  %v3565_v17 = vshll.u32 %v17351_v35, 16  ;;  %v17367_v15 = vld [vmem:[%s21346_s3 + $0x1] ss:$0 sm:$0xff] }
 0x31b   : > { %v14487_v14 = vpop.f32.mrb[68].mxu0  ;;  %v14448_v8 = vpop.f32.mrb[25].mxu1 }
 0x31c   : > { %v14488_v33 = vpop.f32.mrb[69].mxu0  ;;  %v14449_v62 = vadd.f32 %v14448_v8, %v14447_v55  ;;  %v14450_v26 = vpop.f32.mrb[26].mxu1  ;;  %v17374_v8 = vld [vmem:[%s21346_s3 + $0x2] ss:$0 sm:$0xff] }
 0x31d   : > { %v14489_v32 = vadd.f32 %v14488_v33, %v14487_v14  ;;  %v14490_v30 = vpop.f32.mrb[70].mxu0  ;;  %v14451_v2 = vpop.f32.mrb[27].mxu1 }
 0x31e   : > { %v15360_v10 = vadd.f32 %v14449_v62, %v14403_v0  ;;  %v14491_v43 = vpop.f32.mrb[71].mxu0  ;;  %v14452_v41 = vadd.f32 %v14451_v2, %v14450_v26  ;;  %v17378_v62 = vsel %vm16420_vm9, %v13425_v47, %v3733_v52  ;;  %v13434_v2 = vrot.slane %v17362_v21, 9 }
 0x31f   : > { %v14492_v4 = vadd.f32 %v14491_v43, %v14490_v30  ;;  %v15346_v6 = vadd.f32 %v15345_v49, %v14489_v32  ;;  %v17360_v49 = vrot.slane %v3565_v17, 5  ;;  %v3571_v43 = vshll.u32 %v17353_v20, 16 }
 0x320   : > { %v15366_v16 = vadd.f32 %v14452_v41, %v14406_v45 }
 0x321   : > { %v15352_v5 = vadd.f32 %v15351_v53, %v14492_v4  ;;  %v17369_v53 = vld [vmem:[#allocation2 + $0x48] sm:$0xf] }
 0x322   : > { %v14453_v46 = vpop.f32.mrb[28].mxu1 }
 0x323   : > { %v14493_v13 = vpop.f32.mrb[72].mxu0  ;;  %v14454_v44 = vpop.f32.mrb[29].mxu1 }
 0x324   : > { %v14494_v23 = vpop.f32.mrb[73].mxu0  ;;  %v14455_v50 = vadd.f32 %v14454_v44, %v14453_v46  ;;  %v14456_v1 = vpop.f32.mrb[30].mxu1  ;;  %v3688_v46 = vshrl.u32 %v17369_v53, 16 }
 0x325   : > { %v14495_v56 = vadd.f32 %v14494_v23, %v14493_v13  ;;  %v14496_v22 = vpop.f32.mrb[74].mxu0  ;;  %v14457_v29 = vpop.f32.mrb[31].mxu1  ;;  %v3691_v13 = vshll.u32 %v17369_v53, 16 }
 0x326   : > { %v15357_v9 = vadd.f32 %v14455_v50, %v14409_v11  ;;  %v14497_v19 = vpop.f32.mrb[75].mxu0  ;;  %v14458_v12 = vadd.f32 %v14457_v29, %v14456_v1  ;;  %v17481_v20 = vrot.slane %v3688_v46, 4  ;;  %v3532_v46 = vld [vmem:[#allocation2 + $0x3c] sm:$0x1] }
 0x327   : > { %v14498_v60 = vadd.f32 %v14497_v19, %v14496_v22  ;;  %v17345_v0 = vadd.f32 %v15360_v10, %v14495_v56 }
 0x328   : > { %v15363_v28 = vadd.f32 %v14458_v12, %v14412_v31  ;;  %v3562_v31 = vshrl.u32 %v17351_v35, 16 }
 0x329   : > { %v17347_v7 = vadd.f32 %v15366_v16, %v14498_v60 }
 0x32a   : > { %v17358_v24 = vrot.slane %v3562_v31, 4 }
 0x32b   : > { %v14499_v45 = vpop.f32.mrb[76].mxu0 }
 0x32c   : > { %v14500_v18 = vpop.f32.mrb[77].mxu0  ;;  %v3568_v10 = vor.u32 %v17360_v49, %v17358_v24 }
 0x32d   : > { %v14501_v38 = vadd.f32 %v14500_v18, %v14499_v45  ;;  %v14502_v58 = vpop.f32.mrb[78].mxu0 }
 0x32e   : > { %v14503_v51 = vpop.f32.mrb[79].mxu0 }
 0x32f   : > { %v14504_v54 = vadd.f32 %v14503_v51, %v14502_v58  ;;  %v15358_v42 = vadd.f32 %v15357_v9, %v14501_v38 }
 0x331   : > { %v17349_v59 = vadd.f32 %v15363_v28, %v14504_v54 }
 0x333   : > { %v15111_v11 = vpop.f32.mrb[80].mxu0 }
 0x334   : > { %v3350_v57 = vpop.f32.mrb[81].mxu0  ;;  %v3359_v44 = vadd.f32 %v15111_v11, %v17374_v8 }
 0x335   : > { %v15112_v34 = vpop.f32.mrb[82].mxu0  ;;  %v3351_v50 = vadd.f32 %v17374_v8, %v3350_v57 }
 0x336   : > { %v3353_v25 = vpop.f32.mrb[83].mxu0  ;;  %v3362_v22 = vadd.f32 %v15112_v34, %v17374_v8 }
 0x337   : > { %v3354_v19 = vadd.f32 %v17374_v8, %v3353_v25 }
 0x33a   : > { %v15087_v27 = vpop.f32.mrb[8].mxu1 }
 0x33b   : > { %v15347_v55 = vadd.f32 %v15346_v6, %v15087_v27  ;;  %v3171_v14 = vpop.f32.mrb[9].mxu1  ;;  %v15115_v33 = vpop.f32.mrb[84].mxu0 }
 0x33c   : > { %v15350_v26 = vadd.f32 %v17341_v36, %v3171_v14  ;;  %v15088_v32 = vpop.f32.mrb[10].mxu1  ;;  %v3366_v30 = vpop.f32.mrb[85].mxu0 }
 0x33d   : > { %v3217_v41 = vadd.f32 %v15347_v55, %v17367_v15  ;;  %v15353_v4 = vadd.f32 %v15352_v5, %v15088_v32  ;;  %v3174_v6 = vpop.f32.mrb[11].mxu1  ;;  %v17386_v16 = vpop.f32.mrb[86].mxu0  ;;  %v17408_v57 = vadd.f32 %v17374_v8, %v3366_v30 }
 0x33e   : > { %v3215_v36 = vadd.f32 %v15350_v26, %v17367_v15  ;;  %v15356_v23 = vadd.f32 %v17343_v61, %v3174_v6  ;;  %v17394_v1 = vpop.f32.mrb[87].mxu0  ;;  %v17401_v61 = vadd.f32 %v15115_v33, %v17374_v8 }
 0x33f   : > { %v3233_v56 = vmul.f32 0.01, %v3217_v41  ;;  %v3218_v5 = vadd.f32 %v15353_v4, %v17367_v15  ;;  %vm3225_vm6 = vcmp.ge.f32.partialorder %v3217_v41, 0.0 }
 0x340   : > { %v3231_v29 = vmul.f32 0.01, %v3215_v36  ;;  %v3216_v9 = vadd.f32 %v15356_v23, %v17367_v15  ;;  %vm3223_vm7 = vcmp.ge.f32.partialorder %v3215_v36, 0.0 }
 0x341   : > { %v3234_v12 = vmul.f32 0.01, %v3218_v5  ;;  %v3241_v60 = vsel %vm3225_vm6, %v3217_v41, %v3233_v56  ;;  %vm3226_vm8 = vcmp.ge.f32.partialorder %v3218_v5, 0.0 }
 0x342   : > { %v17403_v28 = vadd.f32 %v3359_v44, %v3241_v60  ;;  %v3232_v45 = vmul.f32 0.01, %v3216_v9  ;;  %v3239_v18 = vsel %vm3223_vm7, %v3215_v36, %v3231_v29  ;;  %vm3224_vm10 = vcmp.ge.f32.partialorder %v3216_v9, 0.0  ;;  %v15091_v38 = vpop.f32.mrb[12].mxu1 }
 0x343   : > { %v17405_v58 = vadd.f32 %v3351_v50, %v3239_v18  ;;  %v3242_v51 = vsel %vm3226_vm8, %v3218_v5, %v3234_v12  ;;  %v15359_v54 = vadd.f32 %v15358_v42, %v15091_v38  ;;  %v3187_v11 = vpop.f32.mrb[13].mxu1  ;;  %v3508_v12 = vld [vmem:[#allocation2 + $0x1c] sm:$0x1] }
 0x344   : > { %v14154_v37 = vpack.c.bf16 %v17403_v28, %v17403_v28  ;;  %v17412_v31 = vadd.f32 %v3362_v22, %v3242_v51  ;;  %v3240_v17 = vsel %vm3224_vm10, %v3216_v9, %v3232_v45  ;;  %v15362_v34 = vadd.f32 %v17345_v0, %v3187_v11  ;;  %v15092_v25 = vpop.f32.mrb[14].mxu1  ;;  %v3505_v9 = vld [vmem:[#allocation2 + $0x18] sm:$0xf]  ;;  %v3493_v11 = vld [vmem:[#allocation2 + $0x8] sm:$0xf] }
 0x345   : > { %v14152_v47 = vpack.c.bf16 %v17405_v58, %v17405_v58  ;;  %v17417_v52 = vadd.f32 %v3354_v19, %v3240_v17  ;;  %v3221_v42 = vadd.f32 %v15359_v54, %v17367_v15  ;;  %v15365_v27 = vadd.f32 %v17349_v59, %v15092_v25  ;;  %v3190_v55 = vpop.f32.mrb[15].mxu1 }
 0x346   : > { %v3430_v14 = vshrl.u32 %v14154_v37, 16  ;;  %v3433_v33 = vshll.u32 %v14154_v37, 16  ;;  %v14155_v26 = vpack.c.bf16 %v17412_v31, %v17412_v31  ;;  %v3219_v32 = vadd.f32 %v15362_v34, %v17367_v15  ;;  %v3496_v37 = vld [vmem:[#allocation2 + $0xc] sm:$0x1] }
 0x347   : > { %v3414_v30 = vshrl.u32 %v14152_v47, 16  ;;  %v3417_v0 = vshll.u32 %v14152_v47, 16  ;;  %v14153_v41 = vpack.c.bf16 %v17417_v52, %v17417_v52  ;;  %v3237_v4 = vmul.f32 0.01, %v3221_v42 }
 0x348   : > { %v3432_v6 = vrot.slane %v3430_v14, 7  ;;  %v3438_v36 = vshrl.u32 %v14155_v26, 16  ;;  %v3441_v44 = vshll.u32 %v14155_v26, 16  ;;  %v3235_v23 = vmul.f32 0.01, %v3219_v32 }
 0x349   : > { %v3416_v50 = vrot.slane %v3414_v30, 7  ;;  %v3422_v59 = vshrl.u32 %v14153_v41, 16  ;;  %v3425_v56 = vshll.u32 %v14153_v41, 16  ;;  %v3222_v5 = vadd.f32 %v15365_v27, %v17367_v15  ;;  %v3511_v27 = vld [vmem:[#allocation2 + $0x20] sm:$0xf] }
 0x34a   : > { %v3435_v22 = vor.u32 %v3433_v33, %v3432_v6  ;;  %v3436_v29 = vrot.slane %v3432_v6, 4  ;;  %v3440_v19 = vrot.slane %v3438_v36, 7  ;;  %vm3229_vm11 = vcmp.ge.f32.partialorder %v3221_v42, 0.0  ;;  %v3514_v14 = vld [vmem:[#allocation2 + $0x24] sm:$0x1] }
 0x34b   : > { %v3419_v60 = vor.u32 %v3417_v0, %v3416_v50  ;;  %v3420_v45 = vrot.slane %v3416_v50, 4  ;;  %v3424_v18 = vrot.slane %v3422_v59, 7  ;;  %v3238_v38 = vmul.f32 0.01, %v3222_v5  ;;  %v3499_v41 = vld [vmem:[#allocation2 + $0x10] sm:$0xf] }
 0x34c   : > { %v3506_v51 = vsel %vm16833_vm2, %v3435_v22, %v3505_v9  ;;  %v3509_v54 = vsel %vm16839_vm4, %v3436_v29, %v3508_v12  ;;  %v3443_v17 = vor.u32 %v3441_v44, %v3440_v19  ;;  %v3444_v34 = vrot.slane %v3440_v19, 4  ;;  %v3502_v6 = vld [vmem:[#allocation2 + $0x14] sm:$0x1]  ;;  %v17441_v50 = vld [vmem:[#allocation2 + $0x4c] sm:$0x1]  ;;  %v15733_v19 = vld [vmem:[%s21345_s2 + $0x518] sm:$0xff]  }
 0x34d   : > { %3507 = vst [vmem:[#allocation2 + $0x18] sm:$0xf] %v3506_v51  ;;  %3510 = vst [vmem:[#allocation2 + $0x1c] sm:$0x1] %v3509_v54  ;;  %v3494_v25 = vsel %vm16833_vm2, %v3419_v60, %v3493_v11  ;;  %v3497_v47 = vsel %vm16839_vm4, %v3420_v45, %v3496_v37  ;;  %v3427_v33 = vor.u32 %v3425_v56, %v3424_v18  ;;  %v3428_v26 = vrot.slane %v3424_v18, 4 }
 0x34e   : > { %3495 = vst [vmem:[#allocation2 + $0x8] sm:$0xf] %v3494_v25  ;;  %3498 = vst [vmem:[#allocation2 + $0xc] sm:$0x1] %v3497_v47  ;;  %v3512_v30 = vsel %vm16833_vm2, %v3443_v17, %v3511_v27  ;;  %v3515_v0 = vsel %vm16839_vm4, %v3444_v34, %v3514_v14  ;;  %v3245_v36 = vsel %vm3229_vm11, %v3221_v42, %v3237_v4  ;;  %vm3227_vm13 = vcmp.ge.f32.partialorder %v3219_v32, 0.0 }
 0x34f   : > { %v15368_v44 = vadd.f32 %v17347_v7, %v3190_v55  ;;  %3513 = vst [vmem:[#allocation2 + $0x20] sm:$0xf] %v3512_v30  ;;  %3516 = vst [vmem:[#allocation2 + $0x24] sm:$0x1] %v3515_v0  ;;  %v3500_v59 = vsel %vm16833_vm2, %v3427_v33, %v3499_v41  ;;  %v3503_v56 = vsel %vm16839_vm4, %v3428_v26, %v3502_v6  ;;  %vm3230_vm6 = vcmp.ge.f32.partialorder %v3222_v5, 0.0 }
 0x350   : > { %v17448_v22 = vadd.f32 %v17401_v61, %v3245_v36  ;;  %3501 = vst [vmem:[#allocation2 + $0x10] sm:$0xf] %v3500_v59  ;;  %3504 = vst [vmem:[#allocation2 + $0x14] sm:$0x1] %v3503_v56  ;;  %v3243_v4 = vsel %vm3227_vm13, %v3219_v32, %v3235_v23  ;;  %v3378_v7 = vadd.f32 %v17386_v16, %v17374_v8  ;;  %v3769_v61 = vrot.slane %v17441_v50, 5 }
 0x351   : > { %v3220_v42 = vadd.f32 %v15368_v44, %v17367_v15  ;;  %v17456_v29 = vadd.f32 %v17408_v57, %v3243_v4  ;;  %v3246_v9 = vsel %vm3230_vm6, %v3222_v5, %v3238_v38  ;;  %v17466_v16 = vrot.slane %v3571_v43, 5  ;;  %14529 = vmatprep.subr.bf16.mxu0 %v15733_v19  ;;  %v3529_v51 = vld [vmem:[#allocation2 + $0x38] sm:$0xf]  ;;  %v3517_v26 = vld [vmem:[#allocation2 + $0x28] sm:$0xf] }
 0x352   : > { %v14158_v55 = vpack.c.bf16 %v17448_v22, %v17448_v22  ;;  %v17462_v15 = vadd.f32 %v3378_v7, %v3246_v9  ;;  %v3370_v23 = vadd.f32 %v17374_v8, %v17394_v1  ;;  %v17475_v5 = vrot.slane %v3568_v10, 4  ;;  %v15734_v10 = vld [vmem:[%s21345_s2 + $0x4d8] sm:$0xff]   ;;  %v3520_v30 = vld [vmem:[#allocation2 + $0x2c] sm:$0x1]  ;;  %v3535_v4 = vld [vmem:[#allocation2 + $0x40] sm:$0xf] }
 0x353   : > { %v3236_v12 = vmul.f32 0.01, %v3220_v42  ;;  %vm3228_vm7 = vcmp.ge.f32.partialorder %v3220_v42, 0.0  ;;  %v14156_v57 = vpack.c.bf16 %v17456_v29, %v17456_v29  ;;  %v17485_v43 = vrot.slane %v3691_v13, 5  ;;  %14530 = vmatpush3.bf16.msra.mxu0 %v15734_v10 }
 0x354   : > { %v3462_v32 = vshrl.u32 %v14158_v55, 16  ;;  %v14159_v60 = vpack.c.bf16 %v17462_v15, %v17462_v15  ;;  %v3465_v8 = vshll.u32 %v14158_v55, 16  ;;  %v17491_v49 = vld [vmem:[#allocation2 + $0x18] sm:$0xe]  ;;  %v17506_v7 = vld [vmem:[#allocation2 + $0x1c] sm:$0x1] }
 0x355   : > { %v3244_v45 = vsel %vm3228_vm7, %v3220_v42, %v3236_v12  ;;  %v3446_v1 = vshrl.u32 %v14156_v57, 16  ;;  %v17489_v24 = vld [vmem:[#allocation2 + $0xc] sm:$0x1]  ;;  %v3449_v54 = vshll.u32 %v14156_v57, 16  ;;  %v3702_v13 = vld [vmem:[#allocation2 + $0x8] sm:$0xe] }
 0x356   : > { %v3464_v18 = vrot.slane %v3462_v32, 7  ;;  %v17487_v38 = vadd.f32 %v3370_v23, %v3244_v45  ;;  %v3470_v11 = vshrl.u32 %v14159_v60, 16  ;;  %v3473_v37 = vshll.u32 %v14159_v60, 16  ;;  %v15735_v55 = vld [vmem:[%s21345_s2 + $0x548] sm:$0xff]   ;;  %v15736_v23 = vld [vmem:[%s21345_s2 + $0x520] sm:$0xff]  }
 0x357   : > { %v3737_v17 = vrot.slane %v17489_v24, 5  ;;  %v3448_v47 = vrot.slane %v3446_v1, 7  ;;  %v17499_v14 = vld [vmem:[#allocation2 + $0x14] sm:$0x1]  ;;  %v3703_v33 = vld [vmem:[#allocation2 + $0x10] sm:$0xe]  ;;  %15119 = vmatprep.subr.bf16.mxu1 %v15735_v55  ;;  %14531 = vmatprep.subr.bf16.mxu0 %v15736_v23 }
 0x358   : > { %v3467_v34 = vor.u32 %v3465_v8, %v3464_v18  ;;  %v3468_v25 = vrot.slane %v3464_v18, 4  ;;  %v14157_v27 = vpack.c.bf16 %v17487_v38, %v17487_v38  ;;  %v3472_v0 = vrot.slane %v3470_v11, 7  ;;  %v17512_v57 = vld [vmem:[#allocation2 + $0x8] sm:$0xf]  ;;  %v3538_v18 = vld [vmem:[#allocation2 + $0x44] sm:$0x1]  ;;  %15120 = vmatpush3.bf16.msra.mxu1 %v15735_v55 }
 0x359   : > { %v13426_v41 = vrot.slane %v3702_v13, 9  ;;  %v13427_v6 = vrot.slane %v3703_v33, 9  ;;  %v3741_v36 = vrot.slane %v17499_v14, 5  ;;  %v3451_v56 = vor.u32 %v3449_v54, %v3448_v47  ;;  %v3705_v10 = vld [vmem:[#allocation2 + $0x20] sm:$0xe] }
 0x35a   : > { %v3530_v44 = vsel %vm16833_vm2, %v3467_v34, %v3529_v51  ;;  %v3533_v59 = vsel %vm16839_vm4, %v3468_v25, %v3532_v46  ;;  %v3452_v42 = vrot.slane %v3448_v47, 4  ;;  %v3475_v9 = vor.u32 %v3473_v37, %v3472_v0  ;;  %v17531_v37 = vld [vmem:[#allocation2 + $0x24] sm:$0x1]  ;;  %v17533_v13 = vld [vmem:[#allocation2 + $0x10] sm:$0xf] }
 0x35b   : > { %3531 = vst [vmem:[#allocation2 + $0x38] sm:$0xf] %v3530_v44  ;;  %3534 = vst [vmem:[#allocation2 + $0x3c] sm:$0x1] %v3533_v59  ;;  %v3476_v19 = vrot.slane %v3472_v0, 4  ;;  %v3454_v12 = vshrl.u32 %v14157_v27, 16  ;;  %v3518_v60 = vsel %vm16833_vm2, %v3451_v56, %v3517_v26  ;;  %v3738_v1 = vsel %vm16420_vm9, %v13426_v41, %v3737_v17 }
 0x35c   : > { %v13428_v32 = vrot.slane %v17491_v49, 9  ;;  %v3521_v45 = vsel %vm16839_vm4, %v3452_v42, %v3520_v30  ;;  %v3457_v8 = vshll.u32 %v14157_v27, 16  ;;  %v15737_v49 = vld [vmem:[%s21345_s2 + $0x4e0] sm:$0xff]   ;;  %3519 = vst [vmem:[#allocation2 + $0x28] sm:$0xf] %v3518_v60  ;;  %v3536_v51 = vsel %vm16833_vm2, %v3475_v9, %v3535_v4  ;;  %v15738_v17 = vld [vmem:[%s21345_s2 + $0x528] sm:$0xff]  }
 0x35d   : > { %3522 = vst [vmem:[#allocation2 + $0x2c] sm:$0x1] %v3521_v45  ;;  %v3539_v46 = vsel %vm16839_vm4, %v3476_v19, %v3538_v18  ;;  %v3456_v54 = vrot.slane %v3454_v12, 7  ;;  %v13445_v11 = vcombine.low %v17378_v62, %v3738_v1  ;;  %3537 = vst [vmem:[#allocation2 + $0x40] sm:$0xf] %v3536_v51  ;;  %v3742_v34 = vsel %vm16420_vm9, %v13427_v6, %v3741_v36  ;;  %v15739_v1 = vld [vmem:[%s21345_s2 + $0x4e8] sm:$0xff]  }
 0x35e   : > { %3540 = vst [vmem:[#allocation2 + $0x44] sm:$0x1] %v3539_v46  ;;  %v3745_v25 = vrot.slane %v17506_v7, 5  ;;  %v3576_v47 = vshrl.u32 %v17512_v57, 16  ;;  %v3697_v62 = vshll.u32 %v17441_v50, 16  ;;  %14532 = vmatpush3.bf16.msra.mxu0 %v15737_v49  ;;  %v13429_v30 = vrot.slane %v3705_v10, 9 }
 0x35f   : > { %v3459_v27 = vor.u32 %v3457_v8, %v3456_v54  ;;  %v3460_v33 = vrot.slane %v3456_v54, 4  ;;  %v3523_v26 = vld [vmem:[#allocation2 + $0x30] sm:$0xf]  ;;  %3836 = vrot.lane.b32.xlu0 %v13445_v11, %s16183_s28  ;;  %v3579_v0 = vshll.u32 %v17512_v57, 16  ;;  %14533 = vmatprep.subr.bf16.mxu0 %v15738_v17  ;;  %v3526_v41 = vld [vmem:[#allocation2 + $0x34] sm:$0x1]  ;;  %v3574_v51 = vsel %vm16454_vm12, %v17475_v5, %v17466_v16 }
 0x360   : > { %v3746_v6 = vsel %vm16420_vm9, %v13428_v32, %v3745_v25  ;;  %v3749_v36 = vrot.slane %v17531_v37, 5  ;;  %v3578_v44 = vrot.slane %v3576_v47, 4  ;;  %v3590_v59 = vshrl.u32 %v17533_v13, 16  ;;  %v17553_v9 = vld [vmem:[#allocation2 + $0x18] sm:$0xf] }
 0x361   : > { %v3524_v56 = vsel %vm16833_vm2, %v3459_v27, %v3523_v26  ;;  %v3527_v42 = vsel %vm16839_vm4, %v3460_v33, %v3526_v41  ;;  %v13446_v4 = vcombine.low %v3742_v34, %v3746_v6  ;;  %v3581_v55 = vrot.slane %v3579_v0, 5  ;;  %v17589_v41 = vld [vmem:[#allocation2 + $0x20] sm:$0xf]  ;;  %v15740_v6 = vld [vmem:[%s21345_s2 + $0x470] sm:$0xff]  }
 0x362   : > { %3525 = vst [vmem:[#allocation2 + $0x30] sm:$0xf] %v3524_v56  ;;  %3528 = vst [vmem:[#allocation2 + $0x34] sm:$0x1] %v3527_v42  ;;  %v17555_v19 = vld [vmem:[#allocation2 + $0x3c] sm:$0x1]  ;;  %v3750_v11 = vsel %vm16420_vm9, %v13429_v30, %v3749_v36  ;;  %14534 = vmatpush3.bf16.msra.mxu0 %v15739_v1  ;;  %14569 = vmatprep.subr.bf16.mxu1 %v15740_v6 }
 0x363   : > { %v3708_v12 = vld [vmem:[#allocation2 + $0x38] sm:$0xe]  ;;  %v3585_v32 = vshll.u32 %v17489_v24, 16  ;;  %v3592_v23 = vrot.slane %v3590_v59, 4  ;;  %3838 = vrot.lane.b32.xlu1 %v13446_v4, %s16183_s28  ;;  %v3761_v45 = vrot.slane %v17555_v19, 5  ;;  %v3582_v18 = vor.u32 %v3581_v55, %v3578_v44  ;;  %v15742_v56 = vld [vmem:[%s21345_s2 + $0x530] sm:$0xff]  }
 0x364   : > { %v13432_v60 = vrot.slane %v3708_v12, 9  ;;  %v3593_v8 = vshll.u32 %v17533_v13, 16  ;;  %v17564_v10 = vld [vmem:[#allocation2 + $0x2c] sm:$0x1]  ;;  %v3706_v49 = vld [vmem:[#allocation2 + $0x28] sm:$0xe]  ;;  %v3770_v24 = vsel %vm16420_vm9, %v13434_v2, %v3769_v61  ;;  %v3694_v2 = vor.u32 %v17485_v43, %v17481_v20  ;;  %14535 = vmatprep.subr.bf16.mxu0 %v15742_v56 }
 0x365   : > { %v3599_v46 = vshll.u32 %v17499_v14, 16  ;;  %v3604_v54 = vshrl.u32 %v17553_v9, 16  ;;  %v13430_v17 = vrot.slane %v3706_v49, 9  ;;  %v3753_v34 = vrot.slane %v17564_v10, 5  ;;  %v17581_v25 = vld [vmem:[#allocation2 + $0x44] sm:$0x1] }
 0x366   : > { %v3709_v21 = vld [vmem:[#allocation2 + $0x40] sm:$0xe]  ;;  %v3765_v47 = vrot.slane %v17581_v25, 5  ;;  %v3583_v27 = vrot.slane %v3582_v18, 4  ;;  %v3595_v14 = vrot.slane %v3593_v8, 5  ;;  %v3587_v26 = vrot.slane %v3585_v32, 5 }
 0x367   : > { %v13433_v61 = vrot.slane %v3709_v21, 9  ;;  %v3754_v33 = vsel %vm16420_vm9, %v13430_v17, %v3753_v34  ;;  %v3606_v30 = vrot.slane %v3604_v54, 4  ;;  %v3607_v0 = vshll.u32 %v17553_v9, 16  ;;  %v17596_v59 = vld [vmem:[#allocation2 + $0x28] sm:$0xf]  ;;  %v15744_v42 = vld [vmem:[%s21345_s2 + $0x4f0] sm:$0xff]  }
 0x368   : > { %v13447_v20 = vcombine.low %v3750_v11, %v3754_v33  ;;  %v3596_v36 = vor.u32 %v3595_v14, %v3592_v23  ;;  %v3601_v44 = vrot.slane %v3599_v46, 5  ;;  %v3762_v12 = vsel %vm16420_vm9, %v13432_v60, %v3761_v45  ;;  %14536 = vmatpush3.bf16.msra.mxu0 %v15744_v42  ;;  %v17631_v6 = vld [vmem:[#allocation2 + $0x38] sm:$0xf]  ;;  %v17639_v42 = vld [vmem:[#allocation2 + $0x40] sm:$0xf] }
 0x369   : > { %v3766_v43 = vsel %vm16420_vm9, %v13433_v61, %v3765_v47  ;;  %v17604_v4 = vld [vmem:[#allocation2 + $0x34] sm:$0x1]  ;;  %v3707_v55 = vld [vmem:[#allocation2 + $0x30] sm:$0xe]  ;;  %v3588_v32 = vsel %vm16454_vm12, %v3583_v27, %v3587_v26  ;;  %v3609_v23 = vrot.slane %v3607_v0, 5  ;;  %v3613_v18 = vshll.u32 %v17506_v7, 16 }
 0x36a   : > { %3840 = vrot.lane.b32.xlu0 %v13447_v20, %s16183_s28  ;;  %v13431_v8 = vrot.slane %v3707_v55, 9  ;;  %v3757_v1 = vrot.slane %v17604_v4, 5  ;;  %v3597_v49 = vrot.slane %v3596_v36, 4  ;;  %v3618_v46 = vshrl.u32 %v17589_v41, 16  ;;  %v17615_v45 = vld [vmem:[#allocation2 + $0x30] sm:$0xf] }
 0x36b   : > { %v13449_v54 = vcombine.low %v3766_v43, %v3770_v24  ;;  %v3610_v11 = vor.u32 %v3609_v23, %v3606_v30  ;;  %v3615_v17 = vrot.slane %v3613_v18, 5  ;;  %v3621_v60 = vshll.u32 %v17589_v41, 16  ;;  %v15748_v7 = vld [vmem:[%s21345_s2 + $0x538] sm:$0xff]  }
 0x36c   : > { %v3758_v34 = vsel %vm16420_vm9, %v13431_v8, %v3757_v1  ;;  %v3620_v21 = vrot.slane %v3618_v46, 4  ;;  %v3627_v61 = vshll.u32 %v17531_v37, 16  ;;  %v3632_v47 = vshrl.u32 %v17596_v59, 16  ;;  %14537 = vmatprep.subr.bf16.mxu0 %v15748_v7  ;;  %v15750_v26 = vld [vmem:[%s21345_s2 + $0x4f8] sm:$0xff]  }
 0x36d   : > { %v13448_v24 = vcombine.low %v3758_v34, %v3762_v12  ;;  %v3602_v27 = vsel %vm16454_vm12, %v3597_v49, %v3601_v44  ;;  %v3611_v14 = vrot.slane %v3610_v11, 4  ;;  %v3623_v33 = vrot.slane %v3621_v60, 5  ;;  %14538 = vmatpush3.bf16.msra.mxu0 %v15750_v26  ;;  %v15754_v49 = vld [vmem:[%s21345_s2 + $0x590] sm:$0xff]  }
 0x36e   : > { %3844 = vrot.lane.b32.xlu0 %v13449_v54, %s16183_s28  ;;  %v3634_v30 = vrot.slane %v3632_v47, 4  ;;  %v3635_v0 = vshll.u32 %v17596_v59, 16  ;;  %v3646_v37 = vshrl.u32 %v17615_v45, 16  ;;  %v3695_v20 = vrot.slane %v3694_v2, 4  ;;  %14615 = vmatprep.subr.bf16.mxu0 %v15754_v49  ;;  %v15745_v49 = vld [vmem:[%s21345_s2 + $0x478] sm:$0xff]  }
 0x36f   : > { %3842 = vrot.lane.b32.xlu1 %v13448_v24, %s16183_s28  ;;  %v3616_v43 = vsel %vm16454_vm12, %v3611_v14, %v3615_v17  ;;  %v3624_v36 = vor.u32 %v3623_v33, %v3620_v21  ;;  %v3641_v44 = vshll.u32 %v17564_v10, 16  ;;  %v3649_v56 = vshll.u32 %v17615_v45, 16 }
 0x370   : > { %v13440_v55 = vcombine.low %v3574_v51, %v3588_v32  ;;  %v13441_v2 = vcombine.low %v3602_v27, %v3616_v43  ;;  %v3637_v12 = vrot.slane %v3635_v0, 5  ;;  %v3648_v23 = vrot.slane %v3646_v37, 4 }
 0x371   : > { %v3629_v18 = vrot.slane %v3627_v61, 5  ;;  %v3651_v8 = vrot.slane %v3649_v56, 5  ;;  %v3655_v1 = vshll.u32 %v17604_v4, 16  ;;  %v3660_v10 = vshrl.u32 %v17631_v6, 16 }
 0x372   : > { %3813 = vrot.lane.b32.xlu0 %v13441_v2, %s16184_s5  ;;  %v3625_v46 = vrot.slane %v3624_v36, 4  ;;  %v3638_v54 = vor.u32 %v3637_v12, %v3634_v30  ;;  %v3663_v16 = vshll.u32 %v17631_v6, 16  ;;  %v3674_v5 = vshrl.u32 %v17639_v42, 16 }
 0x373   : > { %3811 = vrot.lane.b32.xlu1 %v13440_v55, %s16184_s5  ;;  %v3643_v51 = vrot.slane %v3641_v44, 5  ;;  %v3652_v32 = vor.u32 %v3651_v8, %v3648_v23  ;;  %v3662_v11 = vrot.slane %v3660_v10, 4  ;;  %v3677_v4 = vshll.u32 %v17639_v42, 16  ;;  %v15741_v10 = vld [vmem:[%s21345_s2 + $0x430] sm:$0xff]  }
 0x374   : > { %v3639_v17 = vrot.slane %v3638_v54, 4  ;;  %v3665_v60 = vrot.slane %v3663_v16, 5  ;;  %v3669_v7 = vshll.u32 %v17555_v19, 16  ;;  %v3676_v34 = vrot.slane %v3674_v5, 4  ;;  %v15746_v5 = vld [vmem:[%s21345_s2 + $0x438] sm:$0xff]  }
 0x375   : > { %v3653_v21 = vrot.slane %v3652_v32, 4  ;;  %v3679_v61 = vrot.slane %v3677_v4, 5  ;;  %v3683_v47 = vshll.u32 %v17581_v25, 16  ;;  %v3699_v24 = vrot.slane %v3697_v62, 5  ;;  %v15751_v32 = vld [vmem:[%s21345_s2 + $0x480] sm:$0xff]  }
 0x376   : > { %v3630_v27 = vsel %vm16454_vm12, %v3625_v46, %v3629_v18  ;;  %v3644_v14 = vsel %vm16454_vm12, %v3639_v17, %v3643_v51  ;;  %v3657_v33 = vrot.slane %v3655_v1, 5  ;;  %v3666_v26 = vor.u32 %v3665_v60, %v3662_v11 }
 0x377   : > { %v13442_v30 = vcombine.low %v3630_v27, %v3644_v14  ;;  %v3680_v0 = vor.u32 %v3679_v61, %v3676_v34  ;;  %v3671_v43 = vrot.slane %v3669_v7, 5  ;;  %v3685_v50 = vrot.slane %v3683_v47, 5 }
 0x378   : > { %v3658_v19 = vsel %vm16454_vm12, %v3653_v21, %v3657_v33  ;;  %v3667_v37 = vrot.slane %v3666_v26, 4  ;;  %v3700_v62 = vsel %vm16454_vm12, %v3695_v20, %v3699_v24  ;;  %v13436_v4 = vcombine.low %v17533_v13, %v17553_v9  ;;  %v15752_v13 = vld [vmem:[%s21345_s2 + $0x440] sm:$0xff]   ;;  %v15756_v24 = vld [vmem:[%s21345_s2 + $0x488] sm:$0xff]   ;;  %v15757_v26 = vld [vmem:[%s21345_s2 + $0x550] sm:$0xff]  }
 0x379   : > { %3815 = vrot.lane.b32.xlu1 %v13442_v30, %s16184_s5  ;;  %v3681_v25 = vrot.slane %v3680_v0, 4  ;;  %v13435_v60 = vcombine.low %v17351_v35, %v17512_v57 }
 0x37a   : > { %v3672_v36 = vsel %vm16454_vm12, %v3667_v37, %v3671_v43  ;;  %v15759_v37 = vld [vmem:[%s21345_s2 + $0x598] sm:$0xff]   ;;  %v13437_v43 = vcombine.low %v17589_v41, %v17596_v59 }
 0x37b   : > { %v13443_v44 = vcombine.low %v3658_v19, %v3672_v36  ;;  %v3686_v56 = vsel %vm16454_vm12, %v3681_v25, %v3685_v50  ;;  %v15758_v19 = vld [vmem:[%s21345_s2 + $0x448] sm:$0xff]   ;;  %v15760_v25 = vld [vmem:[%s21345_s2 + $0x490] sm:$0xff]   ;;  %v15761_v41 = vld [vmem:[%s21345_s2 + $0x558] sm:$0xff]  }
 0x37c   : > { %v13444_v55 = vcombine.low %v3686_v56, %v3700_v62  ;;  %v15763_v56 = vld [vmem:[%s21345_s2 + $0x5a0] sm:$0xff]  }
 0x37d   : > { %3817 = vrot.lane.b32.xlu0 %v13443_v44, %s16184_s5  ;;  %v15762_v44 = vld [vmem:[%s21345_s2 + $0x450] sm:$0xff]  }
 0x37e   : > { %3819 = vrot.lane.b32.xlu1 %v13444_v55, %s16184_s5 }
 0x3d1   : > { %v17675_v2 = vpop.permute.xlu0 %3836 }
 0x3d2   : > { %v3969_v23 = vrot.slane %v17675_v2, 4 }
 0x3d5   : > { %v17677_v12 = vpop.permute.xlu1 %3838 }
 0x3d6   : > { %v3970_v20 = vrot.slane %v17677_v12, 4 }
 0x3d8   : > { %v3971_v18 = vsel %vm408_vm5, %v3969_v23, %v3970_v20  ;;  %v15764_v23 = vld [vmem:[%s21345_s2 + $0x498] sm:$0xff]  }
 0x3d9   : > { %15121 = vmatprep.mubr.msk.bf16.mxu1 %vm2537_vm14, %v3971_v18 }
 0x3dc   : > { %v17683_v8 = vpop.permute.xlu0 %3840 }
 0x3dd   : > { %v3976_v1 = vrot.slane %v17683_v8, 4 }
 0x3df   : > { %v3977_v46 = vsel %vm408_vm5, %v3970_v20, %v3976_v1 }
 0x3e0   : > { %15122 = vmatmul.mubr.msk.bf16.vlgmr.msra.gmra.mrb[32].mxu1 %vm2537_vm14, %v3977_v46  ;;  %v17694_v54 = vpop.permute.xlu0 %3844 }
 0x3e1   : > { %v17696_v16 = vpop.permute.xlu1 %3842  ;;  %14570 = vmatpush3.bf16.msra.mxu1 %v15741_v10  ;;  %v3988_v11 = vrot.slane %v17694_v54, 4  ;;  %v15765_v10 = vld [vmem:[%s21345_s2 + $0x560] sm:$0xff]  }
 0x3e2   : > { %v3982_v51 = vrot.slane %v17696_v16, 4  ;;  %14571 = vmatprep.subr.bf16.mxu1 %v15745_v49  ;;  %v13438_v49 = vcombine.low %v17615_v45, %v17631_v6  ;;  %v15768_v45 = vld [vmem:[%s21345_s2 + $0x4a0] sm:$0xff]  }
 0x3e4   : > { %v3983_v17 = vsel %vm408_vm5, %v3976_v1, %v3982_v51  ;;  %v3814_v7 = vpop.permute.xlu0 %3813  ;;  %v3989_v33 = vsel %vm408_vm5, %v3982_v51, %v3988_v11  ;;  %v15766_v51 = vld [vmem:[%s21345_s2 + $0x458] sm:$0xff]  }
 0x3e5   : > { %15125 = vmatprep.mubr.msk.bf16.mxu1 %vm2537_vm14, %v3983_v17  ;;  %v3812_v34 = vpop.permute.xlu1 %3811  ;;  %14572 = vmatpush3.bf16.msra.mxu1 %v15746_v5  ;;  %v17713_v21 = vsel %vm2275_vm15, %v13436_v4, %v3814_v7  ;;  %v17717_v61 = vsel %vm2296_vm0, %v3814_v7, %v17677_v12  ;;  %v15770_v7 = vld [vmem:[%s21345_s2 + $0x460] sm:$0xff]  }
 0x3e6   : > { %v17723_v9 = vsel %vm2275_vm15, %v13435_v60, %v3812_v34  ;;  %v3867_v35 = vsel %vm2296_vm0, %v3812_v34, %v17675_v2  ;;  %v3964_v57 = vrot.slane %v17713_v21, 4  ;;  %v3967_v47 = vrot.slane %v17717_v61, 4  ;;  %14573 = vmatprep.subr.bf16.mxu1 %v15751_v32  ;;  %v15767_v32 = vld [vmem:[%s21345_s2 + $0x5a8] sm:$0xff]   ;;  %v15771_v34 = vld [vmem:[%s21345_s2 + $0x5b0] sm:$0xff]  }
 0x3e7   : > { %v3963_v27 = vrot.slane %v17723_v9, 4  ;;  %v3966_v14 = vrot.slane %v3867_v35, 4  ;;  %v15769_v60 = vld [vmem:[%s21345_s2 + $0x568] sm:$0xff]  }
 0x3e8   : > { %15126 = vmatmul.mubr.msk.bf16.gmra.mrb[36].mxu1 %vm2537_vm14, %v3989_v33 }
 0x3e9   : > { %14574 = vmatpush3.bf16.msra.mxu1 %v15752_v13  ;;  %v3968_v30 = vsel %vm408_vm5, %v3966_v14, %v3967_v47  ;;  %4396 = vmatprep.mubr.bf16.mxu1 %v3867_v35  ;;  %v3965_v0 = vsel %vm408_vm5, %v3963_v27, %v3964_v57  ;;  %v15772_v35 = vld [vmem:[%s21345_s2 + $0x4a8] sm:$0xff]   ;;  %v15775_v14 = vld [vmem:[%s21345_s2 + $0x5b8] sm:$0xff]  }
 0x3ea   : > { %4150 = vmatprep.mubr.bf16.mxu0 %v3968_v30  ;;  %14575 = vmatprep.subr.bf16.mxu1 %v15756_v24  ;;  %v13439_v24 = vcombine.low %v17639_v42, %v17369_v53  ;;  %v15774_v27 = vld [vmem:[%s21345_s2 + $0x468] sm:$0xff]   ;;  %v15777_v42 = vld [vmem:[%s21345_s2 + $0x578] sm:$0xff]  }
 0x3eb   : > { %v3816_v50 = vpop.permute.xlu1 %3815  ;;  %4151 = vmatmul.mubr.bf16.vlgmr.msra.gmra.mrb[88].mxu0 %v3965_v0 }
 0x3ec   : > { %v17752_v62 = vsel %vm2275_vm15, %v13437_v43, %v3816_v50  ;;  %v17756_v36 = vsel %vm2296_vm0, %v3816_v50, %v17683_v8  ;;  %14616 = vmatpush3.bf16.msra.mxu0 %v15757_v26  ;;  %v15776_v26 = vld [vmem:[%s21345_s2 + $0x4b0] sm:$0xff]   ;;  %v15779_v43 = vld [vmem:[%s21345_s2 + $0x580] sm:$0xff]  }
 0x3ed   : > { %v3974_v59 = vrot.slane %v17756_v36, 4  ;;  %14576 = vmatpush3.bf16.msra.mxu1 %v15758_v19  ;;  %14617 = vmatprep.subr.bf16.mxu0 %v15759_v37  ;;  %v3972_v55 = vrot.slane %v17752_v62, 4  ;;  %v15778_v19 = vld [vmem:[%s21345_s2 + $0x5c0] sm:$0xff]   ;;  %v15782_v37 = vld [vmem:[%s21345_s2 + $0x4b8] sm:$0xff]  }
 0x3ee   : > { %14577 = vmatprep.subr.bf16.mxu1 %v15760_v25  ;;  %v15780_v25 = vld [vmem:[%s21345_s2 + $0x5c8] sm:$0xff]  }
 0x3ef   : > { %v3818_v20 = vpop.permute.xlu0 %3817  ;;  %v3975_v18 = vsel %vm408_vm5, %v3967_v47, %v3974_v59  ;;  %v3973_v11 = vsel %vm408_vm5, %v3964_v57, %v3972_v55  ;;  %v15773_v47 = vld [vmem:[%s21345_s2 + $0x570] sm:$0xff]  }
 0x3f0   : > { %v17775_v1 = vsel %vm2296_vm0, %v3818_v20, %v17696_v16  ;;  %4158 = vmatprep.mubr.bf16.mxu0 %v3975_v18  ;;  %14618 = vmatpush3.bf16.msra.mxu0 %v15761_v41  ;;  %v3820_v5 = vpop.permute.xlu1 %3819  ;;  %v17794_v6 = vsel %vm2275_vm15, %v13438_v49, %v3818_v20  ;;  %v15781_v41 = vld [vmem:[%s21345_s2 + $0x588] sm:$0xff]   ;;  %v15790_v49 = vld [vmem:[%s21345_s2 + $0x680] sm:$0xff]  }
 0x3f1   : > { %v3980_v46 = vrot.slane %v17775_v1, 4  ;;  %14578 = vmatpush3.bf16.msra.mxu1 %v15762_v44  ;;  %14619 = vmatprep.subr.bf16.mxu0 %v15763_v56  ;;  %v3879_v17 = vsel %vm2296_vm0, %v3820_v5, %v17694_v54  ;;  %v3978_v13 = vrot.slane %v17794_v6, 4  ;;  %v3864_v30 = vsel %vm2275_vm15, %v13439_v24, %v3820_v5  ;;  %v15785_v56 = vld [vmem:[%s21345_s2 + $0x6b0] sm:$0xff]  }
 0x3f2   : > { %14579 = vmatprep.subr.bf16.mxu1 %v15764_v23  ;;  %v3986_v57 = vrot.slane %v3879_v17, 4  ;;  %v3984_v0 = vrot.slane %v3864_v30, 4  ;;  %v15789_v23 = vld [vmem:[%s21345_s2 + $0x6c0] sm:$0xff]  }
 0x3f3   : > { %4159 = vmatmul.mubr.bf16.gmra.mrb[92].mxu0 %v3973_v11  ;;  %v3981_v4 = vsel %vm408_vm5, %v3974_v59, %v3980_v46  ;;  %v3979_v33 = vsel %vm408_vm5, %v3972_v55, %v3978_v13  ;;  %v15793_v11 = vld [vmem:[%s21345_s2 + $0x6d0] sm:$0xff]  }
 0x3f4   : > { %4166 = vmatprep.mubr.bf16.mxu0 %v3981_v4  ;;  %14620 = vmatpush3.bf16.msra.mxu0 %v15765_v10  ;;  %v3987_v53 = vsel %vm408_vm5, %v3980_v46, %v3986_v57  ;;  %v3985_v50 = vsel %vm408_vm5, %v3978_v13, %v3984_v0  ;;  %v15791_v46 = vld [vmem:[%s21345_s2 + $0x6c8] sm:$0xff]  }
 0x3f5   : > { %14580 = vmatpush3.bf16.msra.mxu1 %v15766_v51  ;;  %14621 = vmatprep.subr.bf16.mxu0 %v15767_v32  ;;  %v15792_v51 = vld [vmem:[%s21345_s2 + $0x688] sm:$0xff]  }
 0x3f6   : > { %14581 = vmatprep.subr.bf16.mxu1 %v15768_v45 }
 0x3f8   : > { %14622 = vmatpush3.bf16.msra.mxu0 %v15769_v60  ;;  %v15794_v60 = vld [vmem:[%s21345_s2 + $0x690] sm:$0xff]  }
 0x3f9   : > { %14582 = vmatpush3.bf16.msra.mxu1 %v15770_v7  ;;  %14623 = vmatprep.subr.bf16.mxu0 %v15771_v34  ;;  %v15795_v34 = vld [vmem:[%s21345_s2 + $0x6d8] sm:$0xff]  }
 0x3fa   : > { %14583 = vmatprep.subr.bf16.mxu1 %v15772_v35 }
 0x3fb   : > { %4167 = vmatmul.mubr.bf16.gmra.mrb[96].mxu0 %v3979_v33 }
 0x3fc   : > { %4174 = vmatprep.mubr.bf16.mxu0 %v3987_v53  ;;  %14624 = vmatpush3.bf16.msra.mxu0 %v15773_v47 }
 0x3fd   : > { %14584 = vmatpush3.bf16.msra.mxu1 %v15774_v27  ;;  %14625 = vmatprep.subr.bf16.mxu0 %v15775_v14 }
 0x3fe   : > { %15129 = vmatprep.subr.bf16.mxu1 %v15776_v26 }
 0x400   : > { %4397 = vmatmul.mubr.bf16.vlgmr.msra.gmra.mrb[40].mxu1 %v17723_v9  ;;  %14626 = vmatpush3.bf16.msra.mxu0 %v15777_v42  ;;  %v15783_v9 = vld [vmem:[%s21345_s2 + $0x5d0] sm:$0xff]  }
 0x401   : > { %4404 = vmatprep.mubr.bf16.mxu1 %v17717_v61  ;;  %15130 = vmatpush3.bf16.msra.mxu1 %v15776_v26 }
 0x402   : > { %14627 = vmatprep.subr.bf16.mxu0 %v15778_v19  ;;  %15131 = vmatprep.subr.bf16.mxu1 %v15782_v37 }
 0x403   : > { %4175 = vmatmul.mubr.bf16.gmra.mrb[100].mxu0 %v3985_v50 }
 0x404   : > { %14628 = vmatpush3.bf16.msra.mxu0 %v15779_v43  ;;  %4672 = vmatprep.mubr.bf16.mxu0 %v17717_v61 }
 0x405   : > { %14629 = vmatprep.subr.bf16.mxu0 %v15780_v25  ;;  %15132 = vmatpush3.bf16.msra.mxu1 %v15782_v37 }
 0x406   : > { %15141 = vmatprep.subr.bf16.mxu1 %v15783_v9 }
 0x408   : > { %4405 = vmatmul.mubr.bf16.gmra.mrb[44].mxu1 %v17713_v21  ;;  %14630 = vmatpush3.bf16.msra.mxu0 %v15781_v41 }
 0x409   : > { %4412 = vmatprep.mubr.bf16.mxu1 %v17756_v36  ;;  %14661 = vmatprep.subr.bf16.mxu0 %v15785_v56 }
 0x40b   : > { %4673 = vmatmul.mubr.bf16.vlgmr.msra.gmra.mrb[104].mxu0 %v17713_v21  ;;  %v15784_v21 = vld [vmem:[%s21345_s2 + $0x5d8] sm:$0xff]  }
 0x40c   : > { %4680 = vmatprep.mubr.bf16.mxu0 %v17756_v36 }
 0x410   : > { %4413 = vmatmul.mubr.bf16.gmra.mrb[48].mxu1 %v17752_v62 }
 0x411   : > { %4420 = vmatprep.mubr.bf16.mxu1 %v17775_v1 }
 0x413   : > { %4681 = vmatmul.mubr.bf16.gmra.mrb[108].mxu0 %v17752_v62 }
 0x414   : > { %4688 = vmatprep.mubr.bf16.mxu0 %v17775_v1 }
 0x418   : > { %4421 = vmatmul.mubr.bf16.gmra.mrb[52].mxu1 %v17794_v6 }
 0x419   : > { %15133 = vmatprep.mubr.msk.bf16.mxu1 %vm2537_vm14, %v17675_v2 }
 0x41b   : > { %4689 = vmatmul.mubr.bf16.gmra.mrb[112].mxu0 %v17794_v6 }
 0x41c   : > { %4696 = vmatprep.mubr.bf16.mxu0 %v3879_v17 }
 0x420   : > { %15134 = vmatmul.mubr.msk.bf16.vlgmr.msra.gmra.mrb[32].mxu1 %vm2537_vm14, %v17677_v12 }
 0x421   : > { %15137 = vmatprep.mubr.msk.bf16.mxu1 %vm2537_vm14, %v17683_v8  ;;  %15142 = vmatpush3.bf16.msra.mxu1 %v15783_v9 }
 0x422   : > { %15143 = vmatprep.subr.bf16.mxu1 %v15784_v21 }
 0x423   : > { %4697 = vmatmul.mubr.bf16.gmra.mrb[116].mxu0 %v3864_v30 }
 0x425   : > { %15144 = vmatpush3.bf16.msra.mxu1 %v15784_v21 }
 0x428   : > { %15138 = vmatmul.mubr.msk.bf16.gmra.mrb[36].mxu1 %vm2537_vm14, %v17696_v16 }
 0x429   : > { %15145 = vmatprep.mubr.msk.bf16.mxu1 %vm2537_vm14, %v17677_v12  ;;  %v15786_v12 = vld [vmem:[%s21345_s2 + $0x670] sm:$0xff]  }
 0x42a   : > { %14662 = vmatpush3.bf16.msra.mxu0 %v15786_v12 }
 0x430   : > { %15146 = vmatmul.mubr.msk.bf16.vlgmr.msra.gmra.mrb[32].mxu1 %vm2537_vm14, %v17683_v8  ;;  %v15787_v8 = vld [vmem:[%s21345_s2 + $0x6b8] sm:$0xff]  }
 0x431   : > { %15149 = vmatprep.mubr.msk.bf16.mxu1 %vm2537_vm14, %v17696_v16  ;;  %v15788_v16 = vld [vmem:[%s21345_s2 + $0x678] sm:$0xff]   ;;  %14663 = vmatprep.subr.bf16.mxu0 %v15787_v8 }
 0x432   : > { %14664 = vmatpush3.bf16.msra.mxu0 %v15788_v16 }
 0x433   : > { %14665 = vmatprep.subr.bf16.mxu0 %v15789_v23 }
 0x436   : > { %14666 = vmatpush3.bf16.msra.mxu0 %v15790_v49 }
 0x437   : > { %14667 = vmatprep.subr.bf16.mxu0 %v15791_v46 }
 0x438   : > { %15150 = vmatmul.mubr.msk.bf16.gmra.mrb[36].mxu1 %vm2537_vm14, %v17694_v54 }
 0x43a   : > { %14668 = vmatpush3.bf16.msra.mxu0 %v15792_v51 }
 0x43b   : > { %14669 = vmatprep.subr.bf16.mxu0 %v15793_v11 }
 0x43e   : > { %14670 = vmatpush3.bf16.msra.mxu0 %v15794_v60 }
 0x43f   : > { %14671 = vmatprep.subr.bf16.mxu0 %v15795_v34 }
 0x4be   : > { %v14539_v2 = vpop.f32.mrb[88].mxu0 }
 0x4bf   : > { %v14540_v61 = vpop.f32.mrb[89].mxu0 }
 0x4c0   : > { %v14541_v62 = vadd.f32 %v14540_v61, %v14539_v2  ;;  %v14542_v36 = vpop.f32.mrb[90].mxu0 }
 0x4c1   : > { %v14543_v59 = vpop.f32.mrb[91].mxu0 }
 0x4c2   : > { %v14544_v44 = vadd.f32 %v14543_v59, %v14542_v36 }
 0x4c6   : > { %v14545_v54 = vpop.f32.mrb[92].mxu0 }
 0x4c7   : > { %v14546_v55 = vpop.f32.mrb[93].mxu0 }
 0x4c8   : > { %v14547_v20 = vadd.f32 %v14546_v55, %v14545_v54  ;;  %v14548_v18 = vpop.f32.mrb[94].mxu0 }
 0x4c9   : > { %v14549_v1 = vpop.f32.mrb[95].mxu0 }
 0x4ca   : > { %v14550_v10 = vadd.f32 %v14549_v1, %v14548_v18 }
 0x4ce   : > { %v14551_v5 = vpop.f32.mrb[96].mxu0 }
 0x4cf   : > { %v14552_v32 = vpop.f32.mrb[97].mxu0 }
 0x4d0   : > { %v14553_v45 = vadd.f32 %v14552_v32, %v14551_v5  ;;  %v14554_v6 = vpop.f32.mrb[98].mxu0 }
 0x4d1   : > { %v14555_v4 = vpop.f32.mrb[99].mxu0 }
 0x4d2   : > { %v14556_v17 = vadd.f32 %v14555_v4, %v14554_v6 }
 0x4d3   : > { %v14585_v7 = vpop.f32.mrb[40].mxu1 }
 0x4d4   : > { %v14586_v13 = vpop.f32.mrb[41].mxu1 }
 0x4d5   : > { %v14587_v35 = vadd.f32 %v14586_v13, %v14585_v7  ;;  %v14588_v57 = vpop.f32.mrb[42].mxu1 }
 0x4d6   : > { %v14557_v47 = vpop.f32.mrb[100].mxu0  ;;  %v14589_v24 = vpop.f32.mrb[43].mxu1 }
 0x4d7   : > { %v15372_v27 = vadd.f32 %v14587_v35, %v14541_v62  ;;  %v14590_v14 = vadd.f32 %v14589_v24, %v14588_v57  ;;  %v14558_v33 = vpop.f32.mrb[101].mxu0 }
 0x4d8   : > { %v14559_v26 = vadd.f32 %v14558_v33, %v14557_v47  ;;  %v14560_v30 = vpop.f32.mrb[102].mxu0 }
 0x4d9   : > { %v15378_v53 = vadd.f32 %v14590_v14, %v14544_v44  ;;  %v14561_v42 = vpop.f32.mrb[103].mxu0 }
 0x4da   : > { %v14562_v0 = vadd.f32 %v14561_v42, %v14560_v30 }
 0x4db   : > { %v14591_v19 = vpop.f32.mrb[44].mxu1 }
 0x4dc   : > { %v14592_v37 = vpop.f32.mrb[45].mxu1 }
 0x4dd   : > { %v14593_v43 = vadd.f32 %v14592_v37, %v14591_v19  ;;  %v14594_v25 = vpop.f32.mrb[46].mxu1 }
 0x4de   : > { %v14595_v50 = vpop.f32.mrb[47].mxu1  ;;  %v14631_v9 = vpop.f32.mrb[104].mxu0 }
 0x4df   : > { %v15369_v41 = vadd.f32 %v14593_v43, %v14547_v20  ;;  %v14596_v21 = vadd.f32 %v14595_v50, %v14594_v25  ;;  %v14632_v2 = vpop.f32.mrb[105].mxu0 }
 0x4e0   : > { %v14633_v61 = vadd.f32 %v14632_v2, %v14631_v9  ;;  %v14634_v36 = vpop.f32.mrb[106].mxu0  ;;  %v17926_v2 = vld [vmem:[#allocation2 + $0x4] sm:$0x1] }
 0x4e1   : > { %v15375_v62 = vadd.f32 %v14596_v21, %v14550_v10  ;;  %v14635_v59 = vpop.f32.mrb[107].mxu0 }
 0x4e2   : > { %v14636_v56 = vadd.f32 %v14635_v59, %v14634_v36  ;;  %v15373_v12 = vadd.f32 %v15372_v27, %v14633_v61 }
 0x4e3   : > { %v14597_v8 = vpop.f32.mrb[48].mxu1 }
 0x4e4   : > { %v14598_v54 = vpop.f32.mrb[49].mxu1  ;;  %v15379_v44 = vadd.f32 %v15378_v53, %v14636_v56  ;;  %v17932_v56 = vld [vmem:[%s21346_s3 + $0x3] ss:$0 sm:$0xff] }
 0x4e5   : > { %v14599_v16 = vadd.f32 %v14598_v54, %v14597_v8  ;;  %v14600_v55 = vpop.f32.mrb[50].mxu1  ;;  %v17934_v8 = vld [vmem:[#allocation2 + $0x48] sm:$0xf] }
 0x4e6   : > { %v14601_v23 = vpop.f32.mrb[51].mxu1  ;;  %v14637_v18 = vpop.f32.mrb[108].mxu0 }
 0x4e7   : > { %v15384_v1 = vadd.f32 %v14599_v16, %v14553_v45  ;;  %v14602_v49 = vadd.f32 %v14601_v23, %v14600_v55  ;;  %v14638_v46 = vpop.f32.mrb[109].mxu0  ;;  %v17936_v55 = vld [vmem:[#allocation2] sm:$0xe] }
 0x4e8   : > { %v14639_v5 = vadd.f32 %v14638_v46, %v14637_v18  ;;  %v14640_v20 = vpop.f32.mrb[110].mxu0 }
 0x4e9   : > { %v15390_v51 = vadd.f32 %v14602_v49, %v14556_v17  ;;  %v14641_v32 = vpop.f32.mrb[111].mxu0 }
 0x4ea   : > { %v14642_v11 = vadd.f32 %v14641_v32, %v14640_v20  ;;  %v15370_v6 = vadd.f32 %v15369_v41, %v14639_v5  ;;  %v17920_v41 = vld [vmem:[#allocation2] sm:$0xf] }
 0x4eb   : > { %v14603_v10 = vpop.f32.mrb[52].mxu1  ;;  %v4988_v21 = vshrl.u32 %v17920_v41, 16 }
 0x4ec   : > { %v14604_v4 = vpop.f32.mrb[53].mxu1  ;;  %v15376_v60 = vadd.f32 %v15375_v62, %v14642_v11  ;;  %v4997_v62 = vshll.u32 %v17926_v2, 16 }
 0x4ed   : > { %v14605_v7 = vadd.f32 %v14604_v4, %v14603_v10  ;;  %v14606_v34 = vpop.f32.mrb[54].mxu1  ;;  %v4990_v61 = vrot.slane %v4988_v21, 4  ;;  %v13525_v10 = vrot.slane %v17936_v55, 9 }
 0x4ee   : > { %v14607_v13 = vpop.f32.mrb[55].mxu1  ;;  %v14643_v35 = vpop.f32.mrb[112].mxu0  ;;  %v17939_v20 = vrot.slane %v4997_v62, 5 }
 0x4ef   : > { %v15381_v57 = vadd.f32 %v14605_v7, %v14559_v26  ;;  %v14608_v47 = vadd.f32 %v14607_v13, %v14606_v34  ;;  %v14644_v24 = vpop.f32.mrb[113].mxu0  ;;  %v5117_v7 = vshll.u32 %v17934_v8, 16 }
 0x4f0   : > { %v14645_v27 = vadd.f32 %v14644_v24, %v14643_v35  ;;  %v14646_v45 = vpop.f32.mrb[114].mxu0 }
 0x4f1   : > { %v15387_v14 = vadd.f32 %v14608_v47, %v14562_v0  ;;  %v14647_v33 = vpop.f32.mrb[115].mxu0  ;;  %v4991_v0 = vshll.u32 %v17920_v41, 16 }
 0x4f2   : > { %v14648_v30 = vadd.f32 %v14647_v33, %v14646_v45  ;;  %v17916_v53 = vadd.f32 %v15384_v1, %v14645_v27 }
 0x4f3   : > { %v4993_v36 = vrot.slane %v4991_v0, 5 }
 0x4f4   : > { %v17918_v17 = vadd.f32 %v15390_v51, %v14648_v30  ;;  %v5114_v51 = vshrl.u32 %v17934_v8, 16 }
 0x4f5   : > { %v4994_v1 = vor.u32 %v4993_v36, %v4990_v61 }
 0x4f6   : > { %v14649_v42 = vpop.f32.mrb[116].mxu0 }
 0x4f7   : > { %v14650_v19 = vpop.f32.mrb[117].mxu0  ;;  %v17948_v13 = vrot.slane %v4994_v1, 4 }
 0x4f8   : > { %v14651_v37 = vadd.f32 %v14650_v19, %v14649_v42  ;;  %v14652_v43 = vpop.f32.mrb[118].mxu0  ;;  %v17952_v19 = vrot.slane %v5117_v7, 5 }
 0x4f9   : > { %v14653_v25 = vpop.f32.mrb[119].mxu0 }
 0x4fa   : > { %v14654_v50 = vadd.f32 %v14653_v25, %v14652_v43  ;;  %v15382_v9 = vadd.f32 %v15381_v57, %v14651_v37 }
 0x4fc   : > { %v17922_v26 = vadd.f32 %v15387_v14, %v14654_v50 }
 0x503   : > { %v15147_v59 = vpop.f32.mrb[32].mxu1 }
 0x504   : > { %v15371_v54 = vadd.f32 %v15370_v6, %v15147_v59  ;;  %v4739_v16 = vpop.f32.mrb[33].mxu1  ;;  %v5159_v6 = vrot.slane %v17926_v2, 5 }
 0x505   : > { %v15374_v23 = vadd.f32 %v15373_v12, %v4739_v16  ;;  %v15148_v18 = vpop.f32.mrb[34].mxu1 }
 0x506   : > { %v4785_v49 = vadd.f32 %v15371_v54, %v17932_v56  ;;  %v15377_v46 = vadd.f32 %v15376_v60, %v15148_v18  ;;  %v4742_v5 = vpop.f32.mrb[35].mxu1 }
 0x507   : > { %v4783_v32 = vadd.f32 %v15374_v23, %v17932_v56  ;;  %v15380_v11 = vadd.f32 %v15379_v44, %v4742_v5  ;;  %v17950_v44 = vrot.slane %v5114_v51, 4  ;;  %v4931_v51 = vld [vmem:[#allocation2 + $0x18] sm:$0xf] }
 0x508   : > { %vm4793_vm8 = vcmp.ge.f32.partialorder %v4785_v49, 0.0  ;;  %v4801_v4 = vmul.f32 0.01, %v4785_v49  ;;  %v4786_v12 = vadd.f32 %v15377_v46, %v17932_v56 }
 0x509   : > { %vm4791_vm10 = vcmp.ge.f32.partialorder %v4783_v32, 0.0  ;;  %v4799_v60 = vmul.f32 0.01, %v4783_v32  ;;  %v4784_v34 = vadd.f32 %v15380_v11, %v17932_v56 }
 0x50a   : > { %v4809_v35 = vsel %vm4793_vm8, %v4785_v49, %v4801_v4  ;;  %vm4794_vm11 = vcmp.ge.f32.partialorder %v4786_v12, 0.0  ;;  %v4802_v57 = vmul.f32 0.01, %v4786_v12  ;;  %v4934_v4 = vld [vmem:[#allocation2 + $0x1c] sm:$0x1] }
 0x50b   : > { %v14162_v47 = vpack.c.bf16 %v4809_v35, %v4809_v35  ;;  %v4807_v24 = vsel %vm4791_vm10, %v4783_v32, %v4799_v60  ;;  %vm4792_vm13 = vcmp.ge.f32.partialorder %v4784_v34, 0.0  ;;  %v4800_v27 = vmul.f32 0.01, %v4784_v34  ;;  %v15151_v45 = vpop.f32.mrb[36].mxu1  ;;  %v4919_v60 = vld [vmem:[#allocation2 + $0x8] sm:$0xf] }
 0x50c   : > { %v14160_v14 = vpack.c.bf16 %v4807_v24, %v4807_v24  ;;  %v4810_v33 = vsel %vm4794_vm11, %v4786_v12, %v4802_v57  ;;  %v15383_v30 = vadd.f32 %v15382_v9, %v15151_v45  ;;  %v4755_v42 = vpop.f32.mrb[37].mxu1  ;;  %v4937_v45 = vld [vmem:[#allocation2 + $0x20] sm:$0xf] }
 0x50d   : > { %v4856_v37 = vshrl.u32 %v14162_v47, 16  ;;  %v4859_v43 = vshll.u32 %v14162_v47, 16  ;;  %v14163_v25 = vpack.c.bf16 %v4810_v33, %v4810_v33  ;;  %v4808_v50 = vsel %vm4792_vm13, %v4784_v34, %v4800_v27  ;;  %v15152_v21 = vpop.f32.mrb[38].mxu1  ;;  %v4922_v47 = vld [vmem:[#allocation2 + $0xc] sm:$0x1] }
 0x50e   : > { %v4840_v0 = vshrl.u32 %v14160_v14, 16  ;;  %v4843_v61 = vshll.u32 %v14160_v14, 16  ;;  %v14161_v36 = vpack.c.bf16 %v4808_v50, %v4808_v50  ;;  %v4789_v62 = vadd.f32 %v15383_v30, %v17932_v56  ;;  %v4758_v59 = vpop.f32.mrb[39].mxu1  ;;  %v4940_v30 = vld [vmem:[#allocation2 + $0x24] sm:$0x1] }
 0x50f   : > { %v4858_v54 = vrot.slane %v4856_v37, 7  ;;  %v4864_v16 = vshrl.u32 %v14163_v25, 16  ;;  %v4867_v23 = vshll.u32 %v14163_v25, 16  ;;  %v15386_v18 = vadd.f32 %v17916_v53, %v4755_v42 }
 0x510   : > { %v4842_v9 = vrot.slane %v4840_v0, 7  ;;  %v4848_v1 = vshrl.u32 %v14161_v36, 16  ;;  %v4851_v49 = vshll.u32 %v14161_v36, 16  ;;  %vm4797_vm6 = vcmp.ge.f32.partialorder %v4789_v62, 0.0  ;;  %v4928_v0 = vld [vmem:[#allocation2 + $0x14] sm:$0x1] }
 0x511   : > { %v4861_v46 = vor.u32 %v4859_v43, %v4858_v54  ;;  %v4862_v5 = vrot.slane %v4858_v54, 4  ;;  %v4866_v32 = vrot.slane %v4864_v16, 7  ;;  %v4805_v11 = vmul.f32 0.01, %v4789_v62  ;;  %v4925_v43 = vld [vmem:[#allocation2 + $0x10] sm:$0xf] }
 0x512   : > { %v4845_v12 = vor.u32 %v4843_v61, %v4842_v9  ;;  %v4846_v7 = vrot.slane %v4842_v9, 4  ;;  %v4850_v34 = vrot.slane %v4848_v1, 7  ;;  %v4787_v35 = vadd.f32 %v15386_v18, %v17932_v56  ;;  %v17970_v36 = vld [vmem:[#allocation2 + $0x48] sm:$0xe]  ;;  %v17976_v9 = vld [vmem:[#allocation2 + $0x4c] sm:$0x1] }
 0x513   : > { %v4932_v57 = vsel %vm16833_vm2, %v4861_v46, %v4931_v51  ;;  %v4935_v53 = vsel %vm16839_vm4, %v4862_v5, %v4934_v4  ;;  %v4869_v24 = vor.u32 %v4867_v23, %v4866_v32  ;;  %v4870_v27 = vrot.slane %v4866_v32, 4  ;;  %v4958_v4 = vld [vmem:[#allocation2 + $0x3c] sm:$0x1] }
 0x514   : > { %4933 = vst [vmem:[#allocation2 + $0x18] sm:$0xf] %v4932_v57  ;;  %4936 = vst [vmem:[#allocation2 + $0x1c] sm:$0x1] %v4935_v53  ;;  %v4920_v14 = vsel %vm16833_vm2, %v4845_v12, %v4919_v60  ;;  %v4923_v33 = vsel %vm16839_vm4, %v4846_v7, %v4922_v47  ;;  %v4853_v42 = vor.u32 %v4851_v49, %v4850_v34  ;;  %v4854_v37 = vrot.slane %v4850_v34, 4 }
 0x515   : > { %4921 = vst [vmem:[#allocation2 + $0x8] sm:$0xf] %v4920_v14  ;;  %4924 = vst [vmem:[#allocation2 + $0xc] sm:$0x1] %v4923_v33  ;;  %v4938_v25 = vsel %vm16833_vm2, %v4869_v24, %v4937_v45  ;;  %v4941_v50 = vsel %vm16839_vm4, %v4870_v27, %v4940_v30  ;;  %v4813_v61 = vsel %vm4797_vm6, %v4789_v62, %v4805_v11  ;;  %vm4795_vm7 = vcmp.ge.f32.partialorder %v4787_v35, 0.0  ;;  %v15797_v27 = vld [vmem:[%s21345_s2 + $0x698] sm:$0xff]  }
 0x516   : > { %4939 = vst [vmem:[#allocation2 + $0x20] sm:$0xf] %v4938_v25  ;;  %4942 = vst [vmem:[#allocation2 + $0x24] sm:$0x1] %v4941_v50  ;;  %v4926_v54 = vsel %vm16833_vm2, %v4853_v42, %v4925_v43  ;;  %v4929_v16 = vsel %vm16839_vm4, %v4854_v37, %v4928_v0  ;;  %v14166_v23 = vpack.c.bf16 %v4813_v61, %v4813_v61  ;;  %v4803_v18 = vmul.f32 0.01, %v4787_v35 }
 0x517   : > { %4927 = vst [vmem:[#allocation2 + $0x10] sm:$0xf] %v4926_v54  ;;  %4930 = vst [vmem:[#allocation2 + $0x14] sm:$0x1] %v4929_v16  ;;  %v15389_v1 = vadd.f32 %v17922_v26, %v15152_v21  ;;  %v15392_v62 = vadd.f32 %v17918_v17, %v4758_v59  ;;  %v17986_v49 = vsel %vm16420_vm9, %v13525_v10, %v5159_v6  ;;  %v13534_v32 = vrot.slane %v17970_v36, 9 }
 0x518   : > { %v4888_v46 = vshrl.u32 %v14166_v23, 16  ;;  %v4811_v5 = vsel %vm4795_vm7, %v4787_v35, %v4803_v18  ;;  %v5000_v51 = vsel %vm16454_vm12, %v17948_v13, %v17939_v20  ;;  %v5195_v55 = vrot.slane %v17976_v9, 5  ;;  %v4955_v11 = vld [vmem:[#allocation2 + $0x38] sm:$0xf]  ;;  %v4943_v33 = vld [vmem:[#allocation2 + $0x28] sm:$0xf]  ;;  %14672 = vmatpush3.bf16.msra.mxu0 %v15797_v27 }
 0x519   : > { %v14164_v26 = vpack.c.bf16 %v4811_v5, %v4811_v5  ;;  %v4790_v17 = vadd.f32 %v15389_v1, %v17932_v56  ;;  %v4788_v2 = vadd.f32 %v15392_v62, %v17932_v56  ;;  %v4891_v59 = vshll.u32 %v14166_v23, 16  ;;  %v4946_v25 = vld [vmem:[#allocation2 + $0x2c] sm:$0x1]  ;;  %v15801_v13 = vld [vmem:[%s21345_s2 + $0x6f0] sm:$0xff]  }
 0x51a   : > { %v4890_v21 = vrot.slane %v4888_v46, 7  ;;  %v5120_v10 = vor.u32 %v17952_v19, %v17950_v44  ;;  %v5123_v6 = vshll.u32 %v17976_v9, 16  ;;  %15153 = vmatprep.subr.bf16.mxu1 %v15801_v13 }
 0x51b   : > { %v4872_v12 = vshrl.u32 %v14164_v26, 16  ;;  %v4875_v7 = vshll.u32 %v14164_v26, 16  ;;  %vm4798_vm8 = vcmp.ge.f32.partialorder %v4790_v17, 0.0  ;;  %v4806_v60 = vmul.f32 0.01, %v4790_v17  ;;  %15154 = vmatpush3.bf16.msra.mxu1 %v15801_v13 }
 0x51c   : > { %v4893_v34 = vor.u32 %v4891_v59, %v4890_v21  ;;  %v4894_v35 = vrot.slane %v4890_v21, 4  ;;  %vm4796_vm10 = vcmp.ge.f32.partialorder %v4788_v2, 0.0  ;;  %v4804_v57 = vmul.f32 0.01, %v4788_v2  ;;  %v17999_v56 = vld [vmem:[#allocation2 + $0x8] sm:$0xf] }
 0x51d   : > { %v4874_v53 = vrot.slane %v4872_v12, 7  ;;  %v4814_v47 = vsel %vm4798_vm8, %v4790_v17, %v4806_v60  ;;  %v18001_v24 = vld [vmem:[#allocation2 + $0xc] sm:$0x1]  ;;  %v5002_v44 = vshrl.u32 %v17999_v56, 16  ;;  %v5005_v19 = vshll.u32 %v17999_v56, 16 }
 0x51e   : > { %v4956_v45 = vsel %vm16833_vm2, %v4893_v34, %v4955_v11  ;;  %v4959_v14 = vsel %vm16839_vm4, %v4894_v35, %v4958_v4  ;;  %v14167_v30 = vpack.c.bf16 %v4814_v47, %v4814_v47  ;;  %v4812_v42 = vsel %vm4796_vm10, %v4788_v2, %v4804_v57  ;;  %v18012_v61 = vld [vmem:[#allocation2 + $0x10] sm:$0xf]  ;;  %v18015_v18 = vld [vmem:[#allocation2 + $0x18] sm:$0xf]  ;;  %v18023_v59 = vld [vmem:[#allocation2 + $0x14] sm:$0x1] }
 0x51f   : > { %4957 = vst [vmem:[#allocation2 + $0x38] sm:$0xf] %v4956_v45  ;;  %4960 = vst [vmem:[#allocation2 + $0x3c] sm:$0x1] %v4959_v14  ;;  %v4877_v37 = vor.u32 %v4875_v7, %v4874_v53  ;;  %v4878_v43 = vrot.slane %v4874_v53, 4  ;;  %v14165_v50 = vpack.c.bf16 %v4812_v42, %v4812_v42  ;;  %v5004_v0 = vrot.slane %v5002_v44, 4 }
 0x520   : > { %v4896_v54 = vshrl.u32 %v14167_v30, 16  ;;  %v5007_v16 = vrot.slane %v5005_v19, 5  ;;  %v5011_v23 = vshll.u32 %v18001_v24, 16  ;;  %v18017_v1 = vrot.slane %v5120_v10, 4  ;;  %v4961_v4 = vld [vmem:[#allocation2 + $0x40] sm:$0xf] }
 0x521   : > { %v4944_v62 = vsel %vm16833_vm2, %v4877_v37, %v4943_v33  ;;  %v4947_v46 = vsel %vm16839_vm4, %v4878_v43, %v4946_v25  ;;  %v4899_v5 = vshll.u32 %v14167_v30, 16  ;;  %v4880_v26 = vshrl.u32 %v14165_v50, 16  ;;  %v4964_v10 = vld [vmem:[#allocation2 + $0x44] sm:$0x1]  ;;  %v4949_v53 = vld [vmem:[#allocation2 + $0x30] sm:$0xf] }
 0x522   : > { %4945 = vst [vmem:[#allocation2 + $0x28] sm:$0xf] %v4944_v62  ;;  %4948 = vst [vmem:[#allocation2 + $0x2c] sm:$0x1] %v4947_v46  ;;  %v4898_v17 = vrot.slane %v4896_v54, 7  ;;  %v4883_v2 = vshll.u32 %v14165_v50, 16  ;;  %v5008_v21 = vor.u32 %v5007_v16, %v5004_v0 }
 0x523   : > { %v5016_v11 = vshrl.u32 %v18012_v61, 16  ;;  %v4882_v12 = vrot.slane %v4880_v26, 7  ;;  %v5013_v7 = vrot.slane %v5011_v23, 5  ;;  %v5019_v60 = vshll.u32 %v18012_v61, 16  ;;  %v4952_v47 = vld [vmem:[#allocation2 + $0x34] sm:$0x1] }
 0x524   : > { %v5030_v34 = vshrl.u32 %v18015_v18, 16  ;;  %v4901_v35 = vor.u32 %v4899_v5, %v4898_v17  ;;  %v4902_v57 = vrot.slane %v4898_v17, 4  ;;  %v5009_v44 = vrot.slane %v5008_v21, 4  ;;  %v18028_v19 = vld [vmem:[#allocation2 + $0x1c] sm:$0x1]  ;;  %v15799_v26 = vld [vmem:[%s21345_s2 + $0x6e0] sm:$0xff]  }
 0x525   : > { %v5018_v27 = vrot.slane %v5016_v11, 4  ;;  %v4885_v45 = vor.u32 %v4883_v2, %v4882_v12  ;;  %v4886_v14 = vrot.slane %v4882_v12, 4  ;;  %v5021_v33 = vrot.slane %v5019_v60, 5  ;;  %v5128_v42 = vld [vmem:[#allocation2 + $0x8] sm:$0xe]  ;;  %v15800_v17 = vld [vmem:[%s21345_s2 + $0x6a0] sm:$0xff]   ;;  %14673 = vmatprep.subr.bf16.mxu0 %v15799_v26 }
 0x526   : > { %v5025_v30 = vshll.u32 %v18023_v59, 16  ;;  %v4962_v37 = vsel %vm16833_vm2, %v4901_v35, %v4961_v4  ;;  %v4965_v43 = vsel %vm16839_vm4, %v4902_v57, %v4964_v10  ;;  %v5014_v25 = vsel %vm16454_vm12, %v5009_v44, %v5013_v7  ;;  %v5129_v0 = vld [vmem:[#allocation2 + $0x10] sm:$0xe]  ;;  %v5130_v54 = vld [vmem:[#allocation2 + $0x18] sm:$0xe]  ;;  %14674 = vmatpush3.bf16.msra.mxu0 %v15800_v17 }
 0x527   : > { %v5032_v50 = vrot.slane %v5030_v34, 4  ;;  %4963 = vst [vmem:[#allocation2 + $0x40] sm:$0xf] %v4962_v37  ;;  %4966 = vst [vmem:[#allocation2 + $0x44] sm:$0x1] %v4965_v43  ;;  %v4950_v16 = vsel %vm16833_vm2, %v4885_v45, %v4949_v53  ;;  %v4953_v23 = vsel %vm16839_vm4, %v4886_v14, %v4952_v47  ;;  %v13540_v62 = vcombine.low %v5000_v51, %v5014_v25  ;;  %v15802_v53 = vld [vmem:[%s21345_s2 + $0x6e8] sm:$0xff]  }
 0x528   : > { %v5022_v46 = vor.u32 %v5021_v33, %v5018_v27  ;;  %v18046_v5 = vld [vmem:[#allocation2 + $0x20] sm:$0xf]  ;;  %4951 = vst [vmem:[#allocation2 + $0x30] sm:$0xf] %v4950_v16  ;;  %4954 = vst [vmem:[#allocation2 + $0x34] sm:$0x1] %v4953_v23  ;;  %14675 = vmatprep.subr.bf16.mxu0 %v15802_v53 }
 0x529   : > { %v5033_v2 = vshll.u32 %v18015_v18, 16  ;;  %v5039_v21 = vshll.u32 %v18028_v19, 16  ;;  %v13526_v11 = vrot.slane %v5128_v42, 9  ;;  %v5163_v20 = vrot.slane %v18001_v24, 5  ;;  %5237 = vrot.lane.b32.xlu0 %v13540_v62, %s16184_s5  ;;  %v18062_v7 = vld [vmem:[#allocation2 + $0x24] sm:$0x1] }
 0x52a   : > { %v5023_v51 = vrot.slane %v5022_v46, 4  ;;  %v5027_v4 = vrot.slane %v5025_v30, 5  ;;  %v13527_v10 = vrot.slane %v5129_v0, 9  ;;  %v5167_v12 = vrot.slane %v18023_v59, 5  ;;  %v18067_v57 = vld [vmem:[#allocation2 + $0x28] sm:$0xf] }
 0x52b   : > { %v5035_v60 = vrot.slane %v5033_v2, 5  ;;  %v5164_v34 = vsel %vm16420_vm9, %v13526_v11, %v5163_v20  ;;  %v13528_v35 = vrot.slane %v5130_v54, 9  ;;  %v5171_v24 = vrot.slane %v18028_v19, 5  ;;  %v4982_v44 = vld [vmem:[#allocation2 + $0x2c] sm:$0x1] }
 0x52c   : > { %v5041_v47 = vrot.slane %v5039_v21, 5  ;;  %v13545_v59 = vcombine.low %v17986_v49, %v5164_v34  ;;  %v5044_v27 = vshrl.u32 %v18046_v5, 16  ;;  %v18076_v45 = vrot.slane %v5123_v6, 5  ;;  %v5131_v42 = vld [vmem:[#allocation2 + $0x20] sm:$0xe]  ;;  %v15804_v49 = vld [vmem:[%s21345_s2 + $0x6a8] sm:$0xff]  }
 0x52d   : > { %v5028_v19 = vsel %vm16454_vm12, %v5023_v51, %v5027_v4  ;;  %v5036_v14 = vor.u32 %v5035_v60, %v5032_v50  ;;  %v5168_v33 = vsel %vm16420_vm9, %v13527_v10, %v5167_v12  ;;  %v5047_v30 = vshll.u32 %v18046_v5, 16  ;;  %v15805_v6 = vld [vmem:[%s21345_s2 + $0x6f8] sm:$0xff]   ;;  %v5132_v0 = vld [vmem:[#allocation2 + $0x28] sm:$0xe]  ;;  %14676 = vmatpush3.bf16.msra.mxu0 %v15804_v49 }
 0x52e   : > { %5262 = vrot.lane.b32.xlu0 %v13545_v59, %s16183_s28  ;;  %v5046_v37 = vrot.slane %v5044_v27, 4  ;;  %v5053_v43 = vshll.u32 %v18062_v7, 16  ;;  %v5058_v25 = vshrl.u32 %v18067_v57, 16  ;;  %v5061_v50 = vshll.u32 %v18067_v57, 16  ;;  %15155 = vmatprep.subr.bf16.mxu1 %v15805_v6  ;;  %v18100_v4 = vld [vmem:[#allocation2 + $0x38] sm:$0xf] }
 0x52f   : > { %v5037_v54 = vrot.slane %v5036_v14, 4  ;;  %v5172_v16 = vsel %vm16420_vm9, %v13528_v35, %v5171_v24  ;;  %v5049_v23 = vrot.slane %v5047_v30, 5  ;;  %v5067_v62 = vshll.u32 %v4982_v44, 16  ;;  %v18095_v21 = vld [vmem:[#allocation2 + $0x30] sm:$0xf]  ;;  %15156 = vmatpush3.bf16.msra.mxu1 %v15805_v6  ;;  %v15806_v24 = vld [vmem:[%s21345_s2 + $0x620] sm:$0xff]  }
 0x530   : > { %v13546_v46 = vcombine.low %v5168_v33, %v5172_v16  ;;  %v5060_v26 = vrot.slane %v5058_v25, 4  ;;  %v5063_v17 = vrot.slane %v5061_v50, 5  ;;  %v13529_v2 = vrot.slane %v5131_v42, 9  ;;  %v4983_v10 = vld [vmem:[#allocation2 + $0x34] sm:$0x1]  ;;  %14707 = vmatprep.subr.bf16.mxu0 %v15806_v24 }
 0x531   : > { %v5042_v11 = vsel %vm16454_vm12, %v5037_v54, %v5041_v47  ;;  %v5050_v20 = vor.u32 %v5049_v23, %v5046_v37  ;;  %v5175_v13 = vrot.slane %v18062_v7, 5  ;;  %v13530_v51 = vrot.slane %v5132_v0, 9  ;;  %v4984_v27 = vld [vmem:[#allocation2 + $0x3c] sm:$0x1]  ;;  %v18118_v16 = vld [vmem:[#allocation2 + $0x40] sm:$0xf] }
 0x532   : > { %v13541_v12 = vcombine.low %v5028_v19, %v5042_v11  ;;  %v5055_v60 = vrot.slane %v5053_v43, 5  ;;  %v5064_v34 = vor.u32 %v5063_v17, %v5060_v26  ;;  %v5179_v35 = vrot.slane %v4982_v44, 5  ;;  %v5133_v44 = vld [vmem:[#allocation2 + $0x30] sm:$0xe]  ;;  %v5134_v43 = vld [vmem:[#allocation2 + $0x38] sm:$0xe] }
 0x533   : > { %v5051_v53 = vrot.slane %v5050_v20, 4  ;;  %v5069_v59 = vrot.slane %v5067_v62, 5  ;;  %v5072_v47 = vshrl.u32 %v18095_v21, 16  ;;  %v5075_v14 = vshll.u32 %v18095_v21, 16  ;;  %v5135_v24 = vld [vmem:[#allocation2 + $0x40] sm:$0xe] }
 0x534   : > { %5239 = vrot.lane.b32.xlu1 %v13541_v12, %s16184_s5  ;;  %v5065_v7 = vrot.slane %v5064_v34, 4  ;;  %v5081_v33 = vshll.u32 %v4983_v10, 16  ;;  %v5086_v19 = vshrl.u32 %v18100_v4, 16  ;;  %v5089_v30 = vshll.u32 %v18100_v4, 16 }
 0x535   : > { %v5176_v42 = vsel %vm16420_vm9, %v13529_v2, %v5175_v13  ;;  %v5180_v49 = vsel %vm16420_vm9, %v13530_v51, %v5179_v35  ;;  %v5074_v6 = vrot.slane %v5072_v47, 4  ;;  %v5077_v37 = vrot.slane %v5075_v14, 5  ;;  %v4985_v51 = vld [vmem:[#allocation2 + $0x44] sm:$0x1] }
 0x536   : > { %v5056_v25 = vsel %vm16454_vm12, %v5051_v53, %v5055_v60  ;;  %v5070_v50 = vsel %vm16454_vm12, %v5065_v7, %v5069_v59  ;;  %v5088_v0 = vrot.slane %v5086_v19, 4  ;;  %v5091_v54 = vrot.slane %v5089_v30, 5 }
 0x537   : > { %v13542_v23 = vcombine.low %v5056_v25, %v5070_v50  ;;  %v5078_v62 = vor.u32 %v5077_v37, %v5074_v6  ;;  %v5095_v26 = vshll.u32 %v4984_v27, 16  ;;  %v13531_v17 = vrot.slane %v5133_v44, 9 }
 0x538   : > { %5264 = vrot.lane.b32.xlu1 %v13546_v46, %s16183_s28  ;;  %v5083_v2 = vrot.slane %v5081_v33, 5  ;;  %v5092_v11 = vor.u32 %v5091_v54, %v5088_v0  ;;  %v5183_v20 = vrot.slane %v4983_v10, 5  ;;  %v13532_v13 = vrot.slane %v5134_v43, 9  ;;  %v18129_v10 = vld [vmem:[%s21345_s2 + $0x660] sm:$0xff]  }
 0x539   : > { %5241 = vrot.lane.b32.xlu0 %v13542_v23, %s16184_s5  ;;  %v5079_v12 = vrot.slane %v5078_v62, 4  ;;  %v5187_v60 = vrot.slane %v4984_v27, 5  ;;  %v5100_v34 = vshrl.u32 %v18118_v16, 16  ;;  %v5103_v35 = vshll.u32 %v18118_v16, 16  ;;  %15165 = vmatprep.subr.bf16.mxu1 %v18129_v10 }
 0x53a   : > { %v13547_v53 = vcombine.low %v5176_v42, %v5180_v49  ;;  %v5093_v59 = vrot.slane %v5092_v11, 4  ;;  %v5097_v47 = vrot.slane %v5095_v26, 5  ;;  %v5184_v46 = vsel %vm16420_vm9, %v13531_v17, %v5183_v20 }
 0x53b   : > { %v5084_v14 = vsel %vm16454_vm12, %v5079_v12, %v5083_v2  ;;  %v5102_v27 = vrot.slane %v5100_v34, 4  ;;  %v5105_v7 = vrot.slane %v5103_v35, 5  ;;  %v5109_v33 = vshll.u32 %v4985_v51, 16  ;;  %v15808_v34 = vld [vmem:[%s21345_s2 + $0x5e0] sm:$0xff]  }
 0x53c   : > { %5266 = vrot.lane.b32.xlu1 %v13547_v53, %s16183_s28  ;;  %v5098_v19 = vsel %vm16454_vm12, %v5093_v59, %v5097_v47  ;;  %v13533_v30 = vrot.slane %v5135_v24, 9  ;;  %v5191_v44 = vrot.slane %v4985_v51, 5  ;;  %v5188_v49 = vsel %vm16420_vm9, %v13532_v13, %v5187_v60  ;;  %v15809_v59 = vld [vmem:[%s21345_s2 + $0x628] sm:$0xff]  }
 0x53d   : > { %v13543_v42 = vcombine.low %v5084_v14, %v5098_v19  ;;  %v5106_v6 = vor.u32 %v5105_v7, %v5102_v27  ;;  %v13548_v37 = vcombine.low %v5184_v46, %v5188_v49  ;;  %v5196_v43 = vsel %vm16420_vm9, %v13534_v32, %v5195_v55  ;;  %v15817_v27 = vld [vmem:[%s21345_s2 + $0x668] sm:$0xff]  }
 0x53e   : > { %v5111_v50 = vrot.slane %v5109_v33, 5  ;;  %v5126_v0 = vsel %vm16454_vm12, %v18017_v1, %v18076_v45  ;;  %v5192_v54 = vsel %vm16420_vm9, %v13533_v30, %v5191_v44  ;;  %v13536_v55 = vcombine.low %v18012_v61, %v18015_v18  ;;  %v15811_v33 = vld [vmem:[%s21345_s2 + $0x5e8] sm:$0xff]  }
 0x53f   : > { %5243 = vrot.lane.b32.xlu0 %v13543_v42, %s16184_s5  ;;  %v5107_v25 = vrot.slane %v5106_v6, 4  ;;  %v13549_v23 = vcombine.low %v5192_v54, %v5196_v43  ;;  %v13535_v45 = vcombine.low %v17920_v41, %v17999_v56  ;;  %v13537_v35 = vcombine.low %v18046_v5, %v18067_v57  ;;  %v15812_v42 = vld [vmem:[%s21345_s2 + $0x630] sm:$0xff]  }
 0x540   : > { %5268 = vrot.lane.b32.xlu1 %v13548_v37, %s16183_s28  ;;  %v13538_v54 = vcombine.low %v18095_v21, %v18100_v4 }
 0x541   : > { %v5112_v36 = vsel %vm16454_vm12, %v5107_v25, %v5111_v50  ;;  %v15824_v25 = vld [vmem:[%s21345_s2 + $0x780] sm:$0xff]  }
 0x542   : > { %v13544_v9 = vcombine.low %v5112_v36, %v5126_v0  ;;  %v15813_v0 = vld [vmem:[%s21345_s2 + $0x5f0] sm:$0xff]   ;;  %v15815_v36 = vld [vmem:[%s21345_s2 + $0x638] sm:$0xff]  }
 0x544   : > { %5245 = vrot.lane.b32.xlu0 %v13544_v9, %s16184_s5  ;;  %5270 = vrot.lane.b32.xlu1 %v13549_v23, %s16183_s28 }
 0x59b   : > { %v5238_v32 = vpop.permute.xlu0 %5237 }
 0x59c   : > { %v18171_v2 = vsel %vm2275_vm15, %v13535_v45, %v5238_v32  ;;  %v15816_v45 = vld [vmem:[%s21345_s2 + $0x5f8] sm:$0xff]  }
 0x59d   : > { %v5389_v12 = vrot.slane %v18171_v2, 4 }
 0x5a0   : > { %v18159_v1 = vpop.permute.xlu0 %5262 }
 0x5a1   : > { %v18168_v17 = vsel %vm2296_vm0, %v5238_v32, %v18159_v1  ;;  %v5395_v18 = vrot.slane %v18159_v1, 4 }
 0x5a2   : > { %v5392_v56 = vrot.slane %v18168_v17, 4 }
 0x5a6   : > { %v5240_v62 = vpop.permute.xlu1 %5239 }
 0x5a7   : > { %v18164_v26 = vsel %vm2275_vm15, %v13536_v55, %v5240_v62 }
 0x5a8   : > { %v5390_v61 = vrot.slane %v18164_v26, 4 }
 0x5aa   : > { %v18173_v11 = vpop.permute.xlu1 %5264  ;;  %v5391_v14 = vsel %vm408_vm5, %v5389_v12, %v5390_v61 }
 0x5ab   : > { %v18179_v20 = vsel %vm2296_vm0, %v5240_v62, %v18173_v11  ;;  %v5396_v41 = vrot.slane %v18173_v11, 4  ;;  %v5242_v13 = vpop.permute.xlu0 %5241 }
 0x5ac   : > { %v5393_v51 = vrot.slane %v18179_v20, 4  ;;  %v18205_v5 = vsel %vm2275_vm15, %v13537_v35, %v5242_v13 }
 0x5ad   : > { %v5397_v60 = vsel %vm408_vm5, %v5395_v18, %v5396_v41  ;;  %v5398_v49 = vrot.slane %v18205_v5, 4 }
 0x5ae   : > { %v18191_v24 = vpop.permute.xlu1 %5266  ;;  %15157 = vmatprep.mubr.msk.bf16.mxu1 %vm2537_vm14, %v5397_v60  ;;  %v5394_v53 = vsel %vm408_vm5, %v5392_v56, %v5393_v51  ;;  %v15819_v56 = vld [vmem:[%s21345_s2 + $0x600] sm:$0xff]  }
 0x5af   : > { %v18200_v47 = vsel %vm2296_vm0, %v5242_v13, %v18191_v24  ;;  %v5402_v46 = vrot.slane %v18191_v24, 4  ;;  %5576 = vmatprep.mubr.bf16.mxu0 %v5394_v53  ;;  %v5399_v23 = vsel %vm408_vm5, %v5390_v61, %v5398_v49  ;;  %v15818_v61 = vld [vmem:[%s21345_s2 + $0x640] sm:$0xff]   ;;  %v13539_v13 = vcombine.low %v18118_v16, %v17934_v8  ;;  %v15821_v8 = vld [vmem:[%s21345_s2 + $0x608] sm:$0xff]   ;;  %v15822_v16 = vld [vmem:[%s21345_s2 + $0x650] sm:$0xff]  }
 0x5b0   : > { %5577 = vmatmul.mubr.bf16.vlgmr.msra.gmra.mrb[120].mxu0 %v5391_v14  ;;  %v5400_v57 = vrot.slane %v18200_v47, 4  ;;  %v15823_v53 = vld [vmem:[%s21345_s2 + $0x610] sm:$0xff]   ;;  %v15826_v14 = vld [vmem:[%s21345_s2 + $0x618] sm:$0xff]  }
 0x5b1   : > { %14708 = vmatpush3.bf16.msra.mxu0 %v15808_v34  ;;  %v5403_v7 = vsel %vm408_vm5, %v5396_v41, %v5402_v46  ;;  %v5244_v19 = vpop.permute.xlu0 %5243  ;;  %v15827_v34 = vld [vmem:[%s21345_s2 + $0x788] sm:$0xff]  }
 0x5b2   : > { %15158 = vmatmul.mubr.msk.bf16.vlgmr.msra.gmra.mrb[56].mxu1 %vm2537_vm14, %v5403_v7  ;;  %v18216_v30 = vpop.permute.xlu1 %5268  ;;  %v5401_v44 = vsel %vm408_vm5, %v5393_v51, %v5400_v57  ;;  %14709 = vmatprep.subr.bf16.mxu0 %v15809_v59  ;;  %v18248_v32 = vsel %vm2275_vm15, %v13538_v54, %v5244_v19  ;;  %v15820_v51 = vld [vmem:[%s21345_s2 + $0x648] sm:$0xff]   ;;  %v15825_v59 = vld [vmem:[%s21345_s2 + $0x658] sm:$0xff]  }
 0x5b3   : > { %v18225_v6 = vsel %vm2296_vm0, %v5244_v19, %v18216_v30  ;;  %v5408_v37 = vrot.slane %v18216_v30, 4  ;;  %5584 = vmatprep.mubr.bf16.mxu0 %v5401_v44  ;;  %15166 = vmatpush3.bf16.msra.mxu1 %v18129_v10  ;;  %v5404_v18 = vrot.slane %v18248_v32, 4  ;;  %v15831_v7 = vld [vmem:[%s21345_s2 + $0x708] sm:$0xff]   ;;  %v15836_v19 = vld [vmem:[%s21345_s2 + $0x760] sm:$0xff]  }
 0x5b4   : > { %v5406_v43 = vrot.slane %v18225_v6, 4  ;;  %15167 = vmatprep.subr.bf16.mxu1 %v15817_v27  ;;  %v15838_v44 = vld [vmem:[%s21345_s2 + $0x768] sm:$0xff]  }
 0x5b5   : > { %14710 = vmatpush3.bf16.msra.mxu0 %v15811_v33  ;;  %v5409_v50 = vsel %vm408_vm5, %v5402_v46, %v5408_v37  ;;  %v5405_v12 = vsel %vm408_vm5, %v5398_v49, %v5404_v18  ;;  %v15834_v33 = vld [vmem:[%s21345_s2 + $0x758] sm:$0xff]   ;;  %v15840_v49 = vld [vmem:[%s21345_s2 + $0x770] sm:$0xff]  }
 0x5b6   : > { %15161 = vmatprep.mubr.msk.bf16.mxu1 %vm2537_vm14, %v5409_v50  ;;  %v18240_v10 = vpop.permute.xlu1 %5270  ;;  %14711 = vmatprep.subr.bf16.mxu0 %v15812_v42  ;;  %v5246_v55 = vpop.permute.xlu0 %5245  ;;  %v5407_v21 = vsel %vm408_vm5, %v5400_v57, %v5406_v43  ;;  %v15828_v57 = vld [vmem:[%s21345_s2 + $0x740] sm:$0xff]   ;;  %v15839_v42 = vld [vmem:[%s21345_s2 + $0x728] sm:$0xff]  }
 0x5b7   : > { %v5414_v9 = vrot.slane %v18240_v10, 4  ;;  %15168 = vmatpush3.bf16.msra.mxu1 %v15817_v27  ;;  %v18253_v4 = vsel %vm2296_vm0, %v5246_v55, %v18240_v10  ;;  %v18277_v60 = vsel %vm2275_vm15, %v13539_v13, %v5246_v55  ;;  %v15830_v27 = vld [vmem:[%s21345_s2 + $0x748] sm:$0xff]  }
 0x5b8   : > { %5585 = vmatmul.mubr.bf16.gmra.mrb[124].mxu0 %v5399_v23  ;;  %15177 = vmatprep.subr.bf16.mxu1 %v15824_v25  ;;  %v5412_v41 = vrot.slane %v18253_v4, 4  ;;  %v5410_v35 = vrot.slane %v18277_v60, 4 }
 0x5b9   : > { %5592 = vmatprep.mubr.bf16.mxu0 %v5407_v21  ;;  %14712 = vmatpush3.bf16.msra.mxu0 %v15813_v0  ;;  %v5415_v62 = vsel %vm408_vm5, %v5408_v37, %v5414_v9  ;;  %v15841_v37 = vld [vmem:[%s21345_s2 + $0x730] sm:$0xff]  }
 0x5ba   : > { %15162 = vmatmul.mubr.msk.bf16.gmra.mrb[60].mxu1 %vm2537_vm14, %v5415_v62  ;;  %14713 = vmatprep.subr.bf16.mxu0 %v15815_v36  ;;  %v5411_v46 = vsel %vm408_vm5, %v5404_v18, %v5410_v35 }
 0x5bb   : > { %15169 = vmatprep.mubr.msk.bf16.mxu1 %vm2537_vm14, %v18159_v1  ;;  %v5413_v1 = vsel %vm408_vm5, %v5406_v43, %v5412_v41  ;;  %v15842_v43 = vld [vmem:[%s21345_s2 + $0x778] sm:$0xff]  }
 0x5bd   : > { %14714 = vmatpush3.bf16.msra.mxu0 %v15816_v45 }
 0x5be   : > { %14715 = vmatprep.subr.bf16.mxu0 %v15818_v61 }
 0x5c0   : > { %5593 = vmatmul.mubr.bf16.gmra.mrb[128].mxu0 %v5405_v12 }
 0x5c1   : > { %5600 = vmatprep.mubr.bf16.mxu0 %v5413_v1  ;;  %14716 = vmatpush3.bf16.msra.mxu0 %v15819_v56 }
 0x5c2   : > { %15170 = vmatmul.mubr.msk.bf16.vlgmr.msra.gmra.mrb[56].mxu1 %vm2537_vm14, %v18173_v11  ;;  %14717 = vmatprep.subr.bf16.mxu0 %v15820_v51 }
 0x5c3   : > { %15173 = vmatprep.mubr.msk.bf16.mxu1 %vm2537_vm14, %v18191_v24  ;;  %15178 = vmatpush3.bf16.msra.mxu1 %v15824_v25  ;;  %v15843_v25 = vld [vmem:[%s21345_s2 + $0x738] sm:$0xff]  }
 0x5c4   : > { %15179 = vmatprep.subr.bf16.mxu1 %v15827_v34 }
 0x5c5   : > { %14718 = vmatpush3.bf16.msra.mxu0 %v15821_v8 }
 0x5c6   : > { %14719 = vmatprep.subr.bf16.mxu0 %v15822_v16 }
 0x5c7   : > { %15180 = vmatpush3.bf16.msra.mxu1 %v15827_v34 }
 0x5c8   : > { %5601 = vmatmul.mubr.bf16.gmra.mrb[132].mxu0 %v5411_v46 }
 0x5c9   : > { %14720 = vmatpush3.bf16.msra.mxu0 %v15823_v53  ;;  %5822 = vmatprep.mubr.bf16.mxu0 %v18168_v17  ;;  %v15829_v17 = vld [vmem:[%s21345_s2 + $0x700] sm:$0xff]  }
 0x5ca   : > { %15174 = vmatmul.mubr.msk.bf16.gmra.mrb[60].mxu1 %vm2537_vm14, %v18216_v30  ;;  %14721 = vmatprep.subr.bf16.mxu0 %v15825_v59 }
 0x5cb   : > { %15181 = vmatprep.mubr.msk.bf16.mxu1 %vm2537_vm14, %v18173_v11  ;;  %v15832_v11 = vld [vmem:[%s21345_s2 + $0x750] sm:$0xff]  }
 0x5cd   : > { %14722 = vmatpush3.bf16.msra.mxu0 %v15826_v14 }
 0x5ce   : > { %14753 = vmatprep.subr.bf16.mxu0 %v15828_v57 }
 0x5d0   : > { %5823 = vmatmul.mubr.bf16.vlgmr.msra.gmra.mrb[136].mxu0 %v18171_v2  ;;  %v15833_v2 = vld [vmem:[%s21345_s2 + $0x710] sm:$0xff]  }
 0x5d1   : > { %5830 = vmatprep.mubr.bf16.mxu0 %v18179_v20  ;;  %14754 = vmatpush3.bf16.msra.mxu0 %v15829_v17 }
 0x5d2   : > { %15182 = vmatmul.mubr.msk.bf16.vlgmr.msra.gmra.mrb[56].mxu1 %vm2537_vm14, %v18191_v24  ;;  %14755 = vmatprep.subr.bf16.mxu0 %v15830_v27  ;;  %v15835_v24 = vld [vmem:[%s21345_s2 + $0x718] sm:$0xff]  }
 0x5d3   : > { %15185 = vmatprep.mubr.msk.bf16.mxu1 %vm2537_vm14, %v18216_v30  ;;  %v15837_v30 = vld [vmem:[%s21345_s2 + $0x720] sm:$0xff]  }
 0x5d5   : > { %14756 = vmatpush3.bf16.msra.mxu0 %v15831_v7 }
 0x5d6   : > { %14757 = vmatprep.subr.bf16.mxu0 %v15832_v11 }
 0x5d8   : > { %5831 = vmatmul.mubr.bf16.gmra.mrb[140].mxu0 %v18164_v26 }
 0x5d9   : > { %5838 = vmatprep.mubr.bf16.mxu0 %v18200_v47  ;;  %14758 = vmatpush3.bf16.msra.mxu0 %v15833_v2 }
 0x5da   : > { %15186 = vmatmul.mubr.msk.bf16.gmra.mrb[60].mxu1 %vm2537_vm14, %v18240_v10  ;;  %14759 = vmatprep.subr.bf16.mxu0 %v15834_v33 }
 0x5dd   : > { %14760 = vmatpush3.bf16.msra.mxu0 %v15835_v24 }
 0x5de   : > { %14761 = vmatprep.subr.bf16.mxu0 %v15836_v19 }
 0x5e0   : > { %5839 = vmatmul.mubr.bf16.gmra.mrb[144].mxu0 %v18205_v5 }
 0x5e1   : > { %5846 = vmatprep.mubr.bf16.mxu0 %v18225_v6  ;;  %14762 = vmatpush3.bf16.msra.mxu0 %v15837_v30 }
 0x5e2   : > { %14763 = vmatprep.subr.bf16.mxu0 %v15838_v44 }
 0x5e5   : > { %14764 = vmatpush3.bf16.msra.mxu0 %v15839_v42 }
 0x5e6   : > { %14765 = vmatprep.subr.bf16.mxu0 %v15840_v49 }
 0x5e8   : > { %5847 = vmatmul.mubr.bf16.gmra.mrb[148].mxu0 %v18248_v32 }
 0x5e9   : > { %14766 = vmatpush3.bf16.msra.mxu0 %v15841_v37  ;;  %6098 = vmatprep.mubr.bf16.mxu0 %v18179_v20 }
 0x5ea   : > { %14767 = vmatprep.subr.bf16.mxu0 %v15842_v43 }
 0x5ed   : > { %14768 = vmatpush3.bf16.msra.mxu0 %v15843_v25 }
 0x5f0   : > { %6099 = vmatmul.mubr.bf16.vlgmr.msra.gmra.mrb[152].mxu0 %v18164_v26 }
 0x5f1   : > { %6106 = vmatprep.mubr.bf16.mxu0 %v18200_v47 }
 0x5f8   : > { %6107 = vmatmul.mubr.bf16.gmra.mrb[156].mxu0 %v18205_v5 }
 0x5f9   : > { %6114 = vmatprep.mubr.bf16.mxu0 %v18225_v6  ;;  %v15844_v6 = vld [vmem:[%s21345_s2 + $0x8a0] sm:$0xff]  }
 0x5fa   : > { %15189 = vmatprep.subr.bf16.mxu0 %v15844_v6 }
 0x5fb   : > { %15190 = vmatpush3.bf16.msra.mxu0 %v15844_v6 }
 0x600   : > { %6115 = vmatmul.mubr.bf16.gmra.mrb[160].mxu0 %v18248_v32 }
 0x601   : > { %6122 = vmatprep.mubr.bf16.mxu0 %v18253_v4 }
 0x608   : > { %6123 = vmatmul.mubr.bf16.gmra.mrb[164].mxu0 %v18277_v60 }
 0x683   : > { %v14677_v20 = vpop.f32.mrb[120].mxu0 }
 0x684   : > { %v14678_v50 = vpop.f32.mrb[121].mxu0 }
 0x685   : > { %v14679_v0 = vadd.f32 %v14678_v50, %v14677_v20  ;;  %v14680_v54 = vpop.f32.mrb[122].mxu0 }
 0x686   : > { %v14681_v10 = vpop.f32.mrb[123].mxu0 }
 0x687   : > { %v14682_v36 = vadd.f32 %v14681_v10, %v14680_v54 }
 0x68b   : > { %v14683_v9 = vpop.f32.mrb[124].mxu0 }
 0x68c   : > { %v14684_v26 = vpop.f32.mrb[125].mxu0 }
 0x68d   : > { %v14685_v23 = vadd.f32 %v14684_v26, %v14683_v9  ;;  %v14686_v47 = vpop.f32.mrb[126].mxu0 }
 0x68e   : > { %v14687_v55 = vpop.f32.mrb[127].mxu0 }
 0x68f   : > { %v14688_v5 = vadd.f32 %v14687_v55, %v14686_v47 }
 0x693   : > { %v14689_v32 = vpop.f32.mrb[128].mxu0 }
 0x694   : > { %v14690_v21 = vpop.f32.mrb[129].mxu0 }
 0x695   : > { %v14691_v4 = vadd.f32 %v14690_v21, %v14689_v32  ;;  %v14692_v62 = vpop.f32.mrb[130].mxu0  ;;  %v18399_v21 = vld [vmem:[#allocation2] sm:$0xf] }
 0x696   : > { %v14693_v45 = vpop.f32.mrb[131].mxu0 }
 0x697   : > { %v14694_v61 = vadd.f32 %v14693_v45, %v14692_v62  ;;  %v6422_v62 = vshrl.u32 %v18399_v21, 16 }
 0x69b   : > { %v14695_v18 = vpop.f32.mrb[132].mxu0 }
 0x69c   : > { %v14696_v41 = vpop.f32.mrb[133].mxu0 }
 0x69d   : > { %v14697_v56 = vadd.f32 %v14696_v41, %v14695_v18  ;;  %v14698_v13 = vpop.f32.mrb[134].mxu0 }
 0x69e   : > { %v14699_v51 = vpop.f32.mrb[135].mxu0 }
 0x69f   : > { %v14700_v12 = vadd.f32 %v14699_v51, %v14698_v13  ;;  %v6424_v51 = vrot.slane %v6422_v62, 4 }
 0x6a3   : > { %v14723_v60 = vpop.f32.mrb[136].mxu0 }
 0x6a4   : > { %v14724_v1 = vpop.f32.mrb[137].mxu0 }
 0x6a5   : > { %v14725_v34 = vadd.f32 %v14724_v1, %v14723_v60  ;;  %v14726_v8 = vpop.f32.mrb[138].mxu0  ;;  %v18381_v16 = vpop.f32.mrb[56].mxu1 }
 0x6a6   : > { %v14727_v35 = vpop.f32.mrb[139].mxu0  ;;  %v6165_v53 = vpop.f32.mrb[57].mxu1 }
 0x6a7   : > { %v15396_v59 = vadd.f32 %v14725_v34, %v14679_v0  ;;  %v14728_v46 = vadd.f32 %v14727_v35, %v14726_v8  ;;  %v18383_v14 = vpop.f32.mrb[58].mxu1  ;;  %v6411_v35 = vld [vmem:[#allocation2 + $0x4] sm:$0x1] }
 0x6a8   : > { %v6168_v57 = vpop.f32.mrb[59].mxu1 }
 0x6a9   : > { %v15402_v17 = vadd.f32 %v14728_v46, %v14682_v36 }
 0x6ab   : > { %v14729_v27 = vpop.f32.mrb[140].mxu0 }
 0x6ac   : > { %v14730_v7 = vpop.f32.mrb[141].mxu0 }
 0x6ad   : > { %v14731_v11 = vadd.f32 %v14730_v7, %v14729_v27  ;;  %v14732_v2 = vpop.f32.mrb[142].mxu0  ;;  %v18385_v33 = vpop.f32.mrb[60].mxu1  ;;  %v6431_v27 = vshll.u32 %v6411_v35, 16 }
 0x6ae   : > { %v14733_v24 = vpop.f32.mrb[143].mxu0  ;;  %v18387_v19 = vpop.f32.mrb[61].mxu1 }
 0x6af   : > { %v15393_v30 = vadd.f32 %v14731_v11, %v14685_v23  ;;  %v14734_v44 = vadd.f32 %v14733_v24, %v14732_v2  ;;  %v18389_v42 = vpop.f32.mrb[62].mxu1  ;;  %v6561_v24 = vld [vmem:[#allocation2] sm:$0xe] }
 0x6b0   : > { %v18391_v49 = vpop.f32.mrb[63].mxu1 }
 0x6b1   : > { %v15399_v37 = vadd.f32 %v14734_v44, %v14688_v5 }
 0x6b3   : > { %v14735_v43 = vpop.f32.mrb[144].mxu0 }
 0x6b4   : > { %v14736_v25 = vpop.f32.mrb[145].mxu0 }
 0x6b5   : > { %v14737_v20 = vadd.f32 %v14736_v25, %v14735_v43  ;;  %v14738_v50 = vpop.f32.mrb[146].mxu0 }
 0x6b6   : > { %v14739_v0 = vpop.f32.mrb[147].mxu0 }
 0x6b7   : > { %v18393_v54 = vadd.f32 %v14737_v20, %v14691_v4  ;;  %v14740_v10 = vadd.f32 %v14739_v0, %v14738_v50  ;;  %v6425_v4 = vshll.u32 %v18399_v21, 16  ;;  %v13625_v0 = vrot.slane %v6561_v24, 9 }
 0x6b9   : > { %v18395_v36 = vadd.f32 %v14740_v10, %v14694_v61  ;;  %v6427_v60 = vrot.slane %v6425_v4, 5  ;;  %v6593_v10 = vrot.slane %v6411_v35, 5 }
 0x6bb   : > { %v14741_v9 = vpop.f32.mrb[148].mxu0  ;;  %v6428_v46 = vor.u32 %v6427_v60, %v6424_v51 }
 0x6bc   : > { %v14742_v26 = vpop.f32.mrb[149].mxu0 }
 0x6bd   : > { %v14743_v47 = vadd.f32 %v14742_v26, %v14741_v9  ;;  %v14744_v23 = vpop.f32.mrb[150].mxu0 }
 0x6be   : > { %v14745_v55 = vpop.f32.mrb[151].mxu0 }
 0x6bf   : > { %v18397_v6 = vadd.f32 %v14743_v47, %v14697_v56  ;;  %v14746_v32 = vadd.f32 %v14745_v55, %v14744_v23  ;;  %v18408_v56 = vld [vmem:[%s21346_s3 + $0x4] ss:$0 sm:$0xff]  ;;  %v18419_v55 = vld [vmem:[#allocation2 + $0x4c] sm:$0x1] }
 0x6c0   : > { %v6629_v51 = vrot.slane %v18419_v55, 5 }
 0x6c1   : > { %v18401_v5 = vadd.f32 %v14746_v32, %v14700_v12  ;;  %v18421_v32 = vld [vmem:[#allocation2 + $0x48] sm:$0xe] }
 0x6c3   : > { %v14769_v45 = vpop.f32.mrb[152].mxu0 }
 0x6c4   : > { %v14770_v18 = vpop.f32.mrb[153].mxu0 }
 0x6c5   : > { %v14771_v61 = vadd.f32 %v14770_v18, %v14769_v45  ;;  %v14772_v41 = vpop.f32.mrb[154].mxu0 }
 0x6c6   : > { %v14773_v13 = vpop.f32.mrb[155].mxu0 }
 0x6c7   : > { %v15397_v1 = vadd.f32 %v15396_v59, %v14771_v61  ;;  %v14774_v34 = vadd.f32 %v14773_v13, %v14772_v41  ;;  %v13634_v13 = vrot.slane %v18421_v32, 9  ;;  %v15854_v32 = vld [vmem:[%s21345_s2 + $0x880] sm:$0xff]  }
 0x6c9   : > { %v15398_v12 = vadd.f32 %v15397_v1, %v6165_v53  ;;  %v15403_v8 = vadd.f32 %v15402_v17, %v14774_v34  ;;  %v18412_v53 = vrot.slane %v6428_v46, 4  ;;  %v18414_v17 = vrot.slane %v6431_v27, 5 }
 0x6ca   : > { %v6557_v34 = vshll.u32 %v18419_v55, 16  ;;  %v15861_v55 = vld [vmem:[%s21345_s2 + $0x850] sm:$0xff]  }
 0x6cb   : > { %v6209_v7 = vadd.f32 %v15398_v12, %v18408_v56  ;;  %v15404_v11 = vadd.f32 %v15403_v8, %v6168_v57  ;;  %v14775_v2 = vpop.f32.mrb[156].mxu0 }
 0x6cc   : > { %v14776_v44 = vpop.f32.mrb[157].mxu0  ;;  %v18639_v48 = vrot.slane %v6557_v34, 5 }
 0x6cd   : > { %vm6217_vm11 = vcmp.ge.f32.partialorder %v6209_v7, 0.0  ;;  %v6225_v43 = vmul.f32 0.01, %v6209_v7  ;;  %v6210_v59 = vadd.f32 %v15404_v11, %v18408_v56  ;;  %v14777_v25 = vadd.f32 %v14776_v44, %v14775_v2  ;;  %v14778_v20 = vpop.f32.mrb[158].mxu0 }
 0x6ce   : > { %v14779_v50 = vpop.f32.mrb[159].mxu0 }
 0x6cf   : > { %v6233_v9 = vsel %vm6217_vm11, %v6209_v7, %v6225_v43  ;;  %vm6218_vm13 = vcmp.ge.f32.partialorder %v6210_v59, 0.0  ;;  %v6226_v26 = vmul.f32 0.01, %v6210_v59  ;;  %v15394_v57 = vadd.f32 %v15393_v30, %v14777_v25 }
 0x6d0   : > { %v18417_v47 = vadd.f32 %v6233_v9, %v17405_v58  ;;  %v14780_v23 = vadd.f32 %v14779_v50, %v14778_v20  ;;  %v18431_v30 = vsel %vm16420_vm9, %v13625_v0, %v6593_v10  ;;  %v6353_v50 = vld [vmem:[#allocation2 + $0x8] sm:$0xf]  ;;  %v6356_v0 = vld [vmem:[#allocation2 + $0xc] sm:$0x1] }
 0x6d1   : > { %v6234_v62 = vsel %vm6218_vm13, %v6210_v59, %v6226_v26  ;;  %v15395_v4 = vadd.f32 %v15394_v57, %v18381_v16  ;;  %v6434_v16 = vsel %vm16454_vm12, %v18412_v53, %v18414_v17 }
 0x6d2   : > { %v14168_v45 = vpack.c.bf16 %v18417_v47, %v18417_v47  ;;  %v18427_v18 = vadd.f32 %v6234_v62, %v17417_v52  ;;  %v15400_v61 = vadd.f32 %v15399_v37, %v14780_v23  ;;  %v18453_v62 = vld [vmem:[#allocation2 + $0x48] sm:$0xf] }
 0x6d3   : > { %v6211_v58 = vadd.f32 %v15395_v4, %v18408_v56  ;;  %v14781_v41 = vpop.f32.mrb[160].mxu0 }
 0x6d4   : > { %v6274_v60 = vshrl.u32 %v14168_v45, 16  ;;  %v14169_v52 = vpack.c.bf16 %v18427_v18, %v18427_v18  ;;  %v15401_v37 = vadd.f32 %v15400_v61, %v18383_v14  ;;  %v14782_v1 = vpop.f32.mrb[161].mxu0  ;;  %v6249_v46 = vpack.c.bf16 %v18427_v18, %v18417_v47 }
 0x6d5   : > { %vm6219_vm6 = vcmp.ge.f32.partialorder %v6211_v58, 0.0  ;;  %v6227_v12 = vmul.f32 0.01, %v6211_v58  ;;  %v14783_v8 = vadd.f32 %v14782_v1, %v14781_v41  ;;  %v14784_v35 = vpop.f32.mrb[162].mxu0  ;;  %v6277_v7 = vshll.u32 %v14168_v45, 16 }
 0x6d6   : > { %v6276_v27 = vrot.slane %v6274_v60, 7  ;;  %v6282_v11 = vshrl.u32 %v14169_v52, 16  ;;  %v6212_v2 = vadd.f32 %v15401_v37, %v18408_v56  ;;  %v14785_v24 = vpop.f32.mrb[163].mxu0  ;;  %v6285_v44 = vshll.u32 %v14169_v52, 16 }
 0x6d7   : > { %v6235_v43 = vsel %vm6219_vm6, %v6211_v58, %v6227_v12  ;;  %v15409_v14 = vadd.f32 %v18393_v54, %v14783_v8  ;;  %v14786_v59 = vadd.f32 %v14785_v24, %v14784_v35  ;;  %v6362_v58 = vld [vmem:[#allocation2 + $0x14] sm:$0x1]  ;;  %v6548_v35 = vshrl.u32 %v18453_v62, 16 }
 0x6d8   : > { %v6279_v25 = vor.u32 %v6277_v7, %v6276_v27  ;;  %v6280_v20 = vrot.slane %v6276_v27, 4  ;;  %v6284_v10 = vrot.slane %v6282_v11, 7  ;;  %v18449_v9 = vadd.f32 %v6235_v43, %v17403_v28  ;;  %v6359_v28 = vld [vmem:[#allocation2 + $0x10] sm:$0xf] }
 0x6d9   : > { %vm6220_vm7 = vcmp.ge.f32.partialorder %v6212_v2, 0.0  ;;  %v6228_v26 = vmul.f32 0.01, %v6212_v2  ;;  %v15410_v57 = vadd.f32 %v15409_v14, %v18387_v19  ;;  %v15415_v23 = vadd.f32 %v18395_v36, %v14786_v59 }
 0x6da   : > { %v6354_v54 = vsel %vm16833_vm2, %v6279_v25, %v6353_v50  ;;  %v6357_v4 = vsel %vm16839_vm4, %v6280_v20, %v6356_v0  ;;  %v6287_v45 = vor.u32 %v6285_v44, %v6284_v10  ;;  %v6288_v61 = vrot.slane %v6284_v10, 4 }
 0x6db   : > { %6355 = vst [vmem:[#allocation2 + $0x8] sm:$0xf] %v6354_v54  ;;  %6358 = vst [vmem:[#allocation2 + $0xc] sm:$0x1] %v6357_v4  ;;  %v14170_v41 = vpack.c.bf16 %v18449_v9, %v18449_v9  ;;  %v6236_v19 = vsel %vm6220_vm7, %v6212_v2, %v6228_v26  ;;  %v6213_v36 = vadd.f32 %v15410_v57, %v18408_v56  ;;  %v14787_v52 = vpop.f32.mrb[164].mxu0  ;;  %v18480_v10 = vrot.slane %v6548_v35, 4 }
 0x6dc   : > { %v15416_v60 = vadd.f32 %v15415_v23, %v18391_v49  ;;  %v6360_v37 = vsel %vm16833_vm2, %v6287_v45, %v6359_v28  ;;  %v6363_v1 = vsel %vm16839_vm4, %v6288_v61, %v6362_v58  ;;  %v18468_v12 = vadd.f32 %v6236_v19, %v17412_v31  ;;  %v14788_v8 = vpop.f32.mrb[165].mxu0  ;;  %v15845_v26 = vld [vmem:[%s21345_s2 + $0x860] sm:$0xff]   ;;  %v15847_v23 = vld [vmem:[%s21345_s2 + $0x8a8] sm:$0xff]   ;;  %v6365_v45 = vld [vmem:[#allocation2 + $0x18] sm:$0xf] }
 0x6dd   : > { %6361 = vst [vmem:[#allocation2 + $0x10] sm:$0xf] %v6360_v37  ;;  %6364 = vst [vmem:[#allocation2 + $0x14] sm:$0x1] %v6363_v1  ;;  %v6290_v27 = vshrl.u32 %v14170_v41, 16  ;;  %vm6221_vm8 = vcmp.ge.f32.partialorder %v6213_v36, 0.0  ;;  %v14789_v44 = vadd.f32 %v14788_v8, %v14787_v52  ;;  %14799 = vmatprep.subr.bf16.mxu1 %v15845_v26  ;;  %15191 = vmatprep.subr.bf16.mxu0 %v15847_v23 }
 0x6de   : > { %v6229_v7 = vmul.f32 0.01, %v6213_v36  ;;  %v14790_v11 = vpop.f32.mrb[166].mxu0  ;;  %v6551_v49 = vshll.u32 %v18453_v62, 16  ;;  %v6250_v2 = vpack.c.bf16 %v18468_v12, %v18449_v9  ;;  %v14171_v24 = vpack.c.bf16 %v18468_v12, %v18468_v12  ;;  %v15846_v57 = vld [vmem:[%s21345_s2 + $0x820] sm:$0xff]   ;;  %v15848_v28 = vld [vmem:[%s21345_s2 + $0x868] sm:$0xff]   ;;  %15192 = vmatpush3.bf16.msra.mxu0 %v15847_v23 }
 0x6df   : > { %v6214_v31 = vadd.f32 %v15416_v60, %v18408_v56  ;;  %v14791_v43 = vpop.f32.mrb[167].mxu0  ;;  %v6292_v14 = vrot.slane %v6290_v27, 7  ;;  %v6293_v59 = vshll.u32 %v14170_v41, 16  ;;  %v15406_v61 = vadd.f32 %v18397_v6, %v14789_v44  ;;  %v6368_v58 = vld [vmem:[#allocation2 + $0x1c] sm:$0x1]  ;;  %14800 = vmatpush3.bf16.msra.mxu1 %v15846_v57  ;;  %v15849_v44 = vld [vmem:[%s21345_s2 + $0x828] sm:$0xff]  }
 0x6e0   : > { %v6237_v25 = vsel %vm6221_vm8, %v6213_v36, %v6229_v7  ;;  %v14792_v20 = vadd.f32 %v14791_v43, %v14790_v11  ;;  %v6298_v50 = vshrl.u32 %v14171_v24, 16  ;;  %v6301_v19 = vshll.u32 %v14171_v24, 16  ;;  %v6371_v7 = vld [vmem:[#allocation2 + $0x20] sm:$0xf]  ;;  %14801 = vmatprep.subr.bf16.mxu1 %v15848_v28  ;;  %v6374_v43 = vld [vmem:[#allocation2 + $0x24] sm:$0x1] }
 0x6e1   : > { %v18478_v0 = vadd.f32 %v6237_v25, %v17456_v29  ;;  %vm6222_vm10 = vcmp.ge.f32.partialorder %v6214_v31, 0.0  ;;  %v6295_v54 = vor.u32 %v6293_v59, %v6292_v14  ;;  %v6296_v4 = vrot.slane %v6292_v14, 4  ;;  %v6377_v23 = vld [vmem:[#allocation2 + $0x28] sm:$0xf] }
 0x6e2   : > { %v6230_v29 = vmul.f32 0.01, %v6214_v31  ;;  %v6300_v41 = vrot.slane %v6298_v50, 7  ;;  %v15412_v60 = vadd.f32 %v18401_v5, %v14792_v20  ;;  %v6562_v52 = vld [vmem:[#allocation2 + $0x8] sm:$0xe]  ;;  %v15407_v8 = vadd.f32 %v15406_v61, %v18385_v33  ;;  %v15850_v20 = vld [vmem:[%s21345_s2 + $0x870] sm:$0xff]  }
 0x6e3   : > { %v14172_v36 = vpack.c.bf16 %v18478_v0, %v18478_v0  ;;  %v6366_v37 = vsel %vm16833_vm2, %v6295_v54, %v6365_v45  ;;  %v6369_v6 = vsel %vm16839_vm4, %v6296_v4, %v6368_v58  ;;  %v18504_v35 = vld [vmem:[#allocation2 + $0xc] sm:$0x1]  ;;  %v13626_v59 = vrot.slane %v6562_v52, 9  ;;  %14802 = vmatpush3.bf16.msra.mxu1 %v15849_v44  ;;  %v15851_v45 = vld [vmem:[%s21345_s2 + $0x830] sm:$0xff]  }
 0x6e4   : > { %v6238_v1 = vsel %vm6222_vm10, %v6214_v31, %v6230_v29  ;;  %6367 = vst [vmem:[#allocation2 + $0x18] sm:$0xf] %v6366_v37  ;;  %6370 = vst [vmem:[#allocation2 + $0x1c] sm:$0x1] %v6369_v6  ;;  %v6303_v27 = vor.u32 %v6301_v19, %v6300_v41  ;;  %v6304_v5 = vrot.slane %v6300_v41, 4  ;;  %v6215_v33 = vadd.f32 %v15407_v8, %v18408_v56  ;;  %v15852_v19 = vld [vmem:[%s21345_s2 + $0x878] sm:$0xff]  }
 0x6e5   : > { %v6306_v11 = vshrl.u32 %v14172_v36, 16  ;;  %v6309_v24 = vshll.u32 %v14172_v36, 16  ;;  %v18510_v31 = vadd.f32 %v6238_v1, %v17487_v38  ;;  %v15413_v14 = vadd.f32 %v15412_v60, %v18389_v42  ;;  %v6563_v25 = vld [vmem:[#allocation2 + $0x10] sm:$0xe]  ;;  %v18530_v58 = vld [vmem:[#allocation2 + $0x14] sm:$0x1]  ;;  %14803 = vmatprep.subr.bf16.mxu1 %v15850_v20 }
 0x6e6   : > { %v6372_v50 = vsel %vm16833_vm2, %v6303_v27, %v6371_v7  ;;  %v6375_v26 = vsel %vm16839_vm4, %v6304_v5, %v6374_v43  ;;  %v6597_v38 = vrot.slane %v18504_v35, 5  ;;  %vm6223_vm11 = vcmp.ge.f32.partialorder %v6215_v33, 0.0  ;;  %v6380_v36 = vld [vmem:[#allocation2 + $0x2c] sm:$0x1] }
 0x6e7   : > { %v6308_v57 = vrot.slane %v6306_v11, 7  ;;  %6373 = vst [vmem:[#allocation2 + $0x20] sm:$0xf] %v6372_v50  ;;  %6376 = vst [vmem:[#allocation2 + $0x24] sm:$0x1] %v6375_v26  ;;  %v14173_v42 = vpack.c.bf16 %v18510_v31, %v18510_v31  ;;  %v6216_v4 = vadd.f32 %v15413_v14, %v18408_v56  ;;  %v13627_v41 = vrot.slane %v6563_v25, 9  ;;  %14804 = vmatpush3.bf16.msra.mxu1 %v15851_v45 }
 0x6e8   : > { %v6231_v54 = vmul.f32 0.01, %v6215_v33  ;;  %v6598_v28 = vsel %vm16420_vm9, %v13626_v59, %v6597_v38  ;;  %v18552_v44 = vsel %vm16420_vm9, %v13634_v13, %v6629_v51  ;;  %14805 = vmatprep.subr.bf16.mxu1 %v15852_v19  ;;  %v15853_v59 = vld [vmem:[%s21345_s2 + $0x838] sm:$0xff]   ;;  %v6386_v25 = vld [vmem:[#allocation2 + $0x34] sm:$0x1]  ;;  %v18572_v26 = vrot.slane %v6551_v49, 5 }
 0x6e9   : > { %v6311_v29 = vor.u32 %v6309_v24, %v6308_v57  ;;  %v6312_v61 = vrot.slane %v6308_v57, 4  ;;  %v6314_v56 = vshrl.u32 %v14173_v42, 16  ;;  %v6317_v60 = vshll.u32 %v14173_v42, 16  ;;  %v18568_v50 = vld [vmem:[#allocation2 + $0x8] sm:$0xf] }
 0x6ea   : > { %v6239_v52 = vsel %vm6223_vm11, %v6215_v33, %v6231_v54  ;;  %vm6224_vm13 = vcmp.ge.f32.partialorder %v6216_v4, 0.0  ;;  %v6232_v8 = vmul.f32 0.01, %v6216_v4  ;;  %v13645_v5 = vcombine.low %v18431_v30, %v6598_v28  ;;  %v18592_v28 = vld [vmem:[%s21345_s2 + $0x810] sm:$0xff]  }
 0x6eb   : > { %v6378_v37 = vsel %vm16833_vm2, %v6311_v29, %v6377_v23  ;;  %v6381_v6 = vsel %vm16839_vm4, %v6312_v61, %v6380_v36  ;;  %v18540_v1 = vadd.f32 %v6239_v52, %v17448_v22  ;;  %v6316_v27 = vrot.slane %v6314_v56, 7  ;;  %v18543_v7 = vld [vmem:[#allocation2 + $0x1c] sm:$0x1]  ;;  %v6564_v11 = vld [vmem:[#allocation2 + $0x18] sm:$0xe]  ;;  %14806 = vmatpush3.bf16.msra.mxu1 %v15853_v59  ;;  %v15855_v61 = vld [vmem:[%s21345_s2 + $0x840] sm:$0xff]   ;;  %15201 = vmatprep.subr.bf16.mxu0 %v18592_v28 }
 0x6ec   : > { %6379 = vst [vmem:[#allocation2 + $0x28] sm:$0xf] %v6378_v37  ;;  %6382 = vst [vmem:[#allocation2 + $0x2c] sm:$0x1] %v6381_v6  ;;  %v6601_v24 = vrot.slane %v18530_v58, 5  ;;  %v6240_v30 = vsel %vm6224_vm13, %v6216_v4, %v6232_v8  ;;  %v13628_v33 = vrot.slane %v6564_v11, 9  ;;  %6696 = vrot.lane.b32.xlu0 %v13645_v5, %s16183_s28  ;;  %14807 = vmatprep.subr.bf16.mxu1 %v15854_v32 }
 0x6ed   : > { %v6383_v22 = vld [vmem:[#allocation2 + $0x30] sm:$0xf]  ;;  %v14174_v43 = vpack.c.bf16 %v18540_v1, %v18540_v1  ;;  %v6605_v14 = vrot.slane %v18543_v7, 5  ;;  %v6319_v13 = vor.u32 %v6317_v60, %v6316_v27  ;;  %v6320_v51 = vrot.slane %v6316_v27, 4  ;;  %v15857_v60 = vld [vmem:[%s21345_s2 + $0x888] sm:$0xff]  }
 0x6ee   : > { %v18565_v20 = vadd.f32 %v6240_v30, %v17462_v15  ;;  %v6602_v23 = vsel %vm16420_vm9, %v13627_v41, %v6601_v24  ;;  %v18578_v54 = vld [vmem:[#allocation2 + $0x24] sm:$0x1]  ;;  %v6565_v15 = vld [vmem:[#allocation2 + $0x20] sm:$0xe]  ;;  %v6436_v56 = vshrl.u32 %v18568_v50, 16  ;;  %v6439_v8 = vshll.u32 %v18568_v50, 16 }
 0x6ef   : > { %v6322_v57 = vshrl.u32 %v14174_v43, 16  ;;  %v6325_v38 = vshll.u32 %v14174_v43, 16  ;;  %v6606_v42 = vsel %vm16420_vm9, %v13628_v33, %v6605_v14  ;;  %v6384_v4 = vsel %vm16833_vm2, %v6319_v13, %v6383_v22  ;;  %v6389_v52 = vld [vmem:[#allocation2 + $0x38] sm:$0xf]  ;;  %v18602_v5 = vld [vmem:[#allocation2 + $0x10] sm:$0xf]  ;;  %14808 = vmatpush3.bf16.msra.mxu1 %v15855_v61 }
 0x6f0   : > { %v6387_v45 = vsel %vm16839_vm4, %v6320_v51, %v6386_v25  ;;  %v14175_v49 = vpack.c.bf16 %v18565_v20, %v18565_v20  ;;  %v13646_v29 = vcombine.low %v6602_v23, %v6606_v42  ;;  %6385 = vst [vmem:[#allocation2 + $0x30] sm:$0xf] %v6384_v4  ;;  %v13629_v19 = vrot.slane %v6565_v15, 9  ;;  %v6392_v14 = vld [vmem:[#allocation2 + $0x3c] sm:$0x1]  ;;  %14809 = vmatprep.subr.bf16.mxu1 %v15857_v60 }
 0x6f1   : > { %6388 = vst [vmem:[#allocation2 + $0x34] sm:$0x1] %v6387_v45  ;;  %v6324_v41 = vrot.slane %v6322_v57, 7  ;;  %v6609_v36 = vrot.slane %v18578_v54, 5  ;;  %v6445_v27 = vshll.u32 %v18504_v35, 16  ;;  %v6438_v30 = vrot.slane %v6436_v56, 4 }
 0x6f2   : > { %v6330_v37 = vshrl.u32 %v14175_v49, 16  ;;  %v6333_v6 = vshll.u32 %v14175_v49, 16  ;;  %6698 = vrot.lane.b32.xlu1 %v13646_v29, %s16183_s28  ;;  %v6554_v33 = vor.u32 %v18572_v26, %v18480_v10  ;;  %v6441_v51 = vrot.slane %v6439_v8, 5  ;;  %v6395_v42 = vld [vmem:[#allocation2 + $0x40] sm:$0xf]  ;;  %v15858_v49 = vld [vmem:[%s21345_s2 + $0x848] sm:$0xff]  }
 0x6f3   : > { %v6327_v11 = vor.u32 %v6325_v38, %v6324_v41  ;;  %v6328_v24 = vrot.slane %v6324_v41, 4  ;;  %v18605_v22 = vld [vmem:[#allocation2 + $0x2c] sm:$0x1]  ;;  %v6566_v43 = vld [vmem:[#allocation2 + $0x28] sm:$0xe]  ;;  %v6610_v57 = vsel %vm16420_vm9, %v13629_v19, %v6609_v36  ;;  %v6450_v10 = vshrl.u32 %v18602_v5, 16  ;;  %14810 = vmatpush3.bf16.msra.mxu1 %v15858_v49 }
 0x6f4   : > { %v6332_v59 = vrot.slane %v6330_v37, 7  ;;  %v13630_v32 = vrot.slane %v6566_v43, 9  ;;  %v6613_v13 = vrot.slane %v18605_v22, 5  ;;  %v18616_v38 = vld [vmem:[#allocation2 + $0x18] sm:$0xf]  ;;  %v6442_v45 = vor.u32 %v6441_v51, %v6438_v30 }
 0x6f5   : > { %v6390_v35 = vsel %vm16833_vm2, %v6327_v11, %v6389_v52  ;;  %v6393_v25 = vsel %vm16839_vm4, %v6328_v24, %v6392_v14  ;;  %v6398_v15 = vld [vmem:[#allocation2 + $0x44] sm:$0x1]  ;;  %v6452_v61 = vrot.slane %v6450_v10, 4  ;;  %v6453_v41 = vshll.u32 %v18602_v5, 16  ;;  %v18626_v36 = vld [vmem:[#allocation2 + $0x20] sm:$0xf] }
 0x6f6   : > { %6391 = vst [vmem:[#allocation2 + $0x38] sm:$0xf] %v6390_v35  ;;  %6394 = vst [vmem:[#allocation2 + $0x3c] sm:$0x1] %v6393_v25  ;;  %v6335_v26 = vor.u32 %v6333_v6, %v6332_v59  ;;  %v6336_v23 = vrot.slane %v6332_v59, 4  ;;  %v6614_v4 = vsel %vm16420_vm9, %v13630_v32, %v6613_v13  ;;  %v6459_v19 = vshll.u32 %v18530_v58, 16 }
 0x6f7   : > { %v13647_v29 = vcombine.low %v6610_v57, %v6614_v4  ;;  %v6567_v37 = vld [vmem:[#allocation2 + $0x30] sm:$0xe]  ;;  %v6443_v6 = vrot.slane %v6442_v45, 4  ;;  %v6464_v8 = vshrl.u32 %v18616_v38, 16  ;;  %v6455_v24 = vrot.slane %v6453_v41, 5 }
 0x6f8   : > { %v6396_v56 = vsel %vm16833_vm2, %v6335_v26, %v6395_v42  ;;  %v6399_v60 = vsel %vm16839_vm4, %v6336_v23, %v6398_v15  ;;  %v18632_v52 = vld [vmem:[#allocation2 + $0x34] sm:$0x1]  ;;  %v13631_v58 = vrot.slane %v6567_v37, 9  ;;  %v6447_v63 = vrot.slane %v6445_v27, 5  ;;  %v15866_v37 = vld [vmem:[%s21345_s2 + $0x858] sm:$0xff]  }
 0x6f9   : > { %6397 = vst [vmem:[#allocation2 + $0x40] sm:$0xf] %v6396_v56  ;;  %6400 = vst [vmem:[#allocation2 + $0x44] sm:$0x1] %v6399_v60  ;;  %6700 = vrot.lane.b32.xlu0 %v13647_v29, %s16183_s28  ;;  %v6617_v11 = vrot.slane %v18632_v52, 5  ;;  %v6466_v43 = vrot.slane %v6464_v8, 4  ;;  %v6456_v32 = vor.u32 %v6455_v24, %v6452_v61  ;;  %v6251_v15 = vpack.c.bf16 %v18510_v31, %v18478_v0 }
 0x6fa   : > { %v6467_v30 = vshll.u32 %v18616_v38, 16  ;;  %v18642_v14 = vrot.slane %v6554_v33, 4  ;;  %v15859_v59 = vld [vmem:[%s21345_s2 + $0x890] sm:$0xff]   ;;  %v6461_v13 = vrot.slane %v6459_v19, 5  ;;  %v6473_v51 = vshll.u32 %v18543_v7, 16 }
 0x6fb   : > { %v6478_v35 = vshrl.u32 %v18626_v36, 16  ;;  %v6448_v34 = vsel %vm16454_vm12, %v6443_v6, %v6447_v63  ;;  %v18654_v33 = vld [vmem:[#allocation2 + $0x28] sm:$0xf]  ;;  %v6481_v25 = vshll.u32 %v18626_v36, 16  ;;  %v6487_v57 = vshll.u32 %v18578_v54, 16  ;;  %14811 = vmatprep.subr.bf16.mxu1 %v15859_v59  ;;  %v15864_v54 = vld [vmem:[%s21345_s2 + $0x898] sm:$0xff]  }
 0x6fc   : > { %v6469_v27 = vrot.slane %v6467_v30, 5  ;;  %v6618_v26 = vsel %vm16420_vm9, %v13631_v58, %v6617_v11  ;;  %v6457_v23 = vrot.slane %v6456_v32, 4  ;;  %14812 = vmatpush3.bf16.msra.mxu1 %v15861_v55  ;;  %v13640_v61 = vcombine.low %v6434_v16, %v6448_v34  ;;  %v18675_v60 = vld [vmem:[#allocation2 + $0x30] sm:$0xf] }
 0x6fd   : > { %v18658_v10 = vld [vmem:[#allocation2 + $0x3c] sm:$0x1]  ;;  %v6568_v7 = vld [vmem:[#allocation2 + $0x38] sm:$0xe]  ;;  %v6480_v42 = vrot.slane %v6478_v35, 4  ;;  %v6483_v29 = vrot.slane %v6481_v25, 5  ;;  %14813 = vmatprep.subr.bf16.mxu1 %v15864_v54 }
 0x6fe   : > { %v13632_v4 = vrot.slane %v6568_v7, 9  ;;  %v6621_v45 = vrot.slane %v18658_v10, 5  ;;  %v6470_v49 = vor.u32 %v6469_v27, %v6466_v43  ;;  %v6475_v41 = vrot.slane %v6473_v51, 5  ;;  %v18687_v35 = vld [vmem:[#allocation2 + $0x38] sm:$0xf] }
 0x6ff   : > { %v6492_v19 = vshrl.u32 %v18654_v33, 16  ;;  %v6495_v56 = vshll.u32 %v18654_v33, 16  ;;  %v6484_v24 = vor.u32 %v6483_v29, %v6480_v42  ;;  %v6501_v53 = vshll.u32 %v18605_v22, 16 }
 0x700   : > { %v6622_v6 = vsel %vm16420_vm9, %v13632_v4, %v6621_v45  ;;  %v6419_v8 = vld [vmem:[#allocation2 + $0x44] sm:$0x1]  ;;  %v6569_v58 = vld [vmem:[#allocation2 + $0x40] sm:$0xe]  ;;  %v6471_v11 = vrot.slane %v6470_v49, 4  ;;  %14814 = vmatpush3.bf16.msra.mxu1 %v15866_v37  ;;  %v6462_v30 = vsel %vm16454_vm12, %v6457_v23, %v6461_v13  ;;  %v6489_v32 = vrot.slane %v6487_v57, 5 }
 0x701   : > { %v13648_v17 = vcombine.low %v6618_v26, %v6622_v6  ;;  %v13633_v16 = vrot.slane %v6569_v58, 9  ;;  %v6625_v63 = vrot.slane %v6419_v8, 5  ;;  %v6494_v43 = vrot.slane %v6492_v19, 4  ;;  %v18694_v25 = vld [vmem:[#allocation2 + $0x40] sm:$0xf]  ;;  %v15868_v23 = vld [vmem:[%s21345_s2 + $0x7d0] sm:$0xff]  }
 0x702   : > { %v6476_v59 = vsel %vm16454_vm12, %v6471_v11, %v6475_v41  ;;  %v6497_v51 = vrot.slane %v6495_v56, 5  ;;  %v6485_v55 = vrot.slane %v6484_v24, 4  ;;  %v6506_v34 = vshrl.u32 %v18675_v60, 16  ;;  %14845 = vmatprep.subr.bf16.mxu1 %v15868_v23 }
 0x703   : > { %6702 = vrot.lane.b32.xlu1 %v13648_v17, %s16183_s28  ;;  %v6626_v22 = vsel %vm16420_vm9, %v13633_v16, %v6625_v63  ;;  %v6509_v27 = vshll.u32 %v18675_v60, 16  ;;  %v13641_v7 = vcombine.low %v6462_v30, %v6476_v59  ;;  %v6503_v57 = vrot.slane %v6501_v53, 5 }
 0x704   : > { %v13649_v13 = vcombine.low %v6626_v22, %v18552_v44  ;;  %v6498_v26 = vor.u32 %v6497_v51, %v6494_v43  ;;  %v6508_v42 = vrot.slane %v6506_v34, 4  ;;  %v6520_v45 = vshrl.u32 %v18687_v35, 16 }
 0x705   : > { %v6511_v4 = vrot.slane %v6509_v27, 5  ;;  %v6523_v49 = vshll.u32 %v18687_v35, 16  ;;  %v6515_v54 = vshll.u32 %v18632_v52, 16  ;;  %v6529_v44 = vshll.u32 %v18658_v10, 16 }
 0x706   : > { %6704 = vrot.lane.b32.xlu0 %v13649_v13, %s16183_s28  ;;  %v6499_v29 = vrot.slane %v6498_v26, 4  ;;  %v6534_v41 = vshrl.u32 %v18694_v25, 16  ;;  %v6522_v56 = vrot.slane %v6520_v45, 4  ;;  %v6537_v6 = vshll.u32 %v18694_v25, 16 }
 0x707   : > { %6671 = vrot.lane.b32.xlu1 %v13640_v61, %s16184_s5  ;;  %v6512_v19 = vor.u32 %v6511_v4, %v6508_v42  ;;  %v6525_v37 = vrot.slane %v6523_v49, 5  ;;  %v6490_v58 = vsel %vm16454_vm12, %v6485_v55, %v6489_v32  ;;  %v6543_v52 = vshll.u32 %v6419_v8, 16  ;;  %v15862_v4 = vld [vmem:[%s21345_s2 + $0x818] sm:$0xff]   ;;  %v15871_v49 = vld [vmem:[%s21345_s2 + $0x8f0] sm:$0xff]  }
 0x708   : > { %v6504_v11 = vsel %vm16454_vm12, %v6499_v29, %v6503_v57  ;;  %v6536_v24 = vrot.slane %v6534_v41, 4  ;;  %v6539_v16 = vrot.slane %v6537_v6, 5  ;;  %v6252_v61 = vpack.c.bf16 %v18565_v20, %v18540_v1  ;;  %v15950_v1 = vld [vmem:[%s21345_s2 + $0xa90] sm:$0xff]  }
 0x709   : > { %v13642_v53 = vcombine.low %v6490_v58, %v6504_v11  ;;  %v6513_v10 = vrot.slane %v6512_v19, 4  ;;  %v6526_v17 = vor.u32 %v6525_v37, %v6522_v56  ;;  %v6517_v63 = vrot.slane %v6515_v54, 5  ;;  %v15951_v20 = vld [vmem:[%s21345_s2 + $0xaf0] sm:$0xff]  }
 0x70a   : > { %6673 = vrot.lane.b32.xlu0 %v13641_v7, %s16184_s5  ;;  %v6531_v30 = vrot.slane %v6529_v44, 5  ;;  %v6540_v59 = vor.u32 %v6539_v16, %v6536_v24  ;;  %v6560_v8 = vsel %vm16454_vm12, %v18642_v14, %v18639_v48  ;;  %v6545_v55 = vrot.slane %v6543_v52, 5 }
 0x70b   : > { %6675 = vrot.lane.b32.xlu1 %v13642_v53, %s16184_s5  ;;  %v6527_v43 = vrot.slane %v6526_v17, 4  ;;  %v6518_v32 = vsel %vm16454_vm12, %v6513_v10, %v6517_v63  ;;  %v13635_v19 = vcombine.low %v18399_v21, %v18568_v50  ;;  %v13636_v58 = vcombine.low %v18602_v5, %v18616_v38  ;;  %v15870_v63 = vld [vmem:[%s21345_s2 + $0x790] sm:$0xff]  }
 0x70c   : > { %v6541_v22 = vrot.slane %v6540_v59, 4  ;;  %vm7779_vm2 = vcmask 519168   ;;  %vm7784_vm4 = vcmask 516096  }
 0x70d   : > { %v6532_v51 = vsel %vm16454_vm12, %v6527_v43, %v6531_v30  ;;  %v13637_v43 = vcombine.low %v18626_v36, %v18654_v33  ;;  %v15875_v36 = vld [vmem:[%s21345_s2 + $0x8f8] sm:$0xff]   ;;  %vm19097_vm11 = vmand %vm7779_vm2, %vm255_vm3 }
 0x70e   : > { %v13643_v34 = vcombine.low %v6518_v32, %v6532_v51  ;;  %v6546_v27 = vsel %vm16454_vm12, %v6541_v22, %v6545_v55  ;;  %v15872_v51 = vld [vmem:[%s21345_s2 + $0x8b0] sm:$0xff]   ;;  %vm19104_vm13 = vmand %vm7784_vm4, %vm223_vm1 }
 0x70f   : > { %v13644_v13 = vcombine.low %v6546_v27, %v6560_v8  ;;  %v15873_v8 = vld [vmem:[%s21345_s2 + $0x7d8] sm:$0xff]   ;;  %v15877_v27 = vld [vmem:[%s21345_s2 + $0x7e0] sm:$0xff]  }
 0x710   : > { %6677 = vrot.lane.b32.xlu0 %v13643_v34, %s16184_s5  ;;  %v15874_v34 = vld [vmem:[%s21345_s2 + $0x798] sm:$0xff]  }
 0x711   : > { %6679 = vrot.lane.b32.xlu1 %v13644_v13, %s16184_s5 }
 0x75e   : > { %v6697_v7 = vpop.permute.xlu0 %6696 }
 0x75f   : > { %v6829_v48 = vrot.slane %v6697_v7, 4 }
 0x764   : > { %v18728_v26 = vpop.permute.xlu1 %6698 }
 0x765   : > { %v6830_v14 = vrot.slane %v18728_v26, 4 }
 0x767   : > { %v6831_v57 = vsel %vm408_vm5, %v6829_v48, %v6830_v14 }
 0x768   : > { %15193 = vmatprep.mubr.msk.bf16.mxu0 %vm2537_vm14, %v6831_v57  ;;  %v15878_v57 = vld [vmem:[%s21345_s2 + $0x7a0] sm:$0xff]  }
 0x76b   : > { %v18733_v23 = vpop.permute.xlu0 %6700 }
 0x76c   : > { %v6836_v42 = vrot.slane %v18733_v23, 4 }
 0x76e   : > { %v6837_v45 = vsel %vm408_vm5, %v6830_v14, %v6836_v42  ;;  %v15879_v14 = vld [vmem:[%s21345_s2 + $0x900] sm:$0xff]  }
 0x76f   : > { %15194 = vmatmul.mubr.msk.bf16.vlgmr.msra.gmra.mrb[168].mxu0 %vm2537_vm14, %v6837_v45  ;;  %v15881_v45 = vld [vmem:[%s21345_s2 + $0x7e8] sm:$0xff]  }
 0x770   : > { %15202 = vmatpush3.bf16.msra.mxu0 %v18592_v28 }
 0x771   : > { %15203 = vmatprep.subr.bf16.mxu0 %v15862_v4 }
 0x774   : > { %15204 = vmatpush3.bf16.msra.mxu0 %v15862_v4 }
 0x775   : > { %v18745_v29 = vpop.permute.xlu1 %6702  ;;  %14891 = vmatprep.subr.bf16.mxu0 %v15871_v49 }
 0x776   : > { %v6842_v54 = vrot.slane %v18745_v29, 4 }
 0x778   : > { %v18748_v44 = vpop.permute.xlu0 %6704  ;;  %v6843_v41 = vsel %vm408_vm5, %v6836_v42, %v6842_v54  ;;  %v13638_v42 = vcombine.low %v18675_v60, %v18687_v35  ;;  %v15883_v60 = vld [vmem:[%s21345_s2 + $0x908] sm:$0xff]  }
 0x779   : > { %v6848_v28 = vrot.slane %v18748_v44, 4  ;;  %15197 = vmatprep.mubr.msk.bf16.mxu0 %vm2537_vm14, %v6843_v41  ;;  %v6672_v56 = vpop.permute.xlu1 %6671 }
 0x77a   : > { %v18756_v37 = vsel %vm2275_vm15, %v13635_v19, %v6672_v56  ;;  %v18759_v6 = vsel %vm2296_vm0, %v6672_v56, %v6697_v7  ;;  %v15885_v56 = vld [vmem:[%s21345_s2 + $0x7f0] sm:$0xff]  }
 0x77b   : > { %v6849_v11 = vsel %vm408_vm5, %v6842_v54, %v6848_v28  ;;  %v6823_v21 = vrot.slane %v18756_v37, 4  ;;  %v6826_v10 = vrot.slane %v18759_v6, 4  ;;  %v15880_v54 = vld [vmem:[%s21345_s2 + $0x8c0] sm:$0xff]   ;;  %v15882_v28 = vld [vmem:[%s21345_s2 + $0x7a8] sm:$0xff]  }
 0x77c   : > { %v6674_v24 = vpop.permute.xlu0 %6673  ;;  %15198 = vmatmul.mubr.msk.bf16.gmra.mrb[172].mxu0 %vm2537_vm14, %v6849_v11  ;;  %v15884_v11 = vld [vmem:[%s21345_s2 + $0x8c8] sm:$0xff]  }
 0x77d   : > { %v18767_v50 = vsel %vm2275_vm15, %v13636_v58, %v6674_v24  ;;  %v18771_v52 = vsel %vm2296_vm0, %v6674_v24, %v18728_v26  ;;  %15205 = vmatprep.mubr.msk.bf16.mxu0 %vm2537_vm14, %v6697_v7  ;;  %v6676_v53 = vpop.permute.xlu1 %6675  ;;  %v15876_v7 = vld [vmem:[%s21345_s2 + $0x8b8] sm:$0xff]  }
 0x77e   : > { %v6824_v5 = vrot.slane %v18767_v50, 4  ;;  %v6827_v38 = vrot.slane %v18771_v52, 4  ;;  %v18779_v17 = vsel %vm2296_vm0, %v6676_v53, %v18733_v23  ;;  %v18797_v22 = vsel %vm2275_vm15, %v13637_v43, %v6676_v53  ;;  %v15886_v53 = vld [vmem:[%s21345_s2 + $0x7b0] sm:$0xff]  }
 0x77f   : > { %v6834_v16 = vrot.slane %v18779_v17, 4  ;;  %v6832_v13 = vrot.slane %v18797_v22, 4 }
 0x780   : > { %v6828_v30 = vsel %vm408_vm5, %v6826_v10, %v6827_v38  ;;  %v6825_v59 = vsel %vm408_vm5, %v6823_v21, %v6824_v5  ;;  %v15887_v21 = vld [vmem:[%s21345_s2 + $0x910] sm:$0xff]   ;;  %v13639_v10 = vcombine.low %v18694_v25, %v18453_v62  ;;  %v15891_v62 = vld [vmem:[%s21345_s2 + $0x918] sm:$0xff]  }
 0x781   : > { %7010 = vmatprep.mubr.bf16.mxu1 %v6828_v30  ;;  %v6835_v32 = vsel %vm408_vm5, %v6827_v38, %v6834_v16  ;;  %v6833_v49 = vsel %vm408_vm5, %v6824_v5, %v6832_v13  ;;  %v15889_v5 = vld [vmem:[%s21345_s2 + $0x7f8] sm:$0xff]   ;;  %v15893_v30 = vld [vmem:[%s21345_s2 + $0x800] sm:$0xff]  }
 0x782   : > { %v6678_v55 = vpop.permute.xlu0 %6677  ;;  %7011 = vmatmul.mubr.bf16.vlgmr.msra.gmra.mrb[64].mxu1 %v6825_v59  ;;  %v15890_v25 = vld [vmem:[%s21345_s2 + $0x7b8] sm:$0xff]  }
 0x783   : > { %v18804_v33 = vsel %vm2296_vm0, %v6678_v55, %v18745_v29  ;;  %7018 = vmatprep.mubr.bf16.mxu1 %v6835_v32  ;;  %14846 = vmatpush3.bf16.msra.mxu1 %v15870_v63  ;;  %v6680_v4 = vpop.permute.xlu1 %6679  ;;  %v18837_v41 = vsel %vm2275_vm15, %v13638_v42, %v6678_v55  ;;  %v15895_v32 = vld [vmem:[%s21345_s2 + $0x920] sm:$0xff]   ;;  %v15897_v55 = vld [vmem:[%s21345_s2 + $0x808] sm:$0xff]  }
 0x784   : > { %15206 = vmatmul.mubr.msk.bf16.vlgmr.msra.gmra.mrb[168].mxu0 %vm2537_vm14, %v18728_v26  ;;  %14847 = vmatprep.subr.bf16.mxu1 %v15873_v8  ;;  %v6840_v48 = vrot.slane %v18804_v33, 4  ;;  %v18845_v35 = vsel %vm2296_vm0, %v6680_v4, %v18748_v44  ;;  %v6838_v58 = vrot.slane %v18837_v41, 4  ;;  %v6724_v63 = vsel %vm2275_vm15, %v13639_v10, %v6680_v4  ;;  %v15892_v8 = vld [vmem:[%s21345_s2 + $0x8d8] sm:$0xff]  }
 0x785   : > { %14892 = vmatpush3.bf16.msra.mxu0 %v15872_v51  ;;  %15209 = vmatprep.mubr.msk.bf16.mxu0 %vm2537_vm14, %v18733_v23  ;;  %v6846_v24 = vrot.slane %v18845_v35, 4  ;;  %v6844_v59 = vrot.slane %v6724_v63, 4  ;;  %v15894_v51 = vld [vmem:[%s21345_s2 + $0x7c0] sm:$0xff]  }
 0x786   : > { %14893 = vmatprep.subr.bf16.mxu0 %v15875_v36  ;;  %v6841_v19 = vsel %vm408_vm5, %v6834_v16, %v6840_v48  ;;  %v6839_v38 = vsel %vm408_vm5, %v6832_v13, %v6838_v58  ;;  %v15888_v16 = vld [vmem:[%s21345_s2 + $0x8d0] sm:$0xff]   ;;  %v15898_v13 = vld [vmem:[%s21345_s2 + $0x7c8] sm:$0xff]  }
 0x787   : > { %14848 = vmatpush3.bf16.msra.mxu1 %v15874_v34  ;;  %v6847_v43 = vsel %vm408_vm5, %v6840_v48, %v6846_v24  ;;  %v6845_v36 = vsel %vm408_vm5, %v6838_v58, %v6844_v59  ;;  %v15896_v34 = vld [vmem:[%s21345_s2 + $0x8e0] sm:$0xff]   ;;  %v15901_v48 = vld [vmem:[%s21345_s2 + $0x930] sm:$0xff]   ;;  %v15914_v24 = vld [vmem:[%s21345_s2 + $0x9c8] sm:$0xff]  }
 0x788   : > { %14849 = vmatprep.subr.bf16.mxu1 %v15877_v27  ;;  %v15899_v27 = vld [vmem:[%s21345_s2 + $0x928] sm:$0xff]  }
 0x789   : > { %14894 = vmatpush3.bf16.msra.mxu0 %v15876_v7  ;;  %v15900_v7 = vld [vmem:[%s21345_s2 + $0x8e8] sm:$0xff]  }
 0x78a   : > { %7019 = vmatmul.mubr.bf16.gmra.mrb[68].mxu1 %v6833_v49  ;;  %14895 = vmatprep.subr.bf16.mxu0 %v15879_v14  ;;  %v15907_v14 = vld [vmem:[%s21345_s2 + $0xa10] sm:$0xff]   ;;  %v15910_v49 = vld [vmem:[%s21345_s2 + $0x9b8] sm:$0xff]  }
 0x78b   : > { %7026 = vmatprep.mubr.bf16.mxu1 %v6841_v19  ;;  %14850 = vmatpush3.bf16.msra.mxu1 %v15878_v57  ;;  %v15908_v57 = vld [vmem:[%s21345_s2 + $0x9b0] sm:$0xff]  }
 0x78c   : > { %15210 = vmatmul.mubr.msk.bf16.gmra.mrb[172].mxu0 %vm2537_vm14, %v18745_v29  ;;  %14851 = vmatprep.subr.bf16.mxu1 %v15881_v45  ;;  %v15909_v45 = vld [vmem:[%s21345_s2 + $0xa18] sm:$0xff]  }
 0x78d   : > { %14896 = vmatpush3.bf16.msra.mxu0 %v15880_v54  ;;  %7532 = vmatprep.mubr.bf16.mxu0 %v18771_v52 }
 0x78e   : > { %14897 = vmatprep.subr.bf16.mxu0 %v15883_v60 }
 0x78f   : > { %14852 = vmatpush3.bf16.msra.mxu1 %v15882_v28  ;;  %v15912_v28 = vld [vmem:[%s21345_s2 + $0x9c0] sm:$0xff]  }
 0x790   : > { %14853 = vmatprep.subr.bf16.mxu1 %v15885_v56 }
 0x791   : > { %14898 = vmatpush3.bf16.msra.mxu0 %v15884_v11  ;;  %v15913_v11 = vld [vmem:[%s21345_s2 + $0xa28] sm:$0xff]  }
 0x792   : > { %7027 = vmatmul.mubr.bf16.gmra.mrb[72].mxu1 %v6839_v38  ;;  %14899 = vmatprep.subr.bf16.mxu0 %v15887_v21  ;;  %v15915_v38 = vld [vmem:[%s21345_s2 + $0xa30] sm:$0xff]  }
 0x793   : > { %7034 = vmatprep.mubr.bf16.mxu1 %v6847_v43  ;;  %14854 = vmatpush3.bf16.msra.mxu1 %v15886_v53 }
 0x794   : > { %14855 = vmatprep.subr.bf16.mxu1 %v15889_v5 }
 0x795   : > { %14900 = vmatpush3.bf16.msra.mxu0 %v15888_v16  ;;  %v15916_v16 = vld [vmem:[%s21345_s2 + $0x9d0] sm:$0xff]  }
 0x796   : > { %14901 = vmatprep.subr.bf16.mxu0 %v15891_v62  ;;  %v15917_v62 = vld [vmem:[%s21345_s2 + $0xa38] sm:$0xff]  }
 0x797   : > { %14856 = vmatpush3.bf16.msra.mxu1 %v15890_v25  ;;  %v15918_v25 = vld [vmem:[%s21345_s2 + $0x9d8] sm:$0xff]  }
 0x798   : > { %14857 = vmatprep.subr.bf16.mxu1 %v15893_v30 }
 0x799   : > { %14902 = vmatpush3.bf16.msra.mxu0 %v15892_v8 }
 0x79a   : > { %7035 = vmatmul.mubr.bf16.gmra.mrb[76].mxu1 %v6845_v36  ;;  %14903 = vmatprep.subr.bf16.mxu0 %v15895_v32 }
 0x79b   : > { %14858 = vmatpush3.bf16.msra.mxu1 %v15894_v51  ;;  %7256 = vmatprep.mubr.bf16.mxu1 %v18759_v6  ;;  %v15902_v6 = vld [vmem:[%s21345_s2 + $0x938] sm:$0xff]   ;;  %v15919_v51 = vld [vmem:[%s21345_s2 + $0xa40] sm:$0xff]  }
 0x79c   : > { %14859 = vmatprep.subr.bf16.mxu1 %v15897_v55  ;;  %v15920_v55 = vld [vmem:[%s21345_s2 + $0x9e0] sm:$0xff]  }
 0x79d   : > { %14904 = vmatpush3.bf16.msra.mxu0 %v15896_v34 }
 0x79e   : > { %14905 = vmatprep.subr.bf16.mxu0 %v15899_v27  ;;  %v15921_v27 = vld [vmem:[%s21345_s2 + $0xa48] sm:$0xff]  }
 0x79f   : > { %14860 = vmatpush3.bf16.msra.mxu1 %v15898_v13  ;;  %v15922_v13 = vld [vmem:[%s21345_s2 + $0x9e8] sm:$0xff]  }
 0x7a0   : > { %8305 = vmatprep.subr.bf16.mxu1 %v16182_v3 }
 0x7a1   : > { %14906 = vmatpush3.bf16.msra.mxu0 %v15900_v7 }
 0x7a2   : > { %7257 = vmatmul.mubr.bf16.vlgmr.msra.gmra.mrb[80].mxu1 %v18756_v37  ;;  %15213 = vmatprep.subr.bf16.mxu0 %v15901_v48  ;;  %v15903_v37 = vld [vmem:[%s21345_s2 + $0xa00] sm:$0xff]  }
 0x7a3   : > { %7264 = vmatprep.mubr.bf16.mxu1 %v18771_v52 }
 0x7a4   : > { %7533 = vmatmul.mubr.bf16.vlgmr.msra.gmra.mrb[176].mxu0 %v18767_v50 }
 0x7a5   : > { %7540 = vmatprep.mubr.bf16.mxu0 %v18779_v17  ;;  %15214 = vmatpush3.bf16.msra.mxu0 %v15901_v48 }
 0x7a6   : > { %15215 = vmatprep.subr.bf16.mxu0 %v15902_v6 }
 0x7a9   : > { %15216 = vmatpush3.bf16.msra.mxu0 %v15902_v6 }
 0x7aa   : > { %7265 = vmatmul.mubr.bf16.gmra.mrb[84].mxu1 %v18767_v50  ;;  %8618 = vmatprep.subr.bf16.mxu0 %v16182_v3  ;;  %v15904_v50 = vld [vmem:[%s21345_s2 + $0x9a0] sm:$0xff]  }
 0x7ab   : > { %7272 = vmatprep.mubr.bf16.mxu1 %v18779_v17  ;;  %8306 = vmatpush1.bf16.msra.mxu1 %v15904_v50 }
 0x7ac   : > { %7541 = vmatmul.mubr.bf16.gmra.mrb[180].mxu0 %v18797_v22  ;;  %8307 = vmatprep.subr.bf16.mxu1 %v16182_v3 }
 0x7ad   : > { %7548 = vmatprep.mubr.bf16.mxu0 %v18804_v33 }
 0x7b2   : > { %7273 = vmatmul.mubr.bf16.gmra.mrb[88].mxu1 %v18797_v22 }
 0x7b3   : > { %7280 = vmatprep.mubr.bf16.mxu1 %v18804_v33 }
 0x7b4   : > { %7549 = vmatmul.mubr.bf16.gmra.mrb[184].mxu0 %v18837_v41 }
 0x7b5   : > { %7556 = vmatprep.mubr.bf16.mxu0 %v18845_v35  ;;  %v15911_v35 = vld [vmem:[%s21345_s2 + $0xa20] sm:$0xff]  }
 0x7ba   : > { %7281 = vmatmul.mubr.bf16.gmra.mrb[92].mxu1 %v18837_v41 }
 0x7bc   : > { %7557 = vmatmul.mubr.bf16.gmra.mrb[188].mxu0 %v6724_v63 }
 0x7bd   : > { %15217 = vmatprep.mubr.msk.bf16.mxu0 %vm2537_vm14, %v18728_v26  ;;  %v15905_v26 = vld [vmem:[%s21345_s2 + $0xa08] sm:$0xff]  }
 0x7c4   : > { %15218 = vmatmul.mubr.msk.bf16.vlgmr.msra.gmra.mrb[168].mxu0 %vm2537_vm14, %v18733_v23  ;;  %v15906_v23 = vld [vmem:[%s21345_s2 + $0x9a8] sm:$0xff]  }
 0x7c5   : > { %15221 = vmatprep.mubr.msk.bf16.mxu0 %vm2537_vm14, %v18745_v29  ;;  %8619 = vmatpush1.bf16.msra.mxu0 %v15903_v37 }
 0x7c6   : > { %8620 = vmatprep.subr.bf16.mxu0 %v16182_v3  ;;  %8308 = vmatpush1.bf16.msra.mxu1 %v15906_v23 }
 0x7c7   : > { %8309 = vmatprep.subr.bf16.mxu1 %v16182_v3 }
 0x7c9   : > { %8621 = vmatpush1.bf16.msra.mxu0 %v15905_v26 }
 0x7ca   : > { %8622 = vmatprep.subr.bf16.mxu0 %v16182_v3  ;;  %8310 = vmatpush1.bf16.msra.mxu1 %v15908_v57 }
 0x7cb   : > { %8311 = vmatprep.subr.bf16.mxu1 %v16182_v3 }
 0x7cc   : > { %15222 = vmatmul.mubr.msk.bf16.gmra.mrb[172].mxu0 %vm2537_vm14, %v18748_v44 }
 0x7cd   : > { %8623 = vmatpush1.bf16.msra.mxu0 %v15907_v14  ;;  %v15924_v14 = vld [vmem:[%s21345_s2 + $0x9f0] sm:$0xff]  }
 0x7ce   : > { %8624 = vmatprep.subr.bf16.mxu0 %v16182_v3  ;;  %8312 = vmatpush1.bf16.msra.mxu1 %v15910_v49 }
 0x7cf   : > { %8313 = vmatprep.subr.bf16.mxu1 %v16182_v3 }
 0x7d1   : > { %8625 = vmatpush1.bf16.msra.mxu0 %v15909_v45 }
 0x7d2   : > { %8626 = vmatprep.subr.bf16.mxu0 %v16182_v3  ;;  %8314 = vmatpush1.bf16.msra.mxu1 %v15912_v28 }
 0x7d3   : > { %8315 = vmatprep.subr.bf16.mxu1 %v16182_v3 }
 0x7d5   : > { %8627 = vmatpush1.bf16.msra.mxu0 %v15911_v35 }
 0x7d6   : > { %8628 = vmatprep.subr.bf16.mxu0 %v16182_v3  ;;  %8316 = vmatpush1.bf16.msra.mxu1 %v15914_v24 }
 0x7d7   : > { %8317 = vmatprep.subr.bf16.mxu1 %v16182_v3 }
 0x7d9   : > { %8629 = vmatpush1.bf16.msra.mxu0 %v15913_v11 }
 0x7da   : > { %8630 = vmatprep.subr.bf16.mxu0 %v16182_v3  ;;  %8318 = vmatpush1.bf16.msra.mxu1 %v15916_v16 }
 0x7db   : > { %8319 = vmatprep.subr.bf16.mxu1 %v16182_v3 }
 0x7dd   : > { %8631 = vmatpush1.bf16.msra.mxu0 %v15915_v38 }
 0x7de   : > { %8632 = vmatprep.subr.bf16.mxu0 %v16182_v3  ;;  %8320 = vmatpush1.bf16.msra.mxu1 %v15918_v25 }
 0x7df   : > { %8321 = vmatprep.subr.bf16.mxu1 %v16182_v3 }
 0x7e1   : > { %8633 = vmatpush1.bf16.msra.mxu0 %v15917_v62 }
 0x7e2   : > { %8634 = vmatprep.subr.bf16.mxu0 %v16182_v3  ;;  %8322 = vmatpush1.bf16.msra.mxu1 %v15920_v55 }
 0x7e3   : > { %8323 = vmatprep.subr.bf16.mxu1 %v16182_v3 }
 0x7e5   : > { %8635 = vmatpush1.bf16.msra.mxu0 %v15919_v51 }
 0x7e6   : > { %8636 = vmatprep.subr.bf16.mxu0 %v16182_v3  ;;  %8324 = vmatpush1.bf16.msra.mxu1 %v15922_v13 }
 0x7e7   : > { %8325 = vmatprep.subr.bf16.mxu1 %v16182_v3 }
 0x7e9   : > { %8637 = vmatpush1.bf16.msra.mxu0 %v15921_v27 }
 0x7ea   : > { %8638 = vmatprep.subr.bf16.mxu0 %v16182_v3  ;;  %8326 = vmatpush1.bf16.msra.mxu1 %v15924_v14 }
 0x7eb   : > { %8327 = vmatprep.subr.bf16.mxu1 %v16182_v3 }
 0x855   : > { %v14815_v52 = vpop.f32.mrb[64].mxu1 }
 0x856   : > { %v14816_v17 = vpop.f32.mrb[65].mxu1 }
 0x857   : > { %v18954_v29 = vadd.f32 %v14816_v17, %v14815_v52  ;;  %v14818_v44 = vpop.f32.mrb[66].mxu1 }
 0x858   : > { %v14819_v22 = vpop.f32.mrb[67].mxu1 }
 0x859   : > { %v18958_v33 = vadd.f32 %v14819_v22, %v14818_v44  ;;  %v15923_v22 = vld [vmem:[%s21345_s2 + $0xa50] sm:$0xff]  }
 0x85a   : > { %8639 = vmatpush1.bf16.msra.mxu0 %v15923_v22 }
 0x85b   : > { %8640 = vmatprep.subr.bf16.mxu0 %v16182_v3 }
 0x85d   : > { %v14821_v42 = vpop.f32.mrb[68].mxu1 }
 0x85e   : > { %v14822_v4 = vpop.f32.mrb[69].mxu1 }
 0x85f   : > { %v18974_v54 = vadd.f32 %v14822_v4, %v14821_v42  ;;  %v14824_v41 = vpop.f32.mrb[70].mxu1 }
 0x860   : > { %v14825_v19 = vpop.f32.mrb[71].mxu1 }
 0x861   : > { %v18978_v60 = vadd.f32 %v14825_v19, %v14824_v41 }
 0x865   : > { %v14827_v56 = vpop.f32.mrb[72].mxu1 }
 0x866   : > { %v14828_v58 = vpop.f32.mrb[73].mxu1 }
 0x867   : > { %v18994_v21 = vadd.f32 %v14828_v58, %v14827_v56  ;;  %v14830_v53 = vpop.f32.mrb[74].mxu1 }
 0x868   : > { %v14831_v10 = vpop.f32.mrb[75].mxu1 }
 0x869   : > { %v18998_v5 = vadd.f32 %v14831_v10, %v14830_v53 }
 0x86d   : > { %v14833_v63 = vpop.f32.mrb[76].mxu1 }
 0x86e   : > { %v14834_v43 = vpop.f32.mrb[77].mxu1 }
 0x86f   : > { %v19014_v30 = vadd.f32 %v14834_v43, %v14833_v63  ;;  %v14836_v59 = vpop.f32.mrb[78].mxu1 }
 0x870   : > { %v14837_v8 = vpop.f32.mrb[79].mxu1 }
 0x871   : > { %v19018_v32 = vadd.f32 %v14837_v8, %v14836_v59 }
 0x875   : > { %v14861_v36 = vpop.f32.mrb[80].mxu1 }
 0x876   : > { %v14862_v34 = vpop.f32.mrb[81].mxu1 }
 0x877   : > { %v14863_v7 = vadd.f32 %v14862_v34, %v14861_v36  ;;  %v14907_v48 = vpop.f32.mrb[176].mxu0  ;;  %v14864_v6 = vpop.f32.mrb[82].mxu1 }
 0x878   : > { %v14908_v37 = vpop.f32.mrb[177].mxu0  ;;  %v14865_v50 = vpop.f32.mrb[83].mxu1 }
 0x879   : > { %v15420_v52 = vadd.f32 %v14863_v7, %v18954_v29  ;;  %v14909_v17 = vadd.f32 %v14908_v37, %v14907_v48  ;;  %v14866_v26 = vadd.f32 %v14865_v50, %v14864_v6  ;;  %v14910_v23 = vpop.f32.mrb[178].mxu0  ;;  %v19060_v50 = vld [vmem:[#allocation2] sm:$0xf] }
 0x87a   : > { %v14911_v44 = vpop.f32.mrb[179].mxu0  ;;  %v7852_v22 = vshrl.u32 %v19060_v50, 16 }
 0x87b   : > { %v15426_v57 = vadd.f32 %v14866_v26, %v18958_v33  ;;  %v14912_v42 = vadd.f32 %v14911_v44, %v14910_v23  ;;  %v19044_v4 = vadd.f32 %v15420_v52, %v14909_v17 }
 0x87d   : > { %v14867_v29 = vpop.f32.mrb[84].mxu1  ;;  %v19048_v45 = vadd.f32 %v15426_v57, %v14912_v42 }
 0x87e   : > { %v14868_v49 = vpop.f32.mrb[85].mxu1 }
 0x87f   : > { %v14869_v41 = vadd.f32 %v14868_v49, %v14867_v29  ;;  %v14913_v19 = vpop.f32.mrb[180].mxu0  ;;  %v14870_v35 = vpop.f32.mrb[86].mxu1  ;;  %v7855_v29 = vshll.u32 %v19060_v50, 16 }
 0x880   : > { %v14914_v33 = vpop.f32.mrb[181].mxu0  ;;  %v14871_v28 = vpop.f32.mrb[87].mxu1 }
 0x881   : > { %v15417_v56 = vadd.f32 %v14869_v41, %v18974_v54  ;;  %v14915_v58 = vadd.f32 %v14914_v33, %v14913_v19  ;;  %v14872_v11 = vadd.f32 %v14871_v28, %v14870_v35  ;;  %v14916_v24 = vpop.f32.mrb[182].mxu0  ;;  %v7854_v28 = vrot.slane %v7852_v22, 4 }
 0x882   : > { %v14917_v53 = vpop.f32.mrb[183].mxu0 }
 0x883   : > { %v15423_v10 = vadd.f32 %v14872_v11, %v18978_v60  ;;  %v14918_v38 = vadd.f32 %v14917_v53, %v14916_v24  ;;  %v15418_v16 = vadd.f32 %v15417_v56, %v14915_v58  ;;  %v7857_v56 = vrot.slane %v7855_v29, 5  ;;  %v19071_v11 = vld [vmem:[%s21346_s3 + $0x5] ss:$0 sm:$0xff] }
 0x885   : > { %v14873_v63 = vpop.f32.mrb[88].mxu1  ;;  %v15424_v43 = vadd.f32 %v15423_v10, %v14918_v38  ;;  %v19075_v10 = vld [vmem:[#allocation2] sm:$0xe] }
 0x886   : > { %v14874_v62 = vpop.f32.mrb[89].mxu1 }
 0x887   : > { %v14875_v25 = vadd.f32 %v14874_v62, %v14873_v63  ;;  %v14919_v59 = vpop.f32.mrb[184].mxu0  ;;  %v14876_v8 = vpop.f32.mrb[90].mxu1  ;;  %v7858_v62 = vor.u32 %v7857_v56, %v7854_v28 }
 0x888   : > { %v14920_v51 = vpop.f32.mrb[185].mxu0  ;;  %v14877_v55 = vpop.f32.mrb[91].mxu1 }
 0x889   : > { %v15432_v36 = vadd.f32 %v14875_v25, %v18994_v21  ;;  %v14921_v34 = vadd.f32 %v14920_v51, %v14919_v59  ;;  %v14878_v54 = vadd.f32 %v14877_v55, %v14876_v8  ;;  %v14922_v27 = vpop.f32.mrb[186].mxu0 }
 0x88a   : > { %v14923_v13 = vpop.f32.mrb[187].mxu0 }
 0x88b   : > { %v15438_v7 = vadd.f32 %v14878_v54, %v18998_v5  ;;  %v14924_v48 = vadd.f32 %v14923_v13, %v14922_v27  ;;  %v19056_v60 = vadd.f32 %v15432_v36, %v14921_v34  ;;  %v19084_v34 = vld [vmem:[#allocation2 + $0x48] sm:$0xf] }
 0x88d   : > { %v14879_v6 = vpop.f32.mrb[92].mxu1  ;;  %v19058_v37 = vadd.f32 %v15438_v7, %v14924_v48  ;;  %v19090_v7 = vrot.slane %v7858_v62, 4 }
 0x88e   : > { %v14880_v52 = vpop.f32.mrb[93].mxu1 }
 0x88f   : > { %v14881_v17 = vadd.f32 %v14880_v52, %v14879_v6  ;;  %v14925_v26 = vpop.f32.mrb[188].mxu0  ;;  %v14882_v23 = vpop.f32.mrb[94].mxu1  ;;  %v7978_v6 = vshrl.u32 %v19084_v34, 16 }
 0x890   : > { %v14926_v44 = vpop.f32.mrb[189].mxu0  ;;  %v14883_v21 = vpop.f32.mrb[95].mxu1 }
 0x891   : > { %v15429_v14 = vadd.f32 %v14881_v17, %v19014_v30  ;;  %v14927_v57 = vadd.f32 %v14926_v44, %v14925_v26  ;;  %v14884_v5 = vadd.f32 %v14883_v21, %v14882_v23  ;;  %v14928_v42 = vpop.f32.mrb[190].mxu0  ;;  %v19073_v30 = vld [vmem:[#allocation2 + $0x4] sm:$0x1] }
 0x892   : > { %v14929_v49 = vpop.f32.mrb[191].mxu0  ;;  %v8023_v36 = vrot.slane %v19073_v30, 5 }
 0x893   : > { %v15435_v41 = vadd.f32 %v14884_v5, %v19018_v32  ;;  %v14930_v19 = vadd.f32 %v14929_v49, %v14928_v42  ;;  %v15430_v35 = vadd.f32 %v15429_v14, %v14927_v57  ;;  %v7861_v32 = vshll.u32 %v19073_v30, 16 }
 0x894   : > { %v7981_v57 = vshll.u32 %v19084_v34, 16 }
 0x895   : > { %v19066_v33 = vadd.f32 %v15435_v41, %v14930_v19  ;;  %v19087_v27 = vrot.slane %v7861_v32, 5 }
 0x897   : > { %v15219_v58 = vpop.f32.mrb[168].mxu0 }
 0x898   : > { %v15419_v24 = vadd.f32 %v15418_v16, %v15219_v58  ;;  %v7599_v53 = vpop.f32.mrb[169].mxu0  ;;  %v13725_v16 = vrot.slane %v19075_v10, 9 }
 0x899   : > { %v15422_v38 = vadd.f32 %v19044_v4, %v7599_v53  ;;  %v15220_v63 = vpop.f32.mrb[170].mxu0 }
 0x89a   : > { %v7645_v25 = vadd.f32 %v15419_v24, %v19071_v11  ;;  %v15425_v59 = vadd.f32 %v15424_v43, %v15220_v63  ;;  %v7602_v8 = vpop.f32.mrb[171].mxu0 }
 0x89b   : > { %v7643_v51 = vadd.f32 %v15422_v38, %v19071_v11  ;;  %v15428_v55 = vadd.f32 %v19048_v45, %v7602_v8 }
 0x89c   : > { %vm7653_vm6 = vcmp.ge.f32.partialorder %v7645_v25, 0.0  ;;  %v7661_v4 = vmul.f32 0.01, %v7645_v25  ;;  %v7646_v54 = vadd.f32 %v15425_v59, %v19071_v11 }
 0x89d   : > { %vm7651_vm7 = vcmp.ge.f32.partialorder %v7643_v51, 0.0  ;;  %v7659_v13 = vmul.f32 0.01, %v7643_v51  ;;  %v7644_v43 = vadd.f32 %v15428_v55, %v19071_v11 }
 0x89e   : > { %v7669_v48 = vsel %vm7653_vm6, %v7645_v25, %v7661_v4  ;;  %vm7654_vm8 = vcmp.ge.f32.partialorder %v7646_v54, 0.0  ;;  %v7662_v45 = vmul.f32 0.01, %v7646_v54 }
 0x89f   : > { %v14178_v52 = vpack.c.bf16 %v7669_v48, %v7669_v48  ;;  %v7667_v17 = vsel %vm7651_vm7, %v7643_v51, %v7659_v13  ;;  %vm7652_vm10 = vcmp.ge.f32.partialorder %v7644_v43, 0.0  ;;  %v7660_v26 = vmul.f32 0.01, %v7644_v43  ;;  %v15223_v23 = vpop.f32.mrb[172].mxu0  ;;  %v7795_v13 = vld [vmem:[#allocation2 + $0x18] sm:$0xf] }
 0x8a0   : > { %v14176_v44 = vpack.c.bf16 %v7667_v17, %v7667_v17  ;;  %v7670_v21 = vsel %vm7654_vm8, %v7646_v54, %v7662_v45  ;;  %v15431_v22 = vadd.f32 %v15430_v35, %v15223_v23  ;;  %v7615_v14 = vpop.f32.mrb[173].mxu0  ;;  %v7781_v23 = vld [vmem:[#allocation2 + $0x8] sm:$0xf] }
 0x8a1   : > { %v7716_v5 = vshrl.u32 %v14178_v52, 16  ;;  %v7719_v42 = vshll.u32 %v14178_v52, 16  ;;  %v14179_v29 = vpack.c.bf16 %v7670_v21, %v7670_v21  ;;  %v7668_v49 = vsel %vm7652_vm10, %v7644_v43, %v7660_v26  ;;  %v15224_v41 = vpop.f32.mrb[174].mxu0  ;;  %v7798_v43 = vld [vmem:[#allocation2 + $0x1c] sm:$0x1] }
 0x8a2   : > { %v7700_v19 = vshrl.u32 %v14176_v44, 16  ;;  %v7703_v28 = vshll.u32 %v14176_v44, 16  ;;  %v14177_v56 = vpack.c.bf16 %v7668_v49, %v7668_v49  ;;  %v7649_v58 = vadd.f32 %v15431_v22, %v19071_v11  ;;  %v7618_v24 = vpop.f32.mrb[175].mxu0  ;;  %v7786_v44 = vld [vmem:[#allocation2 + $0xc] sm:$0x1] }
 0x8a3   : > { %v7718_v35 = vrot.slane %v7716_v5, 7  ;;  %v7724_v32 = vshrl.u32 %v14179_v29, 16  ;;  %v7727_v38 = vshll.u32 %v14179_v29, 16  ;;  %v15434_v63 = vadd.f32 %v19056_v60, %v7615_v14  ;;  %v7804_v29 = vld [vmem:[#allocation2 + $0x24] sm:$0x1] }
 0x8a4   : > { %v7702_v25 = vrot.slane %v7700_v19, 7  ;;  %v7708_v59 = vshrl.u32 %v14177_v56, 16  ;;  %v7711_v8 = vshll.u32 %v14177_v56, 16  ;;  %vm7657_vm6 = vcmp.ge.f32.partialorder %v7649_v58, 0.0 }
 0x8a5   : > { %v7721_v51 = vor.u32 %v7719_v42, %v7718_v35  ;;  %v7722_v55 = vrot.slane %v7718_v35, 4  ;;  %v7726_v4 = vrot.slane %v7724_v32, 7  ;;  %v7665_v54 = vmul.f32 0.01, %v7649_v58  ;;  %v7801_v42 = vld [vmem:[#allocation2 + $0x20] sm:$0xf] }
 0x8a6   : > { %v7705_v48 = vor.u32 %v7703_v28, %v7702_v25  ;;  %v7706_v45 = vrot.slane %v7702_v25, 4  ;;  %v7710_v52 = vrot.slane %v7708_v59, 7  ;;  %v7647_v60 = vadd.f32 %v15434_v63, %v19071_v11  ;;  %v7789_v35 = vld [vmem:[#allocation2 + $0x10] sm:$0xf]  ;;  %v7792_v32 = vld [vmem:[#allocation2 + $0x14] sm:$0x1] }
 0x8a7   : > { %v7796_v17 = vsel %vm19097_vm11, %v7721_v51, %v7795_v13  ;;  %v7799_v26 = vsel %vm19104_vm13, %v7722_v55, %v7798_v43  ;;  %v7729_v21 = vor.u32 %v7727_v38, %v7726_v4  ;;  %v7730_v22 = vrot.slane %v7726_v4, 4 }
 0x8a8   : > { %7797 = vst [vmem:[#allocation2 + $0x18] sm:$0xf] %v7796_v17  ;;  %7800 = vst [vmem:[#allocation2 + $0x1c] sm:$0x1] %v7799_v26  ;;  %v7782_v14 = vsel %vm19097_vm11, %v7705_v48, %v7781_v23  ;;  %v7787_v5 = vsel %vm19104_vm13, %v7706_v45, %v7786_v44  ;;  %v7713_v49 = vor.u32 %v7711_v8, %v7710_v52  ;;  %v7714_v19 = vrot.slane %v7710_v52, 4 }
 0x8a9   : > { %7783 = vst [vmem:[#allocation2 + $0x8] sm:$0xf] %v7782_v14  ;;  %7788 = vst [vmem:[#allocation2 + $0xc] sm:$0x1] %v7787_v5  ;;  %v7802_v28 = vsel %vm19097_vm11, %v7729_v21, %v7801_v42  ;;  %v7805_v56 = vsel %vm19104_vm13, %v7730_v22, %v7804_v29  ;;  %v7673_v38 = vsel %vm7657_vm6, %v7649_v58, %v7665_v54  ;;  %vm7655_vm2 = vcmp.ge.f32.partialorder %v7647_v60, 0.0 }
 0x8aa   : > { %7803 = vst [vmem:[#allocation2 + $0x20] sm:$0xf] %v7802_v28  ;;  %7806 = vst [vmem:[#allocation2 + $0x24] sm:$0x1] %v7805_v56  ;;  %v7790_v63 = vsel %vm19097_vm11, %v7713_v49, %v7789_v35  ;;  %v7793_v25 = vsel %vm19104_vm13, %v7714_v19, %v7792_v32  ;;  %v14182_v59 = vpack.c.bf16 %v7673_v38, %v7673_v38  ;;  %v7663_v8 = vmul.f32 0.01, %v7647_v60 }
 0x8ab   : > { %7791 = vst [vmem:[#allocation2 + $0x10] sm:$0xf] %v7790_v63  ;;  %7794 = vst [vmem:[#allocation2 + $0x14] sm:$0x1] %v7793_v25  ;;  %v15437_v51 = vadd.f32 %v19066_v33, %v15224_v41  ;;  %v15440_v55 = vadd.f32 %v19058_v37, %v7618_v24  ;;  %v19130_v58 = vrot.slane %v7978_v6, 4  ;;  %v19134_v4 = vrot.slane %v7981_v57, 5 }
 0x8ac   : > { %v7748_v54 = vshrl.u32 %v14182_v59, 16  ;;  %v7671_v13 = vsel %vm7655_vm2, %v7647_v60, %v7663_v8  ;;  %v7751_v17 = vshll.u32 %v14182_v59, 16  ;;  %v19144_v37 = vsel %vm16420_vm9, %v13725_v16, %v8023_v36  ;;  %v7819_v6 = vld [vmem:[#allocation2 + $0x38] sm:$0xf]  ;;  %v7822_v57 = vld [vmem:[#allocation2 + $0x3c] sm:$0x1] }
 0x8ad   : > { %v14180_v43 = vpack.c.bf16 %v7671_v13, %v7671_v13  ;;  %v7650_v48 = vadd.f32 %v15437_v51, %v19071_v11  ;;  %v7648_v45 = vadd.f32 %v15440_v55, %v19071_v11  ;;  %v7864_v33 = vsel %vm16454_vm12, %v19090_v7, %v19087_v27  ;;  %v7807_v5 = vld [vmem:[#allocation2 + $0x28] sm:$0xf]  ;;  %v7810_v42 = vld [vmem:[#allocation2 + $0x2c] sm:$0x1] }
 0x8ae   : > { %v7750_v52 = vrot.slane %v7748_v54, 7  ;;  %v7984_v24 = vor.u32 %v19134_v4, %v19130_v58 }
 0x8af   : > { %v7732_v41 = vshrl.u32 %v14180_v43, 16  ;;  %vm7658_vm4 = vcmp.ge.f32.partialorder %v7650_v48, 0.0  ;;  %v7666_v11 = vmul.f32 0.01, %v7650_v48  ;;  %vm7656_vm7 = vcmp.ge.f32.partialorder %v7648_v45, 0.0 }
 0x8b0   : > { %v7753_v30 = vor.u32 %v7751_v17, %v7750_v52  ;;  %v7754_v60 = vrot.slane %v7750_v52, 4  ;;  %v7664_v10 = vmul.f32 0.01, %v7648_v45  ;;  %v19152_v26 = vld [vmem:[#allocation2 + $0x1c] sm:$0x1]  ;;  %v7735_v36 = vshll.u32 %v14180_v43, 16 }
 0x8b1   : > { %v7734_v16 = vrot.slane %v7732_v41, 7  ;;  %v7674_v23 = vsel %vm7658_vm4, %v7650_v48, %v7666_v11  ;;  %v7994_v44 = vld [vmem:[#allocation2 + $0x18] sm:$0xe]  ;;  %v8035_v21 = vrot.slane %v19152_v26, 5  ;;  %v7842_v63 = vld [vmem:[#allocation2 + $0xc] sm:$0x1] }
 0x8b2   : > { %v7820_v22 = vsel %vm19097_vm11, %v7753_v30, %v7819_v6  ;;  %v7823_v14 = vsel %vm19104_vm13, %v7754_v60, %v7822_v57  ;;  %v14183_v29 = vpack.c.bf16 %v7674_v23, %v7674_v23  ;;  %v7672_v49 = vsel %vm7656_vm7, %v7648_v45, %v7664_v10  ;;  %v19159_v19 = vld [vmem:[#allocation2 + $0x14] sm:$0x1]  ;;  %v7993_v28 = vld [vmem:[#allocation2 + $0x10] sm:$0xe]  ;;  %v7992_v25 = vld [vmem:[#allocation2 + $0x8] sm:$0xe] }
 0x8b3   : > { %7821 = vst [vmem:[#allocation2 + $0x38] sm:$0xf] %v7820_v22  ;;  %7824 = vst [vmem:[#allocation2 + $0x3c] sm:$0x1] %v7823_v14  ;;  %v7737_v56 = vor.u32 %v7735_v36, %v7734_v16  ;;  %v7738_v35 = vrot.slane %v7734_v16, 4  ;;  %v14181_v32 = vpack.c.bf16 %v7672_v49, %v7672_v49  ;;  %v13727_v38 = vrot.slane %v7993_v28, 9 }
 0x8b4   : > { %v7756_v59 = vshrl.u32 %v14183_v29, 16  ;;  %v7759_v8 = vshll.u32 %v14183_v29, 16  ;;  %v8031_v51 = vrot.slane %v19159_v19, 5  ;;  %v13728_v55 = vrot.slane %v7994_v44, 9  ;;  %v19162_v54 = vld [vmem:[#allocation2 + $0x8] sm:$0xf] }
 0x8b5   : > { %v7808_v13 = vsel %vm19097_vm11, %v7737_v56, %v7807_v5  ;;  %v7811_v43 = vsel %vm19104_vm13, %v7738_v35, %v7810_v42  ;;  %v7740_v48 = vshrl.u32 %v14181_v32, 16  ;;  %v7743_v45 = vshll.u32 %v14181_v32, 16  ;;  %v7825_v36 = vld [vmem:[#allocation2 + $0x40] sm:$0xf]  ;;  %v7813_v23 = vld [vmem:[#allocation2 + $0x30] sm:$0xf] }
 0x8b6   : > { %7809 = vst [vmem:[#allocation2 + $0x28] sm:$0xf] %v7808_v13  ;;  %7812 = vst [vmem:[#allocation2 + $0x2c] sm:$0x1] %v7811_v43  ;;  %v7758_v52 = vrot.slane %v7756_v59, 7  ;;  %v8032_v17 = vsel %vm16420_vm9, %v13727_v38, %v8031_v51  ;;  %v8036_v6 = vsel %vm16420_vm9, %v13728_v55, %v8035_v21  ;;  %v13726_v57 = vrot.slane %v7992_v25, 9 }
 0x8b7   : > { %v7742_v41 = vrot.slane %v7740_v48, 7  ;;  %v19172_v11 = vcombine.low %v8032_v17, %v8036_v6  ;;  %v8027_v30 = vrot.slane %v7842_v63, 5  ;;  %v7866_v60 = vshrl.u32 %v19162_v54, 16  ;;  %v7816_v44 = vld [vmem:[#allocation2 + $0x34] sm:$0x1]  ;;  %v15926_v5 = vld [vmem:[%s21345_s2 + $0xa58] sm:$0xff]  }
 0x8b8   : > { %v7761_v10 = vor.u32 %v7759_v8, %v7758_v52  ;;  %v7762_v16 = vrot.slane %v7758_v52, 4  ;;  %v7869_v22 = vshll.u32 %v19162_v54, 16  ;;  %v7875_v14 = vshll.u32 %v7842_v63, 16  ;;  %v7828_v21 = vld [vmem:[#allocation2 + $0x44] sm:$0x1]  ;;  %8641 = vmatpush1.bf16.msra.mxu0 %v15926_v5  ;;  %v15928_v17 = vld [vmem:[%s21345_s2 + $0x9f8] sm:$0xff]  }
 0x8b9   : > { %v7745_v42 = vor.u32 %v7743_v45, %v7742_v41  ;;  %v7746_v29 = vrot.slane %v7742_v41, 4  ;;  %13794 = vmatprep.mubr.msk.bf16.mxu0 %vm2296_vm0, %v19172_v11  ;;  %v8028_v49 = vsel %vm16420_vm9, %v13726_v57, %v8027_v30  ;;  %v8203_v28 = vrot.slane %v19172_v11, 4  ;;  %v19184_v56 = vld [vmem:[#allocation2 + $0x10] sm:$0xf]  ;;  %v19193_v25 = vld [vmem:[#allocation2 + $0x18] sm:$0xf]  ;;  %9492 = vmatprep.subr.bf16.mxu0 %v16182_v3 }
 0x8ba   : > { %v7826_v35 = vsel %vm19097_vm11, %v7761_v10, %v7825_v36  ;;  %v7829_v32 = vsel %vm19104_vm13, %v7762_v16, %v7828_v21  ;;  %v19191_v38 = vcombine.low %v19144_v37, %v8028_v49  ;;  %v7868_v63 = vrot.slane %v7866_v60, 4  ;;  %v19195_v59 = vld [vmem:[#allocation2 + $0x4c] sm:$0x1]  ;;  %v19201_v13 = vld [vmem:[#allocation2 + $0x20] sm:$0xf]  ;;  %8328 = vmatpush1.bf16.msra.mxu1 %v15928_v17 }
 0x8bb   : > { %7827 = vst [vmem:[#allocation2 + $0x40] sm:$0xf] %v7826_v35  ;;  %7830 = vst [vmem:[#allocation2 + $0x44] sm:$0x1] %v7829_v32  ;;  %v7814_v8 = vsel %vm19097_vm11, %v7745_v42, %v7813_v23  ;;  %v7817_v51 = vsel %vm19104_vm13, %v7746_v29, %v7816_v44  ;;  %v7871_v55 = vrot.slane %v7869_v22, 5  ;;  %v7987_v37 = vshll.u32 %v19195_v59, 16  ;;  %8454 = vmatprep.subr.bf16.mxu1 %v16182_v3 }
 0x8bc   : > { %7815 = vst [vmem:[#allocation2 + $0x30] sm:$0xf] %v7814_v8  ;;  %7818 = vst [vmem:[#allocation2 + $0x34] sm:$0x1] %v7817_v51  ;;  %v8202_v43 = vrot.slane %v19191_v38, 4  ;;  %v7880_v48 = vshrl.u32 %v19184_v56, 16 }
 0x8bd   : > { %v7883_v45 = vshll.u32 %v19184_v56, 16  ;;  %v7889_v52 = vshll.u32 %v19159_v19, 16  ;;  %v7872_v6 = vor.u32 %v7871_v55, %v7868_v63  ;;  %v7877_v57 = vrot.slane %v7875_v14, 5  ;;  %v19214_v60 = vld [vmem:[#allocation2 + $0x24] sm:$0x1] }
 0x8be   : > { %v7894_v41 = vshrl.u32 %v19193_v25, 16  ;;  %v7897_v30 = vshll.u32 %v19193_v25, 16  ;;  %v8204_v10 = vsel %vm408_vm5, %v8202_v43, %v8203_v28  ;;  %v7882_v16 = vrot.slane %v7880_v48, 4  ;;  %v19220_v23 = vld [vmem:[#allocation2 + $0x28] sm:$0xf] }
 0x8bf   : > { %v7885_v36 = vrot.slane %v7883_v45, 5  ;;  %v7903_v19 = vshll.u32 %v19152_v26, 16  ;;  %13762 = vmatprep.mubr.msk.bf16.mxu1 %vm2296_vm0, %v8204_v10  ;;  %v7873_v44 = vrot.slane %v7872_v6, 4  ;;  %v7891_v22 = vrot.slane %v7889_v52, 5  ;;  %v19229_v32 = vld [vmem:[#allocation2 + $0x2c] sm:$0x1] }
 0x8c0   : > { %v7896_v14 = vrot.slane %v7894_v41, 4  ;;  %v7899_v5 = vrot.slane %v7897_v30, 5  ;;  %v7908_v42 = vshrl.u32 %v19201_v13, 16  ;;  %v7911_v29 = vshll.u32 %v19201_v13, 16 }
 0x8c1   : > { %v7886_v21 = vor.u32 %v7885_v36, %v7882_v16  ;;  %v7917_v49 = vshll.u32 %v19214_v60, 16  ;;  %v7878_v26 = vsel %vm16454_vm12, %v7873_v44, %v7877_v57  ;;  %v7922_v63 = vshrl.u32 %v19220_v23, 16  ;;  %v19244_v16 = vld [vmem:[#allocation2 + $0x38] sm:$0xf] }
 0x8c2   : > { %v7900_v35 = vor.u32 %v7899_v5, %v7896_v14  ;;  %v7925_v8 = vshll.u32 %v19220_v23, 16  ;;  %v13740_v51 = vcombine.low %v7864_v33, %v7878_v26  ;;  %v7910_v43 = vrot.slane %v7908_v42, 4  ;;  %v19252_v44 = vld [vmem:[#allocation2 + $0x40] sm:$0xf]  ;;  %v19265_v4 = vld [vmem:[#allocation2 + $0x44] sm:$0x1] }
 0x8c3   : > { %v7887_v55 = vrot.slane %v7886_v21, 4  ;;  %v7913_v48 = vrot.slane %v7911_v29, 5  ;;  %v7905_v52 = vrot.slane %v7903_v19, 5  ;;  %v7924_v17 = vrot.slane %v7922_v63, 4  ;;  %v19238_v57 = vld [vmem:[#allocation2 + $0x30] sm:$0xf] }
 0x8c4   : > { %v7901_v45 = vrot.slane %v7900_v35, 4  ;;  %v7927_v6 = vrot.slane %v7925_v8, 5  ;;  %8101 = vrot.lane.b32.xlu0 %v13740_v51, %s16183_s28  ;;  %v7931_v10 = vshll.u32 %v19229_v32, 16  ;;  %v7936_v27 = vshrl.u32 %v19238_v57, 16  ;;  %v19249_v36 = vld [vmem:[#allocation2 + $0x34] sm:$0x1] }
 0x8c5   : > { %v7892_v41 = vsel %vm16454_vm12, %v7887_v55, %v7891_v22  ;;  %v7914_v30 = vor.u32 %v7913_v48, %v7910_v43  ;;  %v7939_v19 = vshll.u32 %v19238_v57, 16  ;;  %v7985_v22 = vrot.slane %v7984_v24, 4  ;;  %v19257_v35 = vld [vmem:[#allocation2 + $0x3c] sm:$0x1] }
 0x8c6   : > { %v7906_v7 = vsel %vm16454_vm12, %v7901_v45, %v7905_v52  ;;  %v7928_v33 = vor.u32 %v7927_v6, %v7924_v17  ;;  %v7919_v21 = vrot.slane %v7917_v49, 5  ;;  %v7938_v42 = vrot.slane %v7936_v27, 4 }
 0x8c7   : > { %v13741_v14 = vcombine.low %v7892_v41, %v7906_v7  ;;  %v7915_v5 = vrot.slane %v7914_v30, 4  ;;  %v7933_v26 = vrot.slane %v7931_v10, 5  ;;  %v7941_v63 = vrot.slane %v7939_v19, 5 }
 0x8c8   : > { %v7929_v29 = vrot.slane %v7928_v33, 4  ;;  %v7950_v8 = vshrl.u32 %v19244_v16, 16  ;;  %v7945_v55 = vshll.u32 %v19249_v36, 16  ;;  %v7953_v58 = vshll.u32 %v19244_v16, 16 }
 0x8c9   : > { %8103 = vrot.lane.b32.xlu1 %v13741_v14, %s16183_s28  ;;  %v7920_v51 = vsel %vm16454_vm12, %v7915_v5, %v7919_v21  ;;  %v7964_v24 = vshrl.u32 %v19252_v44, 16  ;;  %v7942_v43 = vor.u32 %v7941_v63, %v7938_v42  ;;  %v7967_v45 = vshll.u32 %v19252_v44, 16 }
 0x8ca   : > { %v7934_v49 = vsel %vm16454_vm12, %v7929_v29, %v7933_v26  ;;  %v7952_v48 = vrot.slane %v7950_v8, 4  ;;  %v7955_v17 = vrot.slane %v7953_v58, 5  ;;  %v7959_v6 = vshll.u32 %v19257_v35, 16  ;;  %v7996_v58 = vld [vmem:[#allocation2 + $0x28] sm:$0xe] }
 0x8cb   : > { %v13742_v52 = vcombine.low %v7920_v51, %v7934_v49  ;;  %v7966_v41 = vrot.slane %v7964_v24, 4  ;;  %v7943_v30 = vrot.slane %v7942_v43, 4  ;;  %v7969_v10 = vrot.slane %v7967_v45, 5  ;;  %v7995_v24 = vld [vmem:[#allocation2 + $0x20] sm:$0xe] }
 0x8cc   : > { %v7973_v27 = vshll.u32 %v19265_v4, 16  ;;  %v7989_v7 = vrot.slane %v7987_v37, 5  ;;  %v7947_v33 = vrot.slane %v7945_v55, 5  ;;  %v7956_v19 = vor.u32 %v7955_v17, %v7952_v48 }
 0x8cd   : > { %8105 = vrot.lane.b32.xlu0 %v13742_v52, %s16183_s28  ;;  %v7970_v14 = vor.u32 %v7969_v10, %v7966_v41  ;;  %v7961_v42 = vrot.slane %v7959_v6, 5  ;;  %v13730_v49 = vrot.slane %v7996_v58, 9  ;;  %v8043_v43 = vrot.slane %v19229_v32, 5  ;;  %v7997_v52 = vld [vmem:[#allocation2 + $0x30] sm:$0xe] }
 0x8ce   : > { %v7948_v5 = vsel %vm16454_vm12, %v7943_v30, %v7947_v33  ;;  %v7957_v21 = vrot.slane %v7956_v19, 4  ;;  %v7975_v26 = vrot.slane %v7973_v27, 5  ;;  %v7990_v63 = vsel %vm16454_vm12, %v7985_v22, %v7989_v7  ;;  %v7998_v10 = vld [vmem:[#allocation2 + $0x38] sm:$0xe] }
 0x8cf   : > { %v7971_v29 = vrot.slane %v7970_v14, 4  ;;  %v13729_v48 = vrot.slane %v7995_v24, 9  ;;  %v8039_v22 = vrot.slane %v19214_v60, 5  ;;  %v8044_v45 = vsel %vm16420_vm9, %v13730_v49, %v8043_v43 }
 0x8d0   : > { %v7962_v8 = vsel %vm16454_vm12, %v7957_v21, %v7961_v42  ;;  %v13735_v41 = vcombine.low %v19060_v50, %v19162_v54  ;;  %v13731_v27 = vrot.slane %v7997_v52, 9  ;;  %v8047_v32 = vrot.slane %v19249_v36, 5  ;;  %v15929_v36 = vld [vmem:[%s21345_s2 + $0x940] sm:$0xff]   ;;  %v8000_v42 = vld [vmem:[#allocation2 + $0x48] sm:$0xe] }
 0x8d1   : > { %v13743_v51 = vcombine.low %v7948_v5, %v7962_v8  ;;  %v7976_v37 = vsel %vm16454_vm12, %v7971_v29, %v7975_v26  ;;  %v8040_v6 = vsel %vm16420_vm9, %v13729_v48, %v8039_v22  ;;  %v13736_v60 = vcombine.low %v19184_v56, %v19193_v25 }
 0x8d2   : > { %v13744_v55 = vcombine.low %v7976_v37, %v7990_v63  ;;  %v19294_v30 = vcombine.low %v8040_v6, %v8044_v45  ;;  %v13732_v19 = vrot.slane %v7998_v10, 9  ;;  %v8051_v14 = vrot.slane %v19257_v35, 5  ;;  %v7999_v35 = vld [vmem:[#allocation2 + $0x40] sm:$0xe] }
 0x8d3   : > { %8107 = vrot.lane.b32.xlu1 %v13743_v51, %s16183_s28  ;;  %v8048_v56 = vsel %vm16420_vm9, %v13731_v27, %v8047_v32  ;;  %v13737_v25 = vcombine.low %v19201_v13, %v19220_v23  ;;  %v8059_v13 = vrot.slane %v19195_v59, 5  ;;  %v15930_v23 = vld [vmem:[%s21345_s2 + $0x948] sm:$0xff]   ;;  %v8055_v58 = vrot.slane %v19265_v4, 5  ;;  %v15932_v59 = vld [vmem:[%s21345_s2 + $0x950] sm:$0xff]   ;;  %v15935_v27 = vld [vmem:[%s21345_s2 + $0x960] sm:$0xff]  }
 0x8d4   : > { %8109 = vrot.lane.b32.xlu0 %v13744_v55, %s16183_s28  ;;  %v8207_v50 = vrot.slane %v19294_v30, 4  ;;  %v8052_v63 = vsel %vm16420_vm9, %v13732_v19, %v8051_v14  ;;  %v13733_v55 = vrot.slane %v7999_v35, 9  ;;  %v13734_v24 = vrot.slane %v8000_v42, 9  ;;  %v15936_v14 = vld [vmem:[%s21345_s2 + $0x968] sm:$0xff]   ;;  %v15946_v42 = vld [vmem:[%s21345_s2 + $0xa70] sm:$0xff]  }
 0x8d5   : > { %v19328_v37 = vcombine.low %v8048_v56, %v8052_v63  ;;  %v13738_v22 = vcombine.low %v19238_v57, %v19244_v16  ;;  %v13739_v32 = vcombine.low %v19252_v44, %v19084_v34  ;;  %v15938_v34 = vld [vmem:[%s21345_s2 + $0x970] sm:$0xff]   ;;  %v15943_v56 = vld [vmem:[%s21345_s2 + $0x998] sm:$0xff]   ;;  %v15945_v35 = vld [vmem:[%s21345_s2 + $0xa68] sm:$0xff]  }
 0x8d6   : > { %v8208_v8 = vsel %vm408_vm5, %v8203_v28, %v8207_v50  ;;  %v8056_v43 = vsel %vm16420_vm9, %v13733_v55, %v8055_v58  ;;  %v8060_v4 = vsel %vm16420_vm9, %v13734_v24, %v8059_v13  ;;  %v15954_v55 = vld [vmem:[%s21345_s2 + $0xaa0] sm:$0xff]  }
 0x8d7   : > { %v8211_v49 = vrot.slane %v19328_v37, 4  ;;  %v13749_v6 = vcombine.low %v8056_v43, %v8060_v4  ;;  %v15955_v58 = vld [vmem:[%s21345_s2 + $0xb00] sm:$0xff]   ;;  %v15956_v4 = vld [vmem:[%s21345_s2 + $0xaa8] sm:$0xff]  }
 0x8d9   : > { %v8212_v52 = vsel %vm408_vm5, %v8207_v50, %v8211_v49  ;;  %v8215_v16 = vrot.slane %v13749_v6, 4 }
 0x936   : > { %v8102_v17 = vpop.permute.xlu0 %8101 }
 0x937   : > { %v19298_v7 = vsel %vm2296_vm0, %v13735_v41, %v8102_v17  ;;  %v15933_v41 = vld [vmem:[%s21345_s2 + $0x958] sm:$0xff]  }
 0x938   : > { %v8199_v54 = vrot.slane %v19298_v7, 4 }
 0x93b   : > { %v8104_v33 = vpop.permute.xlu1 %8103 }
 0x93c   : > { %v19304_v5 = vsel %vm2296_vm0, %v13736_v60, %v8104_v33  ;;  %v8216_v33 = vsel %vm408_vm5, %v8211_v49, %v8215_v16 }
 0x93d   : > { %v8200_v21 = vrot.slane %v19304_v5, 4  ;;  %8651 = vmatmul.mubr.bf16.vlgmr.msra.gmra.mrb[192].mxu0 %v19304_v5 }
 0x93e   : > { %13795 = vmatprep.mubr.msk.bf16.mxu0 %vm2296_vm0, %v19294_v30  ;;  %9493 = vmatpush1.bf16.msra.mxu0 %v15951_v20 }
 0x93f   : > { %v8201_v29 = vsel %vm408_vm5, %v8199_v54, %v8200_v21  ;;  %v8106_v26 = vpop.permute.xlu0 %8105  ;;  %v15939_v54 = vld [vmem:[%s21345_s2 + $0x978] sm:$0xff]   ;;  %9494 = vmatprep.subr.bf16.mxu0 %v16182_v3 }
 0x940   : > { %8338 = vmatmul.mubr.bf16.vlgmr.msra.gmra.mrb[96].mxu1 %v8201_v29  ;;  %v19326_v51 = vsel %vm2296_vm0, %v13737_v25, %v8106_v26  ;;  %v15944_v25 = vld [vmem:[%s21345_s2 + $0xa60] sm:$0xff]   ;;  %v15947_v29 = vld [vmem:[%s21345_s2 + $0xa78] sm:$0xff]  }
 0x941   : > { %8455 = vmatpush1.bf16.msra.mxu1 %v15929_v36  ;;  %13763 = vmatprep.mubr.msk.bf16.mxu1 %vm2296_vm0, %v8208_v8  ;;  %v8205_v28 = vrot.slane %v19326_v51, 4  ;;  %v15941_v36 = vld [vmem:[%s21345_s2 + $0x988] sm:$0xff]   ;;  %v15952_v8 = vld [vmem:[%s21345_s2 + $0xa98] sm:$0xff]  }
 0x942   : > { %8456 = vmatprep.subr.bf16.mxu1 %v16182_v3 }
 0x943   : > { %v8206_v45 = vsel %vm408_vm5, %v8200_v21, %v8205_v28  ;;  %v15940_v21 = vld [vmem:[%s21345_s2 + $0x980] sm:$0xff]  }
 0x945   : > { %8457 = vmatpush1.bf16.msra.mxu1 %v15930_v23  ;;  %8659 = vmatmul.mubr.bf16.gmra.mrb[196].mxu0 %v19326_v51  ;;  %v8108_v48 = vpop.permute.xlu1 %8107 }
 0x946   : > { %13796 = vmatprep.mubr.msk.bf16.mxu0 %vm2296_vm0, %v19328_v37  ;;  %8458 = vmatprep.subr.bf16.mxu1 %v16182_v3  ;;  %v19355_v17 = vsel %vm2296_vm0, %v13738_v22, %v8108_v48  ;;  %v8110_v10 = vpop.permute.xlu0 %8109  ;;  %v15957_v48 = vld [vmem:[%s21345_s2 + $0xb08] sm:$0xff]  }
 0x947   : > { %v8209_v57 = vrot.slane %v19355_v17, 4  ;;  %v8144_v19 = vsel %vm2296_vm0, %v13739_v32, %v8110_v10  ;;  %v15960_v32 = vld [vmem:[%s21345_s2 + $0xab8] sm:$0xff]  }
 0x948   : > { %8346 = vmatmul.mubr.bf16.gmra.mrb[100].mxu1 %v8206_v45  ;;  %v8213_v50 = vrot.slane %v8144_v19, 4 }
 0x949   : > { %8459 = vmatpush1.bf16.msra.mxu1 %v15932_v59  ;;  %13764 = vmatprep.mubr.msk.bf16.mxu1 %vm2296_vm0, %v8212_v52  ;;  %v8210_v60 = vsel %vm408_vm5, %v8205_v28, %v8209_v57 }
 0x94a   : > { %8460 = vmatprep.subr.bf16.mxu1 %v16182_v3  ;;  %v8214_v44 = vsel %vm408_vm5, %v8209_v57, %v8213_v50  ;;  %v15963_v50 = vld [vmem:[%s21345_s2 + $0xb20] sm:$0xff]  }
 0x94d   : > { %8461 = vmatpush1.bf16.msra.mxu1 %v15933_v41  ;;  %8667 = vmatmul.mubr.bf16.gmra.mrb[200].mxu0 %v19355_v17 }
 0x94e   : > { %13797 = vmatprep.mubr.msk.bf16.mxu0 %vm2296_vm0, %v13749_v6  ;;  %8462 = vmatprep.subr.bf16.mxu1 %v16182_v3  ;;  %v15959_v6 = vld [vmem:[%s21345_s2 + $0xb10] sm:$0xff]  }
 0x950   : > { %8354 = vmatmul.mubr.bf16.gmra.mrb[104].mxu1 %v8210_v60  ;;  %v15961_v60 = vld [vmem:[%s21345_s2 + $0xb18] sm:$0xff]  }
 0x951   : > { %8463 = vmatpush1.bf16.msra.mxu1 %v15935_v27  ;;  %13765 = vmatprep.mubr.msk.bf16.mxu1 %vm2296_vm0, %v8216_v33 }
 0x952   : > { %8464 = vmatprep.subr.bf16.mxu1 %v16182_v3 }
 0x955   : > { %8465 = vmatpush1.bf16.msra.mxu1 %v15936_v14  ;;  %8675 = vmatmul.mubr.bf16.gmra.mrb[204].mxu0 %v8144_v19  ;;  %v15962_v14 = vld [vmem:[%s21345_s2 + $0xac0] sm:$0xff]  }
 0x956   : > { %8466 = vmatprep.subr.bf16.mxu1 %v16182_v3 }
 0x958   : > { %8362 = vmatmul.mubr.bf16.gmra.mrb[108].mxu1 %v8214_v44  ;;  %v15965_v44 = vld [vmem:[%s21345_s2 + $0xb28] sm:$0xff]  }
 0x959   : > { %8467 = vmatpush1.bf16.msra.mxu1 %v15938_v34  ;;  %13778 = vmatprep.mubr.msk.bf16.mxu1 %vm2296_vm0, %v19191_v38  ;;  %v15942_v38 = vld [vmem:[%s21345_s2 + $0x990] sm:$0xff]   ;;  %v15964_v34 = vld [vmem:[%s21345_s2 + $0xac8] sm:$0xff]  }
 0x95a   : > { %8468 = vmatprep.subr.bf16.mxu1 %v16182_v3 }
 0x95d   : > { %8469 = vmatpush1.bf16.msra.mxu1 %v15939_v54  ;;  %v15966_v54 = vld [vmem:[%s21345_s2 + $0xad0] sm:$0xff]  }
 0x95e   : > { %8470 = vmatprep.subr.bf16.mxu1 %v16182_v3 }
 0x961   : > { %8471 = vmatpush1.bf16.msra.mxu1 %v15940_v21  ;;  %v15967_v21 = vld [vmem:[%s21345_s2 + $0xb30] sm:$0xff]  }
 0x962   : > { %8472 = vmatprep.subr.bf16.mxu1 %v16182_v3 }
 0x965   : > { %8473 = vmatpush1.bf16.msra.mxu1 %v15941_v36  ;;  %v15968_v36 = vld [vmem:[%s21345_s2 + $0xad8] sm:$0xff]  }
 0x966   : > { %8474 = vmatprep.subr.bf16.mxu1 %v16182_v3 }
 0x969   : > { %8475 = vmatpush1.bf16.msra.mxu1 %v15942_v38  ;;  %v15969_v38 = vld [vmem:[%s21345_s2 + $0xb38] sm:$0xff]  }
 0x96a   : > { %8476 = vmatprep.subr.bf16.mxu1 %v16182_v3 }
 0x96d   : > { %8477 = vmatpush1.bf16.msra.mxu1 %v15943_v56  ;;  %v15970_v56 = vld [vmem:[%s21345_s2 + $0xae0] sm:$0xff]  }
 0x96e   : > { %15225 = vmatprep.subr.bf16.mxu1 %v15944_v25 }
 0x970   : > { %8487 = vmatmul.mubr.bf16.vlgmr.msra.gmra.mrb[112].mxu1 %v19298_v7  ;;  %v15949_v7 = vld [vmem:[%s21345_s2 + $0xa88] sm:$0xff]  }
 0x971   : > { %13779 = vmatprep.mubr.msk.bf16.mxu1 %vm2296_vm0, %v19172_v11  ;;  %15226 = vmatpush3.bf16.msra.mxu1 %v15944_v25  ;;  %v15948_v11 = vld [vmem:[%s21345_s2 + $0xa80] sm:$0xff]  }
 0x972   : > { %15227 = vmatprep.subr.bf16.mxu1 %v15945_v35  ;;  %v15971_v25 = vld [vmem:[%s21345_s2 + $0xb40] sm:$0xff]  }
 0x975   : > { %15228 = vmatpush3.bf16.msra.mxu1 %v15945_v35 }
 0x976   : > { %15229 = vmatprep.subr.bf16.mxu1 %v15946_v42 }
 0x978   : > { %8495 = vmatmul.mubr.bf16.gmra.mrb[116].mxu1 %v19304_v5 }
 0x979   : > { %13780 = vmatprep.mubr.msk.bf16.mxu1 %vm2296_vm0, %v19294_v30  ;;  %15230 = vmatpush3.bf16.msra.mxu1 %v15946_v42 }
 0x97a   : > { %15231 = vmatprep.subr.bf16.mxu1 %v15947_v29 }
 0x97d   : > { %15232 = vmatpush3.bf16.msra.mxu1 %v15947_v29 }
 0x97e   : > { %15233 = vmatprep.subr.bf16.mxu1 %v15948_v11 }
 0x980   : > { %8503 = vmatmul.mubr.bf16.gmra.mrb[120].mxu1 %v19326_v51  ;;  %v15953_v51 = vld [vmem:[%s21345_s2 + $0xaf8] sm:$0xff]  }
 0x981   : > { %13781 = vmatprep.mubr.msk.bf16.mxu1 %vm2296_vm0, %v19328_v37  ;;  %15234 = vmatpush3.bf16.msra.mxu1 %v15948_v11  ;;  %v15972_v11 = vld [vmem:[%s21345_s2 + $0xae8] sm:$0xff]  }
 0x982   : > { %15235 = vmatprep.subr.bf16.mxu1 %v15949_v7  ;;  %9495 = vmatpush1.bf16.msra.mxu0 %v15953_v51 }
 0x983   : > { %9496 = vmatprep.subr.bf16.mxu0 %v16182_v3 }
 0x985   : > { %15236 = vmatpush3.bf16.msra.mxu1 %v15949_v7 }
 0x986   : > { %9641 = vmatprep.subr.bf16.mxu1 %v16182_v3  ;;  %9497 = vmatpush1.bf16.msra.mxu0 %v15955_v58 }
 0x987   : > { %9498 = vmatprep.subr.bf16.mxu0 %v16182_v3 }
 0x988   : > { %8511 = vmatmul.mubr.bf16.gmra.mrb[124].mxu1 %v19355_v17  ;;  %v15958_v17 = vld [vmem:[%s21345_s2 + $0xab0] sm:$0xff]  }
 0x989   : > { %15237 = vmatprep.mubr.msk.bf16.mxu1 %vm2275_vm15, %v6249_v46 }
 0x98a   : > { %9499 = vmatpush1.bf16.msra.mxu0 %v15957_v48 }
 0x98b   : > { %9500 = vmatprep.subr.bf16.mxu0 %v16182_v3 }
 0x98e   : > { %9501 = vmatpush1.bf16.msra.mxu0 %v15959_v6  ;;  %v19597_v6 = vld [vmem:[#allocation2 + $0x4] sm:$0x1] }
 0x98f   : > { %9502 = vmatprep.subr.bf16.mxu0 %v16182_v3 }
 0x990   : > { %15238 = vmatmul.mubr.msk.bf16.vlgmr.msra.gmra.mrb[128].mxu1 %vm2275_vm15, %v6250_v2 }
 0x991   : > { %15241 = vmatprep.mubr.msk.bf16.mxu1 %vm2275_vm15, %v6251_v15  ;;  %9642 = vmatpush1.bf16.msra.mxu1 %v15950_v1 }
 0x992   : > { %9643 = vmatprep.subr.bf16.mxu1 %v16182_v3  ;;  %9503 = vmatpush1.bf16.msra.mxu0 %v15961_v60  ;;  %v19602_v60 = vld [vmem:[#allocation2] sm:$0xe] }
 0x993   : > { %9504 = vmatprep.subr.bf16.mxu0 %v16182_v3 }
 0x995   : > { %9644 = vmatpush1.bf16.msra.mxu1 %v15952_v8 }
 0x996   : > { %9645 = vmatprep.subr.bf16.mxu1 %v16182_v3  ;;  %9505 = vmatpush1.bf16.msra.mxu0 %v15963_v50 }
 0x997   : > { %9506 = vmatprep.subr.bf16.mxu0 %v16182_v3 }
 0x998   : > { %15242 = vmatmul.mubr.msk.bf16.gmra.mrb[132].mxu1 %vm2275_vm15, %v6252_v61 }
 0x999   : > { %9646 = vmatpush1.bf16.msra.mxu1 %v15954_v55 }
 0x99a   : > { %9647 = vmatprep.subr.bf16.mxu1 %v16182_v3  ;;  %9507 = vmatpush1.bf16.msra.mxu0 %v15965_v44 }
 0x99b   : > { %9508 = vmatprep.subr.bf16.mxu0 %v16182_v3 }
 0x99d   : > { %9648 = vmatpush1.bf16.msra.mxu1 %v15956_v4 }
 0x99e   : > { %9649 = vmatprep.subr.bf16.mxu1 %v16182_v3  ;;  %9509 = vmatpush1.bf16.msra.mxu0 %v15967_v21 }
 0x99f   : > { %9510 = vmatprep.subr.bf16.mxu0 %v16182_v3 }
 0x9a1   : > { %9650 = vmatpush1.bf16.msra.mxu1 %v15958_v17 }
 0x9a2   : > { %9651 = vmatprep.subr.bf16.mxu1 %v16182_v3  ;;  %9511 = vmatpush1.bf16.msra.mxu0 %v15969_v38  ;;  %v9210_v38 = vrot.slane %v19597_v6, 5 }
 0x9a3   : > { %9512 = vmatprep.subr.bf16.mxu0 %v16182_v3 }
 0x9a5   : > { %9652 = vmatpush1.bf16.msra.mxu1 %v15960_v32 }
 0x9a6   : > { %9653 = vmatprep.subr.bf16.mxu1 %v16182_v3  ;;  %9513 = vmatpush1.bf16.msra.mxu0 %v15971_v25 }
 0x9a7   : > { %9514 = vmatprep.subr.bf16.mxu0 %v16182_v3 }
 0x9a9   : > { %9654 = vmatpush1.bf16.msra.mxu1 %v15962_v14 }
 0x9aa   : > { %9655 = vmatprep.subr.bf16.mxu1 %v16182_v3 }
 0x9ad   : > { %9656 = vmatpush1.bf16.msra.mxu1 %v15964_v34 }
 0x9ae   : > { %9657 = vmatprep.subr.bf16.mxu1 %v16182_v3 }
 0x9b1   : > { %9658 = vmatpush1.bf16.msra.mxu1 %v15966_v54 }
 0x9b2   : > { %9659 = vmatprep.subr.bf16.mxu1 %v16182_v3 }
 0x9b5   : > { %9660 = vmatpush1.bf16.msra.mxu1 %v15968_v36 }
 0x9b6   : > { %9661 = vmatprep.subr.bf16.mxu1 %v16182_v3 }
 0x9b9   : > { %9662 = vmatpush1.bf16.msra.mxu1 %v15970_v56 }
 0x9ba   : > { %9663 = vmatprep.subr.bf16.mxu1 %v16182_v3 }
 0x9bd   : > { %9664 = vmatpush1.bf16.msra.mxu1 %v15972_v11 }
 0x9be   : > { %10541 = vmatprep.subr.bf16.mxu1 %v16182_v3 }
 0xa10   : > { %v19451_v30 = vpop.f32.mrb[192].mxu0 }
 0xa11   : > { %v8654_v47 = vpop.f32.mrb[193].mxu0 }
 0xa12   : > { %v19453_v18 = vpop.f32.mrb[194].mxu0 }
 0xa13   : > { %v19455_v46 = vpop.f32.mrb[96].mxu1  ;;  %v8657_v9 = vpop.f32.mrb[195].mxu0 }
 0xa14   : > { %v8341_v12 = vpop.f32.mrb[97].mxu1 }
 0xa15   : > { %v19457_v2 = vpop.f32.mrb[98].mxu1 }
 0xa16   : > { %v8344_v5 = vpop.f32.mrb[99].mxu1 }
 0xa18   : > { %v19459_v0 = vpop.f32.mrb[196].mxu0 }
 0xa19   : > { %v8662_v31 = vpop.f32.mrb[197].mxu0 }
 0xa1a   : > { %v19461_v15 = vpop.f32.mrb[198].mxu0 }
 0xa1b   : > { %v19469_v61 = vpop.f32.mrb[100].mxu1  ;;  %v8665_v26 = vpop.f32.mrb[199].mxu0 }
 0xa1c   : > { %v8349_v63 = vpop.f32.mrb[101].mxu1 }
 0xa1d   : > { %v19477_v37 = vpop.f32.mrb[102].mxu1 }
 0xa1e   : > { %v8352_v13 = vpop.f32.mrb[103].mxu1 }
 0xa20   : > { %v19481_v23 = vpop.f32.mrb[200].mxu0 }
 0xa21   : > { %v8670_v24 = vpop.f32.mrb[201].mxu0 }
 0xa22   : > { %v19491_v28 = vpop.f32.mrb[202].mxu0 }
 0xa23   : > { %v19493_v49 = vpop.f32.mrb[104].mxu1  ;;  %v8673_v59 = vpop.f32.mrb[203].mxu0 }
 0xa24   : > { %v8357_v43 = vpop.f32.mrb[105].mxu1 }
 0xa25   : > { %v19501_v22 = vpop.f32.mrb[106].mxu1 }
 0xa26   : > { %v8360_v45 = vpop.f32.mrb[107].mxu1 }
 0xa27   : > { %v19594_v45 = vld [vmem:[#allocation2 + $0x48] sm:$0xf] }
 0xa28   : > { %v19505_v52 = vpop.f32.mrb[204].mxu0  ;;  %v9165_v14 = vshrl.u32 %v19594_v45, 16 }
 0xa29   : > { %v8678_v41 = vpop.f32.mrb[205].mxu0 }
 0xa2a   : > { %v19515_v57 = vpop.f32.mrb[206].mxu0 }
 0xa2b   : > { %v19517_v16 = vpop.f32.mrb[108].mxu1  ;;  %v8681_v10 = vpop.f32.mrb[207].mxu0 }
 0xa2c   : > { %v8365_v27 = vpop.f32.mrb[109].mxu1  ;;  %v9048_v10 = vshll.u32 %v19597_v6, 16 }
 0xa2d   : > { %v19525_v33 = vpop.f32.mrb[110].mxu1 }
 0xa2e   : > { %v8368_v19 = vpop.f32.mrb[111].mxu1  ;;  %v19615_v25 = vrot.slane %v9048_v10, 5 }
 0xa43   : > { %v8488_v35 = vpop.f32.mrb[112].mxu1 }
 0xa44   : > { %v8489_v42 = vadd.f32 %v8488_v35, %v19455_v46  ;;  %v8490_v29 = vpop.f32.mrb[113].mxu1  ;;  %v19617_v35 = vrot.slane %v9165_v14, 4 }
 0xa45   : > { %v8491_v7 = vpop.f32.mrb[114].mxu1 }
 0xa46   : > { %v8683_v47 = vadd.f32 %v19451_v30, %v8489_v42  ;;  %v8492_v9 = vadd.f32 %v8491_v7, %v19457_v2  ;;  %v8493_v12 = vpop.f32.mrb[115].mxu1  ;;  %v19583_v2 = vld [vmem:[#allocation2] sm:$0xf] }
 0xa47   : > { %v9039_v59 = vshrl.u32 %v19583_v2, 16 }
 0xa48   : > { %v8684_v5 = vadd.f32 %v19453_v18, %v8492_v9 }
 0xa49   : > { %v9041_v43 = vrot.slane %v9039_v59, 4 }
 0xa4b   : > { %v8496_v46 = vpop.f32.mrb[116].mxu1 }
 0xa4c   : > { %v8497_v31 = vadd.f32 %v8496_v46, %v19469_v61  ;;  %v8498_v1 = vpop.f32.mrb[117].mxu1 }
 0xa4d   : > { %v8499_v20 = vpop.f32.mrb[118].mxu1 }
 0xa4e   : > { %v8685_v26 = vadd.f32 %v19459_v0, %v8497_v31  ;;  %v8500_v63 = vadd.f32 %v8499_v20, %v19477_v37  ;;  %v8501_v8 = vpop.f32.mrb[119].mxu1  ;;  %v9042_v0 = vshll.u32 %v19583_v2, 16 }
 0xa50   : > { %v8686_v30 = vadd.f32 %v19461_v15, %v8500_v63  ;;  %v13798_v15 = vld [vmem:[%s21346_s3 + $0x6] ss:$0 sm:$0xff]  ;;  %v9044_v4 = vrot.slane %v9042_v0, 5 }
 0xa51   : > { %v8697_v50 = vadd.f32 %v13798_v15, %v8684_v5 }
 0xa52   : > { %v9045_v19 = vor.u32 %v9044_v4, %v9041_v43  ;;  %v8699_v34 = vadd.f32 %v13798_v15, %v8686_v30 }
 0xa53   : > { %v8504_v51 = vpop.f32.mrb[120].mxu1  ;;  %vm8705_vm6 = vcmp.ge.f32.partialorder %v8697_v50, 0.0  ;;  %v8713_v7 = vmul.f32 0.01, %v8697_v50 }
 0xa54   : > { %v8505_v18 = vadd.f32 %v8504_v51, %v19493_v49  ;;  %v8506_v13 = vpop.f32.mrb[121].mxu1  ;;  %v8696_v49 = vadd.f32 %v13798_v15, %v8683_v47  ;;  %v19613_v56 = vrot.slane %v9045_v19, 4  ;;  %v8715_v11 = vmul.f32 0.01, %v8699_v34 }
 0xa55   : > { %v8507_v55 = vpop.f32.mrb[122].mxu1  ;;  %vm8707_vm2 = vcmp.ge.f32.partialorder %v8699_v34, 0.0 }
 0xa56   : > { %v8687_v58 = vadd.f32 %v19481_v23, %v8505_v18  ;;  %v8508_v61 = vadd.f32 %v8507_v55, %v19501_v22  ;;  %v8509_v24 = vpop.f32.mrb[123].mxu1  ;;  %v8698_v23 = vadd.f32 %v13798_v15, %v8685_v26  ;;  %v8712_v44 = vmul.f32 0.01, %v8696_v49 }
 0xa57   : > { %vm8704_vm8 = vcmp.ge.f32.partialorder %v8696_v49, 0.0  ;;  %v8723_v18 = vsel %vm8707_vm2, %v8699_v34, %v8715_v11  ;;  %v8721_v24 = vsel %vm8705_vm6, %v8697_v50, %v8713_v7  ;;  %v8982_v11 = vld [vmem:[#allocation2 + $0x18] sm:$0xf]  ;;  %v8985_v7 = vld [vmem:[#allocation2 + $0x1c] sm:$0x1] }
 0xa58   : > { %v8688_v37 = vadd.f32 %v19491_v28, %v8508_v61  ;;  %v8714_v21 = vmul.f32 0.01, %v8698_v23  ;;  %vm8706_vm10 = vcmp.ge.f32.partialorder %v8698_v23, 0.0  ;;  %v8720_v29 = vsel %vm8704_vm8, %v8696_v49, %v8712_v44 }
 0xa5a   : > { %v8722_v47 = vsel %vm8706_vm10, %v8698_v23, %v8714_v21  ;;  %v19621_v46 = vadd.f32 %v13798_v15, %v8688_v37 }
 0xa5b   : > { %v8512_v48 = vpop.f32.mrb[124].mxu1 }
 0xa5c   : > { %v8513_v22 = vadd.f32 %v8512_v48, %v19517_v16  ;;  %v8514_v17 = vpop.f32.mrb[125].mxu1  ;;  %v8700_v16 = vadd.f32 %v13798_v15, %v8687_v58  ;;  %vm8709_vm8 = vcmp.ge.f32.partialorder %v19621_v46, 0.0  ;;  %v19645_v43 = vmul.f32 0.01, %v19621_v46 }
 0xa5d   : > { %v8515_v41 = vpop.f32.mrb[126].mxu1 }
 0xa5e   : > { %v8689_v27 = vadd.f32 %v19505_v52, %v8513_v22  ;;  %v8516_v32 = vadd.f32 %v8515_v41, %v19525_v33  ;;  %v8517_v28 = vpop.f32.mrb[127].mxu1  ;;  %v19609_v52 = vld [vmem:[%s21346_s3 + $0x7] ss:$0 sm:$0xff]  ;;  %v13818_v33 = vrot.slane %v19602_v60, 9  ;;  %v8716_v5 = vmul.f32 0.01, %v8700_v16 }
 0xa5f   : > { %vm8708_vm4 = vcmp.ge.f32.partialorder %v8700_v16, 0.0  ;;  %v9051_v60 = vsel %vm16454_vm12, %v19613_v56, %v19615_v25 }
 0xa60   : > { %v8690_v54 = vadd.f32 %v19515_v57, %v8516_v32  ;;  %v8702_v36 = vadd.f32 %v13798_v15, %v8689_v27  ;;  %v9168_v57 = vshll.u32 %v19594_v45, 16  ;;  %v8724_v59 = vsel %vm8708_vm4, %v8700_v16, %v8716_v5 }
 0xa62   : > { %v8718_v20 = vmul.f32 0.01, %v8702_v36  ;;  %v19624_v26 = vadd.f32 %v13798_v15, %v8690_v54  ;;  %vm8710_vm7 = vcmp.ge.f32.partialorder %v8702_v36, 0.0  ;;  %v19632_v55 = vrot.slane %v9168_v57, 5 }
 0xa63   : > { %v15239_v42 = vpop.f32.mrb[128].mxu1 }
 0xa64   : > { %v8836_v9 = vadd.f32 %v15239_v42, %v19609_v52  ;;  %v8827_v12 = vpop.f32.mrb[129].mxu1  ;;  %v8726_v37 = vsel %vm8710_vm7, %v8702_v36, %v8718_v20  ;;  %vm8711_vm10 = vcmp.ge.f32.partialorder %v19624_v26, 0.0  ;;  %v8719_v48 = vmul.f32 0.01, %v19624_v26  ;;  %v8970_v20 = vld [vmem:[#allocation2 + $0x8] sm:$0xf] }
 0xa65   : > { %v8828_v31 = vadd.f32 %v19609_v52, %v8827_v12  ;;  %v15240_v1 = vpop.f32.mrb[130].mxu1 }
 0xa66   : > { %v19626_v63 = vadd.f32 %v8836_v9, %v8722_v47  ;;  %v8839_v8 = vadd.f32 %v15240_v1, %v19609_v52  ;;  %v8830_v30 = vpop.f32.mrb[131].mxu1 }
 0xa67   : > { %v19629_v51 = vadd.f32 %v8828_v31, %v8720_v29  ;;  %v8831_v13 = vadd.f32 %v19609_v52, %v8830_v30 }
 0xa68   : > { %v14186_v58 = vpack.c.bf16 %v19626_v63, %v19626_v63  ;;  %v19636_v61 = vadd.f32 %v8839_v8, %v8723_v18  ;;  %v8973_v8 = vld [vmem:[#allocation2 + $0xc] sm:$0x1] }
 0xa69   : > { %v14184_v0 = vpack.c.bf16 %v19629_v51, %v19629_v51  ;;  %v19641_v15 = vadd.f32 %v8831_v13, %v8721_v24  ;;  %v8988_v24 = vld [vmem:[#allocation2 + $0x20] sm:$0xf] }
 0xa6a   : > { %v8907_v4 = vshrl.u32 %v14186_v58, 16  ;;  %v14187_v49 = vpack.c.bf16 %v19636_v61, %v19636_v61  ;;  %v8910_v23 = vshll.u32 %v14186_v58, 16 }
 0xa6b   : > { %v8891_v22 = vshrl.u32 %v14184_v0, 16  ;;  %v8894_v17 = vshll.u32 %v14184_v0, 16  ;;  %v14185_v41 = vpack.c.bf16 %v19641_v15, %v19641_v15  ;;  %v15243_v10 = vpop.f32.mrb[132].mxu1 }
 0xa6c   : > { %v8909_v27 = vrot.slane %v8907_v4, 7  ;;  %v8915_v32 = vshrl.u32 %v14187_v49, 16  ;;  %v8918_v28 = vshll.u32 %v14187_v49, 16  ;;  %v8852_v19 = vadd.f32 %v15243_v10, %v19609_v52  ;;  %v8843_v14 = vpop.f32.mrb[133].mxu1 }
 0xa6d   : > { %v8893_v50 = vrot.slane %v8891_v22, 7  ;;  %v8899_v34 = vshrl.u32 %v14185_v41, 16  ;;  %v8902_v44 = vshll.u32 %v14185_v41, 16  ;;  %v8844_v16 = vadd.f32 %v19609_v52, %v8843_v14  ;;  %v15244_v54 = vpop.f32.mrb[134].mxu1  ;;  %v8979_v22 = vld [vmem:[#allocation2 + $0x14] sm:$0x1] }
 0xa6e   : > { %v8912_v21 = vor.u32 %v8910_v23, %v8909_v27  ;;  %v8913_v36 = vrot.slane %v8909_v27, 4  ;;  %v8917_v57 = vrot.slane %v8915_v32, 7  ;;  %v19655_v42 = vadd.f32 %v8852_v19, %v8726_v37  ;;  %v8846_v29 = vpop.f32.mrb[135].mxu1  ;;  %v8976_v23 = vld [vmem:[#allocation2 + $0x10] sm:$0xf] }
 0xa6f   : > { %v8896_v47 = vor.u32 %v8894_v17, %v8893_v50  ;;  %v8897_v9 = vrot.slane %v8893_v50, 4  ;;  %v8901_v12 = vrot.slane %v8899_v34, 7  ;;  %v19657_v5 = vadd.f32 %v8844_v16, %v8724_v59  ;;  %v8991_v59 = vld [vmem:[#allocation2 + $0x24] sm:$0x1] }
 0xa70   : > { %v8983_v31 = vsel %vm19097_vm11, %v8912_v21, %v8982_v11  ;;  %v8986_v1 = vsel %vm19104_vm13, %v8913_v36, %v8985_v7  ;;  %v8920_v30 = vor.u32 %v8918_v28, %v8917_v57  ;;  %v8921_v18 = vrot.slane %v8917_v57, 4  ;;  %v9006_v36 = vld [vmem:[#allocation2 + $0x38] sm:$0xf]  ;;  %v9009_v57 = vld [vmem:[#allocation2 + $0x3c] sm:$0x1] }
 0xa71   : > { %8984 = vst [vmem:[#allocation2 + $0x18] sm:$0xf] %v8983_v31  ;;  %8987 = vst [vmem:[#allocation2 + $0x1c] sm:$0x1] %v8986_v1  ;;  %v8971_v13 = vsel %vm19097_vm11, %v8896_v47, %v8970_v20  ;;  %v8974_v58 = vsel %vm19104_vm13, %v8897_v9, %v8973_v8  ;;  %v8904_v0 = vor.u32 %v8902_v44, %v8901_v12  ;;  %v8905_v37 = vrot.slane %v8901_v12, 4 }
 0xa72   : > { %8972 = vst [vmem:[#allocation2 + $0x8] sm:$0xf] %v8971_v13  ;;  %8975 = vst [vmem:[#allocation2 + $0xc] sm:$0x1] %v8974_v58  ;;  %v8989_v4 = vsel %vm19097_vm11, %v8920_v30, %v8988_v24  ;;  %v8992_v49 = vsel %vm19104_vm13, %v8921_v18, %v8991_v59  ;;  %v14190_v17 = vpack.c.bf16 %v19655_v42, %v19655_v42 }
 0xa73   : > { %v14188_v41 = vpack.c.bf16 %v19657_v5, %v19657_v5  ;;  %8990 = vst [vmem:[#allocation2 + $0x20] sm:$0xf] %v8989_v4  ;;  %8993 = vst [vmem:[#allocation2 + $0x24] sm:$0x1] %v8992_v49  ;;  %v8977_v10 = vsel %vm19097_vm11, %v8904_v0, %v8976_v23  ;;  %v8980_v27 = vsel %vm19104_vm13, %v8905_v37, %v8979_v22 }
 0xa74   : > { %v8855_v32 = vadd.f32 %v15244_v54, %v19609_v52  ;;  %v8847_v28 = vadd.f32 %v19609_v52, %v8846_v29  ;;  %8978 = vst [vmem:[#allocation2 + $0x10] sm:$0xf] %v8977_v10  ;;  %8981 = vst [vmem:[#allocation2 + $0x14] sm:$0x1] %v8980_v27  ;;  %v8939_v19 = vshrl.u32 %v14190_v17, 16  ;;  %v8727_v50 = vsel %vm8711_vm10, %v19624_v26, %v8719_v48 }
 0xa75   : > { %v8923_v14 = vshrl.u32 %v14188_v41, 16  ;;  %v8725_v34 = vsel %vm8709_vm8, %v19621_v46, %v19645_v43  ;;  %v19698_v52 = vsel %vm16420_vm9, %v13818_v33, %v9210_v38  ;;  %v8942_v21 = vshll.u32 %v14190_v17, 16  ;;  %v8994_v29 = vld [vmem:[#allocation2 + $0x28] sm:$0xf]  ;;  %v8997_v46 = vld [vmem:[#allocation2 + $0x2c] sm:$0x1] }
 0xa76   : > { %v19688_v44 = vadd.f32 %v8855_v32, %v8727_v50  ;;  %v19690_v16 = vadd.f32 %v8847_v28, %v8725_v34  ;;  %v8941_v54 = vrot.slane %v8939_v19, 7  ;;  %v8926_v48 = vshll.u32 %v14188_v41, 16  ;;  %v9012_v17 = vld [vmem:[#allocation2 + $0x40] sm:$0xf]  ;;  %v9015_v50 = vld [vmem:[#allocation2 + $0x44] sm:$0x1] }
 0xa77   : > { %v8925_v26 = vrot.slane %v8923_v14, 7  ;;  %v9171_v33 = vor.u32 %v19632_v55, %v19617_v35 }
 0xa78   : > { %v14191_v43 = vpack.c.bf16 %v19688_v44, %v19688_v44  ;;  %v14189_v6 = vpack.c.bf16 %v19690_v16, %v19690_v16  ;;  %v8944_v38 = vor.u32 %v8942_v21, %v8941_v54  ;;  %v8945_v11 = vrot.slane %v8941_v54, 4  ;;  %v19710_v9 = vld [vmem:[#allocation2 + $0x1c] sm:$0x1]  ;;  %v9181_v12 = vld [vmem:[#allocation2 + $0x18] sm:$0xe] }
 0xa79   : > { %v8928_v7 = vor.u32 %v8926_v48, %v8925_v26  ;;  %v8929_v47 = vrot.slane %v8925_v26, 4  ;;  %v9029_v30 = vld [vmem:[#allocation2 + $0xc] sm:$0x1]  ;;  %v9179_v59 = vld [vmem:[#allocation2 + $0x8] sm:$0xe]  ;;  %v13821_v27 = vrot.slane %v9181_v12, 9 }
 0xa7a   : > { %v8947_v31 = vshrl.u32 %v14191_v43, 16  ;;  %v8950_v1 = vshll.u32 %v14191_v43, 16  ;;  %v8931_v20 = vshrl.u32 %v14189_v6, 16  ;;  %v8934_v8 = vshll.u32 %v14189_v6, 16  ;;  %v19720_v0 = vld [vmem:[#allocation2 + $0x8] sm:$0xf] }
 0xa7b   : > { %v9007_v18 = vsel %vm19097_vm11, %v8944_v38, %v9006_v36  ;;  %v9010_v13 = vsel %vm19104_vm13, %v8945_v11, %v9009_v57  ;;  %v8995_v58 = vsel %vm19097_vm11, %v8928_v7, %v8994_v29  ;;  %v8998_v24 = vsel %vm19104_vm13, %v8929_v47, %v8997_v46  ;;  %v9030_v22 = vld [vmem:[#allocation2 + $0x14] sm:$0x1]  ;;  %v9180_v41 = vld [vmem:[#allocation2 + $0x10] sm:$0xe]  ;;  %v19738_v7 = vld [vmem:[#allocation2 + $0x18] sm:$0xf] }
 0xa7c   : > { %9008 = vst [vmem:[#allocation2 + $0x38] sm:$0xf] %v9007_v18  ;;  %9011 = vst [vmem:[#allocation2 + $0x3c] sm:$0x1] %v9010_v13  ;;  %v8949_v37 = vrot.slane %v8947_v31, 7  ;;  %v8933_v4 = vrot.slane %v8931_v20, 7 }
 0xa7d   : > { %8996 = vst [vmem:[#allocation2 + $0x28] sm:$0xf] %v8995_v58  ;;  %8999 = vst [vmem:[#allocation2 + $0x2c] sm:$0x1] %v8998_v24  ;;  %v13819_v49 = vrot.slane %v9179_v59, 9  ;;  %v9214_v23 = vrot.slane %v9029_v30, 5 }
 0xa7e   : > { %v9218_v10 = vrot.slane %v9030_v22, 5  ;;  %v9222_v32 = vrot.slane %v19710_v9, 5  ;;  %v9053_v28 = vshrl.u32 %v19720_v0, 16  ;;  %v8952_v19 = vor.u32 %v8950_v1, %v8949_v37  ;;  %v9000_v21 = vld [vmem:[#allocation2 + $0x30] sm:$0xf] }
 0xa7f   : > { %v8953_v14 = vrot.slane %v8949_v37, 4  ;;  %v8936_v34 = vor.u32 %v8934_v8, %v8933_v4  ;;  %v8937_v54 = vrot.slane %v8933_v4, 4  ;;  %v9003_v26 = vld [vmem:[#allocation2 + $0x34] sm:$0x1]  ;;  %v9215_v48 = vsel %vm16420_vm9, %v13819_v49, %v9214_v23  ;;  %v19728_v46 = vld [vmem:[#allocation2 + $0x10] sm:$0xf] }
 0xa80   : > { %v13820_v36 = vrot.slane %v9180_v41, 9  ;;  %v9223_v57 = vsel %vm16420_vm9, %v13821_v27, %v9222_v32  ;;  %v9055_v29 = vrot.slane %v9053_v28, 4  ;;  %v9013_v43 = vsel %vm19097_vm11, %v8952_v19, %v9012_v17  ;;  %v19744_v20 = vld [vmem:[#allocation2 + $0x4c] sm:$0x1]  ;;  %v19753_v4 = vld [vmem:[#allocation2 + $0x20] sm:$0xf] }
 0xa81   : > { %v9016_v6 = vsel %vm19104_vm13, %v8953_v14, %v9015_v50  ;;  %v9001_v38 = vsel %vm19097_vm11, %v8936_v34, %v9000_v21  ;;  %v9004_v11 = vsel %vm19104_vm13, %v8937_v54, %v9003_v26  ;;  %9014 = vst [vmem:[#allocation2 + $0x40] sm:$0xf] %v9013_v43  ;;  %v13838_v47 = vcombine.low %v19698_v52, %v9215_v48  ;;  %v19766_v50 = vld [vmem:[#allocation2 + $0x24] sm:$0x1] }
 0xa82   : > { %9017 = vst [vmem:[#allocation2 + $0x44] sm:$0x1] %v9016_v6  ;;  %9002 = vst [vmem:[#allocation2 + $0x30] sm:$0xf] %v9001_v38  ;;  %v9219_v12 = vsel %vm16420_vm9, %v13820_v36, %v9218_v10  ;;  %v9056_v31 = vshll.u32 %v19720_v0, 16  ;;  %v9062_v1 = vshll.u32 %v9029_v30, 16 }
 0xa83   : > { %9005 = vst [vmem:[#allocation2 + $0x34] sm:$0x1] %v9004_v11  ;;  %v19746_v8 = vcombine.low %v9219_v12, %v9223_v57  ;;  %v9067_v18 = vshrl.u32 %v19728_v46, 16  ;;  %v9070_v13 = vshll.u32 %v19728_v46, 16  ;;  %v9174_v58 = vshll.u32 %v19744_v20, 16  ;;  %13871 = vmatprep.mubr.msk.bf16.mxu1 %vm2296_vm0, %v13838_v47 }
 0xa84   : > { %v9389_v24 = vrot.slane %v13838_v47, 4  ;;  %v9058_v52 = vrot.slane %v9056_v31, 5  ;;  %v9076_v59 = vshll.u32 %v9030_v22, 16  ;;  %v9081_v37 = vshrl.u32 %v19738_v7, 16  ;;  %v19758_v28 = vld [vmem:[#allocation2 + $0x28] sm:$0xf] }
 0xa85   : > { %v9390_v30 = vrot.slane %v19746_v8, 4  ;;  %v9064_v49 = vrot.slane %v9062_v1, 5  ;;  %v9069_v23 = vrot.slane %v9067_v18, 4  ;;  %v9072_v17 = vrot.slane %v9070_v13, 5  ;;  %v15975_v22 = vld [vmem:[%s21345_s2 + $0xb48] sm:$0xff]  }
 0xa86   : > { %v9059_v41 = vor.u32 %v9058_v52, %v9055_v29  ;;  %v9083_v10 = vrot.slane %v9081_v37, 4  ;;  %v9084_v27 = vshll.u32 %v19738_v7, 16  ;;  %v9090_v32 = vshll.u32 %v19710_v9, 16  ;;  %v19771_v36 = vld [vmem:[#allocation2 + $0x2c] sm:$0x1]  ;;  %9515 = vmatpush1.bf16.msra.mxu0 %v15975_v22 }
 0xa87   : > { %v9391_v19 = vsel %vm408_vm5, %v9389_v24, %v9390_v30  ;;  %v9073_v14 = vor.u32 %v9072_v17, %v9069_v23  ;;  %v9095_v34 = vshrl.u32 %v19753_v4, 16  ;;  %v9098_v54 = vshll.u32 %v19753_v4, 16  ;;  %9805 = vmatprep.subr.bf16.mxu0 %v16182_v3  ;;  %v19781_v1 = vld [vmem:[#allocation2 + $0x38] sm:$0xf] }
 0xa88   : > { %13855 = vmatprep.mubr.msk.bf16.mxu0 %vm2296_vm0, %v9391_v19  ;;  %v9060_v9 = vrot.slane %v9059_v41, 4  ;;  %v9078_v21 = vrot.slane %v9076_v59, 5  ;;  %v9086_v26 = vrot.slane %v9084_v27, 5  ;;  %v9092_v48 = vrot.slane %v9090_v32, 5  ;;  %v19802_v32 = vld [vmem:[#allocation2 + $0x3c] sm:$0x1] }
 0xa89   : > { %v9074_v57 = vrot.slane %v9073_v14, 4  ;;  %v9097_v29 = vrot.slane %v9095_v34, 4  ;;  %v9100_v43 = vrot.slane %v9098_v54, 5  ;;  %v9109_v6 = vshrl.u32 %v19758_v28, 16  ;;  %v19774_v38 = vld [vmem:[#allocation2 + $0x30] sm:$0xf] }
 0xa8a   : > { %v9065_v11 = vsel %vm16454_vm12, %v9060_v9, %v9064_v49  ;;  %v9087_v47 = vor.u32 %v9086_v26, %v9083_v10  ;;  %v9104_v12 = vshll.u32 %v19766_v50, 16  ;;  %v9112_v31 = vshll.u32 %v19758_v28, 16  ;;  %v19791_v23 = vld [vmem:[#allocation2 + $0x34] sm:$0x1]  ;;  %v19804_v19 = vld [vmem:[#allocation2 + $0x40] sm:$0xf] }
 0xa8b   : > { %v13833_v18 = vcombine.low %v9051_v60, %v9065_v11  ;;  %v9079_v13 = vsel %vm16454_vm12, %v9074_v57, %v9078_v21  ;;  %v9101_v24 = vor.u32 %v9100_v43, %v9097_v29  ;;  %v9111_v52 = vrot.slane %v9109_v6, 4  ;;  %v19807_v26 = vld [vmem:[#allocation2 + $0x44] sm:$0x1] }
 0xa8c   : > { %v9088_v59 = vrot.slane %v9087_v47, 4  ;;  %v9114_v37 = vrot.slane %v9112_v31, 5  ;;  %v9118_v49 = vshll.u32 %v19771_v36, 16  ;;  %v9123_v17 = vshrl.u32 %v19774_v38, 16 }
 0xa8d   : > { %9288 = vrot.lane.b32.xlu1 %v13833_v18, %s16183_s28  ;;  %v9102_v41 = vrot.slane %v9101_v24, 4  ;;  %v9126_v10 = vshll.u32 %v19774_v38, 16  ;;  %v9137_v56 = vshrl.u32 %v19781_v1, 16  ;;  %v9172_v25 = vrot.slane %v9171_v33, 4 }
 0xa8e   : > { %v9093_v60 = vsel %vm16454_vm12, %v9088_v59, %v9092_v48  ;;  %v9115_v27 = vor.u32 %v9114_v37, %v9111_v52  ;;  %v9125_v22 = vrot.slane %v9123_v17, 4  ;;  %v9176_v14 = vrot.slane %v9174_v58, 5 }
 0xa8f   : > { %v13834_v34 = vcombine.low %v9079_v13, %v9093_v60  ;;  %v9106_v54 = vrot.slane %v9104_v12, 5  ;;  %v9128_v9 = vrot.slane %v9126_v10, 5  ;;  %v9132_v21 = vshll.u32 %v19791_v23, 16 }
 0xa90   : > { %v9116_v57 = vrot.slane %v9115_v27, 4  ;;  %v9120_v35 = vrot.slane %v9118_v49, 5  ;;  %v9139_v55 = vrot.slane %v9137_v56, 4  ;;  %v9140_v33 = vshll.u32 %v19781_v1, 16 }
 0xa91   : > { %9290 = vrot.lane.b32.xlu0 %v13834_v34, %s16183_s28  ;;  %v9107_v48 = vsel %vm16454_vm12, %v9102_v41, %v9106_v54  ;;  %v9129_v29 = vor.u32 %v9128_v9, %v9125_v22  ;;  %v9151_v58 = vshrl.u32 %v19804_v19, 16  ;;  %v9154_v43 = vshll.u32 %v19804_v19, 16  ;;  %v9183_v9 = vld [vmem:[#allocation2 + $0x28] sm:$0xe] }
 0xa92   : > { %v9121_v6 = vsel %vm16454_vm12, %v9116_v57, %v9120_v35  ;;  %v9142_v11 = vrot.slane %v9140_v33, 5  ;;  %v9146_v47 = vshll.u32 %v19802_v32, 16  ;;  %v9160_v12 = vshll.u32 %v19807_v26, 16 }
 0xa93   : > { %v13835_v31 = vcombine.low %v9107_v48, %v9121_v6  ;;  %v9130_v18 = vrot.slane %v9129_v29, 4  ;;  %v9153_v13 = vrot.slane %v9151_v58, 4  ;;  %v9156_v24 = vrot.slane %v9154_v43, 5  ;;  %v9184_v48 = vld [vmem:[#allocation2 + $0x30] sm:$0xe] }
 0xa94   : > { %v9134_v52 = vrot.slane %v9132_v21, 5  ;;  %v9143_v59 = vor.u32 %v9142_v11, %v9139_v55  ;;  %v9148_v41 = vrot.slane %v9146_v47, 5  ;;  %v9162_v56 = vrot.slane %v9160_v12, 5  ;;  %v9182_v21 = vld [vmem:[#allocation2 + $0x20] sm:$0xe] }
 0xa95   : > { %9292 = vrot.lane.b32.xlu1 %v13835_v31, %s16183_s28  ;;  %v9157_v37 = vor.u32 %v9156_v24, %v9153_v13  ;;  %v9177_v60 = vsel %vm16454_vm12, %v9172_v25, %v9176_v14  ;;  %v13823_v57 = vrot.slane %v9183_v9, 9  ;;  %v9230_v35 = vrot.slane %v19771_v36, 5  ;;  %v9185_v11 = vld [vmem:[#allocation2 + $0x38] sm:$0xe] }
 0xa96   : > { %v9135_v49 = vsel %vm16454_vm12, %v9130_v18, %v9134_v52  ;;  %v9144_v17 = vrot.slane %v9143_v59, 4  ;;  %v13822_v55 = vrot.slane %v9182_v21, 9  ;;  %v9226_v25 = vrot.slane %v19766_v50, 5  ;;  %v9186_v52 = vld [vmem:[#allocation2 + $0x40] sm:$0xe] }
 0xa97   : > { %v9158_v10 = vrot.slane %v9157_v37, 4  ;;  %v9231_v14 = vsel %vm16420_vm9, %v13823_v57, %v9230_v35  ;;  %v13828_v33 = vcombine.low %v19583_v2, %v19720_v0  ;;  %v13824_v36 = vrot.slane %v9184_v48, 9 }
 0xa98   : > { %v9149_v27 = vsel %vm16454_vm12, %v9144_v17, %v9148_v41  ;;  %v9227_v58 = vsel %vm16420_vm9, %v13822_v55, %v9226_v25  ;;  %v9234_v50 = vrot.slane %v19791_v23, 5  ;;  %v13829_v47 = vcombine.low %v19728_v46, %v19738_v7  ;;  %v15976_v23 = vld [vmem:[%s21345_s2 + $0xb50] sm:$0xff]   ;;  %v15982_v25 = vld [vmem:[%s21345_s2 + $0xb68] sm:$0xff]  }
 0xa99   : > { %v13836_v22 = vcombine.low %v9135_v49, %v9149_v27  ;;  %v9163_v34 = vsel %vm16454_vm12, %v9158_v10, %v9162_v56  ;;  %v19839_v6 = vcombine.low %v9227_v58, %v9231_v14  ;;  %v13825_v0 = vrot.slane %v9185_v11, 9  ;;  %v15984_v11 = vld [vmem:[%s21345_s2 + $0xb78] sm:$0xff]  }
 0xa9a   : > { %v13837_v54 = vcombine.low %v9163_v34, %v9177_v60  ;;  %v9238_v12 = vrot.slane %v19802_v32, 5  ;;  %v9235_v46 = vsel %vm16420_vm9, %v13824_v36, %v9234_v50  ;;  %v13830_v7 = vcombine.low %v19753_v4, %v19758_v28  ;;  %v9187_v32 = vld [vmem:[#allocation2 + $0x48] sm:$0xe]  ;;  %v15979_v28 = vld [vmem:[%s21345_s2 + $0xb58] sm:$0xff]   ;;  %v15981_v34 = vld [vmem:[%s21345_s2 + $0xb60] sm:$0xff]  }
 0xa9b   : > { %9294 = vrot.lane.b32.xlu0 %v13836_v22, %s16183_s28  ;;  %v9394_v18 = vrot.slane %v19839_v6, 4  ;;  %v9246_v4 = vrot.slane %v19744_v20, 5  ;;  %v13826_v56 = vrot.slane %v9186_v52, 9  ;;  %v9242_v60 = vrot.slane %v19807_v26, 5  ;;  %v15986_v50 = vld [vmem:[%s21345_s2 + $0xb88] sm:$0xff]  }
 0xa9c   : > { %9296 = vrot.lane.b32.xlu1 %v13837_v54, %s16183_s28  ;;  %v9239_v49 = vsel %vm16420_vm9, %v13825_v0, %v9238_v12  ;;  %v13827_v27 = vrot.slane %v9187_v32, 9  ;;  %v13831_v9 = vcombine.low %v19774_v38, %v19781_v1  ;;  %v13832_v48 = vcombine.low %v19804_v19, %v19594_v45  ;;  %v15985_v19 = vld [vmem:[%s21345_s2 + $0xb80] sm:$0xff]   ;;  %v15990_v0 = vld [vmem:[%s21345_s2 + $0xba8] sm:$0xff]   ;;  %v15991_v12 = vld [vmem:[%s21345_s2 + $0xbb0] sm:$0xff]  }
 0xa9d   : > { %v9395_v17 = vsel %vm408_vm5, %v9390_v30, %v9394_v18  ;;  %v19868_v10 = vcombine.low %v9235_v46, %v9239_v49  ;;  %v9243_v26 = vsel %vm16420_vm9, %v13826_v56, %v9242_v60  ;;  %v15995_v52 = vld [vmem:[%s21345_s2 + $0xbc8] sm:$0xff]  }
 0xa9e   : > { %v9247_v54 = vsel %vm16420_vm9, %v13827_v27, %v9246_v4 }
 0xa9f   : > { %v9398_v20 = vrot.slane %v19868_v10, 4  ;;  %v13842_v55 = vcombine.low %v9243_v26, %v9247_v54  ;;  %v16001_v26 = vld [vmem:[%s21345_s2 + $0xbe0] sm:$0xff]  }
 0xaa1   : > { %v9399_v35 = vsel %vm408_vm5, %v9394_v18, %v9398_v20  ;;  %v9402_v1 = vrot.slane %v13842_v55, 4  ;;  %v15996_v18 = vld [vmem:[%s21345_s2 + $0xc18] sm:$0xff]  }
 0xaff   : > { %v9289_v29 = vpop.permute.xlu1 %9288 }
 0xb00   : > { %v9315_v43 = vsel %vm2296_vm0, %v13828_v33, %v9289_v29  ;;  %v15983_v33 = vld [vmem:[%s21345_s2 + $0xb70] sm:$0xff]  }
 0xb01   : > { %9674 = vmatmul.mubr.bf16.vlgmr.msra.gmra.mrb[136].mxu1 %v9315_v43  ;;  %v9386_v13 = vrot.slane %v9315_v43, 4  ;;  %v9403_v43 = vsel %vm408_vm5, %v9398_v20, %v9402_v1 }
 0xb02   : > { %13872 = vmatprep.mubr.msk.bf16.mxu1 %vm2296_vm0, %v19746_v8 }
 0xb03   : > { %v9291_v2 = vpop.permute.xlu0 %9290 }
 0xb04   : > { %v19848_v31 = vsel %vm2296_vm0, %v13829_v47, %v9291_v2  ;;  %v15987_v47 = vld [vmem:[%s21345_s2 + $0xb90] sm:$0xff]   ;;  %v15988_v2 = vld [vmem:[%s21345_s2 + $0xb98] sm:$0xff]  }
 0xb05   : > { %v9387_v24 = vrot.slane %v19848_v31, 4 }
 0xb07   : > { %v9388_v59 = vsel %vm408_vm5, %v9386_v13, %v9387_v24  ;;  %v9293_v37 = vpop.permute.xlu1 %9292  ;;  %v15993_v13 = vld [vmem:[%s21345_s2 + $0xbc0] sm:$0xff]  }
 0xb08   : > { %9525 = vmatmul.mubr.bf16.vlgmr.msra.gmra.mrb[208].mxu0 %v9388_v59  ;;  %v19866_v41 = vsel %vm2296_vm0, %v13830_v7, %v9293_v37  ;;  %v16000_v59 = vld [vmem:[%s21345_s2 + $0xc28] sm:$0xff]   ;;  %v15997_v37 = vld [vmem:[%s21345_s2 + $0xbd0] sm:$0xff]  }
 0xb09   : > { %9806 = vmatpush1.bf16.msra.mxu0 %v15976_v23  ;;  %13856 = vmatprep.mubr.msk.bf16.mxu0 %vm2296_vm0, %v9395_v17  ;;  %v9392_v30 = vrot.slane %v19866_v41, 4  ;;  %v16002_v17 = vld [vmem:[%s21345_s2 + $0xc30] sm:$0xff]  }
 0xb0a   : > { %9682 = vmatmul.mubr.bf16.gmra.mrb[140].mxu1 %v19848_v31  ;;  %9807 = vmatprep.subr.bf16.mxu0 %v16182_v3 }
 0xb0b   : > { %13873 = vmatprep.mubr.msk.bf16.mxu1 %vm2296_vm0, %v19839_v6  ;;  %v9393_v21 = vsel %vm408_vm5, %v9387_v24, %v9392_v30  ;;  %v15998_v24 = vld [vmem:[%s21345_s2 + $0xc20] sm:$0xff]  }
 0xb0d   : > { %v9295_v22 = vpop.permute.xlu0 %9294  ;;  %9808 = vmatpush1.bf16.msra.mxu0 %v15979_v28 }
 0xb0e   : > { %9809 = vmatprep.subr.bf16.mxu0 %v16182_v3  ;;  %v9327_v57 = vsel %vm2296_vm0, %v13831_v9, %v9295_v22  ;;  %v9297_v14 = vpop.permute.xlu1 %9296  ;;  %v16004_v22 = vld [vmem:[%s21345_s2 + $0xc38] sm:$0xff]   ;;  %v16006_v9 = vld [vmem:[%s21345_s2 + $0xc40] sm:$0xff]  }
 0xb0f   : > { %v9396_v38 = vrot.slane %v9327_v57, 4  ;;  %v9331_v58 = vsel %vm2296_vm0, %v13832_v48, %v9297_v14  ;;  %v16003_v14 = vld [vmem:[%s21345_s2 + $0xbe8] sm:$0xff]  }
 0xb10   : > { %9533 = vmatmul.mubr.bf16.gmra.mrb[212].mxu0 %v9393_v21  ;;  %v9400_v45 = vrot.slane %v9331_v58, 4  ;;  %v16008_v48 = vld [vmem:[%s21345_s2 + $0xc48] sm:$0xff]  }
 0xb11   : > { %9810 = vmatpush1.bf16.msra.mxu0 %v15981_v34  ;;  %13857 = vmatprep.mubr.msk.bf16.mxu0 %vm2296_vm0, %v9399_v35  ;;  %v9397_v29 = vsel %vm408_vm5, %v9392_v30, %v9396_v38  ;;  %v15999_v30 = vld [vmem:[%s21345_s2 + $0xbd8] sm:$0xff]  }
 0xb12   : > { %9690 = vmatmul.mubr.bf16.gmra.mrb[144].mxu1 %v19866_v41  ;;  %9811 = vmatprep.subr.bf16.mxu0 %v16182_v3  ;;  %v9401_v36 = vsel %vm408_vm5, %v9396_v38, %v9400_v45 }
 0xb13   : > { %13874 = vmatprep.mubr.msk.bf16.mxu1 %vm2296_vm0, %v19868_v10 }
 0xb15   : > { %9812 = vmatpush1.bf16.msra.mxu0 %v15982_v25 }
 0xb16   : > { %9813 = vmatprep.subr.bf16.mxu0 %v16182_v3 }
 0xb18   : > { %9541 = vmatmul.mubr.bf16.gmra.mrb[216].mxu0 %v9397_v29 }
 0xb19   : > { %9814 = vmatpush1.bf16.msra.mxu0 %v15983_v33  ;;  %13858 = vmatprep.mubr.msk.bf16.mxu0 %vm2296_vm0, %v9403_v43 }
 0xb1a   : > { %9698 = vmatmul.mubr.bf16.gmra.mrb[148].mxu1 %v9327_v57  ;;  %9815 = vmatprep.subr.bf16.mxu0 %v16182_v3 }
 0xb1d   : > { %9816 = vmatpush1.bf16.msra.mxu0 %v15984_v11  ;;  %v16010_v11 = vld [vmem:[%s21345_s2 + $0xc50] sm:$0xff]  }
 0xb1e   : > { %9817 = vmatprep.subr.bf16.mxu0 %v16182_v3 }
 0xb20   : > { %9549 = vmatmul.mubr.bf16.gmra.mrb[220].mxu0 %v9401_v36 }
 0xb21   : > { %9818 = vmatpush1.bf16.msra.mxu0 %v15985_v19  ;;  %13887 = vmatprep.mubr.msk.bf16.mxu0 %vm2296_vm0, %v19746_v8  ;;  %v15989_v8 = vld [vmem:[%s21345_s2 + $0xba0] sm:$0xff]  }
 0xb22   : > { %9819 = vmatprep.subr.bf16.mxu0 %v16182_v3 }
 0xb25   : > { %9820 = vmatpush1.bf16.msra.mxu0 %v15986_v50 }
 0xb26   : > { %9821 = vmatprep.subr.bf16.mxu0 %v16182_v3 }
 0xb29   : > { %9822 = vmatpush1.bf16.msra.mxu0 %v15987_v47 }
 0xb2a   : > { %9823 = vmatprep.subr.bf16.mxu0 %v16182_v3 }
 0xb2d   : > { %9824 = vmatpush1.bf16.msra.mxu0 %v15988_v2 }
 0xb2e   : > { %9825 = vmatprep.subr.bf16.mxu0 %v16182_v3 }
 0xb31   : > { %9826 = vmatpush1.bf16.msra.mxu0 %v15989_v8 }
 0xb32   : > { %9827 = vmatprep.subr.bf16.mxu0 %v16182_v3 }
 0xb35   : > { %9828 = vmatpush1.bf16.msra.mxu0 %v15990_v0  ;;  %v16007_v0 = vld [vmem:[%s21345_s2 + $0xbf8] sm:$0xff]  }
 0xb36   : > { %10690 = vmatprep.subr.bf16.mxu0 %v16182_v3 }
 0xb38   : > { %9838 = vmatmul.mubr.bf16.vlgmr.msra.gmra.mrb[224].mxu0 %v19848_v31  ;;  %v15994_v31 = vld [vmem:[%s21345_s2 + $0xc10] sm:$0xff]  }
 0xb39   : > { %13888 = vmatprep.mubr.msk.bf16.mxu0 %vm2296_vm0, %v19839_v6  ;;  %10691 = vmatpush1.bf16.msra.mxu0 %v15991_v12  ;;  %v15992_v6 = vld [vmem:[%s21345_s2 + $0xbb8] sm:$0xff]  }
 0xb3a   : > { %10692 = vmatprep.subr.bf16.mxu0 %v16182_v3  ;;  %10542 = vmatpush1.bf16.msra.mxu1 %v15994_v31 }
 0xb3b   : > { %10543 = vmatprep.subr.bf16.mxu1 %v16182_v3 }
 0xb3d   : > { %10693 = vmatpush1.bf16.msra.mxu0 %v15992_v6  ;;  %v16009_v6 = vld [vmem:[%s21345_s2 + $0xc00] sm:$0xff]  }
 0xb3e   : > { %10694 = vmatprep.subr.bf16.mxu0 %v16182_v3  ;;  %10544 = vmatpush1.bf16.msra.mxu1 %v15996_v18 }
 0xb3f   : > { %10545 = vmatprep.subr.bf16.mxu1 %v16182_v3 }
 0xb40   : > { %9846 = vmatmul.mubr.bf16.gmra.mrb[228].mxu0 %v19866_v41 }
 0xb41   : > { %13889 = vmatprep.mubr.msk.bf16.mxu0 %vm2296_vm0, %v19868_v10  ;;  %10695 = vmatpush1.bf16.msra.mxu0 %v15993_v13 }
 0xb42   : > { %10696 = vmatprep.subr.bf16.mxu0 %v16182_v3  ;;  %10546 = vmatpush1.bf16.msra.mxu1 %v15998_v24 }
 0xb43   : > { %10547 = vmatprep.subr.bf16.mxu1 %v16182_v3 }
 0xb45   : > { %10697 = vmatpush1.bf16.msra.mxu0 %v15995_v52  ;;  %v16011_v52 = vld [vmem:[%s21345_s2 + $0xc08] sm:$0xff]  }
 0xb46   : > { %10698 = vmatprep.subr.bf16.mxu0 %v16182_v3  ;;  %10548 = vmatpush1.bf16.msra.mxu1 %v16000_v59 }
 0xb47   : > { %10549 = vmatprep.subr.bf16.mxu1 %v16182_v3 }
 0xb48   : > { %9854 = vmatmul.mubr.bf16.gmra.mrb[232].mxu0 %v9327_v57 }
 0xb49   : > { %13890 = vmatprep.mubr.msk.bf16.mxu0 %vm2296_vm0, %v13842_v55  ;;  %10699 = vmatpush1.bf16.msra.mxu0 %v15997_v37  ;;  %v20057_v37 = vld [vmem:[%s21346_s3 + $0x8] ss:$0 sm:$0xff] }
 0xb4a   : > { %10700 = vmatprep.subr.bf16.mxu0 %v16182_v3  ;;  %10550 = vmatpush1.bf16.msra.mxu1 %v16002_v17 }
 0xb4b   : > { %10551 = vmatprep.subr.bf16.mxu1 %v16182_v3 }
 0xb4d   : > { %10701 = vmatpush1.bf16.msra.mxu0 %v15999_v30 }
 0xb4e   : > { %10702 = vmatprep.subr.bf16.mxu0 %v16182_v3  ;;  %10552 = vmatpush1.bf16.msra.mxu1 %v16004_v22 }
 0xb4f   : > { %10553 = vmatprep.subr.bf16.mxu1 %v16182_v3 }
 0xb50   : > { %9862 = vmatmul.mubr.bf16.gmra.mrb[236].mxu0 %v9331_v58  ;;  %v16005_v58 = vld [vmem:[%s21345_s2 + $0xbf0] sm:$0xff]  }
 0xb51   : > { %10703 = vmatpush1.bf16.msra.mxu0 %v16001_v26 }
 0xb52   : > { %10704 = vmatprep.subr.bf16.mxu0 %v16182_v3  ;;  %10554 = vmatpush1.bf16.msra.mxu1 %v16006_v9 }
 0xb53   : > { %10555 = vmatprep.subr.bf16.mxu1 %v16182_v3 }
 0xb55   : > { %10705 = vmatpush1.bf16.msra.mxu0 %v16003_v14 }
 0xb56   : > { %10706 = vmatprep.subr.bf16.mxu0 %v16182_v3  ;;  %10556 = vmatpush1.bf16.msra.mxu1 %v16008_v48 }
 0xb57   : > { %10557 = vmatprep.subr.bf16.mxu1 %v16182_v3 }
 0xb59   : > { %10707 = vmatpush1.bf16.msra.mxu0 %v16005_v58 }
 0xb5a   : > { %10708 = vmatprep.subr.bf16.mxu0 %v16182_v3  ;;  %10558 = vmatpush1.bf16.msra.mxu1 %v16010_v11 }
 0xb5b   : > { %10559 = vmatprep.subr.bf16.mxu1 %v16182_v3 }
 0xb5d   : > { %10709 = vmatpush1.bf16.msra.mxu0 %v16007_v0 }
 0xb5e   : > { %10710 = vmatprep.subr.bf16.mxu0 %v16182_v3 }
 0xb61   : > { %10711 = vmatpush1.bf16.msra.mxu0 %v16009_v6 }
 0xb62   : > { %10712 = vmatprep.subr.bf16.mxu0 %v16182_v3 }
 0xb65   : > { %10713 = vmatpush1.bf16.msra.mxu0 %v16011_v52 }
 0xb66   : > { %11598 = vmatprep.subr.bf16.mxu0 %v16182_v3 }
 0xbd4   : > { %v9675_v23 = vpop.f32.mrb[136].mxu1 }
 0xbd5   : > { %v9677_v46 = vpop.f32.mrb[137].mxu1 }
 0xbd6   : > { %v9678_v7 = vpop.f32.mrb[138].mxu1 }
 0xbd7   : > { %v9680_v32 = vpop.f32.mrb[139].mxu1 }
 0xbd8   : > { %v20052_v32 = vld [vmem:[#allocation2] sm:$0xf] }
 0xbd9   : > { %v10091_v17 = vshll.u32 %v20052_v32, 16 }
 0xbdb   : > { %v9526_v49 = vpop.f32.mrb[208].mxu0  ;;  %v10093_v22 = vrot.slane %v10091_v17, 5 }
 0xbdc   : > { %v19989_v41 = vadd.f32 %v9675_v23, %v9526_v49  ;;  %v9528_v10 = vpop.f32.mrb[209].mxu0  ;;  %v10088_v49 = vshrl.u32 %v20052_v32, 16 }
 0xbdd   : > { %v9529_v4 = vpop.f32.mrb[210].mxu0  ;;  %v9683_v28 = vpop.f32.mrb[140].mxu1 }
 0xbde   : > { %v19992_v56 = vadd.f32 %v9678_v7, %v9529_v4  ;;  %v9531_v60 = vpop.f32.mrb[211].mxu0  ;;  %v9685_v27 = vpop.f32.mrb[141].mxu1 }
 0xbdf   : > { %v9686_v20 = vpop.f32.mrb[142].mxu1 }
 0xbe0   : > { %v9688_v34 = vpop.f32.mrb[143].mxu1 }
 0xbe3   : > { %v9534_v54 = vpop.f32.mrb[212].mxu0 }
 0xbe4   : > { %v20009_v21 = vadd.f32 %v9683_v28, %v9534_v54  ;;  %v9536_v57 = vpop.f32.mrb[213].mxu0 }
 0xbe5   : > { %v9537_v35 = vpop.f32.mrb[214].mxu0  ;;  %v9691_v55 = vpop.f32.mrb[144].mxu1 }
 0xbe6   : > { %v20012_v25 = vadd.f32 %v9686_v20, %v9537_v35  ;;  %v9539_v38 = vpop.f32.mrb[215].mxu0  ;;  %v9693_v1 = vpop.f32.mrb[145].mxu1  ;;  %v10090_v20 = vrot.slane %v10088_v49, 4 }
 0xbe7   : > { %v9694_v33 = vpop.f32.mrb[146].mxu1 }
 0xbe8   : > { %v9696_v29 = vpop.f32.mrb[147].mxu1  ;;  %v10094_v38 = vor.u32 %v10093_v22, %v10090_v20  ;;  %v10028_v22 = vld [vmem:[#allocation2 + $0x14] sm:$0x1] }
 0xbeb   : > { %v9542_v43 = vpop.f32.mrb[216].mxu0 }
 0xbec   : > { %v20029_v45 = vadd.f32 %v9691_v55, %v9542_v43  ;;  %v9544_v19 = vpop.f32.mrb[217].mxu0  ;;  %v10077_v55 = vld [vmem:[#allocation2 + $0x4] sm:$0x1] }
 0xbed   : > { %v9545_v36 = vpop.f32.mrb[218].mxu0  ;;  %v9699_v50 = vpop.f32.mrb[148].mxu1 }
 0xbee   : > { %v20032_v47 = vadd.f32 %v9694_v33, %v9545_v36  ;;  %v9547_v2 = vpop.f32.mrb[219].mxu0  ;;  %v9701_v8 = vpop.f32.mrb[149].mxu1 }
 0xbef   : > { %v9702_v12 = vpop.f32.mrb[150].mxu1 }
 0xbf0   : > { %v9704_v31 = vpop.f32.mrb[151].mxu1 }
 0xbf1   : > { %v20070_v31 = vld [vmem:[#allocation2 + $0x48] sm:$0xf] }
 0xbf3   : > { %v9550_v18 = vpop.f32.mrb[220].mxu0 }
 0xbf4   : > { %v20043_v13 = vadd.f32 %v9699_v50, %v9550_v18  ;;  %v9552_v24 = vpop.f32.mrb[221].mxu0  ;;  %v10259_v50 = vrot.slane %v10077_v55, 5 }
 0xbf5   : > { %v9553_v23 = vpop.f32.mrb[222].mxu0 }
 0xbf6   : > { %v20045_v46 = vadd.f32 %v9702_v12, %v9553_v23  ;;  %v9555_v7 = vpop.f32.mrb[223].mxu0  ;;  %v20068_v12 = vrot.slane %v10094_v38, 4 }
 0xbf7   : > { %v10019_v7 = vld [vmem:[#allocation2 + $0x8] sm:$0xf] }
 0xc0b   : > { %v9839_v59 = vpop.f32.mrb[224].mxu0 }
 0xc0c   : > { %v9870_v10 = vadd.f32 %v9839_v59, %v19989_v41  ;;  %v9841_v4 = vpop.f32.mrb[225].mxu0  ;;  %v10227_v41 = vld [vmem:[#allocation2] sm:$0xe]  ;;  %v10022_v59 = vld [vmem:[#allocation2 + $0xc] sm:$0x1] }
 0xc0d   : > { %v9842_v28 = vpop.f32.mrb[226].mxu0  ;;  %v13900_v36 = vrot.slane %v10227_v41, 9 }
 0xc0e   : > { %v9883_v60 = vadd.f32 %v20057_v37, %v9870_v10  ;;  %v9871_v27 = vadd.f32 %v9842_v28, %v19992_v56  ;;  %v9844_v30 = vpop.f32.mrb[227].mxu0  ;;  %v10097_v56 = vshll.u32 %v10077_v55, 16  ;;  %v10214_v10 = vshrl.u32 %v20070_v31, 16 }
 0xc0f   : > { %v10025_v30 = vld [vmem:[#allocation2 + $0x10] sm:$0xf] }
 0xc10   : > { %vm9891_vm6 = vcmp.ge.f32.partialorder %v9883_v60, 0.0  ;;  %v9899_v34 = vmul.f32 0.01, %v9883_v60  ;;  %v9884_v26 = vadd.f32 %v20057_v37, %v9871_v27  ;;  %v20073_v18 = vrot.slane %v10097_v56, 5 }
 0xc12   : > { %v9907_v54 = vsel %vm9891_vm6, %v9883_v60, %v9899_v34  ;;  %vm9892_vm2 = vcmp.ge.f32.partialorder %v9884_v26, 0.0  ;;  %v9900_v9 = vmul.f32 0.01, %v9884_v26 }
 0xc13   : > { %v14192_v57 = vpack.c.bf16 %v9907_v54, %v9907_v54  ;;  %v9847_v35 = vpop.f32.mrb[228].mxu0 }
 0xc14   : > { %v9908_v1 = vsel %vm9892_vm2, %v9884_v26, %v9900_v9  ;;  %v9872_v14 = vadd.f32 %v9847_v35, %v20009_v21  ;;  %v9849_v33 = vpop.f32.mrb[229].mxu0  ;;  %v10217_v35 = vshll.u32 %v20070_v31, 16 }
 0xc15   : > { %v9940_v48 = vshrl.u32 %v14192_v57, 16  ;;  %v14193_v29 = vpack.c.bf16 %v9908_v1, %v9908_v1  ;;  %v9850_v58 = vpop.f32.mrb[230].mxu0  ;;  %v9943_v8 = vshll.u32 %v14192_v57, 16  ;;  %v20081_v57 = vld [vmem:[#allocation2 + $0x4c] sm:$0x1] }
 0xc16   : > { %v9885_v43 = vadd.f32 %v20057_v37, %v9872_v14  ;;  %v9873_v11 = vadd.f32 %v9850_v58, %v20012_v25  ;;  %v9852_v19 = vpop.f32.mrb[231].mxu0  ;;  %v10223_v14 = vshll.u32 %v20081_v57, 16 }
 0xc17   : > { %v9942_v2 = vrot.slane %v9940_v48, 7  ;;  %v9948_v0 = vshrl.u32 %v14193_v29, 16  ;;  %v9951_v52 = vshll.u32 %v14193_v29, 16  ;;  %v20093_v29 = vsel %vm16420_vm9, %v13900_v36, %v10259_v50 }
 0xc18   : > { %vm9893_vm4 = vcmp.ge.f32.partialorder %v9885_v43, 0.0  ;;  %v9901_v21 = vmul.f32 0.01, %v9885_v43  ;;  %v9886_v6 = vadd.f32 %v20057_v37, %v9873_v11  ;;  %v10100_v11 = vsel %vm16454_vm12, %v20068_v12, %v20073_v18 }
 0xc19   : > { %v9945_v24 = vor.u32 %v9943_v8, %v9942_v2  ;;  %v9946_v23 = vrot.slane %v9942_v2, 4  ;;  %v9950_v25 = vrot.slane %v9948_v0, 7  ;;  %v20099_v19 = vrot.slane %v10214_v10, 4 }
 0xc1a   : > { %v9909_v49 = vsel %vm9893_vm4, %v9885_v43, %v9901_v21  ;;  %vm9894_vm7 = vcmp.ge.f32.partialorder %v9886_v6, 0.0  ;;  %v9902_v17 = vmul.f32 0.01, %v9886_v6  ;;  %v10034_v21 = vld [vmem:[#allocation2 + $0x1c] sm:$0x1]  ;;  %v20102_v36 = vrot.slane %v10217_v35, 5 }
 0xc1b   : > { %v10020_v4 = vsel %vm19097_vm11, %v9945_v24, %v10019_v7  ;;  %v10023_v28 = vsel %vm19104_vm13, %v9946_v23, %v10022_v59  ;;  %v9953_v60 = vor.u32 %v9951_v52, %v9950_v25  ;;  %v9954_v27 = vrot.slane %v9950_v25, 4  ;;  %v9855_v20 = vpop.f32.mrb[232].mxu0  ;;  %v10037_v25 = vld [vmem:[#allocation2 + $0x20] sm:$0xf]  ;;  %v10040_v52 = vld [vmem:[#allocation2 + $0x24] sm:$0x1] }
 0xc1c   : > { %10021 = vst [vmem:[#allocation2 + $0x8] sm:$0xf] %v10020_v4  ;;  %10024 = vst [vmem:[#allocation2 + $0xc] sm:$0x1] %v10023_v28  ;;  %v14194_v34 = vpack.c.bf16 %v9909_v49, %v9909_v49  ;;  %v9910_v26 = vsel %vm9894_vm7, %v9886_v6, %v9902_v17  ;;  %v9874_v54 = vadd.f32 %v9855_v20, %v20029_v45  ;;  %v9857_v9 = vpop.f32.mrb[233].mxu0  ;;  %v20104_v50 = vrot.slane %v10223_v14, 5 }
 0xc1d   : > { %v10026_v55 = vsel %vm19097_vm11, %v9953_v60, %v10025_v30  ;;  %v10029_v41 = vsel %vm19104_vm13, %v9954_v27, %v10028_v22  ;;  %v14195_v38 = vpack.c.bf16 %v9910_v26, %v9910_v26  ;;  %v9858_v1 = vpop.f32.mrb[234].mxu0 }
 0xc1e   : > { %10027 = vst [vmem:[#allocation2 + $0x10] sm:$0xf] %v10026_v55  ;;  %10030 = vst [vmem:[#allocation2 + $0x14] sm:$0x1] %v10029_v41  ;;  %v9956_v33 = vshrl.u32 %v14194_v34, 16  ;;  %v9887_v45 = vadd.f32 %v20057_v37, %v9874_v54  ;;  %v9875_v56 = vadd.f32 %v9858_v1, %v20032_v47  ;;  %v9860_v48 = vpop.f32.mrb[235].mxu0 }
 0xc1f   : > { %v9959_v58 = vshll.u32 %v14194_v34, 16  ;;  %v9964_v43 = vshrl.u32 %v14195_v38, 16  ;;  %v10031_v47 = vld [vmem:[#allocation2 + $0x18] sm:$0xf]  ;;  %v9967_v24 = vshll.u32 %v14195_v38, 16 }
 0xc20   : > { %v9958_v2 = vrot.slane %v9956_v33, 7  ;;  %vm9895_vm8 = vcmp.ge.f32.partialorder %v9887_v45, 0.0  ;;  %v9903_v8 = vmul.f32 0.01, %v9887_v45  ;;  %v9888_v0 = vadd.f32 %v20057_v37, %v9875_v56 }
 0xc21   : > { %v9966_v6 = vrot.slane %v9964_v43, 7 }
 0xc22   : > { %v9961_v23 = vor.u32 %v9959_v58, %v9958_v2  ;;  %v9962_v7 = vrot.slane %v9958_v2, 4  ;;  %v9911_v59 = vsel %vm9895_vm8, %v9887_v45, %v9903_v8  ;;  %vm9896_vm10 = vcmp.ge.f32.partialorder %v9888_v0, 0.0 }
 0xc23   : > { %v9969_v49 = vor.u32 %v9967_v24, %v9966_v6  ;;  %v9970_v17 = vrot.slane %v9966_v6, 4  ;;  %v14196_v10 = vpack.c.bf16 %v9911_v59, %v9911_v59  ;;  %v9904_v4 = vmul.f32 0.01, %v9888_v0  ;;  %v9863_v28 = vpop.f32.mrb[236].mxu0  ;;  %v20106_v60 = vld [vmem:[#allocation2 + $0xc] sm:$0x1] }
 0xc24   : > { %v10032_v27 = vsel %vm19097_vm11, %v9961_v23, %v10031_v47  ;;  %v10035_v30 = vsel %vm19104_vm13, %v9962_v7, %v10034_v21  ;;  %v9876_v20 = vadd.f32 %v9863_v28, %v20043_v13  ;;  %v9865_v22 = vpop.f32.mrb[237].mxu0  ;;  %v10228_v34 = vld [vmem:[#allocation2 + $0x8] sm:$0xe]  ;;  %v10263_v26 = vrot.slane %v20106_v60, 5  ;;  %v16013_v23 = vld [vmem:[%s21345_s2 + $0xc58] sm:$0xff]   ;;  %v16014_v28 = vld [vmem:[%s21345_s2 + $0xc60] sm:$0xff]  }
 0xc25   : > { %v20114_v54 = vld [vmem:[#allocation2 + $0x8] sm:$0xf]  ;;  %10033 = vst [vmem:[#allocation2 + $0x18] sm:$0xf] %v10032_v27  ;;  %10036 = vst [vmem:[#allocation2 + $0x1c] sm:$0x1] %v10035_v30  ;;  %v10038_v9 = vsel %vm19097_vm11, %v9969_v49, %v10037_v25  ;;  %v10041_v35 = vsel %vm19104_vm13, %v9970_v17, %v10040_v52  ;;  %v9912_v13 = vsel %vm9896_vm10, %v9888_v0, %v9904_v4  ;;  %10560 = vmatpush1.bf16.msra.mxu1 %v16013_v23 }
 0xc26   : > { %v9972_v55 = vshrl.u32 %v14196_v10, 16  ;;  %v9975_v41 = vshll.u32 %v14196_v10, 16  ;;  %v9866_v38 = vpop.f32.mrb[238].mxu0  ;;  %10039 = vst [vmem:[#allocation2 + $0x20] sm:$0xf] %v10038_v9  ;;  %v9889_v1 = vadd.f32 %v20057_v37, %v9876_v20  ;;  %v13901_v45 = vrot.slane %v10228_v34, 9  ;;  %10561 = vmatprep.subr.bf16.mxu1 %v16182_v3 }
 0xc27   : > { %10042 = vst [vmem:[#allocation2 + $0x24] sm:$0x1] %v10041_v35  ;;  %v9877_v14 = vadd.f32 %v9866_v38, %v20045_v46  ;;  %v9868_v33 = vpop.f32.mrb[239].mxu0  ;;  %v14197_v48 = vpack.c.bf16 %v9912_v13, %v9912_v13  ;;  %v10102_v58 = vshrl.u32 %v20114_v54, 16  ;;  %v10105_v43 = vshll.u32 %v20114_v54, 16 }
 0xc28   : > { %v9974_v56 = vrot.slane %v9972_v55, 7  ;;  %vm9897_vm6 = vcmp.ge.f32.partialorder %v9889_v1, 0.0  ;;  %v9905_v2 = vmul.f32 0.01, %v9889_v1  ;;  %v10264_v47 = vsel %vm16420_vm9, %v13901_v45, %v10263_v26  ;;  %v10043_v6 = vld [vmem:[#allocation2 + $0x28] sm:$0xf] }
 0xc29   : > { %v9890_v8 = vadd.f32 %v20057_v37, %v9877_v14  ;;  %v9980_v24 = vshrl.u32 %v14197_v48, 16  ;;  %v9983_v46 = vshll.u32 %v14197_v48, 16  ;;  %v10046_v7 = vld [vmem:[#allocation2 + $0x2c] sm:$0x1]  ;;  %v20132_v59 = vcombine.low %v20093_v29, %v10264_v47  ;;  %v10229_v4 = vld [vmem:[#allocation2 + $0x10] sm:$0xe]  ;;  %10562 = vmatpush1.bf16.msra.mxu1 %v16014_v28 }
 0xc2a   : > { %v9977_v0 = vor.u32 %v9975_v41, %v9974_v56  ;;  %v9978_v21 = vrot.slane %v9974_v56, 4  ;;  %v9913_v25 = vsel %vm9897_vm6, %v9889_v1, %v9905_v2  ;;  %v10049_v27 = vld [vmem:[#allocation2 + $0x30] sm:$0xf]  ;;  %v10104_v29 = vrot.slane %v10102_v58, 4  ;;  %v20144_v34 = vld [vmem:[#allocation2 + $0x14] sm:$0x1]  ;;  %10563 = vmatprep.subr.bf16.mxu1 %v16182_v3 }
 0xc2b   : > { %vm9898_vm2 = vcmp.ge.f32.partialorder %v9890_v8, 0.0  ;;  %v9906_v52 = vmul.f32 0.01, %v9890_v8  ;;  %v9982_v17 = vrot.slane %v9980_v24, 7  ;;  %v14198_v10 = vpack.c.bf16 %v9913_v25, %v9913_v25  ;;  %13953 = vmatprep.mubr.msk.bf16.mxu0 %vm2296_vm0, %v20132_v59  ;;  %v10052_v38 = vld [vmem:[#allocation2 + $0x34] sm:$0x1] }
 0xc2c   : > { %v10044_v37 = vsel %vm19097_vm11, %v9977_v0, %v10043_v6  ;;  %v10047_v49 = vsel %vm19104_vm13, %v9978_v21, %v10046_v7  ;;  %v10107_v20 = vrot.slane %v10105_v43, 5  ;;  %v10111_v22 = vshll.u32 %v20106_v60, 16  ;;  %v10230_v41 = vld [vmem:[#allocation2 + $0x18] sm:$0xe]  ;;  %v20147_v33 = vld [vmem:[#allocation2 + $0x1c] sm:$0x1] }
 0xc2d   : > { %10045 = vst [vmem:[#allocation2 + $0x28] sm:$0xf] %v10044_v37  ;;  %10048 = vst [vmem:[#allocation2 + $0x2c] sm:$0x1] %v10047_v49  ;;  %v9914_v30 = vsel %vm9898_vm2, %v9890_v8, %v9906_v52  ;;  %v9985_v26 = vor.u32 %v9983_v46, %v9982_v17  ;;  %v9986_v9 = vrot.slane %v9982_v17, 4  ;;  %v9988_v35 = vshrl.u32 %v14198_v10, 16 }
 0xc2e   : > { %v9991_v55 = vshll.u32 %v14198_v10, 16  ;;  %v14199_v13 = vpack.c.bf16 %v9914_v30, %v9914_v30  ;;  %v10108_v1 = vor.u32 %v10107_v20, %v10104_v29  ;;  %v10113_v14 = vrot.slane %v10111_v22, 5  ;;  %v20154_v43 = vld [vmem:[#allocation2 + $0x10] sm:$0xf]  ;;  %v10055_v24 = vld [vmem:[#allocation2 + $0x38] sm:$0xf] }
 0xc2f   : > { %v13902_v45 = vrot.slane %v10229_v4, 9  ;;  %v10050_v56 = vsel %vm19097_vm11, %v9985_v26, %v10049_v27  ;;  %v10053_v60 = vsel %vm19104_vm13, %v9986_v9, %v10052_v38  ;;  %v9990_v48 = vrot.slane %v9988_v35, 7  ;;  %v10058_v46 = vld [vmem:[#allocation2 + $0x3c] sm:$0x1]  ;;  %v20163_v49 = vld [vmem:[#allocation2 + $0x18] sm:$0xf] }
 0xc30   : > { %v10267_v58 = vrot.slane %v20144_v34, 5  ;;  %10051 = vst [vmem:[#allocation2 + $0x30] sm:$0xf] %v10050_v56  ;;  %10054 = vst [vmem:[#allocation2 + $0x34] sm:$0x1] %v10053_v60  ;;  %v9996_v2 = vshrl.u32 %v14199_v13, 16 }
 0xc31   : > { %v9999_v8 = vshll.u32 %v14199_v13, 16  ;;  %v10109_v47 = vrot.slane %v10108_v1, 4  ;;  %v13903_v0 = vrot.slane %v10230_v41, 9  ;;  %v9993_v21 = vor.u32 %v9991_v55, %v9990_v48  ;;  %v16015_v10 = vld [vmem:[%s21345_s2 + $0xc68] sm:$0xff]   ;;  %v10061_v20 = vld [vmem:[#allocation2 + $0x40] sm:$0xf] }
 0xc32   : > { %v9994_v6 = vrot.slane %v9990_v48, 4  ;;  %v10268_v23 = vsel %vm16420_vm9, %v13902_v45, %v10267_v58  ;;  %v10271_v7 = vrot.slane %v20147_v33, 5  ;;  %v9998_v25 = vrot.slane %v9996_v2, 7  ;;  %v10064_v22 = vld [vmem:[#allocation2 + $0x44] sm:$0x1]  ;;  %10564 = vmatpush1.bf16.msra.mxu1 %v16015_v10 }
 0xc33   : > { %v10114_v52 = vsel %vm16454_vm12, %v10109_v47, %v10113_v14  ;;  %v10438_v37 = vrot.slane %v20132_v59, 4  ;;  %v10116_v17 = vshrl.u32 %v20154_v43, 16  ;;  %v10056_v4 = vsel %vm19097_vm11, %v9993_v21, %v10055_v24  ;;  %v20187_v55 = vld [vmem:[#allocation2 + $0x20] sm:$0xf]  ;;  %10854 = vmatprep.subr.bf16.mxu1 %v16182_v3 }
 0xc34   : > { %v10059_v28 = vsel %vm19104_vm13, %v9994_v6, %v10058_v46  ;;  %v13915_v59 = vcombine.low %v10100_v11, %v10114_v52  ;;  %v10272_v27 = vsel %vm16420_vm9, %v13903_v0, %v10271_v7  ;;  %10057 = vst [vmem:[#allocation2 + $0x38] sm:$0xf] %v10056_v4  ;;  %v10001_v30 = vor.u32 %v9999_v8, %v9998_v25  ;;  %v20196_v14 = vld [vmem:[#allocation2 + $0x28] sm:$0xf]  ;;  %v20205_v8 = vld [vmem:[#allocation2 + $0x2c] sm:$0x1] }
 0xc35   : > { %10060 = vst [vmem:[#allocation2 + $0x3c] sm:$0x1] %v10059_v28  ;;  %v10002_v29 = vrot.slane %v9998_v25, 4  ;;  %v20180_v26 = vcombine.low %v10268_v23, %v10272_v27  ;;  %v10118_v9 = vrot.slane %v10116_v17, 4  ;;  %v10119_v35 = vshll.u32 %v20154_v43, 16 }
 0xc36   : > { %10337 = vrot.lane.b32.xlu0 %v13915_v59, %s16183_s28  ;;  %v10125_v12 = vshll.u32 %v20144_v34, 16  ;;  %v10130_v18 = vshrl.u32 %v20163_v49, 16  ;;  %v10133_v11 = vshll.u32 %v20163_v49, 16  ;;  %v10062_v41 = vsel %vm19097_vm11, %v10001_v30, %v10061_v20  ;;  %v20198_v34 = vld [vmem:[#allocation2 + $0x24] sm:$0x1] }
 0xc37   : > { %v10065_v38 = vsel %vm19104_vm13, %v10002_v29, %v10064_v22  ;;  %v10439_v13 = vrot.slane %v20180_v26, 4  ;;  %v10139_v1 = vshll.u32 %v20147_v33, 16  ;;  %10063 = vst [vmem:[#allocation2 + $0x40] sm:$0xf] %v10062_v41  ;;  %v10121_v45 = vrot.slane %v10119_v35, 5 }
 0xc38   : > { %10066 = vst [vmem:[#allocation2 + $0x44] sm:$0x1] %v10065_v38  ;;  %v10132_v56 = vrot.slane %v10130_v18, 4  ;;  %v10135_v60 = vrot.slane %v10133_v11, 5  ;;  %v10220_v48 = vor.u32 %v20102_v36, %v20099_v19  ;;  %v10127_v2 = vrot.slane %v10125_v12, 5 }
 0xc39   : > { %v10440_v58 = vsel %vm408_vm5, %v10438_v37, %v10439_v13  ;;  %v10144_v33 = vshrl.u32 %v20187_v55, 16  ;;  %v10147_v47 = vshll.u32 %v20187_v55, 16  ;;  %v10122_v0 = vor.u32 %v10121_v45, %v10118_v9  ;;  %v20212_v19 = vld [vmem:[#allocation2 + $0x30] sm:$0xf]  ;;  %v20223_v22 = vld [vmem:[#allocation2 + $0x34] sm:$0x1] }
 0xc3a   : > { %13937 = vmatprep.mubr.msk.bf16.mxu1 %vm2296_vm0, %v10440_v58  ;;  %v10136_v21 = vor.u32 %v10135_v60, %v10132_v56  ;;  %v10153_v6 = vshll.u32 %v20198_v34, 16  ;;  %v10158_v24 = vshrl.u32 %v20196_v14, 16  ;;  %v10141_v36 = vrot.slane %v10139_v1, 5 }
 0xc3b   : > { %v10146_v46 = vrot.slane %v10144_v33, 4  ;;  %v10149_v23 = vrot.slane %v10147_v47, 5  ;;  %v10161_v7 = vshll.u32 %v20196_v14, 16  ;;  %v10123_v25 = vrot.slane %v10122_v0, 4  ;;  %v20216_v28 = vld [vmem:[#allocation2 + $0x38] sm:$0xf] }
 0xc3c   : > { %v10137_v52 = vrot.slane %v10136_v21, 4  ;;  %v10160_v37 = vrot.slane %v10158_v24, 4  ;;  %v10167_v17 = vshll.u32 %v20205_v8, 16  ;;  %v10172_v59 = vshrl.u32 %v20212_v19, 16  ;;  %v20225_v9 = vld [vmem:[#allocation2 + $0x3c] sm:$0x1] }
 0xc3d   : > { %v10150_v10 = vor.u32 %v10149_v23, %v10146_v46  ;;  %v10163_v4 = vrot.slane %v10161_v7, 5  ;;  %v10221_v27 = vrot.slane %v10220_v48, 4  ;;  %v10128_v30 = vsel %vm16454_vm12, %v10123_v25, %v10127_v2 }
 0xc3e   : > { %v10142_v29 = vsel %vm16454_vm12, %v10137_v52, %v10141_v36  ;;  %v10155_v20 = vrot.slane %v10153_v6, 5  ;;  %v10175_v35 = vshll.u32 %v20212_v19, 16  ;;  %v10174_v41 = vrot.slane %v10172_v59, 4  ;;  %v20228_v38 = vld [vmem:[#allocation2 + $0x40] sm:$0xf] }
 0xc3f   : > { %v13916_v12 = vcombine.low %v10128_v30, %v10142_v29  ;;  %v10151_v18 = vrot.slane %v10150_v10, 4  ;;  %v10164_v11 = vor.u32 %v10163_v4, %v10160_v37  ;;  %v10169_v1 = vrot.slane %v10167_v17, 5  ;;  %v20232_v48 = vld [vmem:[#allocation2 + $0x44] sm:$0x1] }
 0xc40   : > { %v10177_v45 = vrot.slane %v10175_v35, 5  ;;  %v10186_v56 = vshrl.u32 %v20216_v28, 16  ;;  %v10189_v60 = vshll.u32 %v20216_v28, 16  ;;  %v10181_v2 = vshll.u32 %v20223_v22, 16 }
 0xc41   : > { %10339 = vrot.lane.b32.xlu1 %v13916_v12, %s16183_s28  ;;  %v10165_v58 = vrot.slane %v10164_v11, 4  ;;  %v10195_v33 = vshll.u32 %v20225_v9, 16  ;;  %v10200_v47 = vshrl.u32 %v20228_v38, 16  ;;  %v10203_v24 = vshll.u32 %v20228_v38, 16 }
 0xc42   : > { %v10178_v0 = vor.u32 %v10177_v45, %v10174_v41  ;;  %v10188_v21 = vrot.slane %v10186_v56, 4  ;;  %v10191_v6 = vrot.slane %v10189_v60, 5  ;;  %v10156_v36 = vsel %vm16454_vm12, %v10151_v18, %v10155_v20  ;;  %v10232_v45 = vld [vmem:[#allocation2 + $0x28] sm:$0xe]  ;;  %v10231_v56 = vld [vmem:[#allocation2 + $0x20] sm:$0xe] }
 0xc43   : > { %v10170_v46 = vsel %vm16454_vm12, %v10165_v58, %v10169_v1  ;;  %v10202_v23 = vrot.slane %v10200_v47, 4  ;;  %v10209_v7 = vshll.u32 %v20232_v48, 16  ;;  %v10205_v17 = vrot.slane %v10203_v24, 5 }
 0xc44   : > { %v13917_v25 = vcombine.low %v10156_v36, %v10170_v46  ;;  %v10179_v52 = vrot.slane %v10178_v0, 4  ;;  %v10192_v37 = vor.u32 %v10191_v6, %v10188_v21  ;;  %v10183_v10 = vrot.slane %v10181_v2, 5  ;;  %v10234_v21 = vld [vmem:[#allocation2 + $0x38] sm:$0xe]  ;;  %v10233_v6 = vld [vmem:[#allocation2 + $0x30] sm:$0xe] }
 0xc45   : > { %v10197_v59 = vrot.slane %v10195_v33, 5  ;;  %v10206_v30 = vor.u32 %v10205_v17, %v10202_v23  ;;  %v10226_v29 = vsel %vm16454_vm12, %v10221_v27, %v20104_v50  ;;  %v10211_v18 = vrot.slane %v10209_v7, 5 }
 0xc46   : > { %10341 = vrot.lane.b32.xlu0 %v13917_v25, %s16183_s28  ;;  %v10193_v4 = vrot.slane %v10192_v37, 4  ;;  %v10184_v20 = vsel %vm16454_vm12, %v10179_v52, %v10183_v10  ;;  %v13910_v50 = vcombine.low %v20052_v32, %v20114_v54  ;;  %v13905_v58 = vrot.slane %v10232_v45, 9 }
 0xc47   : > { %v10207_v12 = vrot.slane %v10206_v30, 4  ;;  %v10279_v2 = vrot.slane %v20205_v8, 5  ;;  %v13904_v33 = vrot.slane %v10231_v56, 9  ;;  %v10275_v47 = vrot.slane %v20198_v34, 5  ;;  %v16021_v56 = vld [vmem:[%s21345_s2 + $0xc88] sm:$0xff]  }
 0xc48   : > { %v10198_v35 = vsel %vm16454_vm12, %v10193_v4, %v10197_v59  ;;  %v13907_v24 = vrot.slane %v10234_v21, 9  ;;  %v10287_v8 = vrot.slane %v20225_v9, 5  ;;  %v13911_v36 = vcombine.low %v20154_v43, %v20163_v49  ;;  %v16017_v9 = vld [vmem:[%s21345_s2 + $0xc70] sm:$0xff]   ;;  %v10235_v49 = vld [vmem:[#allocation2 + $0x40] sm:$0xe] }
 0xc49   : > { %v13918_v11 = vcombine.low %v10184_v20, %v10198_v35  ;;  %v10212_v41 = vsel %vm16454_vm12, %v10207_v12, %v10211_v18  ;;  %v10280_v0 = vsel %vm16420_vm9, %v13905_v58, %v10279_v2  ;;  %v10276_v32 = vsel %vm16420_vm9, %v13904_v33, %v10275_v47  ;;  %v16024_v47 = vld [vmem:[%s21345_s2 + $0xc90] sm:$0xff]  }
 0xc4a   : > { %v13919_v1 = vcombine.low %v10212_v41, %v10226_v29  ;;  %v20267_v54 = vcombine.low %v10276_v32, %v10280_v0  ;;  %v13906_v23 = vrot.slane %v10233_v6, 9  ;;  %v10283_v34 = vrot.slane %v20223_v22, 5  ;;  %v10236_v22 = vld [vmem:[#allocation2 + $0x48] sm:$0xe]  ;;  %v16025_v6 = vld [vmem:[%s21345_s2 + $0xc98] sm:$0xff]  }
 0xc4b   : > { %10343 = vrot.lane.b32.xlu1 %v13918_v11, %s16183_s28  ;;  %v10288_v43 = vsel %vm16420_vm9, %v13907_v24, %v10287_v8  ;;  %v13912_v10 = vcombine.low %v20187_v55, %v20196_v14  ;;  %v10295_v59 = vrot.slane %v20081_v57, 5  ;;  %v16018_v55 = vld [vmem:[%s21345_s2 + $0xc78] sm:$0xff]   ;;  %v13908_v35 = vrot.slane %v10235_v49, 9  ;;  %v16027_v8 = vld [vmem:[%s21345_s2 + $0xca8] sm:$0xff]   ;;  %v16034_v49 = vld [vmem:[%s21345_s2 + $0xce0] sm:$0xff]  }
 0xc4c   : > { %10345 = vrot.lane.b32.xlu0 %v13919_v1, %s16183_s28  ;;  %v10443_v25 = vrot.slane %v20267_v54, 4  ;;  %v10284_v4 = vsel %vm16420_vm9, %v13906_v23, %v10283_v34  ;;  %v10291_v57 = vrot.slane %v20232_v48, 5  ;;  %v13909_v12 = vrot.slane %v10236_v22, 9  ;;  %v16020_v1 = vld [vmem:[%s21345_s2 + $0xc80] sm:$0xff]   ;;  %v16031_v23 = vld [vmem:[%s21345_s2 + $0xcc8] sm:$0xff]  }
 0xc4d   : > { %v20295_v20 = vcombine.low %v10284_v4, %v10288_v43  ;;  %v13913_v11 = vcombine.low %v20212_v19, %v20216_v28  ;;  %v13914_v0 = vcombine.low %v20228_v38, %v20070_v31  ;;  %v16026_v31 = vld [vmem:[%s21345_s2 + $0xca0] sm:$0xff]   ;;  %v16037_v43 = vld [vmem:[%s21345_s2 + $0xd38] sm:$0xff]  }
 0xc4e   : > { %v10444_v30 = vsel %vm408_vm5, %v10439_v13, %v10443_v25  ;;  %v10292_v45 = vsel %vm16420_vm9, %v13908_v35, %v10291_v57 }
 0xc4f   : > { %v10447_v18 = vrot.slane %v20295_v20, 4 }
 0xc51   : > { %v10448_v28 = vsel %vm408_vm5, %v10443_v25, %v10447_v18 }
 0xca8   : > { %v10338_v27 = vpop.permute.xlu0 %10337 }
 0xca9   : > { %v10364_v60 = vsel %vm2296_vm0, %v13910_v50, %v10338_v27  ;;  %v10296_v50 = vsel %vm16420_vm9, %v13909_v12, %v10295_v59 }
 0xcaa   : > { %10723 = vmatmul.mubr.bf16.vlgmr.msra.gmra.mrb[240].mxu0 %v10364_v60  ;;  %v10435_v52 = vrot.slane %v10364_v60, 4  ;;  %v13924_v27 = vcombine.low %v10292_v45, %v10296_v50  ;;  %v16040_v50 = vld [vmem:[%s21345_s2 + $0xcf8] sm:$0xff]  }
 0xcab   : > { %13954 = vmatprep.mubr.msk.bf16.mxu0 %vm2296_vm0, %v20180_v26 }
 0xcac   : > { %v10451_v58 = vrot.slane %v13924_v27, 4 }
 0xcae   : > { %v10452_v32 = vsel %vm408_vm5, %v10447_v18, %v10451_v58 }
 0xcb3   : > { %v10340_v46 = vpop.permute.xlu1 %10339 }
 0xcb4   : > { %v20274_v7 = vsel %vm2296_vm0, %v13911_v36, %v10340_v46  ;;  %v16028_v36 = vld [vmem:[%s21345_s2 + $0xcb0] sm:$0xff]   ;;  %v16029_v46 = vld [vmem:[%s21345_s2 + $0xcb8] sm:$0xff]  }
 0xcb5   : > { %v10436_v37 = vrot.slane %v20274_v7, 4  ;;  %10731 = vmatmul.mubr.bf16.gmra.mrb[244].mxu0 %v20274_v7 }
 0xcb6   : > { %13955 = vmatprep.mubr.msk.bf16.mxu0 %vm2296_vm0, %v20267_v54 }
 0xcb7   : > { %v10437_v17 = vsel %vm408_vm5, %v10435_v52, %v10436_v37 }
 0xcb8   : > { %10574 = vmatmul.mubr.bf16.vlgmr.msra.gmra.mrb[152].mxu1 %v10437_v17  ;;  %v10342_v29 = vpop.permute.xlu0 %10341  ;;  %v16039_v17 = vld [vmem:[%s21345_s2 + $0xd40] sm:$0xff]  }
 0xcb9   : > { %10855 = vmatpush1.bf16.msra.mxu1 %v16017_v9  ;;  %13938 = vmatprep.mubr.msk.bf16.mxu1 %vm2296_vm0, %v10444_v30  ;;  %v20302_v14 = vsel %vm2296_vm0, %v13912_v10, %v10342_v29  ;;  %v16033_v9 = vld [vmem:[%s21345_s2 + $0xcd8] sm:$0xff]   ;;  %v16036_v29 = vld [vmem:[%s21345_s2 + $0xce8] sm:$0xff]  }
 0xcba   : > { %10856 = vmatprep.subr.bf16.mxu1 %v16182_v3  ;;  %v10441_v13 = vrot.slane %v20302_v14, 4 }
 0xcbc   : > { %v10442_v41 = vsel %vm408_vm5, %v10436_v37, %v10441_v13 }
 0xcbd   : > { %10857 = vmatpush1.bf16.msra.mxu1 %v16018_v55  ;;  %10739 = vmatmul.mubr.bf16.gmra.mrb[248].mxu0 %v20302_v14  ;;  %v10344_v48 = vpop.permute.xlu1 %10343 }
 0xcbe   : > { %13956 = vmatprep.mubr.msk.bf16.mxu0 %vm2296_vm0, %v20295_v20  ;;  %10858 = vmatprep.subr.bf16.mxu1 %v16182_v3  ;;  %v10376_v19 = vsel %vm2296_vm0, %v13913_v11, %v10344_v48  ;;  %v10346_v2 = vpop.permute.xlu0 %10345  ;;  %v16043_v11 = vld [vmem:[%s21345_s2 + $0xd50] sm:$0xff]  }
 0xcbf   : > { %v10445_v60 = vrot.slane %v10376_v19, 4  ;;  %v10380_v21 = vsel %vm2296_vm0, %v13914_v0, %v10346_v2  ;;  %v16042_v2 = vld [vmem:[%s21345_s2 + $0xd00] sm:$0xff]  }
 0xcc0   : > { %10582 = vmatmul.mubr.bf16.gmra.mrb[156].mxu1 %v10442_v41  ;;  %v10449_v24 = vrot.slane %v10380_v21, 4 }
 0xcc1   : > { %10859 = vmatpush1.bf16.msra.mxu1 %v16020_v1  ;;  %13939 = vmatprep.mubr.msk.bf16.mxu1 %vm2296_vm0, %v10448_v28  ;;  %v10446_v33 = vsel %vm408_vm5, %v10441_v13, %v10445_v60  ;;  %v16038_v13 = vld [vmem:[%s21345_s2 + $0xcf0] sm:$0xff]  }
 0xcc2   : > { %10860 = vmatprep.subr.bf16.mxu1 %v16182_v3  ;;  %v10450_v38 = vsel %vm408_vm5, %v10445_v60, %v10449_v24  ;;  %v16044_v24 = vld [vmem:[%s21345_s2 + $0xd08] sm:$0xff]  }
 0xcc5   : > { %10861 = vmatpush1.bf16.msra.mxu1 %v16021_v56  ;;  %10747 = vmatmul.mubr.bf16.gmra.mrb[252].mxu0 %v10376_v19 }
 0xcc6   : > { %10862 = vmatprep.subr.bf16.mxu1 %v16182_v3 }
 0xcc8   : > { %10590 = vmatmul.mubr.bf16.gmra.mrb[160].mxu1 %v10446_v33 }
 0xcc9   : > { %10863 = vmatpush1.bf16.msra.mxu1 %v16024_v47  ;;  %13940 = vmatprep.mubr.msk.bf16.mxu1 %vm2296_vm0, %v10452_v32  ;;  %v16047_v47 = vld [vmem:[%s21345_s2 + $0xd60] sm:$0xff]  }
 0xcca   : > { %10864 = vmatprep.subr.bf16.mxu1 %v16182_v3 }
 0xccd   : > { %10865 = vmatpush1.bf16.msra.mxu1 %v16025_v6 }
 0xcce   : > { %10866 = vmatprep.subr.bf16.mxu1 %v16182_v3 }
 0xcd0   : > { %10598 = vmatmul.mubr.bf16.gmra.mrb[164].mxu1 %v10450_v38 }
 0xcd1   : > { %10867 = vmatpush1.bf16.msra.mxu1 %v16026_v31  ;;  %13969 = vmatprep.mubr.msk.bf16.mxu1 %vm2296_vm0, %v20180_v26  ;;  %v16030_v26 = vld [vmem:[%s21345_s2 + $0xcc0] sm:$0xff]  }
 0xcd2   : > { %10868 = vmatprep.subr.bf16.mxu1 %v16182_v3 }
 0xcd5   : > { %10869 = vmatpush1.bf16.msra.mxu1 %v16027_v8  ;;  %v16049_v8 = vld [vmem:[%s21345_s2 + $0xd68] sm:$0xff]  }
 0xcd6   : > { %10870 = vmatprep.subr.bf16.mxu1 %v16182_v3 }
 0xcd9   : > { %10871 = vmatpush1.bf16.msra.mxu1 %v16028_v36 }
 0xcda   : > { %10872 = vmatprep.subr.bf16.mxu1 %v16182_v3 }
 0xcdd   : > { %10873 = vmatpush1.bf16.msra.mxu1 %v16029_v46 }
 0xcde   : > { %10874 = vmatprep.subr.bf16.mxu1 %v16182_v3 }
 0xce1   : > { %10875 = vmatpush1.bf16.msra.mxu1 %v16030_v26 }
 0xce2   : > { %10876 = vmatprep.subr.bf16.mxu1 %v16182_v3 }
 0xce5   : > { %10877 = vmatpush1.bf16.msra.mxu1 %v16031_v23  ;;  %v16046_v23 = vld [vmem:[%s21345_s2 + $0xd10] sm:$0xff]  }
 0xce6   : > { %11747 = vmatprep.subr.bf16.mxu1 %v16182_v3 }
 0xce8   : > { %10887 = vmatmul.mubr.bf16.vlgmr.msra.gmra.mrb[168].mxu1 %v20274_v7  ;;  %v16032_v7 = vld [vmem:[%s21345_s2 + $0xcd0] sm:$0xff]  }
 0xce9   : > { %13970 = vmatprep.mubr.msk.bf16.mxu1 %vm2296_vm0, %v20267_v54  ;;  %v16035_v54 = vld [vmem:[%s21345_s2 + $0xd30] sm:$0xff]   ;;  %11748 = vmatpush1.bf16.msra.mxu1 %v16032_v7 }
 0xcea   : > { %11749 = vmatprep.subr.bf16.mxu1 %v16182_v3  ;;  %11599 = vmatpush1.bf16.msra.mxu0 %v16035_v54 }
 0xceb   : > { %11600 = vmatprep.subr.bf16.mxu0 %v16182_v3 }
 0xced   : > { %11750 = vmatpush1.bf16.msra.mxu1 %v16033_v9 }
 0xcee   : > { %11751 = vmatprep.subr.bf16.mxu1 %v16182_v3  ;;  %11601 = vmatpush1.bf16.msra.mxu0 %v16037_v43 }
 0xcef   : > { %11602 = vmatprep.subr.bf16.mxu0 %v16182_v3 }
 0xcf0   : > { %10895 = vmatmul.mubr.bf16.gmra.mrb[172].mxu1 %v20302_v14  ;;  %v16041_v14 = vld [vmem:[%s21345_s2 + $0xd48] sm:$0xff]  }
 0xcf1   : > { %13971 = vmatprep.mubr.msk.bf16.mxu1 %vm2296_vm0, %v20295_v20  ;;  %11752 = vmatpush1.bf16.msra.mxu1 %v16034_v49  ;;  %v16050_v49 = vld [vmem:[%s21345_s2 + $0xd20] sm:$0xff]  }
 0xcf2   : > { %11753 = vmatprep.subr.bf16.mxu1 %v16182_v3  ;;  %11603 = vmatpush1.bf16.msra.mxu0 %v16039_v17 }
 0xcf3   : > { %11604 = vmatprep.subr.bf16.mxu0 %v16182_v3 }
 0xcf5   : > { %11754 = vmatpush1.bf16.msra.mxu1 %v16036_v29 }
 0xcf6   : > { %11755 = vmatprep.subr.bf16.mxu1 %v16182_v3  ;;  %11605 = vmatpush1.bf16.msra.mxu0 %v16041_v14 }
 0xcf7   : > { %11606 = vmatprep.subr.bf16.mxu0 %v16182_v3 }
 0xcf8   : > { %10903 = vmatmul.mubr.bf16.gmra.mrb[176].mxu1 %v10376_v19 }
 0xcf9   : > { %13972 = vmatprep.mubr.msk.bf16.mxu1 %vm2296_vm0, %v13924_v27  ;;  %11756 = vmatpush1.bf16.msra.mxu1 %v16038_v13  ;;  %v16045_v27 = vld [vmem:[%s21345_s2 + $0xd58] sm:$0xff]   ;;  %v20486_v13 = vld [vmem:[#allocation2] sm:$0xf] }
 0xcfa   : > { %11757 = vmatprep.subr.bf16.mxu1 %v16182_v3  ;;  %11607 = vmatpush1.bf16.msra.mxu0 %v16043_v11 }
 0xcfb   : > { %11608 = vmatprep.subr.bf16.mxu0 %v16182_v3 }
 0xcfd   : > { %11758 = vmatpush1.bf16.msra.mxu1 %v16040_v50 }
 0xcfe   : > { %11759 = vmatprep.subr.bf16.mxu1 %v16182_v3  ;;  %11609 = vmatpush1.bf16.msra.mxu0 %v16045_v27 }
 0xcff   : > { %11610 = vmatprep.subr.bf16.mxu0 %v16182_v3 }
 0xd00   : > { %10911 = vmatmul.mubr.bf16.gmra.mrb[180].mxu1 %v10380_v21 }
 0xd01   : > { %11760 = vmatpush1.bf16.msra.mxu1 %v16042_v2 }
 0xd02   : > { %11761 = vmatprep.subr.bf16.mxu1 %v16182_v3  ;;  %11611 = vmatpush1.bf16.msra.mxu0 %v16047_v47  ;;  %v11134_v47 = vld [vmem:[#allocation2 + $0x4] sm:$0x1] }
 0xd03   : > { %11612 = vmatprep.subr.bf16.mxu0 %v16182_v3 }
 0xd05   : > { %11762 = vmatpush1.bf16.msra.mxu1 %v16044_v24 }
 0xd06   : > { %11763 = vmatprep.subr.bf16.mxu1 %v16182_v3  ;;  %11613 = vmatpush1.bf16.msra.mxu0 %v16049_v8 }
 0xd07   : > { %11614 = vmatprep.subr.bf16.mxu0 %v16182_v3 }
 0xd09   : > { %11764 = vmatpush1.bf16.msra.mxu1 %v16046_v23 }
 0xd0a   : > { %11765 = vmatprep.subr.bf16.mxu1 %v16182_v3 }
 0xd7d   : > { %v10724_v34 = vpop.f32.mrb[240].mxu0 }
 0xd7e   : > { %v10726_v25 = vpop.f32.mrb[241].mxu0 }
 0xd7f   : > { %v10727_v52 = vpop.f32.mrb[242].mxu0 }
 0xd80   : > { %v10729_v37 = vpop.f32.mrb[243].mxu0 }
 0xd88   : > { %v10732_v22 = vpop.f32.mrb[244].mxu0 }
 0xd89   : > { %v10734_v10 = vpop.f32.mrb[245].mxu0 }
 0xd8a   : > { %v10735_v4 = vpop.f32.mrb[246].mxu0  ;;  %v20480_v10 = vld [vmem:[%s21346_s3 + $0x9] ss:$0 sm:$0xff] }
 0xd8b   : > { %v10575_v59 = vpop.f32.mrb[152].mxu1  ;;  %v10737_v30 = vpop.f32.mrb[247].mxu0 }
 0xd8c   : > { %v20403_v20 = vadd.f32 %v10724_v34, %v10575_v59  ;;  %v10577_v55 = vpop.f32.mrb[153].mxu1  ;;  %v16051_v34 = vld [vmem:[%s21345_s2 + $0xd70] sm:$0xff]  }
 0xd8d   : > { %v10578_v35 = vpop.f32.mrb[154].mxu1  ;;  %11615 = vmatpush1.bf16.msra.mxu0 %v16051_v34 }
 0xd8e   : > { %v20410_v57 = vadd.f32 %v10727_v52, %v10578_v35  ;;  %v10580_v12 = vpop.f32.mrb[155].mxu1  ;;  %v16048_v52 = vld [vmem:[%s21345_s2 + $0xd18] sm:$0xff]   ;;  %11616 = vmatprep.subr.bf16.mxu0 %v16182_v3 }
 0xd8f   : > { %11766 = vmatpush1.bf16.msra.mxu1 %v16048_v52 }
 0xd90   : > { %v10740_v18 = vpop.f32.mrb[248].mxu0  ;;  %11767 = vmatprep.subr.bf16.mxu1 %v16182_v3 }
 0xd91   : > { %v10742_v41 = vpop.f32.mrb[249].mxu0 }
 0xd92   : > { %v10743_v1 = vpop.f32.mrb[250].mxu0 }
 0xd93   : > { %v10583_v48 = vpop.f32.mrb[156].mxu1  ;;  %v10745_v45 = vpop.f32.mrb[251].mxu0  ;;  %11768 = vmatpush1.bf16.msra.mxu1 %v16050_v49 }
 0xd94   : > { %v20423_v19 = vadd.f32 %v10732_v22, %v10583_v48  ;;  %v10585_v28 = vpop.f32.mrb[157].mxu1  ;;  %v16052_v22 = vld [vmem:[%s21345_s2 + $0xd28] sm:$0xff]   ;;  %11769 = vmatprep.subr.bf16.mxu1 %v16182_v3  ;;  %v11145_v48 = vshrl.u32 %v20486_v13, 16 }
 0xd95   : > { %v10586_v56 = vpop.f32.mrb[158].mxu1  ;;  %v11148_v28 = vshll.u32 %v20486_v13, 16 }
 0xd96   : > { %v20430_v60 = vadd.f32 %v10735_v4, %v10586_v56  ;;  %v10588_v58 = vpop.f32.mrb[159].mxu1 }
 0xd97   : > { %11770 = vmatpush1.bf16.msra.mxu1 %v16052_v22  ;;  %v11076_v22 = vld [vmem:[#allocation2 + $0x8] sm:$0xf] }
 0xd98   : > { %v10748_v33 = vpop.f32.mrb[252].mxu0 }
 0xd99   : > { %v10750_v0 = vpop.f32.mrb[253].mxu0 }
 0xd9a   : > { %v10751_v21 = vpop.f32.mrb[254].mxu0 }
 0xd9b   : > { %v10591_v32 = vpop.f32.mrb[160].mxu1  ;;  %v10753_v6 = vpop.f32.mrb[255].mxu0 }
 0xd9c   : > { %v20443_v31 = vadd.f32 %v10740_v18, %v10591_v32  ;;  %v10593_v38 = vpop.f32.mrb[161].mxu1  ;;  %v11147_v32 = vrot.slane %v11145_v48, 4 }
 0xd9d   : > { %v10594_v36 = vpop.f32.mrb[162].mxu1  ;;  %v11150_v38 = vrot.slane %v11148_v28, 5 }
 0xd9e   : > { %v20450_v46 = vadd.f32 %v10743_v1, %v10594_v36  ;;  %v10596_v26 = vpop.f32.mrb[163].mxu1  ;;  %v20491_v1 = vld [vmem:[#allocation2] sm:$0xe] }
 0xd9f   : > { %v13982_v0 = vrot.slane %v20491_v1, 9  ;;  %v11316_v26 = vrot.slane %v11134_v47, 5 }
 0xda3   : > { %v10599_v25 = vpop.f32.mrb[164].mxu1 }
 0xda4   : > { %v20463_v37 = vadd.f32 %v10748_v33, %v10599_v25  ;;  %v10601_v7 = vpop.f32.mrb[165].mxu1 }
 0xda5   : > { %v10602_v54 = vpop.f32.mrb[166].mxu1 }
 0xda6   : > { %v20467_v9 = vadd.f32 %v10751_v21, %v10602_v54  ;;  %v10604_v43 = vpop.f32.mrb[167].mxu1 }
 0xdbb   : > { %v10888_v17 = vpop.f32.mrb[168].mxu1 }
 0xdbc   : > { %v10919_v4 = vadd.f32 %v10888_v17, %v20403_v20  ;;  %v10890_v59 = vpop.f32.mrb[169].mxu1  ;;  %v11079_v17 = vld [vmem:[#allocation2 + $0xc] sm:$0x1] }
 0xdbd   : > { %v10891_v30 = vpop.f32.mrb[170].mxu1 }
 0xdbe   : > { %v10932_v29 = vadd.f32 %v20480_v10, %v10919_v4  ;;  %v10920_v55 = vadd.f32 %v10891_v30, %v20410_v57  ;;  %v10893_v14 = vpop.f32.mrb[171].mxu1 }
 0xdc0   : > { %vm10940_vm4 = vcmp.ge.f32.partialorder %v10932_v29, 0.0  ;;  %v10948_v35 = vmul.f32 0.01, %v10932_v29  ;;  %v10933_v12 = vadd.f32 %v20480_v10, %v10920_v55  ;;  %v11154_v55 = vshll.u32 %v11134_v47, 16 }
 0xdc2   : > { %v10956_v18 = vsel %vm10940_vm4, %v10932_v29, %v10948_v35  ;;  %vm10941_vm7 = vcmp.ge.f32.partialorder %v10933_v12, 0.0  ;;  %v10949_v11 = vmul.f32 0.01, %v10933_v12  ;;  %v11151_v29 = vor.u32 %v11150_v38, %v11147_v32 }
 0xdc3   : > { %v20489_v41 = vadd.f32 %v10956_v18, %v19629_v51  ;;  %v10896_v20 = vpop.f32.mrb[172].mxu1  ;;  %v11317_v32 = vsel %vm16420_vm9, %v13982_v0, %v11316_v26 }
 0xdc4   : > { %v10957_v45 = vsel %vm10941_vm7, %v10933_v12, %v10949_v11  ;;  %v10921_v57 = vadd.f32 %v10896_v20, %v20423_v19  ;;  %v10898_v50 = vpop.f32.mrb[173].mxu1  ;;  %v11085_v20 = vld [vmem:[#allocation2 + $0x14] sm:$0x1] }
 0xdc5   : > { %v14200_v27 = vpack.c.bf16 %v20489_v41, %v20489_v41  ;;  %v20499_v56 = vadd.f32 %v10957_v45, %v19641_v15  ;;  %v10899_v58 = vpop.f32.mrb[174].mxu1 }
 0xdc6   : > { %v10934_v51 = vadd.f32 %v20480_v10, %v10921_v57  ;;  %v10922_v2 = vadd.f32 %v10899_v58, %v20430_v60  ;;  %v10901_v33 = vpop.f32.mrb[175].mxu1 }
 0xdc7   : > { %v10997_v21 = vshrl.u32 %v14200_v27, 16  ;;  %v14201_v19 = vpack.c.bf16 %v20499_v56, %v20499_v56  ;;  %v10972_v6 = vpack.c.bf16 %v20499_v56, %v20489_v41  ;;  %v11000_v36 = vshll.u32 %v14200_v27, 16 }
 0xdc8   : > { %vm10942_vm8 = vcmp.ge.f32.partialorder %v10934_v51, 0.0  ;;  %v10950_v15 = vmul.f32 0.01, %v10934_v51  ;;  %v10935_v24 = vadd.f32 %v20480_v10, %v10922_v2  ;;  %v20535_v33 = vrot.slane %v11151_v29, 4 }
 0xdc9   : > { %v10999_v8 = vrot.slane %v10997_v21, 7  ;;  %v11005_v60 = vshrl.u32 %v14201_v19, 16  ;;  %v11008_v23 = vshll.u32 %v14201_v19, 16 }
 0xdca   : > { %v10958_v34 = vsel %vm10942_vm8, %v10934_v51, %v10950_v15  ;;  %vm10943_vm10 = vcmp.ge.f32.partialorder %v10935_v24, 0.0  ;;  %v10951_v25 = vmul.f32 0.01, %v10935_v24  ;;  %v20532_v51 = vrot.slane %v11154_v55, 5  ;;  %v20539_v15 = vld [vmem:[#allocation2 + $0x48] sm:$0xf] }
 0xdcb   : > { %v11002_v52 = vor.u32 %v11000_v36, %v10999_v8  ;;  %v11003_v7 = vrot.slane %v10999_v8, 4  ;;  %v11007_v54 = vrot.slane %v11005_v60, 7  ;;  %v20510_v43 = vadd.f32 %v10958_v34, %v19626_v63  ;;  %v10904_v49 = vpop.f32.mrb[176].mxu1  ;;  %v11082_v63 = vld [vmem:[#allocation2 + $0x10] sm:$0xf] }
 0xdcc   : > { %v10959_v4 = vsel %vm10943_vm10, %v10935_v24, %v10951_v25  ;;  %v10923_v59 = vadd.f32 %v10904_v49, %v20443_v31  ;;  %v10906_v30 = vpop.f32.mrb[177].mxu1  ;;  %v11088_v24 = vld [vmem:[#allocation2 + $0x18] sm:$0xf]  ;;  %v11091_v25 = vld [vmem:[#allocation2 + $0x1c] sm:$0x1]  ;;  %vm12125_vm8 = vcmask 257024  }
 0xdcd   : > { %v11077_v14 = vsel %vm19097_vm11, %v11002_v52, %v11076_v22  ;;  %v11080_v35 = vsel %vm19104_vm13, %v11003_v7, %v11079_v17  ;;  %v11010_v12 = vor.u32 %v11008_v23, %v11007_v54  ;;  %v11011_v18 = vrot.slane %v11007_v54, 4  ;;  %v10907_v11 = vpop.f32.mrb[178].mxu1 }
 0xdce   : > { %11078 = vst [vmem:[#allocation2 + $0x8] sm:$0xf] %v11077_v14  ;;  %11081 = vst [vmem:[#allocation2 + $0xc] sm:$0x1] %v11080_v35  ;;  %v14202_v1 = vpack.c.bf16 %v20510_v43, %v20510_v43  ;;  %v20520_v31 = vadd.f32 %v10959_v4, %v19636_v61  ;;  %v10936_v48 = vadd.f32 %v20480_v10, %v10923_v59  ;;  %v10909_v57 = vpop.f32.mrb[179].mxu1  ;;  %v11271_v59 = vshrl.u32 %v20539_v15, 16 }
 0xdcf   : > { %v10924_v45 = vadd.f32 %v10907_v11, %v20450_v46  ;;  %v11083_v50 = vsel %vm19097_vm11, %v11010_v12, %v11082_v63  ;;  %v11086_v28 = vsel %vm19104_vm13, %v11011_v18, %v11085_v20  ;;  %v11157_v4 = vsel %vm16454_vm12, %v20535_v33, %v20532_v51  ;;  %v11094_v14 = vld [vmem:[#allocation2 + $0x20] sm:$0xf]  ;;  %v11097_v35 = vld [vmem:[#allocation2 + $0x24] sm:$0x1] }
 0xdd0   : > { %11084 = vst [vmem:[#allocation2 + $0x10] sm:$0xf] %v11083_v50  ;;  %11087 = vst [vmem:[#allocation2 + $0x14] sm:$0x1] %v11086_v28  ;;  %v11013_v27 = vshrl.u32 %v14202_v1, 16  ;;  %v10973_v58 = vpack.c.bf16 %v20520_v31, %v20510_v43  ;;  %v14203_v61 = vpack.c.bf16 %v20520_v31, %v20520_v31  ;;  %vm10944_vm6 = vcmp.ge.f32.partialorder %v10936_v48, 0.0 }
 0xdd1   : > { %v10952_v46 = vmul.f32 0.01, %v10936_v48  ;;  %v10937_v2 = vadd.f32 %v20480_v10, %v10924_v45  ;;  %v11016_v21 = vshll.u32 %v14202_v1, 16  ;;  %vm12130_vm10 = vcmask 253952  }
 0xdd2   : > { %v11015_v47 = vrot.slane %v11013_v27, 7  ;;  %v11021_v19 = vshrl.u32 %v14203_v61, 16  ;;  %v11024_v38 = vshll.u32 %v14203_v61, 16 }
 0xdd3   : > { %v10960_v8 = vsel %vm10944_vm6, %v10936_v48, %v10952_v46  ;;  %vm10945_vm2 = vcmp.ge.f32.partialorder %v10937_v2, 0.0  ;;  %v10953_v36 = vmul.f32 0.01, %v10937_v2  ;;  %v10912_v60 = vpop.f32.mrb[180].mxu1  ;;  %vm20905_vm6 = vmand %vm12125_vm8, %vm255_vm3 }
 0xdd4   : > { %v11018_v23 = vor.u32 %v11016_v21, %v11015_v47  ;;  %v11019_v34 = vrot.slane %v11015_v47, 4  ;;  %v11023_v52 = vrot.slane %v11021_v19, 7  ;;  %v20542_v7 = vadd.f32 %v10960_v8, %v19657_v5  ;;  %v10914_v54 = vpop.f32.mrb[181].mxu1 }
 0xdd5   : > { %v10961_v49 = vsel %vm10945_vm2, %v10937_v2, %v10953_v36  ;;  %v10925_v22 = vadd.f32 %v10912_v60, %v20463_v37  ;;  %v10915_v0 = vpop.f32.mrb[182].mxu1  ;;  %v20545_v26 = vld [vmem:[#allocation2 + $0xc] sm:$0x1]  ;;  %v11285_v17 = vld [vmem:[#allocation2 + $0x8] sm:$0xe]  ;;  %vm20910_vm2 = vmand %vm12130_vm10, %vm223_vm1 }
 0xdd6   : > { %v11089_v30 = vsel %vm19097_vm11, %v11018_v23, %v11088_v24  ;;  %v11092_v5 = vsel %vm19104_vm13, %v11019_v34, %v11091_v25  ;;  %v11026_v29 = vor.u32 %v11024_v38, %v11023_v52  ;;  %v11027_v55 = vrot.slane %v11023_v52, 4  ;;  %v10917_v37 = vpop.f32.mrb[183].mxu1  ;;  %v20563_v20 = vld [vmem:[#allocation2 + $0x8] sm:$0xf]  ;;  %v11103_v34 = vld [vmem:[#allocation2 + $0x2c] sm:$0x1] }
 0xdd7   : > { %11090 = vst [vmem:[#allocation2 + $0x18] sm:$0xf] %v11089_v30  ;;  %11093 = vst [vmem:[#allocation2 + $0x1c] sm:$0x1] %v11092_v5  ;;  %v14204_v12 = vpack.c.bf16 %v20542_v7, %v20542_v7  ;;  %v20559_v18 = vadd.f32 %v10961_v49, %v19690_v16  ;;  %v10938_v11 = vadd.f32 %v20480_v10, %v10925_v22  ;;  %v13983_v45 = vrot.slane %v11285_v17, 9 }
 0xdd8   : > { %v10926_v63 = vadd.f32 %v10915_v0, %v20467_v9  ;;  %v11095_v1 = vsel %vm19097_vm11, %v11026_v29, %v11094_v14  ;;  %v11098_v48 = vsel %vm19104_vm13, %v11027_v55, %v11097_v35  ;;  %v11320_v57 = vrot.slane %v20545_v26, 5  ;;  %v11100_v24 = vld [vmem:[#allocation2 + $0x28] sm:$0xf]  ;;  %v20584_v52 = vld [vmem:[#allocation2 + $0x14] sm:$0x1]  ;;  %v16054_v14 = vld [vmem:[%s21345_s2 + $0xd78] sm:$0xff]  }
 0xdd9   : > { %11096 = vst [vmem:[#allocation2 + $0x20] sm:$0xf] %v11095_v1  ;;  %11099 = vst [vmem:[#allocation2 + $0x24] sm:$0x1] %v11098_v48  ;;  %v11029_v50 = vshrl.u32 %v14204_v12, 16  ;;  %v14205_v16 = vpack.c.bf16 %v20559_v18, %v20559_v18  ;;  %vm10946_vm4 = vcmp.ge.f32.partialorder %v10938_v11, 0.0  ;;  %11617 = vmatpush1.bf16.msra.mxu0 %v16054_v14 }
 0xdda   : > { %v11274_v9 = vshll.u32 %v20539_v15, 16  ;;  %v10954_v28 = vmul.f32 0.01, %v10938_v11  ;;  %v10939_v27 = vadd.f32 %v20480_v10, %v10926_v63  ;;  %v11321_v61 = vsel %vm16420_vm9, %v13983_v45, %v11320_v57  ;;  %v11106_v54 = vld [vmem:[#allocation2 + $0x30] sm:$0xf]  ;;  %11618 = vmatprep.subr.bf16.mxu0 %v16182_v3 }
 0xddb   : > { %v11159_v46 = vshrl.u32 %v20563_v20, 16  ;;  %v11031_v2 = vrot.slane %v11029_v50, 7  ;;  %v11032_v47 = vshll.u32 %v14204_v12, 16  ;;  %v11037_v21 = vshrl.u32 %v14205_v16, 16  ;;  %v11286_v17 = vld [vmem:[#allocation2 + $0x10] sm:$0xe] }
 0xddc   : > { %v20577_v19 = vcombine.low %v11317_v32, %v11321_v61  ;;  %v11040_v38 = vshll.u32 %v14205_v16, 16  ;;  %v10962_v8 = vsel %vm10946_vm4, %v10938_v11, %v10954_v28  ;;  %vm10947_vm7 = vcmp.ge.f32.partialorder %v10939_v27, 0.0  ;;  %v11109_v55 = vld [vmem:[#allocation2 + $0x34] sm:$0x1]  ;;  %v20592_v37 = vld [vmem:[#allocation2 + $0x4c] sm:$0x1] }
 0xddd   : > { %v10955_v36 = vmul.f32 0.01, %v10939_v27  ;;  %v11034_v60 = vor.u32 %v11032_v47, %v11031_v2  ;;  %v11035_v23 = vrot.slane %v11031_v2, 4  ;;  %v11039_v25 = vrot.slane %v11037_v21, 7 }
 0xdde   : > { %v20580_v10 = vadd.f32 %v10962_v8, %v19655_v42  ;;  %14035 = vmatprep.mubr.msk.bf16.mxu1 %vm2296_vm0, %v20577_v19  ;;  %v11161_v49 = vrot.slane %v11159_v46, 4  ;;  %v11162_v22 = vshll.u32 %v20563_v20, 16  ;;  %v11168_v0 = vshll.u32 %v20545_v26, 16  ;;  %v20602_v11 = vld [vmem:[#allocation2 + $0x1c] sm:$0x1] }
 0xddf   : > { %v10963_v32 = vsel %vm10947_vm7, %v10939_v27, %v10955_v36  ;;  %v11101_v30 = vsel %vm19097_vm11, %v11034_v60, %v11100_v24  ;;  %v11104_v42 = vsel %vm19104_vm13, %v11035_v23, %v11103_v34  ;;  %v11042_v5 = vor.u32 %v11040_v38, %v11039_v25  ;;  %v11287_v63 = vld [vmem:[#allocation2 + $0x18] sm:$0xe]  ;;  %v20617_v46 = vld [vmem:[#allocation2 + $0x10] sm:$0xf] }
 0xde0   : > { %v11043_v29 = vrot.slane %v11039_v25, 4  ;;  %11102 = vst [vmem:[#allocation2 + $0x28] sm:$0xf] %v11101_v30  ;;  %11105 = vst [vmem:[#allocation2 + $0x2c] sm:$0x1] %v11104_v42  ;;  %v14206_v26 = vpack.c.bf16 %v20580_v10, %v20580_v10  ;;  %v20600_v35 = vadd.f32 %v10963_v32, %v19688_v44  ;;  %v11164_v12 = vrot.slane %v11162_v22, 5 }
 0xde1   : > { %v11280_v1 = vshll.u32 %v20592_v37, 16  ;;  %v11107_v48 = vsel %vm19097_vm11, %v11042_v5, %v11106_v54  ;;  %v13984_v57 = vrot.slane %v11286_v17, 9  ;;  %v11324_v50 = vrot.slane %v20584_v52, 5  ;;  %v16055_v44 = vld [vmem:[%s21345_s2 + $0xd80] sm:$0xff]   ;;  %v11112_v22 = vld [vmem:[#allocation2 + $0x38] sm:$0xf] }
 0xde2   : > { %v11110_v45 = vsel %vm19104_vm13, %v11043_v29, %v11109_v55  ;;  %11108 = vst [vmem:[#allocation2 + $0x30] sm:$0xf] %v11107_v48  ;;  %v11045_v16 = vshrl.u32 %v14206_v26, 16  ;;  %v10975_v28 = vpack.c.bf16 %v20600_v35, %v20580_v10  ;;  %v14207_v27 = vpack.c.bf16 %v20600_v35, %v20600_v35  ;;  %11619 = vmatpush1.bf16.msra.mxu0 %v16055_v44  ;;  %v20633_v29 = vld [vmem:[#allocation2 + $0x18] sm:$0xf] }
 0xde3   : > { %11111 = vst [vmem:[#allocation2 + $0x34] sm:$0x1] %v11110_v45  ;;  %v11170_v61 = vrot.slane %v11168_v0, 5  ;;  %v11048_v2 = vshll.u32 %v14206_v26, 16  ;;  %v11165_v47 = vor.u32 %v11164_v12, %v11161_v49  ;;  %v13985_v21 = vrot.slane %v11287_v63, 9  ;;  %11620 = vmatprep.subr.bf16.mxu0 %v16182_v3  ;;  %v16056_v26 = vld [vmem:[%s21345_s2 + $0xd88] sm:$0xff]  }
 0xde4   : > { %v11328_v24 = vrot.slane %v20602_v11, 5  ;;  %v11047_v38 = vrot.slane %v11045_v16, 7  ;;  %v11053_v8 = vshrl.u32 %v14207_v27, 16  ;;  %v11056_v36 = vshll.u32 %v14207_v27, 16  ;;  %v11115_v0 = vld [vmem:[#allocation2 + $0x3c] sm:$0x1] }
 0xde5   : > { %v11325_v60 = vsel %vm16420_vm9, %v13984_v57, %v11324_v50  ;;  %v11166_v23 = vrot.slane %v11165_v47, 4  ;;  %v11173_v25 = vshrl.u32 %v20617_v46, 16  ;;  %v11176_v54 = vshll.u32 %v20617_v46, 16  ;;  %v20642_v57 = vld [vmem:[#allocation2 + $0x20] sm:$0xf] }
 0xde6   : > { %v11329_v34 = vsel %vm16420_vm9, %v13985_v21, %v11328_v24  ;;  %v11050_v32 = vor.u32 %v11048_v2, %v11047_v38  ;;  %v11051_v49 = vrot.slane %v11047_v38, 4  ;;  %v11055_v17 = vrot.slane %v11053_v8, 7  ;;  %v11121_v50 = vld [vmem:[#allocation2 + $0x44] sm:$0x1]  ;;  %11621 = vmatpush1.bf16.msra.mxu0 %v16056_v26 }
 0xde7   : > { %v20627_v30 = vcombine.low %v11325_v60, %v11329_v34  ;;  %v11171_v42 = vsel %vm16454_vm12, %v11166_v23, %v11170_v61  ;;  %v11495_v5 = vrot.slane %v20577_v19, 4  ;;  %v11175_v55 = vrot.slane %v11173_v25, 4  ;;  %v11118_v19 = vld [vmem:[#allocation2 + $0x40] sm:$0xf]  ;;  %v20657_v38 = vld [vmem:[#allocation2 + $0x28] sm:$0xf]  ;;  %11911 = vmatprep.subr.bf16.mxu0 %v16182_v3 }
 0xde8   : > { %v11178_v14 = vrot.slane %v11176_v54, 5  ;;  %v11113_v12 = vsel %vm19097_vm11, %v11050_v32, %v11112_v22  ;;  %v11116_v63 = vsel %vm19104_vm13, %v11051_v49, %v11115_v0  ;;  %v11058_v48 = vor.u32 %v11056_v36, %v11055_v17  ;;  %v20665_v62 = vld [vmem:[#allocation2 + $0x24] sm:$0x1]  ;;  %v20676_v25 = vld [vmem:[#allocation2 + $0x2c] sm:$0x1] }
 0xde9   : > { %v11059_v45 = vrot.slane %v11055_v17, 4  ;;  %11114 = vst [vmem:[#allocation2 + $0x38] sm:$0xf] %v11113_v12  ;;  %11117 = vst [vmem:[#allocation2 + $0x3c] sm:$0x1] %v11116_v63  ;;  %v13997_v44 = vcombine.low %v11157_v4, %v11171_v42  ;;  %v11496_v16 = vrot.slane %v20627_v30, 4 }
 0xdea   : > { %v11179_v27 = vor.u32 %v11178_v14, %v11175_v55  ;;  %v11182_v61 = vshll.u32 %v20584_v52, 16  ;;  %v11119_v2 = vsel %vm19097_vm11, %v11058_v48, %v11118_v19  ;;  %v11187_v21 = vshrl.u32 %v20633_v29, 16  ;;  %v20672_v60 = vld [vmem:[#allocation2 + $0x30] sm:$0xf] }
 0xdeb   : > { %v11122_v47 = vsel %vm19104_vm13, %v11059_v45, %v11121_v50  ;;  %v11190_v24 = vshll.u32 %v20633_v29, 16  ;;  %11120 = vst [vmem:[#allocation2 + $0x40] sm:$0xf] %v11119_v2  ;;  %11394 = vrot.lane.b32.xlu1 %v13997_v44, %s16183_s28  ;;  %v11497_v53 = vsel %vm408_vm5, %v11495_v5, %v11496_v16  ;;  %v11196_v51 = vshll.u32 %v20602_v11, 16  ;;  %v20688_v45 = vld [vmem:[#allocation2 + $0x34] sm:$0x1] }
 0xdec   : > { %11123 = vst [vmem:[#allocation2 + $0x44] sm:$0x1] %v11122_v47  ;;  %v11201_v33 = vshrl.u32 %v20642_v57, 16  ;;  %v11273_v4 = vrot.slane %v11271_v59, 4  ;;  %14019 = vmatprep.mubr.msk.bf16.mxu0 %vm2296_vm0, %v11497_v53  ;;  %v11189_v52 = vrot.slane %v11187_v21, 4  ;;  %v11204_v36 = vshll.u32 %v20642_v57, 16 }
 0xded   : > { %v11192_v8 = vrot.slane %v11190_v24, 5  ;;  %v11276_v23 = vrot.slane %v11274_v9, 5  ;;  %v11180_v34 = vrot.slane %v11179_v27, 4  ;;  %v11184_v11 = vrot.slane %v11182_v61, 5 }
 0xdee   : > { %v11203_v54 = vrot.slane %v11201_v33, 4  ;;  %v11215_v32 = vshrl.u32 %v20657_v38, 16  ;;  %v11206_v59 = vrot.slane %v11204_v36, 5  ;;  %v11210_v22 = vshll.u32 %v20665_v62, 16 }
 0xdef   : > { %v11193_v49 = vor.u32 %v11192_v8, %v11189_v52  ;;  %v11218_v0 = vshll.u32 %v20657_v38, 16  ;;  %v11198_v17 = vrot.slane %v11196_v51, 5  ;;  %v11229_v5 = vshrl.u32 %v20672_v60, 16 }
 0xdf0   : > { %v11217_v42 = vrot.slane %v11215_v32, 4  ;;  %v11232_v55 = vshll.u32 %v20672_v60, 16  ;;  %v11207_v14 = vor.u32 %v11206_v59, %v11203_v54  ;;  %v11224_v12 = vshll.u32 %v20676_v25, 16  ;;  %v20684_v63 = vld [vmem:[#allocation2 + $0x38] sm:$0xf] }
 0xdf1   : > { %v11194_v9 = vrot.slane %v11193_v49, 4  ;;  %v11220_v26 = vrot.slane %v11218_v0, 5  ;;  %v11185_v48 = vsel %vm16454_vm12, %v11180_v34, %v11184_v11  ;;  %v11231_v19 = vrot.slane %v11229_v5, 4  ;;  %v20692_v47 = vld [vmem:[#allocation2 + $0x3c] sm:$0x1] }
 0xdf2   : > { %v11234_v50 = vrot.slane %v11232_v55, 5  ;;  %v11277_v44 = vor.u32 %v11276_v23, %v11273_v4  ;;  %v11208_v61 = vrot.slane %v11207_v14, 4  ;;  %v11243_v21 = vshrl.u32 %v20684_v63, 16  ;;  %v20695_v24 = vld [vmem:[#allocation2 + $0x40] sm:$0xf] }
 0xdf3   : > { %v11199_v27 = vsel %vm16454_vm12, %v11194_v9, %v11198_v17  ;;  %v11221_v2 = vor.u32 %v11220_v26, %v11217_v42  ;;  %v11212_v51 = vrot.slane %v11210_v22, 5  ;;  %v11246_v52 = vshll.u32 %v20684_v63, 16  ;;  %v20701_v54 = vld [vmem:[#allocation2 + $0x44] sm:$0x1] }
 0xdf4   : > { %v13998_v53 = vcombine.low %v11185_v48, %v11199_v27  ;;  %v11235_v33 = vor.u32 %v11234_v50, %v11231_v19  ;;  %v11226_v36 = vrot.slane %v11224_v12, 5  ;;  %v11238_v4 = vshll.u32 %v20688_v45, 16 }
 0xdf5   : > { %v11222_v8 = vrot.slane %v11221_v2, 4  ;;  %v11245_v23 = vrot.slane %v11243_v21, 4  ;;  %v11248_v34 = vrot.slane %v11246_v52, 5  ;;  %v11252_v11 = vshll.u32 %v20692_v47, 16  ;;  %v11289_v52 = vld [vmem:[#allocation2 + $0x28] sm:$0xe] }
 0xdf6   : > { %11396 = vrot.lane.b32.xlu0 %v13998_v53, %s16183_s28  ;;  %v11257_v32 = vshrl.u32 %v20695_v24, 16  ;;  %v11260_v49 = vshll.u32 %v20695_v24, 16  ;;  %v11213_v59 = vsel %vm16454_vm12, %v11208_v61, %v11212_v51  ;;  %v11236_v17 = vrot.slane %v11235_v33, 4 }
 0xdf7   : > { %v11227_v22 = vsel %vm16454_vm12, %v11222_v8, %v11226_v36  ;;  %v11249_v42 = vor.u32 %v11248_v34, %v11245_v23  ;;  %v11266_v9 = vshll.u32 %v20701_v54, 16  ;;  %v11278_v14 = vrot.slane %v11277_v44, 4  ;;  %v11288_v36 = vld [vmem:[#allocation2 + $0x20] sm:$0xe] }
 0xdf8   : > { %v13999_v0 = vcombine.low %v11213_v59, %v11227_v22  ;;  %v11259_v5 = vrot.slane %v11257_v32, 4  ;;  %v11262_v55 = vrot.slane %v11260_v49, 5  ;;  %v11282_v26 = vrot.slane %v11280_v1, 5  ;;  %v11291_v22 = vld [vmem:[#allocation2 + $0x38] sm:$0xe] }
 0xdf9   : > { %v11240_v12 = vrot.slane %v11238_v4, 5  ;;  %v11250_v48 = vrot.slane %v11249_v42, 4  ;;  %v11254_v19 = vrot.slane %v11252_v11, 5  ;;  %v11268_v53 = vrot.slane %v11266_v9, 5 }
 0xdfa   : > { %11398 = vrot.lane.b32.xlu1 %v13999_v0, %s16183_s28  ;;  %v11263_v50 = vor.u32 %v11262_v55, %v11259_v5  ;;  %v11283_v44 = vsel %vm16454_vm12, %v11278_v14, %v11282_v26  ;;  %v10974_v51 = vpack.c.bf16 %v20559_v18, %v20542_v7  ;;  %v13992_v8 = vcombine.low %v20486_v13, %v20563_v20  ;;  %v11290_v0 = vld [vmem:[#allocation2 + $0x30] sm:$0xe] }
 0xdfb   : > { %v11241_v27 = vsel %vm16454_vm12, %v11236_v17, %v11240_v12  ;;  %v11255_v61 = vsel %vm16454_vm12, %v11250_v48, %v11254_v19  ;;  %v13987_v23 = vrot.slane %v11289_v52, 9  ;;  %v11336_v34 = vrot.slane %v20676_v25, 5  ;;  %v11293_v48 = vld [vmem:[#allocation2 + $0x48] sm:$0xe] }
 0xdfc   : > { %v14000_v2 = vcombine.low %v11241_v27, %v11255_v61  ;;  %v11264_v21 = vrot.slane %v11263_v50, 4  ;;  %v13986_v32 = vrot.slane %v11288_v36, 9  ;;  %v11332_v49 = vrot.slane %v20665_v62, 5 }
 0xdfd   : > { %v11337_v59 = vsel %vm16420_vm9, %v13987_v23, %v11336_v34  ;;  %v13989_v25 = vrot.slane %v11291_v22, 9  ;;  %v11344_v17 = vrot.slane %v20692_v47, 5  ;;  %v13993_v42 = vcombine.low %v20617_v46, %v20633_v29  ;;  %v16058_v47 = vld [vmem:[%s21345_s2 + $0xd90] sm:$0xff]   ;;  %v16062_v34 = vld [vmem:[%s21345_s2 + $0xda8] sm:$0xff]  }
 0xdfe   : > { %11400 = vrot.lane.b32.xlu0 %v14000_v2, %s16183_s28  ;;  %v11269_v1 = vsel %vm16454_vm12, %v11264_v21, %v11268_v53  ;;  %v11333_v13 = vsel %vm16420_vm9, %v13986_v32, %v11332_v49  ;;  %v13988_v5 = vrot.slane %v11290_v0, 9  ;;  %v11340_v55 = vrot.slane %v20688_v45, 5  ;;  %v11292_v45 = vld [vmem:[#allocation2 + $0x40] sm:$0xe]  ;;  %v16065_v22 = vld [vmem:[%s21345_s2 + $0xdb0] sm:$0xff]  }
 0xdff   : > { %v14001_v33 = vcombine.low %v11269_v1, %v11283_v44  ;;  %v20736_v20 = vcombine.low %v11333_v13, %v11337_v59  ;;  %v11345_v46 = vsel %vm16420_vm9, %v13989_v25, %v11344_v17  ;;  %v13994_v29 = vcombine.low %v20642_v57, %v20657_v38  ;;  %v16059_v38 = vld [vmem:[%s21345_s2 + $0xd98] sm:$0xff]  }
 0xe00   : > { %v11341_v27 = vsel %vm16420_vm9, %v13988_v5, %v11340_v55  ;;  %v11352_v61 = vrot.slane %v20592_v37, 5  ;;  %v11348_v57 = vrot.slane %v20701_v54, 5  ;;  %v13990_v44 = vrot.slane %v11292_v45, 9  ;;  %v16066_v17 = vld [vmem:[%s21345_s2 + $0xdb8] sm:$0xff]   ;;  %v16069_v5 = vld [vmem:[%s21345_s2 + $0xdd0] sm:$0xff]  }
 0xe01   : > { %11402 = vrot.lane.b32.xlu1 %v14001_v33, %s16183_s28  ;;  %v11500_v14 = vrot.slane %v20736_v20, 4  ;;  %v20767_v53 = vcombine.low %v11341_v27, %v11345_v46  ;;  %v13991_v1 = vrot.slane %v11293_v48, 9  ;;  %v13995_v52 = vcombine.low %v20672_v60, %v20684_v63  ;;  %v16070_v55 = vld [vmem:[%s21345_s2 + $0xdd8] sm:$0xff]  }
 0xe02   : > { %v11349_v36 = vsel %vm16420_vm9, %v13990_v44, %v11348_v57  ;;  %v13996_v13 = vcombine.low %v20695_v24, %v20539_v15  ;;  %v16067_v15 = vld [vmem:[%s21345_s2 + $0xdc0] sm:$0xff]  }
 0xe03   : > { %v11501_v2 = vsel %vm408_vm5, %v11496_v16, %v11500_v14  ;;  %v11504_v16 = vrot.slane %v20767_v53, 4 }
 0xe05   : > { %v11505_v63 = vsel %vm408_vm5, %v11500_v14, %v11504_v16  ;;  %v16072_v14 = vld [vmem:[%s21345_s2 + $0xde8] sm:$0xff]  }
 0xe5d   : > { %v11395_v4 = vpop.permute.xlu1 %11394 }
 0xe5e   : > { %v11421_v11 = vsel %vm2296_vm0, %v13992_v8, %v11395_v4  ;;  %v16061_v8 = vld [vmem:[%s21345_s2 + $0xda0] sm:$0xff]   ;;  %v11353_v4 = vsel %vm16420_vm9, %v13991_v1, %v11352_v61 }
 0xe5f   : > { %11780 = vmatmul.mubr.bf16.vlgmr.msra.gmra.mrb[184].mxu1 %v11421_v11  ;;  %v11492_v26 = vrot.slane %v11421_v11, 4  ;;  %v14006_v23 = vcombine.low %v11349_v36, %v11353_v4 }
 0xe60   : > { %14036 = vmatprep.mubr.msk.bf16.mxu1 %vm2296_vm0, %v20627_v30 }
 0xe61   : > { %v11508_v32 = vrot.slane %v14006_v23, 4 }
 0xe63   : > { %v11509_v25 = vsel %vm408_vm5, %v11504_v16, %v11508_v32  ;;  %v20888_v32 = vld [vmem:[%s21346_s3 + $0xa] ss:$0 sm:$0xff] }
 0xe68   : > { %v11397_v62 = vpop.permute.xlu0 %11396 }
 0xe69   : > { %v20743_v9 = vsel %vm2296_vm0, %v13993_v42, %v11397_v62  ;;  %v16068_v62 = vld [vmem:[%s21345_s2 + $0xdc8] sm:$0xff]  }
 0xe6a   : > { %v11493_v12 = vrot.slane %v20743_v9, 4  ;;  %11788 = vmatmul.mubr.bf16.gmra.mrb[188].mxu1 %v20743_v9 }
 0xe6b   : > { %14037 = vmatprep.mubr.msk.bf16.mxu1 %vm2296_vm0, %v20736_v20 }
 0xe6c   : > { %v11494_v19 = vsel %vm408_vm5, %v11492_v26, %v11493_v12  ;;  %v11399_v50 = vpop.permute.xlu1 %11398  ;;  %v16073_v26 = vld [vmem:[%s21345_s2 + $0xe80] sm:$0xff]  }
 0xe6d   : > { %11631 = vmatmul.mubr.bf16.vlgmr.msra.gmra.mrb[0].mxu0 %v11494_v19  ;;  %v20765_v21 = vsel %vm2296_vm0, %v13994_v29, %v11399_v50 }
 0xe6e   : > { %11912 = vmatpush1.bf16.msra.mxu0 %v16058_v47  ;;  %14020 = vmatprep.mubr.msk.bf16.mxu0 %vm2296_vm0, %v11501_v2  ;;  %v11498_v37 = vrot.slane %v20765_v21, 4  ;;  %v16076_v47 = vld [vmem:[%s21345_s2 + $0xe98] sm:$0xff]  }
 0xe6f   : > { %11913 = vmatprep.subr.bf16.mxu0 %v16182_v3 }
 0xe70   : > { %v11401_v33 = vpop.permute.xlu0 %11400  ;;  %v11499_v54 = vsel %vm408_vm5, %v11493_v12, %v11498_v37  ;;  %v16074_v12 = vld [vmem:[%s21345_s2 + $0xe88] sm:$0xff]  }
 0xe71   : > { %v11433_v60 = vsel %vm2296_vm0, %v13995_v52, %v11401_v33 }
 0xe72   : > { %11914 = vmatpush1.bf16.msra.mxu0 %v16059_v38  ;;  %11796 = vmatmul.mubr.bf16.gmra.mrb[192].mxu1 %v20765_v21  ;;  %v11502_v11 = vrot.slane %v11433_v60, 4 }
 0xe73   : > { %14038 = vmatprep.mubr.msk.bf16.mxu1 %vm2296_vm0, %v20767_v53  ;;  %11915 = vmatprep.subr.bf16.mxu0 %v16182_v3  ;;  %v11403_v59 = vpop.permute.xlu1 %11402 }
 0xe74   : > { %v11503_v49 = vsel %vm408_vm5, %v11498_v37, %v11502_v11  ;;  %v11437_v0 = vsel %vm2296_vm0, %v13996_v13, %v11403_v59 }
 0xe75   : > { %11639 = vmatmul.mubr.bf16.gmra.mrb[4].mxu0 %v11499_v54  ;;  %v11506_v42 = vrot.slane %v11437_v0, 4 }
 0xe76   : > { %11916 = vmatpush1.bf16.msra.mxu0 %v16061_v8  ;;  %14021 = vmatprep.mubr.msk.bf16.mxu0 %vm2296_vm0, %v11505_v63 }
 0xe77   : > { %11917 = vmatprep.subr.bf16.mxu0 %v16182_v3  ;;  %v11507_v24 = vsel %vm408_vm5, %v11502_v11, %v11506_v42 }
 0xe7a   : > { %11918 = vmatpush1.bf16.msra.mxu0 %v16062_v34  ;;  %11804 = vmatmul.mubr.bf16.gmra.mrb[196].mxu1 %v11433_v60 }
 0xe7b   : > { %11919 = vmatprep.subr.bf16.mxu0 %v16182_v3 }
 0xe7d   : > { %11647 = vmatmul.mubr.bf16.gmra.mrb[8].mxu0 %v11503_v49 }
 0xe7e   : > { %11920 = vmatpush1.bf16.msra.mxu0 %v16065_v22  ;;  %14022 = vmatprep.mubr.msk.bf16.mxu0 %vm2296_vm0, %v11509_v25 }
 0xe7f   : > { %11921 = vmatprep.subr.bf16.mxu0 %v16182_v3 }
 0xe82   : > { %11922 = vmatpush1.bf16.msra.mxu0 %v16066_v17 }
 0xe83   : > { %11923 = vmatprep.subr.bf16.mxu0 %v16182_v3 }
 0xe85   : > { %11655 = vmatmul.mubr.bf16.gmra.mrb[12].mxu0 %v11507_v24 }
 0xe86   : > { %11924 = vmatpush1.bf16.msra.mxu0 %v16067_v15  ;;  %14051 = vmatprep.mubr.msk.bf16.mxu0 %vm2296_vm0, %v20627_v30  ;;  %v16071_v30 = vld [vmem:[%s21345_s2 + $0xde0] sm:$0xff]  }
 0xe87   : > { %11925 = vmatprep.subr.bf16.mxu0 %v16182_v3  ;;  %v20892_v15 = vld [vmem:[#allocation2] sm:$0xf] }
 0xe8a   : > { %11926 = vmatpush1.bf16.msra.mxu0 %v16068_v62 }
 0xe8b   : > { %11927 = vmatprep.subr.bf16.mxu0 %v16182_v3 }
 0xe8e   : > { %11928 = vmatpush1.bf16.msra.mxu0 %v16069_v5 }
 0xe8f   : > { %11929 = vmatprep.subr.bf16.mxu0 %v16182_v3 }
 0xe92   : > { %11930 = vmatpush1.bf16.msra.mxu0 %v16070_v55 }
 0xe93   : > { %11931 = vmatprep.subr.bf16.mxu0 %v16182_v3 }
 0xe96   : > { %11932 = vmatpush1.bf16.msra.mxu0 %v16071_v30  ;;  %v20894_v30 = vld [vmem:[#allocation2 + $0x4] sm:$0x1] }
 0xe97   : > { %11933 = vmatprep.subr.bf16.mxu0 %v16182_v3  ;;  %v16075_v3 = vld [vmem:[%s21345_s2 + $0xe90] sm:$0xff]  }
 0xe9a   : > { %11934 = vmatpush1.bf16.msra.mxu0 %v16072_v14  ;;  %v20896_v14 = vld [vmem:[#allocation2] sm:$0xe] }
 0xe9b   : > { %15305 = vmatprep.subr.bf16.mxu0 %v16073_v26 }
 0xe9d   : > { %11944 = vmatmul.mubr.bf16.vlgmr.msra.gmra.mrb[16].mxu0 %v20743_v9 }
 0xe9e   : > { %14052 = vmatprep.mubr.msk.bf16.mxu0 %vm2296_vm0, %v20736_v20  ;;  %15306 = vmatpush3.bf16.msra.mxu0 %v16073_v26  ;;  %v12198_v26 = vshrl.u32 %v20892_v15, 16 }
 0xe9f   : > { %15307 = vmatprep.subr.bf16.mxu0 %v16074_v12 }
 0xea2   : > { %15308 = vmatpush3.bf16.msra.mxu0 %v16074_v12 }
 0xea3   : > { %15309 = vmatprep.subr.bf16.mxu0 %v16075_v3 }
 0xea5   : > { %11952 = vmatmul.mubr.bf16.gmra.mrb[20].mxu0 %v20765_v21 }
 0xea6   : > { %14053 = vmatprep.mubr.msk.bf16.mxu0 %vm2296_vm0, %v20767_v53  ;;  %15310 = vmatpush3.bf16.msra.mxu0 %v16075_v3 }
 0xea7   : > { %15311 = vmatprep.subr.bf16.mxu0 %v16076_v47 }
 0xeaa   : > { %15312 = vmatpush3.bf16.msra.mxu0 %v16076_v47 }
 0xead   : > { %11960 = vmatmul.mubr.bf16.gmra.mrb[24].mxu0 %v11433_v60 }
 0xeae   : > { %14054 = vmatprep.mubr.msk.bf16.mxu0 %vm2296_vm0, %v14006_v23 }
 0xeb5   : > { %11968 = vmatmul.mubr.bf16.gmra.mrb[28].mxu0 %v11437_v0 }
 0xeb6   : > { %15313 = vmatprep.mubr.msk.bf16.mxu0 %vm2296_vm0, %v10972_v6  ;;  %v16077_v6 = vld [vmem:[%s21345_s2 + $0xe20] sm:$0xff]  }
 0xeb7   : > { %15245 = vmatprep.subr.bf16.mxu1 %v16077_v6 }
 0xeb8   : > { %15246 = vmatpush3.bf16.msra.mxu1 %v16077_v6 }
 0xebd   : > { %15314 = vmatmul.mubr.msk.bf16.vlgmr.msra.gmra.mrb[32].mxu0 %vm2296_vm0, %v10973_v58 }
 0xebe   : > { %15317 = vmatprep.mubr.msk.bf16.mxu0 %vm2296_vm0, %v10974_v51 }
 0xec5   : > { %15318 = vmatmul.mubr.msk.bf16.gmra.mrb[36].mxu0 %vm2296_vm0, %v10975_v28 }
 0xf32   : > { %v11781_v20 = vpop.f32.mrb[184].mxu1 }
 0xf33   : > { %v11783_v9 = vpop.f32.mrb[185].mxu1 }
 0xf34   : > { %v11784_v41 = vpop.f32.mrb[186].mxu1 }
 0xf35   : > { %v11786_v56 = vpop.f32.mrb[187].mxu1 }
 0xf3d   : > { %v11789_v43 = vpop.f32.mrb[188].mxu1 }
 0xf3e   : > { %v11791_v31 = vpop.f32.mrb[189].mxu1 }
 0xf3f   : > { %v11792_v58 = vpop.f32.mrb[190].mxu1 }
 0xf40   : > { %v11632_v7 = vpop.f32.mrb[0].mxu0  ;;  %v11794_v18 = vpop.f32.mrb[191].mxu1 }
 0xf41   : > { %v11782_v51 = vadd.f32 %v11781_v20, %v11632_v7  ;;  %v11634_v46 = vpop.f32.mrb[1].mxu0  ;;  %v12201_v20 = vshll.u32 %v20892_v15, 16  ;;  %v12369_v7 = vrot.slane %v20894_v30, 5 }
 0xf42   : > { %v11635_v10 = vpop.f32.mrb[2].mxu0 }
 0xf43   : > { %v11785_v35 = vadd.f32 %v11784_v41, %v11635_v10  ;;  %v11637_v28 = vpop.f32.mrb[3].mxu0 }
 0xf45   : > { %v11797_v29 = vpop.f32.mrb[192].mxu1 }
 0xf46   : > { %v11799_v45 = vpop.f32.mrb[193].mxu1 }
 0xf47   : > { %v11800_v48 = vpop.f32.mrb[194].mxu1 }
 0xf48   : > { %v11640_v19 = vpop.f32.mrb[4].mxu0  ;;  %v11802_v50 = vpop.f32.mrb[195].mxu1 }
 0xf49   : > { %v11790_v27 = vadd.f32 %v11789_v43, %v11640_v19  ;;  %v11642_v61 = vpop.f32.mrb[5].mxu0 }
 0xf4a   : > { %v11643_v2 = vpop.f32.mrb[6].mxu0 }
 0xf4b   : > { %v11793_v21 = vadd.f32 %v11792_v58, %v11643_v2  ;;  %v11645_v53 = vpop.f32.mrb[7].mxu0  ;;  %v14064_v58 = vrot.slane %v20896_v14, 9 }
 0xf4d   : > { %v11805_v57 = vpop.f32.mrb[196].mxu1 }
 0xf4e   : > { %v11807_v38 = vpop.f32.mrb[197].mxu1 }
 0xf4f   : > { %v11808_v37 = vpop.f32.mrb[198].mxu1  ;;  %v12207_v38 = vshll.u32 %v20894_v30, 16  ;;  %v20934_v30 = vsel %vm16420_vm9, %v14064_v58, %v12369_v7  ;;  %v12150_v58 = vld [vmem:[#allocation2 + $0x24] sm:$0x1] }
 0xf50   : > { %v11648_v44 = vpop.f32.mrb[8].mxu0  ;;  %v11810_v1 = vpop.f32.mrb[199].mxu1 }
 0xf51   : > { %v20877_v16 = vadd.f32 %v11797_v29, %v11648_v44  ;;  %v11650_v33 = vpop.f32.mrb[9].mxu0  ;;  %v20936_v14 = vrot.slane %v12207_v38, 5 }
 0xf52   : > { %v11651_v52 = vpop.f32.mrb[10].mxu0 }
 0xf53   : > { %v20879_v54 = vadd.f32 %v11800_v48, %v11651_v52  ;;  %v11653_v8 = vpop.f32.mrb[11].mxu0  ;;  %v12203_v48 = vrot.slane %v12201_v20, 5 }
 0xf54   : > { %v12135_v8 = vld [vmem:[#allocation2 + $0x10] sm:$0xf] }
 0xf58   : > { %v11656_v36 = vpop.f32.mrb[12].mxu0 }
 0xf59   : > { %v20881_v4 = vadd.f32 %v11805_v57, %v11656_v36  ;;  %v11658_v60 = vpop.f32.mrb[13].mxu0  ;;  %v12138_v36 = vld [vmem:[#allocation2 + $0x14] sm:$0x1] }
 0xf5a   : > { %v11659_v63 = vpop.f32.mrb[14].mxu0 }
 0xf5b   : > { %v20883_v23 = vadd.f32 %v11808_v37, %v11659_v63  ;;  %v11661_v34 = vpop.f32.mrb[15].mxu0 }
 0xf70   : > { %v11945_v11 = vpop.f32.mrb[16].mxu0 }
 0xf71   : > { %v11976_v49 = vadd.f32 %v11945_v11, %v11782_v51  ;;  %v11947_v59 = vpop.f32.mrb[17].mxu0 }
 0xf72   : > { %v11948_v22 = vpop.f32.mrb[18].mxu0 }
 0xf73   : > { %v11989_v13 = vadd.f32 %v20888_v32, %v11976_v49  ;;  %v11977_v0 = vadd.f32 %v11948_v22, %v11785_v35  ;;  %v11950_v25 = vpop.f32.mrb[19].mxu0  ;;  %v12200_v35 = vrot.slane %v12198_v26, 4 }
 0xf75   : > { %vm11997_vm11 = vcmp.ge.f32.partialorder %v11989_v13, 0.0  ;;  %v12005_v17 = vmul.f32 0.01, %v11989_v13  ;;  %v11990_v42 = vadd.f32 %v20888_v32, %v11977_v0  ;;  %v12204_v0 = vor.u32 %v12203_v48, %v12200_v35 }
 0xf77   : > { %v12013_v24 = vsel %vm11997_vm11, %v11989_v13, %v12005_v17  ;;  %vm11998_vm13 = vcmp.ge.f32.partialorder %v11990_v42, 0.0  ;;  %v12006_v62 = vmul.f32 0.01, %v11990_v42 }
 0xf78   : > { %v14208_v5 = vpack.c.bf16 %v12013_v24, %v12013_v24  ;;  %v11953_v55 = vpop.f32.mrb[20].mxu0 }
 0xf79   : > { %v12014_v12 = vsel %vm11998_vm13, %v11990_v42, %v12006_v62  ;;  %v11978_v3 = vadd.f32 %v11953_v55, %v11790_v27  ;;  %v11955_v47 = vpop.f32.mrb[21].mxu0  ;;  %v12127_v27 = vld [vmem:[#allocation2 + $0x8] sm:$0xf] }
 0xf7a   : > { %v12046_v9 = vshrl.u32 %v14208_v5, 16  ;;  %v14209_v41 = vpack.c.bf16 %v12014_v12, %v12014_v12  ;;  %v11956_v56 = vpop.f32.mrb[22].mxu0  ;;  %v12049_v51 = vshll.u32 %v14208_v5, 16  ;;  %v20927_v62 = vld [vmem:[#allocation2 + $0x48] sm:$0xf] }
 0xf7b   : > { %v11991_v6 = vadd.f32 %v20888_v32, %v11978_v3  ;;  %v11979_v43 = vadd.f32 %v11956_v56, %v11793_v21  ;;  %v11958_v31 = vpop.f32.mrb[23].mxu0  ;;  %v12132_v21 = vld [vmem:[#allocation2 + $0xc] sm:$0x1]  ;;  %v12141_v3 = vld [vmem:[#allocation2 + $0x18] sm:$0xf]  ;;  %v12324_v56 = vshrl.u32 %v20927_v62, 16 }
 0xf7c   : > { %v12048_v18 = vrot.slane %v12046_v9, 7  ;;  %v12054_v10 = vshrl.u32 %v14209_v41, 16  ;;  %v12057_v2 = vshll.u32 %v14209_v41, 16  ;;  %v12144_v47 = vld [vmem:[#allocation2 + $0x1c] sm:$0x1]  ;;  %v20939_v41 = vrot.slane %v12204_v0, 4 }
 0xf7d   : > { %vm11999_vm4 = vcmp.ge.f32.partialorder %v11991_v6, 0.0  ;;  %v12007_v29 = vmul.f32 0.01, %v11991_v6  ;;  %v11992_v45 = vadd.f32 %v20888_v32, %v11979_v43  ;;  %v12147_v31 = vld [vmem:[#allocation2 + $0x20] sm:$0xf] }
 0xf7e   : > { %v12051_v19 = vor.u32 %v12049_v51, %v12048_v18  ;;  %v12052_v50 = vrot.slane %v12048_v18, 4  ;;  %v12056_v61 = vrot.slane %v12054_v10, 7  ;;  %v12153_v0 = vld [vmem:[#allocation2 + $0x28] sm:$0xf] }
 0xf7f   : > { %v12015_v53 = vsel %vm11999_vm4, %v11991_v6, %v12007_v29  ;;  %vm12000_vm3 = vcmp.ge.f32.partialorder %v11992_v45, 0.0  ;;  %v12008_v57 = vmul.f32 0.01, %v11992_v45 }
 0xf80   : > { %v12128_v37 = vsel %vm20905_vm6, %v12051_v19, %v12127_v27  ;;  %v12133_v44 = vsel %vm20910_vm2, %v12052_v50, %v12132_v21  ;;  %v12059_v1 = vor.u32 %v12057_v2, %v12056_v61  ;;  %v12060_v33 = vrot.slane %v12056_v61, 4  ;;  %v11961_v52 = vpop.f32.mrb[24].mxu0 }
 0xf81   : > { %12129 = vst [vmem:[#allocation2 + $0x8] sm:$0xf] %v12128_v37  ;;  %12134 = vst [vmem:[#allocation2 + $0xc] sm:$0x1] %v12133_v44  ;;  %v14210_v60 = vpack.c.bf16 %v12015_v53, %v12015_v53  ;;  %v12016_v63 = vsel %vm12000_vm3, %v11992_v45, %v12008_v57  ;;  %v11980_v34 = vadd.f32 %v11961_v52, %v20877_v16  ;;  %v11963_v11 = vpop.f32.mrb[25].mxu0  ;;  %v16078_v16 = vld [vmem:[%s21345_s2 + $0xe28] sm:$0xff]  }
 0xf82   : > { %v12136_v49 = vsel %vm20905_vm6, %v12059_v1, %v12135_v8  ;;  %v12139_v59 = vsel %vm20910_vm2, %v12060_v33, %v12138_v36  ;;  %v14211_v22 = vpack.c.bf16 %v12016_v63, %v12016_v63  ;;  %v11964_v13 = vpop.f32.mrb[26].mxu0  ;;  %15247 = vmatprep.subr.bf16.mxu1 %v16078_v16 }
 0xf83   : > { %12137 = vst [vmem:[#allocation2 + $0x10] sm:$0xf] %v12136_v49  ;;  %12140 = vst [vmem:[#allocation2 + $0x14] sm:$0x1] %v12139_v59  ;;  %v12062_v25 = vshrl.u32 %v14210_v60, 16  ;;  %v11993_v17 = vadd.f32 %v20888_v32, %v11980_v34  ;;  %v11981_v42 = vadd.f32 %v11964_v13, %v20879_v54  ;;  %v11966_v24 = vpop.f32.mrb[27].mxu0  ;;  %15248 = vmatpush3.bf16.msra.mxu1 %v16078_v16 }
 0xf84   : > { %v12065_v5 = vshll.u32 %v14210_v60, 16  ;;  %v12070_v55 = vshrl.u32 %v14211_v22, 16  ;;  %v12073_v9 = vshll.u32 %v14211_v22, 16 }
 0xf85   : > { %v12064_v26 = vrot.slane %v12062_v25, 7  ;;  %vm12001_vm1 = vcmp.ge.f32.partialorder %v11993_v17, 0.0  ;;  %v12009_v12 = vmul.f32 0.01, %v11993_v17  ;;  %v11994_v54 = vadd.f32 %v20888_v32, %v11981_v42 }
 0xf86   : > { %v12072_v20 = vrot.slane %v12070_v55, 7 }
 0xf87   : > { %v12067_v6 = vor.u32 %v12065_v5, %v12064_v26  ;;  %v12068_v43 = vrot.slane %v12064_v26, 4  ;;  %v12017_v7 = vsel %vm12001_vm1, %v11993_v17, %v12009_v12  ;;  %vm12002_vm7 = vcmp.ge.f32.partialorder %v11994_v54, 0.0  ;;  %v12156_v17 = vld [vmem:[#allocation2 + $0x2c] sm:$0x1] }
 0xf88   : > { %v12075_v18 = vor.u32 %v12073_v9, %v12072_v20  ;;  %v12076_v51 = vrot.slane %v12072_v20, 4  ;;  %v14212_v10 = vpack.c.bf16 %v12017_v7, %v12017_v7  ;;  %v12010_v35 = vmul.f32 0.01, %v11994_v54  ;;  %v11969_v29 = vpop.f32.mrb[28].mxu0  ;;  %v20942_v45 = vld [vmem:[#allocation2 + $0xc] sm:$0x1] }
 0xf89   : > { %v12142_v48 = vsel %vm20905_vm6, %v12067_v6, %v12141_v3  ;;  %v12145_v19 = vsel %vm20910_vm2, %v12068_v43, %v12144_v47  ;;  %v11982_v50 = vadd.f32 %v11969_v29, %v20881_v4  ;;  %v11971_v27 = vpop.f32.mrb[29].mxu0  ;;  %v12338_v61 = vld [vmem:[#allocation2 + $0x8] sm:$0xe]  ;;  %v12373_v2 = vrot.slane %v20942_v45, 5  ;;  %v12162_v3 = vld [vmem:[#allocation2 + $0x34] sm:$0x1] }
 0xf8a   : > { %v20950_v21 = vld [vmem:[#allocation2 + $0x8] sm:$0xf]  ;;  %12143 = vst [vmem:[#allocation2 + $0x18] sm:$0xf] %v12142_v48  ;;  %12146 = vst [vmem:[#allocation2 + $0x1c] sm:$0x1] %v12145_v19  ;;  %v12148_v53 = vsel %vm20905_vm6, %v12075_v18, %v12147_v31  ;;  %v12151_v57 = vsel %vm20910_vm2, %v12076_v51, %v12150_v58  ;;  %v12018_v4 = vsel %vm12002_vm7, %v11994_v54, %v12010_v35 }
 0xf8b   : > { %v12078_v38 = vshrl.u32 %v14212_v10, 16  ;;  %v12081_v37 = vshll.u32 %v14212_v10, 16  ;;  %v11972_v44 = vpop.f32.mrb[30].mxu0  ;;  %12149 = vst [vmem:[#allocation2 + $0x20] sm:$0xf] %v12148_v53  ;;  %v11995_v1 = vadd.f32 %v20888_v32, %v11982_v50  ;;  %v14065_v8 = vrot.slane %v12338_v61, 9 }
 0xf8c   : > { %12152 = vst [vmem:[#allocation2 + $0x24] sm:$0x1] %v12151_v57  ;;  %v11983_v33 = vadd.f32 %v11972_v44, %v20883_v23  ;;  %v11974_v52 = vpop.f32.mrb[31].mxu0  ;;  %v14213_v60 = vpack.c.bf16 %v12018_v4, %v12018_v4  ;;  %v12212_v63 = vshrl.u32 %v20950_v21, 16  ;;  %v12215_v34 = vshll.u32 %v20950_v21, 16  ;;  %v16080_v43 = vld [vmem:[%s21345_s2 + $0xe30] sm:$0xff]  }
 0xf8d   : > { %v12080_v36 = vrot.slane %v12078_v38, 7  ;;  %vm12003_vm11 = vcmp.ge.f32.partialorder %v11995_v1, 0.0  ;;  %v12011_v11 = vmul.f32 0.01, %v11995_v1  ;;  %v12374_v59 = vsel %vm16420_vm9, %v14065_v8, %v12373_v2  ;;  %v12159_v54 = vld [vmem:[#allocation2 + $0x30] sm:$0xf]  ;;  %15249 = vmatprep.subr.bf16.mxu1 %v16080_v43 }
 0xf8e   : > { %v11996_v49 = vadd.f32 %v20888_v32, %v11983_v33  ;;  %v12086_v25 = vshrl.u32 %v14213_v60, 16  ;;  %v12089_v23 = vshll.u32 %v14213_v60, 16  ;;  %v14084_v16 = vcombine.low %v20934_v30, %v12374_v59  ;;  %v20984_v10 = vld [vmem:[#allocation2 + $0x4c] sm:$0x1]  ;;  %v20988_v19 = vld [vmem:[#allocation2 + $0x10] sm:$0xf]  ;;  %15250 = vmatpush3.bf16.msra.mxu1 %v16080_v43 }
 0xf8f   : > { %v12083_v22 = vor.u32 %v12081_v37, %v12080_v36  ;;  %v12084_v13 = vrot.slane %v12080_v36, 4  ;;  %v12019_v42 = vsel %vm12003_vm11, %v11995_v1, %v12011_v11  ;;  %v12214_v30 = vrot.slane %v12212_v63, 4  ;;  %v12165_v57 = vld [vmem:[#allocation2 + $0x38] sm:$0xf]  ;;  %v12168_v38 = vld [vmem:[#allocation2 + $0x3c] sm:$0x1] }
 0xf90   : > { %vm12004_vm13 = vcmp.ge.f32.partialorder %v11996_v49, 0.0  ;;  %v12012_v24 = vmul.f32 0.01, %v11996_v49  ;;  %v12088_v55 = vrot.slane %v12086_v25, 7  ;;  %v14214_v26 = vpack.c.bf16 %v12019_v42, %v12019_v42  ;;  %v20969_v12 = vpop.f32.mrb[32].mxu0  ;;  %12472 = vrot.lane.b32.xlu1 %v14084_v16, %s16183_s28 }
 0xf91   : > { %v12154_v5 = vsel %vm20905_vm6, %v12083_v22, %v12153_v0  ;;  %v12157_v32 = vsel %vm20910_vm2, %v12084_v13, %v12156_v17  ;;  %v20972_v20 = vpop.f32.mrb[33].mxu0  ;;  %v12217_v9 = vrot.slane %v12215_v34, 5  ;;  %v12327_v6 = vshll.u32 %v20927_v62, 16  ;;  %v20999_v53 = vld [vmem:[#allocation2 + $0x18] sm:$0xf] }
 0xf92   : > { %12155 = vst [vmem:[#allocation2 + $0x28] sm:$0xf] %v12154_v5  ;;  %12158 = vst [vmem:[#allocation2 + $0x2c] sm:$0x1] %v12157_v32  ;;  %v12020_v47 = vsel %vm12004_vm13, %v11996_v49, %v12012_v24  ;;  %v12091_v31 = vor.u32 %v12089_v23, %v12088_v55  ;;  %v12092_v58 = vrot.slane %v12088_v55, 4  ;;  %v12094_v7 = vshrl.u32 %v14214_v26, 16 }
 0xf93   : > { %v20978_v18 = vpop.f32.mrb[34].mxu0  ;;  %v12210_v51 = vsel %vm16454_vm12, %v20939_v41, %v20936_v14  ;;  %v14215_v35 = vpack.c.bf16 %v12020_v47, %v12020_v47  ;;  %v12218_v48 = vor.u32 %v12217_v9, %v12214_v30  ;;  %v20992_v50 = vrot.slane %v12324_v56, 4  ;;  %v21002_v52 = vld [vmem:[#allocation2 + $0x14] sm:$0x1]  ;;  %v21006_v11 = vld [vmem:[#allocation2 + $0x1c] sm:$0x1] }
 0xf94   : > { %v20986_v29 = vpop.f32.mrb[35].mxu0  ;;  %v12333_v27 = vshll.u32 %v20984_v10, 16  ;;  %v12160_v61 = vsel %vm20905_vm6, %v12091_v31, %v12159_v54  ;;  %v12163_v14 = vsel %vm20910_vm2, %v12092_v58, %v12162_v3  ;;  %v12096_v41 = vrot.slane %v12094_v7, 7  ;;  %v12171_v22 = vld [vmem:[#allocation2 + $0x40] sm:$0xf]  ;;  %v16082_v9 = vld [vmem:[%s21345_s2 + $0xe38] sm:$0xff]  }
 0xf95   : > { %v12097_v2 = vshll.u32 %v14214_v26, 16  ;;  %12161 = vst [vmem:[#allocation2 + $0x30] sm:$0xf] %v12160_v61  ;;  %12164 = vst [vmem:[#allocation2 + $0x34] sm:$0x1] %v12163_v14  ;;  %v12102_v56 = vshrl.u32 %v14215_v35, 16  ;;  %15251 = vmatprep.subr.bf16.mxu1 %v16082_v9 }
 0xf96   : > { %v12219_v37 = vrot.slane %v12218_v48, 4  ;;  %v12221_v44 = vshll.u32 %v20942_v45, 16  ;;  %v12329_v4 = vrot.slane %v12327_v6, 5  ;;  %v12100_v33 = vrot.slane %v12096_v41, 4  ;;  %v12174_v13 = vld [vmem:[#allocation2 + $0x44] sm:$0x1]  ;;  %15252 = vmatpush3.bf16.msra.mxu1 %v16082_v9 }
 0xf97   : > { %v12099_v1 = vor.u32 %v12097_v2, %v12096_v41  ;;  %v12226_v8 = vshrl.u32 %v20988_v19, 16  ;;  %v12229_v36 = vshll.u32 %v20988_v19, 16  ;;  %v12104_v60 = vrot.slane %v12102_v56, 7  ;;  %v21015_v17 = vld [vmem:[#allocation2 + $0x24] sm:$0x1] }
 0xf98   : > { %v12105_v63 = vshll.u32 %v14215_v35, 16  ;;  %v12223_v34 = vrot.slane %v12221_v44, 5  ;;  %v12240_v49 = vshrl.u32 %v20999_v53, 16  ;;  %v12169_v45 = vsel %vm20910_vm2, %v12100_v33, %v12168_v38  ;;  %v21013_v0 = vpop.f32.mrb[36].mxu0  ;;  %v12341_v55 = vld [vmem:[#allocation2 + $0x20] sm:$0xe] }
 0xf99   : > { %v12166_v59 = vsel %vm20905_vm6, %v12099_v1, %v12165_v57  ;;  %v12228_v25 = vrot.slane %v12226_v8, 4  ;;  %v12231_v23 = vrot.slane %v12229_v36, 5  ;;  %12170 = vst [vmem:[#allocation2 + $0x3c] sm:$0x1] %v12169_v45  ;;  %v12108_v24 = vrot.slane %v12104_v60, 4  ;;  %v21019_v5 = vpop.f32.mrb[37].mxu0 }
 0xf9a   : > { %12167 = vst [vmem:[#allocation2 + $0x38] sm:$0xf] %v12166_v59  ;;  %v12107_v42 = vor.u32 %v12105_v63, %v12104_v60  ;;  %v12224_v16 = vsel %vm16454_vm12, %v12219_v37, %v12223_v34  ;;  %v12235_v32 = vshll.u32 %v21002_v52, 16  ;;  %v21022_v54 = vpop.f32.mrb[38].mxu0  ;;  %v21024_v47 = vld [vmem:[#allocation2 + $0x2c] sm:$0x1]  ;;  %v12330_v7 = vor.u32 %v12329_v4, %v20992_v50 }
 0xf9b   : > { %v14079_v26 = vcombine.low %v12210_v51, %v12224_v16  ;;  %v12232_v3 = vor.u32 %v12231_v23, %v12228_v25  ;;  %v12342_v30 = vld [vmem:[#allocation2 + $0x28] sm:$0xe]  ;;  %v12175_v43 = vsel %vm20910_vm2, %v12108_v24, %v12174_v13  ;;  %v21033_v31 = vpop.f32.mrb[39].mxu0  ;;  %v21035_v58 = vld [vmem:[#allocation2 + $0x20] sm:$0xf]  ;;  %v21038_v51 = vrot.slane %v12333_v27, 5 }
 0xf9c   : > { %v12172_v6 = vsel %vm20905_vm6, %v12107_v42, %v12171_v22  ;;  %12176 = vst [vmem:[#allocation2 + $0x44] sm:$0x1] %v12175_v43  ;;  %v12242_v48 = vrot.slane %v12240_v49, 4  ;;  %v12243_v46 = vshll.u32 %v20999_v53, 16  ;;  %v12249_v28 = vshll.u32 %v21006_v11, 16  ;;  %v16083_v37 = vld [vmem:[%s21345_s2 + $0xe40] sm:$0xff]  }
 0xf9d   : > { %12173 = vst [vmem:[#allocation2 + $0x40] sm:$0xf] %v12172_v6  ;;  %12447 = vrot.lane.b32.xlu0 %v14079_v26, %s16185_s11  ;;  %v12233_v35 = vrot.slane %v12232_v3, 4  ;;  %v14068_v61 = vrot.slane %v12341_v55, 9  ;;  %v12385_v14 = vrot.slane %v21015_v17, 5  ;;  %v14069_v41 = vrot.slane %v12342_v30, 9  ;;  %15253 = vmatprep.subr.bf16.mxu1 %v16083_v37 }
 0xf9e   : > { %v12389_v50 = vrot.slane %v21024_v47, 5  ;;  %v21045_v27 = vld [vmem:[#allocation2 + $0x28] sm:$0xf]  ;;  %v12237_v2 = vrot.slane %v12235_v32, 5  ;;  %v12245_v57 = vrot.slane %v12243_v46, 5  ;;  %v12254_v38 = vshrl.u32 %v21035_v58, 16  ;;  %15254 = vmatpush3.bf16.msra.mxu1 %v16083_v37 }
 0xf9f   : > { %v12405_v56 = vrot.slane %v20984_v10, 5  ;;  %v12257_v4 = vshll.u32 %v21035_v58, 16  ;;  %v12263_v1 = vshll.u32 %v21015_v17, 16  ;;  %v21058_v33 = vrot.slane %v12330_v7, 4  ;;  %v12339_v34 = vld [vmem:[#allocation2 + $0x10] sm:$0xe] }
 0xfa0   : > { %v21054_v44 = vsel %vm16420_vm9, %v14069_v41, %v12389_v50  ;;  %v12238_v8 = vsel %vm16454_vm12, %v12233_v35, %v12237_v2  ;;  %v12246_v36 = vor.u32 %v12245_v57, %v12242_v48  ;;  %v12256_v60 = vrot.slane %v12254_v38, 4  ;;  %v12340_v49 = vld [vmem:[#allocation2 + $0x18] sm:$0xe]  ;;  %v21066_v25 = vld [vmem:[#allocation2 + $0x30] sm:$0xf]  ;;  %v16110_v10 = vld [vmem:[%s16339_s14] sm:$0xff] }
 0xfa1   : > { %v12268_v63 = vshrl.u32 %v21045_v27, 16  ;;  %v12251_v59 = vrot.slane %v12249_v28, 5  ;;  %v12386_v45 = vsel %vm16420_vm9, %v14068_v61, %v12385_v14  ;;  %v12259_v22 = vrot.slane %v12257_v4, 5  ;;  %v21070_v3 = vld [vmem:[#allocation2 + $0x38] sm:$0xf]  ;;  %v16085_v14 = vld [vmem:[%s21345_s2 + $0xe48] sm:$0xff]  }
 0xfa2   : > { %v12271_v13 = vshll.u32 %v21045_v27, 16  ;;  %v12247_v23 = vrot.slane %v12246_v36, 4  ;;  %v14086_v17 = vcombine.low %v12386_v45, %v21054_v44  ;;  %v12277_v24 = vshll.u32 %v21024_v47, 16  ;;  %v21075_v43 = vld [vmem:[#allocation2 + $0x34] sm:$0x1]  ;;  %15255 = vmatprep.subr.bf16.mxu1 %v16085_v14 }
 0xfa3   : > { %v12270_v42 = vrot.slane %v12268_v63, 4  ;;  %v12260_v16 = vor.u32 %v12259_v22, %v12256_v60  ;;  %v12265_v32 = vrot.slane %v12263_v1, 5  ;;  %v14067_v26 = vrot.slane %v12340_v49, 9  ;;  %v21078_v47 = vld [vmem:[#allocation2 + $0x3c] sm:$0x1]  ;;  %15256 = vmatpush3.bf16.msra.mxu1 %v16085_v14 }
 0xfa4   : > { %v12273_v55 = vrot.slane %v12271_v13, 5  ;;  %v12252_v30 = vsel %vm16454_vm12, %v12247_v23, %v12251_v59  ;;  %v14066_v9 = vrot.slane %v12339_v34, 9  ;;  %v12381_v6 = vrot.slane %v21006_v11, 5  ;;  %v21081_v61 = vld [vmem:[#allocation2 + $0x48] sm:$0xe] }
 0xfa5   : > { %v12282_v7 = vshrl.u32 %v21066_v25, 16  ;;  %v14080_v35 = vcombine.low %v12238_v8, %v12252_v30  ;;  %v12261_v48 = vrot.slane %v12260_v16, 4  ;;  %v12285_v28 = vshll.u32 %v21066_v25, 16  ;;  %v21088_v57 = vld [vmem:[#allocation2 + $0x40] sm:$0xf] }
 0xfa6   : > { %v12274_v46 = vor.u32 %v12273_v55, %v12270_v42  ;;  %v12279_v41 = vrot.slane %v12277_v24, 5  ;;  %v12377_v11 = vrot.slane %v21002_v52, 5  ;;  %v12296_v2 = vshrl.u32 %v21070_v3, 16  ;;  %v12195_v1 = vld [vmem:[#allocation2 + $0x44] sm:$0x1]  ;;  %v21097_v52 = vld [vmem:[%s21345_s2 + $0xdf0] sm:$0xff]  }
 0xfa7   : > { %v12284_v50 = vrot.slane %v12282_v7, 4  ;;  %12449 = vrot.lane.b32.xlu1 %v14080_v35, %s16185_s11  ;;  %v12382_v37 = vsel %vm16420_vm9, %v14067_v26, %v12381_v6  ;;  %v12287_v44 = vrot.slane %v12285_v28, 5  ;;  %v12291_v4 = vshll.u32 %v21075_v43, 16  ;;  %15265 = vmatprep.subr.bf16.mxu1 %v21097_v52  ;;  %v12344_v55 = vld [vmem:[#allocation2 + $0x38] sm:$0xe] }
 0xfa8   : > { %v12275_v38 = vrot.slane %v12274_v46, 4  ;;  %v12266_v8 = vsel %vm16454_vm12, %v12261_v48, %v12265_v32  ;;  %v12298_v36 = vrot.slane %v12296_v2, 4  ;;  %v12299_v60 = vshll.u32 %v21070_v3, 16  ;;  %v12345_v26 = vld [vmem:[#allocation2 + $0x40] sm:$0xe] }
 0xfa9   : > { %v12305_v63 = vshll.u32 %v21078_v47, 16  ;;  %v12288_v49 = vor.u32 %v12287_v44, %v12284_v50  ;;  %v12310_v59 = vshrl.u32 %v21088_v57, 16  ;;  %v12313_v45 = vshll.u32 %v21088_v57, 16 }
 0xfaa   : > { %v12280_v34 = vsel %vm16454_vm12, %v12275_v38, %v12279_v41  ;;  %v12301_v13 = vrot.slane %v12299_v60, 5  ;;  %v12319_v23 = vshll.u32 %v12195_v1, 16  ;;  %v14073_v42 = vrot.slane %v21081_v61, 9  ;;  %v16115_v60 = vld [vmem:[%s16339_s14 + $0x28] sm:$0xff] }
 0xfab   : > { %v14081_v22 = vcombine.low %v12266_v8, %v12280_v34  ;;  %12476 = vrot.lane.b32.xlu1 %v14086_v17, %s16183_s28  ;;  %v12378_v24 = vsel %vm16420_vm9, %v14066_v9, %v12377_v11  ;;  %v12312_v16 = vrot.slane %v12310_v59, 4  ;;  %v12315_v32 = vrot.slane %v12313_v45, 5  ;;  %v12343_v9 = vld [vmem:[#allocation2 + $0x30] sm:$0xe]  ;;  %v16117_v34 = vld [vmem:[%s16339_s14 + $0x38] sm:$0xff] }
 0xfac   : > { %v14085_v30 = vcombine.low %v12378_v24, %v12382_v37  ;;  %v12289_v6 = vrot.slane %v12288_v49, 4  ;;  %v12302_v7 = vor.u32 %v12301_v13, %v12298_v36  ;;  %v12336_v35 = vsel %vm16454_vm12, %v21058_v33, %v21038_v51  ;;  %v16112_v8 = vld [vmem:[%s16339_s14 + $0x10] sm:$0xff]  ;;  %v16114_v36 = vld [vmem:[%s16339_s14 + $0x20] sm:$0xff] }
 0xfad   : > { %12451 = vrot.lane.b32.xlu0 %v14081_v22, %s16185_s11  ;;  %v12293_v48 = vrot.slane %v12291_v4, 5  ;;  %v12307_v46 = vrot.slane %v12305_v63, 5  ;;  %v12316_v17 = vor.u32 %v12315_v32, %v12312_v16  ;;  %v12321_v28 = vrot.slane %v12319_v23, 5  ;;  %v16116_v63 = vld [vmem:[%s16339_s14 + $0x30] sm:$0xff] }
 0xfae   : > { %v12303_v61 = vrot.slane %v12302_v7, 4  ;;  %v14071_v14 = vrot.slane %v12344_v55, 9  ;;  %v12397_v41 = vrot.slane %v21078_v47, 5  ;;  %v14072_v11 = vrot.slane %v12345_v26, 9 }
 0xfaf   : > { %v12317_v50 = vrot.slane %v12316_v17, 4  ;;  %v12401_v2 = vrot.slane %v12195_v1, 5  ;;  %v14075_v38 = vcombine.low %v20988_v19, %v20999_v53  ;;  %v14076_v37 = vcombine.low %v21035_v58, %v21045_v27  ;;  %v16089_v17 = vld [vmem:[%s21345_s2 + $0xdf8] sm:$0xff]  }
 0xfb0   : > { %v12294_v51 = vsel %vm16454_vm12, %v12289_v6, %v12293_v48  ;;  %v12308_v33 = vsel %vm16454_vm12, %v12303_v61, %v12307_v46  ;;  %v14077_v47 = vcombine.low %v21066_v25, %v21070_v3  ;;  %v14070_v19 = vrot.slane %v12343_v9, 9 }
 0xfb1   : > { %12474 = vrot.lane.b32.xlu0 %v14085_v30, %s16183_s28  ;;  %v14082_v44 = vcombine.low %v12294_v51, %v12308_v33  ;;  %v12322_v4 = vsel %vm16454_vm12, %v12317_v50, %v12321_v28  ;;  %v12393_v53 = vrot.slane %v21075_v43, 5  ;;  %v12398_v27 = vsel %vm16420_vm9, %v14071_v14, %v12397_v41  ;;  %v16092_v51 = vld [vmem:[%s21345_s2 + $0xe10] sm:$0xff]   ;;  %v16093_v33 = vld [vmem:[%s21345_s2 + $0xe18] sm:$0xff]  }
 0xfb2   : > { %v14083_v58 = vcombine.low %v12322_v4, %v12336_v35  ;;  %v12402_v1 = vsel %vm16420_vm9, %v14072_v11, %v12401_v2  ;;  %v12406_v25 = vsel %vm16420_vm9, %v14073_v42, %v12405_v56  ;;  %v16111_v56 = vld [vmem:[%s16339_s14 + $0x8] sm:$0xff]  ;;  %v14074_v22 = vcombine.low %v20892_v15, %v20950_v21  ;;  %v16090_v11 = vld [vmem:[%s21345_s2 + $0xe00] sm:$0xff]   ;;  %s14216_s14 = sshll.u32 %s16235_s19, 10  ;;  %s21302_s19 = scalar_lea.sflag [#allocation4], %s203_s29 }
 0xfb3   : > { %v12394_v39 = vsel %vm16420_vm9, %v14070_v19, %v12393_v53  ;;  %v14088_v43 = vcombine.low %v12402_v1, %v12406_v25  ;;  %v14078_v28 = vcombine.low %v21088_v57, %v20927_v62  ;;  %v16096_v4 = vld [vmem:[%s21345_s2 + $0xe60] sm:$0xff]   ;;  %v16097_v19 = vld [vmem:[%s21345_s2 + $0xe68] sm:$0xff]   ;;  %v16098_v53 = vld [vmem:[%s21345_s2 + $0xe70] sm:$0xff]   ;;  %s21292_s5 = scalar_lea.hbm %s21347_s4, %s14216_s14 }
 0xfb4   : > { %12455 = vrot.lane.b32.xlu1 %v14083_v58, %s16185_s11  ;;  %v14087_v3 = vcombine.low %v12394_v39, %v12398_v27  ;;  %v16099_v58 = vld [vmem:[%s21345_s2 + $0xe78] sm:$0xff]   ;;  %v14119_v27 = vld [vmem:[%s21346_s3 + $0xb] ss:$0 sm:$0xff]  ;;  %v21237_v25 = vld [vmem:[%s21346_s3 + $0xc] ss:$0 sm:$0xff] }
 0xfb5   : > { %12453 = vrot.lane.b32.xlu0 %v14082_v44, %s16185_s11  ;;  %v16095_v44 = vld [vmem:[%s21345_s2 + $0xe58] sm:$0xff]  }
 0xfb8   : > { %12480 = vrot.lane.b32.xlu1 %v14088_v43, %s16183_s28 }
 0xfb9   : > { %12478 = vrot.lane.b32.xlu0 %v14087_v3, %s16183_s28  ;;  %s13119_s28 = sshll.u32 %s21263_s30, 4  ;;  %s21294_s28 = int_to_ptr.vmem [resolvable:$true] %s13119_s28 }
 0xfba   : > { %s16118_s8 = scalar_lea.vmem %s21294_s28, 1024  ;;  %p16125_p0 = scmp.lt.s32.totalorder %s21294_s28, %s16123_s10 }
 0xfbb   : > { %p16119_p11 = scmp.ne.s32.totalorder %s21294_s28, %s16118_s8 }
 0xfbc   : > { %13067 = vrot.lane.b32.xlu1 %v16111_v56, %s16185_s11 }
 0xfbd   : > { %13065 = vrot.lane.b32.xlu0 %v16110_v10, %s16185_s11  ;;  %p16120_p12 = pnand %p16119_p11, %p16252_p5 }
 0xfbf   : > { %p16121_p13 = pneg %p16120_p12 }
 0xfc0   : > { %13071 = vrot.lane.b32.xlu1 %v16113_v40, %s16185_s11  ;;  %v13019_v40 = vadd.f32 %v20969_v12, %v21237_v25 }
 0xfc1   : > { %13069 = vrot.lane.b32.xlu0 %v16112_v8, %s16185_s11 }
 0xfc4   : > { %13075 = vrot.lane.b32.xlu1 %v16115_v60, %s16185_s11 }
 0xfc5   : > { %13073 = vrot.lane.b32.xlu0 %v16114_v36, %s16185_s11 }
 0xfc8   : > { %13079 = vrot.lane.b32.xlu1 %v16117_v34, %s16185_s11  ;;  %v13011_v34 = vadd.f32 %v21237_v25, %v20972_v20 }
 0xfc9   : > { %13077 = vrot.lane.b32.xlu0 %v16116_v63, %s16185_s11  ;;  %s16124_s11 = scalar_lea.vmem %s16123_s10, 2048 }
 0xfca   : > { %p16126_p1 = scmp.lt.s32.totalorder %s16124_s11, %s16118_s8 }
 0xfcc   : > { %p16127_p2 = por %p16126_p1, %p16125_p0 }
 0xfce   : > { %p16128_p3 = pnand %p16127_p2, %p16121_p13 }
0x1002   : > { %v12473_v49 = vpop.permute.xlu1 %12472 }
0x100f   : > { %v12448_v59 = vpop.permute.xlu0 %12447 }
0x1010   : > { %v12484_v13 = vsel %vm2537_vm14, %v14074_v22, %v12448_v59  ;;  %v13022_v22 = vadd.f32 %v20978_v18, %v21237_v25 }
0x1011   : > { %v12498_v16 = vsel %vm2296_vm0, %v12484_v13, %v12473_v49 }
0x1012   : > { %v12536_v6 = vrot.slane %v12498_v16, 4 }
0x1019   : > { %v12450_v45 = vpop.permute.xlu1 %12449 }
0x101a   : > { %v12487_v55 = vsel %vm2537_vm14, %v14075_v38, %v12450_v45 }
0x101d   : > { %v12477_v24 = vpop.permute.xlu1 %12476 }
0x101f   : > { %v12452_v23 = vpop.permute.xlu0 %12451 }
0x1020   : > { %v12490_v42 = vsel %vm2537_vm14, %v14076_v37, %v12452_v23  ;;  %v297_v23 = vld [vmem:[%s21244_s27 + $0x10] sm:$0xff] }
0x1021   : > { %v21168_v32 = vsel %vm2296_vm0, %v12490_v42, %v12477_v24 }
0x1022   : > { %v12539_v7 = vrot.slane %v21168_v32, 4 }
0x1023   : > { %v12475_v26 = vpop.permute.xlu0 %12474 }
0x1024   : > { %v12500_v30 = vsel %vm2296_vm0, %v12487_v55, %v12475_v26  ;;  %v13014_v55 = vadd.f32 %v21237_v25, %v20986_v29 }
0x1025   : > { %v12537_v15 = vrot.slane %v12500_v30, 4 }
0x1026   : > { %v12456_v46 = vpop.permute.xlu1 %12455 }
0x1027   : > { %v12454_v21 = vpop.permute.xlu0 %12453  ;;  %v12538_v35 = vsel %vm408_vm5, %v12536_v6, %v12537_v15  ;;  %v12540_v48 = vsel %vm408_vm5, %v12537_v15, %v12539_v7  ;;  %v12496_v9 = vsel %vm2537_vm14, %v14078_v28, %v12456_v46  ;;  %v298_v6 = vld [vmem:[%s21244_s27 + $0x18] sm:$0xff] }
0x1028   : > { %15257 = vmatprep.mubr.msk.bf16.mxu1 %vm2275_vm15, %v12538_v35  ;;  %v12493_v61 = vsel %vm2537_vm14, %v14077_v47, %v12454_v21  ;;  %v16094_v47 = vld [vmem:[%s21345_s2 + $0xe50] sm:$0xff]  }
0x1029   : > { %15258 = vmatmul.mubr.msk.bf16.vlgmr.msra.gmra.mrb[200].mxu1 %vm2275_vm15, %v12540_v48 }
0x102a   : > { %15266 = vmatpush3.bf16.msra.mxu1 %v21097_v52  ;;  %v12481_v41 = vpop.permute.xlu1 %12480  ;;  %v16091_v52 = vld [vmem:[%s21345_s2 + $0xe08] sm:$0xff]  }
0x102b   : > { %v12479_v14 = vpop.permute.xlu0 %12478  ;;  %15267 = vmatprep.subr.bf16.mxu1 %v16089_v17  ;;  %v12506_v2 = vsel %vm2296_vm0, %v12496_v9, %v12481_v41 }
0x102c   : > { %v12504_v50 = vsel %vm2296_vm0, %v12493_v61, %v12479_v14  ;;  %v12543_v37 = vrot.slane %v12506_v2, 4  ;;  %v13035_v61 = vadd.f32 %v21013_v0, %v21237_v25 }
0x102d   : > { %v12541_v38 = vrot.slane %v12504_v50, 4 }
0x102e   : > { %15268 = vmatpush3.bf16.msra.mxu1 %v16089_v17  ;;  %v13068_v3 = vpop.permute.xlu1 %13067 }
0x102f   : > { %v12542_v62 = vsel %vm408_vm5, %v12539_v7, %v12541_v38  ;;  %15269 = vmatprep.subr.bf16.mxu1 %v16090_v11  ;;  %v12544_v57 = vsel %vm408_vm5, %v12541_v38, %v12543_v37  ;;  %v13066_v1 = vpop.permute.xlu0 %13065  ;;  %v296_v7 = vld [vmem:[%s21244_s27 + $0x8] sm:$0xff] }
0x1030   : > { %15261 = vmatprep.mubr.msk.bf16.mxu1 %vm2275_vm15, %v12542_v62 }
0x1031   : > { %15262 = vmatmul.mubr.msk.bf16.gmra.mrb[204].mxu1 %vm2275_vm15, %v12544_v57 }
0x1032   : > { %15270 = vmatpush3.bf16.msra.mxu1 %v16090_v11  ;;  %15277 = vmatprep.mubr.msk.bf16.mxu1 %vm2275_vm15, %v12498_v16  ;;  %v295_v16 = vld [vmem:[%s21244_s27] sm:$0xff] }
0x1033   : > { %15271 = vmatprep.subr.bf16.mxu1 %v16091_v52  ;;  %v13070_v45 = vpop.permute.xlu0 %13069 }
0x1036   : > { %15272 = vmatpush3.bf16.msra.mxu1 %v16091_v52 }
0x1037   : > { %15273 = vmatprep.subr.bf16.mxu1 %v16092_v51  ;;  %v13074_v29 = vpop.permute.xlu0 %13073 }
0x103a   : > { %15274 = vmatpush3.bf16.msra.mxu1 %v16092_v51  ;;  %v13027_v51 = vadd.f32 %v21237_v25, %v21019_v5 }
0x103b   : > { %15275 = vmatprep.subr.bf16.mxu1 %v16093_v33 }
0x103e   : > { %15276 = vmatpush3.bf16.msra.mxu1 %v16093_v33 }
0x103f   : > { %15285 = vmatprep.subr.bf16.mxu1 %v16094_v47 }
0x1041   : > { %15278 = vmatmul.mubr.msk.bf16.vlgmr.msra.gmra.mrb[200].mxu1 %vm2275_vm15, %v12500_v30 }
0x1042   : > { %15281 = vmatprep.mubr.msk.bf16.mxu1 %vm2275_vm15, %v21168_v32  ;;  %15286 = vmatpush3.bf16.msra.mxu1 %v16094_v47 }
0x1043   : > { %15287 = vmatprep.subr.bf16.mxu1 %v16095_v44 }
0x1046   : > { %15288 = vmatpush3.bf16.msra.mxu1 %v16095_v44 }
0x1047   : > { %15289 = vmatprep.subr.bf16.mxu1 %v16096_v4 }
0x1049   : > { %15282 = vmatmul.mubr.msk.bf16.gmra.mrb[204].mxu1 %vm2275_vm15, %v12504_v50 }
0x104a   : > { %15290 = vmatpush3.bf16.msra.mxu1 %v16096_v4  ;;  %15297 = vmatprep.mubr.msk.bf16.mxu1 %vm2275_vm15, %v12500_v30 }
0x104b   : > { %15291 = vmatprep.subr.bf16.mxu1 %v16097_v19 }
0x104e   : > { %15292 = vmatpush3.bf16.msra.mxu1 %v16097_v19 }
0x104f   : > { %15293 = vmatprep.subr.bf16.mxu1 %v16098_v53 }
0x1052   : > { %15294 = vmatpush3.bf16.msra.mxu1 %v16098_v53  ;;  %v299_v53 = vld [vmem:[%s21244_s27 + $0x20] sm:$0xff] }
0x1053   : > { %15295 = vmatprep.subr.bf16.mxu1 %v16099_v58 }
0x1056   : > { %15296 = vmatpush3.bf16.msra.mxu1 %v16099_v58  ;;  %v301_v58 = vld [vmem:[%s21244_s27 + $0x30] sm:$0xff] }
0x1059   : > { %15298 = vmatmul.mubr.msk.bf16.vlgmr.msra.gmra.mrb[200].mxu1 %vm2275_vm15, %v21168_v32  ;;  %v13072_v32 = vpop.permute.xlu1 %13071 }
0x105a   : > { %15301 = vmatprep.mubr.msk.bf16.mxu1 %vm2275_vm15, %v12504_v50 }
0x105d   : > { %v13076_v52 = vpop.permute.xlu1 %13075 }
0x1061   : > { %15302 = vmatmul.mubr.msk.bf16.gmra.mrb[204].mxu1 %vm2275_vm15, %v12506_v2 }
0x112c   : > { %v15299_v39 = vpop.f32.mrb[200].mxu1 }
0x112d   : > { %v12897_v43 = vadd.f32 %v15299_v39, %v14119_v27  ;;  %v12851_v10 = vpop.f32.mrb[201].mxu1 }
0x112e   : > { %v12895_v56 = vadd.f32 %v14119_v27, %v12851_v10  ;;  %v15300_v8 = vpop.f32.mrb[202].mxu1  ;;  %v13078_v10 = vpop.permute.xlu0 %13077 }
0x112f   : > { %vm12905_vm5 = vcmp.ge.f32.partialorder %v12897_v43, 0.0  ;;  %v12913_v36 = vmul.f32 0.01, %v12897_v43  ;;  %v12898_v60 = vadd.f32 %v15300_v8, %v14119_v27  ;;  %v12854_v63 = vpop.f32.mrb[203].mxu1 }
0x1130   : > { %vm12903_vm9 = vcmp.ge.f32.partialorder %v12895_v56, 0.0  ;;  %v12911_v49 = vmul.f32 0.01, %v12895_v56  ;;  %v12896_v59 = vadd.f32 %v14119_v27, %v12854_v63 }
0x1131   : > { %v12921_v13 = vsel %vm12905_vm5, %v12897_v43, %v12913_v36  ;;  %vm12906_vm12 = vcmp.ge.f32.partialorder %v12898_v60, 0.0  ;;  %v12914_v12 = vmul.f32 0.01, %v12898_v60 }
0x1132   : > { %v12919_v42 = vsel %vm12903_vm9, %v12895_v56, %v12911_v49  ;;  %vm12904_vm15 = vcmp.ge.f32.partialorder %v12896_v59, 0.0  ;;  %v12912_v24 = vmul.f32 0.01, %v12896_v59  ;;  %v13043_v20 = vadd.f32 %v13019_v40, %v12921_v13  ;;  %v302_v56 = vld [vmem:[%s21244_s27 + $0x38] sm:$0xff] }
0x1133   : > { %v12922_v26 = vsel %vm12906_vm12, %v12898_v60, %v12914_v12  ;;  %v13041_v30 = vadd.f32 %v13011_v34, %v12919_v42  ;;  %v13080_v34 = vpop.permute.xlu1 %13079 }
0x1134   : > { %v12920_v18 = vsel %vm12904_vm15, %v12896_v59, %v12912_v24  ;;  %v15303_v15 = vpop.f32.mrb[204].mxu1  ;;  %v13051_v21 = vmul.f32 %v13043_v20, %v297_v23  ;;  %v13044_v35 = vadd.f32 %v13022_v22, %v12922_v26 }
0x1135   : > { %v13049_v48 = vmul.f32 %v13041_v30, %v295_v16  ;;  %v13042_v46 = vadd.f32 %v13014_v55, %v12920_v18  ;;  %v12901_v17 = vadd.f32 %v15303_v15, %v14119_v27  ;;  %v12867_v28 = vpop.f32.mrb[205].mxu1 }
0x1136   : > { %v13091_v9 = vadd.f32 %v13070_v45, %v13051_v21  ;;  %v12899_v14 = vadd.f32 %v14119_v27, %v12867_v28  ;;  %v15304_v41 = vpop.f32.mrb[206].mxu1  ;;  %v13052_v11 = vmul.f32 %v13044_v35, %v298_v6 }
0x1137   : > { %v13089_v50 = vadd.f32 %v13066_v1, %v13049_v48  ;;  %v13050_v2 = vmul.f32 %v13042_v46, %v296_v7  ;;  %vm12909_vm0 = vcmp.ge.f32.partialorder %v12901_v17, 0.0  ;;  %v12917_v38 = vmul.f32 0.01, %v12901_v17  ;;  %v12870_v37 = vpop.f32.mrb[207].mxu1 }
0x1138   : > { %13099 = vst.msk [vmem:[%s21263_s30 + $0x10] sm:$0xff] %vm2537_vm14, %v13091_v9  ;;  %vm12907_vm8 = vcmp.ge.f32.partialorder %v12899_v14, 0.0  ;;  %v12915_v0 = vmul.f32 0.01, %v12899_v14  ;;  %v12902_v62 = vadd.f32 %v15304_v41, %v14119_v27  ;;  %v12900_v57 = vadd.f32 %v14119_v27, %v12870_v37 }
0x1139   : > { %13097 = vst.msk [vmem:[%s21263_s30] sm:$0xff] %vm2537_vm14, %v13089_v50  ;;  %v13090_v33 = vadd.f32 %v13068_v3, %v13050_v2  ;;  %v12925_v47 = vsel %vm12909_vm0, %v12901_v17, %v12917_v38  ;;  %v13092_v44 = vadd.f32 %v13072_v32, %v13052_v11  ;;  %v13038_v27 = vadd.f32 %v21022_v54, %v21237_v25  ;;  %v300_v54 = vld [vmem:[%s21244_s27 + $0x28] sm:$0xff] }
0x113a   : > { %v12923_v4 = vsel %vm12907_vm8, %v12899_v14, %v12915_v0  ;;  %vm12910_vm10 = vcmp.ge.f32.partialorder %v12902_v62, 0.0  ;;  %v12918_v19 = vmul.f32 0.01, %v12902_v62  ;;  %vm12908_vm6 = vcmp.ge.f32.partialorder %v12900_v57, 0.0 }
0x113b   : > { %13098 = vst.msk [vmem:[%s21263_s30 + $0x8] sm:$0xff] %vm2537_vm14, %v13090_v33  ;;  %v12916_v5 = vmul.f32 0.01, %v12900_v57  ;;  %13100 = vst.msk [vmem:[%s21263_s30 + $0x18] sm:$0xff] %vm2537_vm14, %v13092_v44  ;;  %v13045_v1 = vadd.f32 %v13027_v51, %v12923_v4  ;;  %v13047_v39 = vadd.f32 %v13035_v61, %v12925_v47  ;;  %v13030_v3 = vadd.f32 %v21237_v25, %v21033_v31 }
0x113c   : > { %v12926_v43 = vsel %vm12910_vm10, %v12902_v62, %v12918_v19 }
0x113d   : > { %v12924_v8 = vsel %vm12908_vm6, %v12900_v57, %v12916_v5  ;;  %v13053_v40 = vmul.f32 %v13045_v1, %v299_v53  ;;  %v13055_v36 = vmul.f32 %v13047_v39, %v301_v58  ;;  %v13048_v60 = vadd.f32 %v13038_v27, %v12926_v43 }
0x113e   : > { %v13046_v63 = vadd.f32 %v13030_v3, %v12924_v8 }
0x113f   : > { %v13093_v49 = vadd.f32 %v13074_v29, %v13053_v40  ;;  %v13095_v31 = vadd.f32 %v13078_v10, %v13055_v36  ;;  %v13056_v25 = vmul.f32 %v13048_v60, %v302_v56 }
0x1140   : > { %v13054_v59 = vmul.f32 %v13046_v63, %v300_v54 }
0x1141   : > { %13101 = vst.msk [vmem:[%s21263_s30 + $0x20] sm:$0xff] %vm2537_vm14, %v13093_v49  ;;  %13103 = vst.msk [vmem:[%s21263_s30 + $0x30] sm:$0xff] %vm2537_vm14, %v13095_v31  ;;  %v13096_v45 = vadd.f32 %v13080_v34, %v13056_v25 }
0x1142   : > { %v13094_v22 = vadd.f32 %v13076_v52, %v13054_v59 }
0x1143   : > { %13104 = vst.msk [vmem:[%s21263_s30 + $0x38] sm:$0xff] %vm2537_vm14, %v13096_v45 }
0x1144   : > { %13102 = vst.msk [vmem:[%s21263_s30 + $0x28] sm:$0xff] %vm2537_vm14, %v13094_v22 }
0x1145   : > { %16131 = shalt.err (!%p16128_p3)
}
0x1146   : > { %s16132_s13 = scalar_lea.hbm %s21292_s5, 1024  ;;  %s16136_s23 = scalar_lea.hbm %s21347_s4, 2048 }
0x1147   : > { %p16133_p4 = scmp.ne.s32.totalorder %s21292_s5, %s16132_s13  ;;  %p16137_p9 = scmp.lt.u32.totalorder %s21292_s5, %s21347_s4 }
0x1148   : > { %p16138_p10 = scmp.lt.u32.totalorder %s16136_s23, %s16132_s13  ;;  %p16140_p12 = scmp.lt.u32.totalorder %s16132_s13, %s21292_s5 }
0x1149   : > { %p16134_p7 = pnand %p16133_p4, %p16252_p5 }
0x114a   : > { %p16139_p11 = por %p16138_p10, %p16137_p9 }
0x114b   : > { %p16135_p8 = pneg %p16134_p7 }
0x114c   : > { %p16141_p13 = por %p16140_p12, %p16139_p11 }
0x114e   : > { %p16142_p0 = pnand %p16141_p13, %p16135_p8 }
0x1150   : > { %16145 = shalt.err (!%p16142_p0)
}
0x1151   : > { %s16187_s12 = smov 128   ;;  %s16188_s30 = smov 8  }
0x1152   : > { %15537 = dma.vmem_to_hbm [thread:$0]  (%p16252_p5), %s21294_s28, 1024, %s21292_s5, %s21302_s19, %s16187_s12, %s16187_s12, %s16188_s30  }
0x1153 PF: > { %p15543_p1 = scmp.ge.s32.totalorder %s16180_s18, 2  ;;  %s13134_s14 = sand.u32 1, %s16168_s15  }
0x1154   : > { %s13135_s6 = scalar_lea.sflag [#allocation4], %s13134_s14 }
0x1155   : > { %p15540_p2 = pnand %p15543_p1, %p16256_p6 }
0x1157   : > { %16163 = dma.done.wait (!%p15540_p2), %s13135_s6, 1024  }
0x1158   : > { %16165 = vsyncadd (!%p15540_p2), %s13135_s6, 4294966272  ;;  %p14_p3 = scmp.ge.s32.totalorder %s16239_s21, 4   ;;  %s21372_s15 = smov %s16172_s16 }
0x1159   : > { %s21373_s16 = smov %s16176_s17  ;;  %s21374_s17 = smov %s16250_s24 }
0x115a   : > { %s21375_s18 = smov %s16239_s21  ;;  %16 = sbr.rel (!%p14_p3) target bundleno = 3 (0x3), region = 76 }
0x1161   :  { %13140 = vsyncpa [#allocation4], 1 }
0x1162   :  { %13142 = vsyncpa [#allocation4 + $0x1], 1 }

</bundles_post_ra>
